<compile_context>
chip_gen: v7x
topology: tpu7x:2x2x1
jax: 0.10.0
libtpu: 0.0.40
codegen_flags: <defaults>
</compile_context>

<pallas_src>
import functools

import jax
import jax.numpy as jnp
from jax import lax
from jax.experimental import pallas as pl
from jax.experimental.pallas import tpu as pltpu

EPS = 1e-12
NUM_HEADS = 4
BLOCK_N = 128                      # batch-columns per grid step (upper bound)
VMEM_LIMIT = 32 * 1024 * 1024      # raise scoped VMEM (esp. v5e default 16 MiB)

# Set to jnp.bfloat16 on v6e/v7x for higher MXU throughput (f32 accumulation is
# kept via preferred_element_type); default f32 to match reference numerics.
MXU_DTYPE = jnp.float32


def _mm(a, b):
    return jnp.dot(a.astype(MXU_DTYPE), b.astype(MXU_DTYPE),
                   preferred_element_type=jnp.float32)


def _bmm(a, b, dims):
    return lax.dot_general(a.astype(MXU_DTYPE), b.astype(MXU_DTYPE), dims,
                           preferred_element_type=jnp.float32)


def _round_up(x, m):
    return (x + m - 1) // m * m


# ----------------------------------------------------------------------------
# Multi-head attention block kernel:  y = gLN( MHA(x, x, x) + x )
# One grid step processes Nb batch columns: x block (Nb, T, E).
# ----------------------------------------------------------------------------
def mha_block_kernel(num_heads, x_ref, wqkv_ref, bqkv_ref, wo_ref, bo_ref,
                     gamma_ref, beta_ref, o_ref):
    Nb, T, E = x_ref.shape
    h = num_heads
    d = E // h

    x = x_ref[...]                                       # (Nb, T, E)
    x2 = x.reshape(Nb * T, E)

    # fused qkv projection (1/sqrt(d) already folded into wqkv/bqkv q-section)
    qkv = _mm(x2, wqkv_ref[...]) + bqkv_ref[...]         # (Nb*T, 3E)
    qkv3 = qkv.reshape(Nb, T, 3 * E)

    wo = wo_ref[...]                                     # (E, E)

    # per-head attention, batched over the Nb columns; no concat: each head's
    # output goes straight through its row-slice of the out-projection weight.
    out2 = jnp.zeros((Nb * T, E), jnp.float32)
    for hi in range(h):
        q = qkv3[:, :, hi * d:(hi + 1) * d]                      # (Nb, T, d)
        k = qkv3[:, :, E + hi * d:E + (hi + 1) * d]
        v = qkv3[:, :, 2 * E + hi * d:2 * E + (hi + 1) * d]

        s = _bmm(q, k, (((2,), (2,)), ((0,), (0,))))             # (Nb, T, T)
        s = s - jnp.max(s, axis=-1, keepdims=True)
        p = jnp.exp(s)
        denom = jnp.sum(p, axis=-1, keepdims=True)
        p = p * pl.reciprocal(denom, approx=True)

        oh = _bmm(p, v, (((2,), (1,)), ((0,), (0,))))            # (Nb, T, d)
        out2 = out2 + _mm(oh.reshape(Nb * T, d),
                          wo[hi * d:(hi + 1) * d, :])            # (Nb*T, E)

    out2 = out2 + bo_ref[...]
    y = out2.reshape(Nb, T, E) + x                       # residual

    # global layer norm over (T, E) per batch column n
    mean = jnp.mean(jnp.mean(y, axis=2, keepdims=True), axis=1, keepdims=True)
    cent = y - mean
    var = jnp.mean(jnp.mean(cent * cent, axis=2, keepdims=True),
                   axis=1, keepdims=True)
    yn = cent * lax.rsqrt(var + EPS)
    o_ref[...] = (yn * gamma_ref[...].reshape(1, 1, E)
                  + beta_ref[...].reshape(1, 1, E))


def mha_block_call(x_nte, p, num_heads, block_n=BLOCK_N):
    N, T, E = x_nte.shape
    d = E // num_heads
    scale = 1.0 / float(d) ** 0.5

    # fold the 1/sqrt(d) query scale into the projection weights (one-time)
    wqkv = p["wqkv_t"].at[:, :E].multiply(scale)
    bqkv = p["bqkv"].at[:, :E].multiply(scale)

    Nb = min(_round_up(N, 8), block_n)
    Np = _round_up(N, Nb)
    if Np != N:
        x_nte = jnp.pad(x_nte, ((0, Np - N), (0, 0), (0, 0)))

    kernel = functools.partial(mha_block_kernel, num_heads)
    out = pl.pallas_call(
        kernel,
        out_shape=jax.ShapeDtypeStruct((Np, T, E), jnp.float32),
        grid=(Np // Nb,),
        in_specs=[
            pl.BlockSpec((Nb, T, E), lambda n: (n, 0, 0)),
            pl.BlockSpec((E, 3 * E), lambda n: (0, 0)),
            pl.BlockSpec((1, 3 * E), lambda n: (0, 0)),
            pl.BlockSpec((E, E), lambda n: (0, 0)),
            pl.BlockSpec((1, E), lambda n: (0, 0)),
            pl.BlockSpec((1, E), lambda n: (0, 0)),
            pl.BlockSpec((1, E), lambda n: (0, 0)),
        ],
        out_specs=pl.BlockSpec((Nb, T, E), lambda n: (n, 0, 0)),
        compiler_params=pltpu.CompilerParams(
            dimension_semantics=("parallel",),
            vmem_limit_bytes=VMEM_LIMIT),
    )(x_nte, wqkv, bqkv, p["wo_t"], p["bo"], p["gamma"], p["beta"])
    return out[:N] if Np != N else out


# ----------------------------------------------------------------------------
# Feed-forward block kernel:  y = gLN( FC(ReLU(BiLSTM(x))) + x )
# Gridded over batch columns: block (T, Nb, E).  LSTM input projection is
# hoisted into one big matmul per direction; the recurrence (over T only) is
# fully unrolled and keeps just h_prev @ Whh per step.
# ----------------------------------------------------------------------------
def ffn_block_kernel(x_ref, wih_f_ref, whh_f_ref, b_f_ref,
                     wih_b_ref, whh_b_ref, b_b_ref,
                     wfc_f_ref, wfc_b_ref, bfc_ref, gamma_ref, beta_ref,
                     o_ref, fwd_ref, bwd_ref):
    T, Nb, E = x_ref.shape
    H = whh_f_ref.shape[0]

    x = x_ref[...]                                       # (T, Nb, E)
    x2 = x.reshape(T * Nb, E)

    # hoisted LSTM input projections (one MXU-sized matmul per direction)
    gih_f = (_mm(x2, wih_f_ref[...]) + b_f_ref[...]).reshape(T, Nb, 4 * H)
    gih_b = (_mm(x2, wih_b_ref[...]) + b_b_ref[...]).reshape(T, Nb, 4 * H)

    whh_f = whh_f_ref[...]
    whh_b = whh_b_ref[...]

    def step(gih_t, h_prev, c_prev, whh):
        g = gih_t + _mm(h_prev, whh)                     # (Nb, 4H)
        i = jax.nn.sigmoid(g[:, 0:H])
        f = jax.nn.sigmoid(g[:, H:2 * H])
        gg = jnp.tanh(g[:, 2 * H:3 * H])
        o = jax.nn.sigmoid(g[:, 3 * H:4 * H])
        c_new = f * c_prev + i * gg
        h_new = o * jnp.tanh(c_new)
        return h_new, c_new

    zeros = jnp.zeros((Nb, H), jnp.float32)

    # forward direction (unrolled; T is a static block dim)
    h, c = zeros, zeros
    for t in range(T):
        h, c = step(gih_f[t], h, c, whh_f)
        fwd_ref[t] = h

    # backward direction
    h, c = zeros, zeros
    for s in range(T):
        t = T - 1 - s
        h, c = step(gih_b[t], h, c, whh_b)
        bwd_ref[t] = h

    # ReLU -> Linear -> residual as two large matmuls (wfc split top/bottom,
    # so no per-timestep concat of fwd/bwd hidden states)
    r_f = jnp.maximum(fwd_ref[...], 0.0).reshape(T * Nb, H)
    r_b = jnp.maximum(bwd_ref[...], 0.0).reshape(T * Nb, H)
    y2 = _mm(r_f, wfc_f_ref[...]) + _mm(r_b, wfc_b_ref[...]) + bfc_ref[...] + x2
    y = y2.reshape(T, Nb, E)

    # global layer norm over (T, E) per batch column n (written straight out,
    # no pre-norm scratch)
    mean = jnp.mean(jnp.mean(y, axis=2, keepdims=True), axis=0, keepdims=True)
    cent = y - mean
    var = jnp.mean(jnp.mean(cent * cent, axis=2, keepdims=True),
                   axis=0, keepdims=True)
    yn = cent * lax.rsqrt(var + EPS)
    o_ref[...] = (yn * gamma_ref[...].reshape(1, 1, E)
                  + beta_ref[...].reshape(1, 1, E))


def ffn_block_call(x_tne, p, block_n=BLOCK_N):
    T, N, E = x_tne.shape
    H = p["whh_f_t"].shape[0]

    Nb = min(_round_up(N, 8), block_n)
    Np = _round_up(N, Nb)
    if Np != N:
        x_tne = jnp.pad(x_tne, ((0, 0), (0, Np - N), (0, 0)))

    wfc_f = p["wfc_t"][:H]      # forward-direction half of fc.weight.T
    wfc_b = p["wfc_t"][H:]      # backward-direction half

    out = pl.pallas_call(
        ffn_block_kernel,
        out_shape=jax.ShapeDtypeStruct((T, Np, E), jnp.float32),
        grid=(Np // Nb,),
        in_specs=[
            pl.BlockSpec((T, Nb, E), lambda n: (0, n, 0)),
            pl.BlockSpec((E, 4 * H), lambda n: (0, 0)),
            pl.BlockSpec((H, 4 * H), lambda n: (0, 0)),
            pl.BlockSpec((1, 4 * H), lambda n: (0, 0)),
            pl.BlockSpec((E, 4 * H), lambda n: (0, 0)),
            pl.BlockSpec((H, 4 * H), lambda n: (0, 0)),
            pl.BlockSpec((1, 4 * H), lambda n: (0, 0)),
            pl.BlockSpec((H, E), lambda n: (0, 0)),
            pl.BlockSpec((H, E), lambda n: (0, 0)),
            pl.BlockSpec((1, E), lambda n: (0, 0)),
            pl.BlockSpec((1, E), lambda n: (0, 0)),
            pl.BlockSpec((1, E), lambda n: (0, 0)),
        ],
        out_specs=pl.BlockSpec((T, Nb, E), lambda n: (0, n, 0)),
        scratch_shapes=[
            pltpu.VMEM((T, Nb, H), jnp.float32),   # fwd hidden states
            pltpu.VMEM((T, Nb, H), jnp.float32),   # bwd hidden states
        ],
        compiler_params=pltpu.CompilerParams(
            dimension_semantics=("parallel",),
            vmem_limit_bytes=VMEM_LIMIT),
    )(x_tne, p["wih_f_t"], p["whh_f_t"], p["b_f"],
      p["wih_b_t"], p["whh_b_t"], p["b_b"],
      wfc_f, wfc_b, p["bfc"], p["gamma"], p["beta"])
    return out[:, :N] if Np != N else out


# ----------------------------------------------------------------------------
# Module-level glue (pure JAX: permutes / reshapes only)
# ----------------------------------------------------------------------------
def improved_transformer(x_tne, p, num_heads):
    # MultiheadAttentionBlock (kernel works column-major: (N, T, E))
    x_nte = jnp.transpose(x_tne, (1, 0, 2))
    y_nte = mha_block_call(x_nte, p["attn"], num_heads)
    y_tne = jnp.transpose(y_nte, (1, 0, 2))
    # FeedForwardBlock (kernel works seq-first: (T, N, E))
    return ffn_block_call(y_tne, p["ffn"])


def dual_path_transformer_block(x, params):
    # x: (B, F, S, K)
    B, F, S, K = x.shape
    # IntraChunkTransformer: attend along chunk_size axis
    y = jnp.transpose(x, (3, 0, 2, 1)).reshape(K, B * S, F)
    y = improved_transformer(y, params["intra"], NUM_HEADS)
    y = y.reshape(K, B, S, F)
    y = jnp.transpose(y, (1, 3, 2, 0))                       # (B, F, S, K)
    # InterChunkTransformer: attend along S axis
    z = jnp.transpose(y, (2, 0, 3, 1)).reshape(S, B * K, F)
    z = improved_transformer(z, params["inter"], NUM_HEADS)
    z = z.reshape(S, B, K, F)
    return jnp.transpose(z, (1, 3, 0, 2))                    # (B, F, S, K)


# ----------------------------------------------------------------------------
# Deterministic synthetic parameter initialization (PyTorch-layout weights,
# already transposed; LSTM bias_ih + bias_hh pre-summed)
# ----------------------------------------------------------------------------
def init_transformer_params(key, num_features, hidden_channels):
    E, H = num_features, hidden_channels
    ks = jax.random.split(key, 12)

    def rnd(k, shape, scale=0.1):
        return (scale * jax.random.normal(k, shape)).astype(jnp.float32)

    attn = dict(
        wqkv_t=rnd(ks[0], (E, 3 * E)),      # in_proj_weight.T
        bqkv=rnd(ks[1], (1, 3 * E)),        # in_proj_bias
        wo_t=rnd(ks[2], (E, E)),            # out_proj.weight.T
        bo=rnd(ks[3], (1, E)),              # out_proj.bias
        gamma=jnp.ones((1, E), jnp.float32),
        beta=jnp.zeros((1, E), jnp.float32),
    )
    ffn = dict(
        wih_f_t=rnd(ks[4], (E, 4 * H)),     # weight_ih_l0.T
        whh_f_t=rnd(ks[5], (H, 4 * H)),     # weight_hh_l0.T
        b_f=rnd(ks[6], (1, 4 * H)),         # bias_ih_l0 + bias_hh_l0 (pre-summed)
        wih_b_t=rnd(ks[7], (E, 4 * H)),     # weight_ih_l0_reverse.T
        whh_b_t=rnd(ks[8], (H, 4 * H)),     # weight_hh_l0_reverse.T
        b_b=rnd(ks[9], (1, 4 * H)),
        wfc_t=rnd(ks[10], (2 * H, E)),      # fc.weight.T
        bfc=rnd(ks[11], (1, E)),            # fc.bias
        gamma=jnp.ones((1, E), jnp.float32),
        beta=jnp.zeros((1, E), jnp.float32),
    )
    return dict(attn=attn, ffn=ffn)


if __name__ == "__main__":
    # small shapes: batch=2, num_features=16, S=8, chunk_size=8, hidden=32
    B, F, S, K = 2, 16, 8, 8
    H = 32

    key = jax.random.PRNGKey(0)
    kx, k_intra, k_inter = jax.random.split(key, 3)
    x = jax.random.normal(kx, (B, F, S, K), jnp.float32)

    params = dict(
        intra=init_transformer_params(k_intra, F, H),
        inter=init_transformer_params(k_inter, F, H),
    )

    fn = jax.jit(dual_path_transformer_block)
    out = fn(x, params)
    out = jax.block_until_ready(out)

    assert out.shape == (B, F, S, K), out.shape
    assert out.dtype == jnp.float32
    assert bool(jnp.all(jnp.isfinite(out)))
    print("KERNEL_OK")
</pallas_src>

<mosaic_0001>
module attributes {stable_mosaic.version = 11 : i64} {
  func.func @mha_block_kernel(%arg0: i32, %arg1: memref<16x8x16xf32, #tpu.memory_space<vmem>>, %arg2: memref<16x48xf32, #tpu.memory_space<vmem>>, %arg3: memref<1x48xf32, #tpu.memory_space<vmem>>, %arg4: memref<16x16xf32, #tpu.memory_space<vmem>>, %arg5: memref<1x16xf32, #tpu.memory_space<vmem>>, %arg6: memref<1x16xf32, #tpu.memory_space<vmem>>, %arg7: memref<1x16xf32, #tpu.memory_space<vmem>>, %arg8: memref<16x8x16xf32, #tpu.memory_space<vmem>>) attributes {dimension_semantics = [#tpu.dimension_semantics<parallel>], iteration_bounds = array<i64: 1>, scalar_prefetch = 0 : i64, scratch_operands = 0 : i64, tpu.core_type = #tpu.core_type<tc>, window_params = [{transform_indices = @transform_0, window_bounds = array<i64: 16, 8, 16>}, {pipeline_mode = #tpu.pipeline_mode<synchronous>, transform_indices = @transform_1, window_bounds = array<i64: 16, 48>}, {pipeline_mode = #tpu.pipeline_mode<synchronous>, transform_indices = @transform_2, window_bounds = array<i64: 1, 48>}, {pipeline_mode = #tpu.pipeline_mode<synchronous>, transform_indices = @transform_3, window_bounds = array<i64: 16, 16>}, {pipeline_mode = #tpu.pipeline_mode<synchronous>, transform_indices = @transform_4, window_bounds = array<i64: 1, 16>}, {pipeline_mode = #tpu.pipeline_mode<synchronous>, transform_indices = @transform_5, window_bounds = array<i64: 1, 16>}, {pipeline_mode = #tpu.pipeline_mode<synchronous>, transform_indices = @transform_6, window_bounds = array<i64: 1, 16>}, {transform_indices = @transform_7, window_bounds = array<i64: 16, 8, 16>}]} {
    %c0 = arith.constant 0 : index
    %c0_0 = arith.constant 0 : index
    %c0_1 = arith.constant 0 : index
    %0 = vector.load %arg1[%c0, %c0_0, %c0_1] : memref<16x8x16xf32, #tpu.memory_space<vmem>>, vector<16x8x16xf32>
    %1 = vector.shape_cast %0 : vector<16x8x16xf32> to vector<128x16xf32>
    %c0_2 = arith.constant 0 : index
    %c0_3 = arith.constant 0 : index
    %2 = vector.load %arg2[%c0_2, %c0_3] : memref<16x48xf32, #tpu.memory_space<vmem>>, vector<16x48xf32>
    %cst = arith.constant dense<0.000000e+00> : vector<128x48xf32>
    %3 = tpu.matmul %1, %2, %cst {dimension_numbers = #tpu.dot_dimension_numbers<[1], [0], [0], [1], [0, 0, 1, 1], [], []>} : vector<128x16xf32>, vector<16x48xf32>, vector<128x48xf32> -> vector<128x48xf32>
    %c0_4 = arith.constant 0 : index
    %c0_5 = arith.constant 0 : index
    %4 = vector.load %arg3[%c0_4, %c0_5] : memref<1x48xf32, #tpu.memory_space<vmem>>, vector<1x48xf32>
    %5 = vector.broadcast %4 : vector<1x48xf32> to vector<128x48xf32>
    %6 = arith.addf %3, %5 : vector<128x48xf32>
    %7 = vector.shape_cast %6 : vector<128x48xf32> to vector<16x8x48xf32>
    %c0_6 = arith.constant 0 : index
    %c0_7 = arith.constant 0 : index
    %8 = vector.load %arg4[%c0_6, %c0_7] : memref<16x16xf32, #tpu.memory_space<vmem>>, vector<16x16xf32>
    %cst_8 = arith.constant 0.000000e+00 : f32
    %9 = vector.broadcast %cst_8 : f32 to vector<128x16xf32>
    %10 = vector.extract_strided_slice %7 {offsets = [0, 0, 0], sizes = [16, 8, 4], strides = [1, 1, 1]} : vector<16x8x48xf32> to vector<16x8x4xf32>
    %11 = vector.extract_strided_slice %7 {offsets = [0, 0, 16], sizes = [16, 8, 4], strides = [1, 1, 1]} : vector<16x8x48xf32> to vector<16x8x4xf32>
    %12 = vector.extract_strided_slice %7 {offsets = [0, 0, 32], sizes = [16, 8, 4], strides = [1, 1, 1]} : vector<16x8x48xf32> to vector<16x8x4xf32>
    %cst_9 = arith.constant dense<0.000000e+00> : vector<16x8x8xf32>
    %13 = tpu.matmul %10, %11, %cst_9 {dimension_numbers = #tpu.dot_dimension_numbers<[2], [2], [1], [1], [0, 0, 0, 1, 1, 1], [0], [0]>} : vector<16x8x4xf32>, vector<16x8x4xf32>, vector<16x8x8xf32> -> vector<16x8x8xf32>
    %cst_10 = arith.constant dense<0xFF800000> : vector<16x8xf32>
    %14 = vector.multi_reduction <maximumf>, %13, %cst_10 [2] : vector<16x8x8xf32> to vector<16x8xf32>
    %15 = vector.shape_cast %14 : vector<16x8xf32> to vector<16x8x1xf32>
    %16 = vector.broadcast %15 : vector<16x8x1xf32> to vector<16x8x8xf32>
    %17 = arith.subf %13, %16 : vector<16x8x8xf32>
    %18 = math.exp %17 : vector<16x8x8xf32>
    %cst_11 = arith.constant dense<0.000000e+00> : vector<16x8xf32>
    %19 = vector.multi_reduction <add>, %18, %cst_11 [2] : vector<16x8x8xf32> to vector<16x8xf32>
    %20 = vector.shape_cast %19 : vector<16x8xf32> to vector<16x8x1xf32>
    %21 = tpu.reciprocal %20 {approx = true} : vector<16x8x1xf32> -> vector<16x8x1xf32>
    %22 = vector.broadcast %21 : vector<16x8x1xf32> to vector<16x8x8xf32>
    %23 = arith.mulf %18, %22 : vector<16x8x8xf32>
    %cst_12 = arith.constant dense<0.000000e+00> : vector<16x8x4xf32>
    %24 = tpu.matmul %23, %12, %cst_12 {dimension_numbers = #tpu.dot_dimension_numbers<[2], [1], [1], [2], [0, 0, 0, 1, 1, 2], [0], [0]>} : vector<16x8x8xf32>, vector<16x8x4xf32>, vector<16x8x4xf32> -> vector<16x8x4xf32>
    %25 = vector.shape_cast %24 : vector<16x8x4xf32> to vector<128x4xf32>
    %26 = vector.extract_strided_slice %8 {offsets = [0, 0], sizes = [4, 16], strides = [1, 1]} : vector<16x16xf32> to vector<4x16xf32>
    %cst_13 = arith.constant dense<0.000000e+00> : vector<128x16xf32>
    %27 = tpu.matmul %25, %26, %cst_13 {dimension_numbers = #tpu.dot_dimension_numbers<[1], [0], [0], [1], [0, 0, 1, 1], [], []>} : vector<128x4xf32>, vector<4x16xf32>, vector<128x16xf32> -> vector<128x16xf32>
    %28 = arith.addf %9, %27 : vector<128x16xf32>
    %29 = vector.extract_strided_slice %7 {offsets = [0, 0, 4], sizes = [16, 8, 4], strides = [1, 1, 1]} : vector<16x8x48xf32> to vector<16x8x4xf32>
    %30 = vector.extract_strided_slice %7 {offsets = [0, 0, 20], sizes = [16, 8, 4], strides = [1, 1, 1]} : vector<16x8x48xf32> to vector<16x8x4xf32>
    %31 = vector.extract_strided_slice %7 {offsets = [0, 0, 36], sizes = [16, 8, 4], strides = [1, 1, 1]} : vector<16x8x48xf32> to vector<16x8x4xf32>
    %cst_14 = arith.constant dense<0.000000e+00> : vector<16x8x8xf32>
    %32 = tpu.matmul %29, %30, %cst_14 {dimension_numbers = #tpu.dot_dimension_numbers<[2], [2], [1], [1], [0, 0, 0, 1, 1, 1], [0], [0]>} : vector<16x8x4xf32>, vector<16x8x4xf32>, vector<16x8x8xf32> -> vector<16x8x8xf32>
    %cst_15 = arith.constant dense<0xFF800000> : vector<16x8xf32>
    %33 = vector.multi_reduction <maximumf>, %32, %cst_15 [2] : vector<16x8x8xf32> to vector<16x8xf32>
    %34 = vector.shape_cast %33 : vector<16x8xf32> to vector<16x8x1xf32>
    %35 = vector.broadcast %34 : vector<16x8x1xf32> to vector<16x8x8xf32>
    %36 = arith.subf %32, %35 : vector<16x8x8xf32>
    %37 = math.exp %36 : vector<16x8x8xf32>
    %cst_16 = arith.constant dense<0.000000e+00> : vector<16x8xf32>
    %38 = vector.multi_reduction <add>, %37, %cst_16 [2] : vector<16x8x8xf32> to vector<16x8xf32>
    %39 = vector.shape_cast %38 : vector<16x8xf32> to vector<16x8x1xf32>
    %40 = tpu.reciprocal %39 {approx = true} : vector<16x8x1xf32> -> vector<16x8x1xf32>
    %41 = vector.broadcast %40 : vector<16x8x1xf32> to vector<16x8x8xf32>
    %42 = arith.mulf %37, %41 : vector<16x8x8xf32>
    %cst_17 = arith.constant dense<0.000000e+00> : vector<16x8x4xf32>
    %43 = tpu.matmul %42, %31, %cst_17 {dimension_numbers = #tpu.dot_dimension_numbers<[2], [1], [1], [2], [0, 0, 0, 1, 1, 2], [0], [0]>} : vector<16x8x8xf32>, vector<16x8x4xf32>, vector<16x8x4xf32> -> vector<16x8x4xf32>
    %44 = vector.shape_cast %43 : vector<16x8x4xf32> to vector<128x4xf32>
    %45 = vector.extract_strided_slice %8 {offsets = [4, 0], sizes = [4, 16], strides = [1, 1]} : vector<16x16xf32> to vector<4x16xf32>
    %cst_18 = arith.constant dense<0.000000e+00> : vector<128x16xf32>
    %46 = tpu.matmul %44, %45, %cst_18 {dimension_numbers = #tpu.dot_dimension_numbers<[1], [0], [0], [1], [0, 0, 1, 1], [], []>} : vector<128x4xf32>, vector<4x16xf32>, vector<128x16xf32> -> vector<128x16xf32>
    %47 = arith.addf %28, %46 : vector<128x16xf32>
    %48 = vector.extract_strided_slice %7 {offsets = [0, 0, 8], sizes = [16, 8, 4], strides = [1, 1, 1]} : vector<16x8x48xf32> to vector<16x8x4xf32>
    %49 = vector.extract_strided_slice %7 {offsets = [0, 0, 24], sizes = [16, 8, 4], strides = [1, 1, 1]} : vector<16x8x48xf32> to vector<16x8x4xf32>
    %50 = vector.extract_strided_slice %7 {offsets = [0, 0, 40], sizes = [16, 8, 4], strides = [1, 1, 1]} : vector<16x8x48xf32> to vector<16x8x4xf32>
    %cst_19 = arith.constant dense<0.000000e+00> : vector<16x8x8xf32>
    %51 = tpu.matmul %48, %49, %cst_19 {dimension_numbers = #tpu.dot_dimension_numbers<[2], [2], [1], [1], [0, 0, 0, 1, 1, 1], [0], [0]>} : vector<16x8x4xf32>, vector<16x8x4xf32>, vector<16x8x8xf32> -> vector<16x8x8xf32>
    %cst_20 = arith.constant dense<0xFF800000> : vector<16x8xf32>
    %52 = vector.multi_reduction <maximumf>, %51, %cst_20 [2] : vector<16x8x8xf32> to vector<16x8xf32>
    %53 = vector.shape_cast %52 : vector<16x8xf32> to vector<16x8x1xf32>
    %54 = vector.broadcast %53 : vector<16x8x1xf32> to vector<16x8x8xf32>
    %55 = arith.subf %51, %54 : vector<16x8x8xf32>
    %56 = math.exp %55 : vector<16x8x8xf32>
    %cst_21 = arith.constant dense<0.000000e+00> : vector<16x8xf32>
    %57 = vector.multi_reduction <add>, %56, %cst_21 [2] : vector<16x8x8xf32> to vector<16x8xf32>
    %58 = vector.shape_cast %57 : vector<16x8xf32> to vector<16x8x1xf32>
    %59 = tpu.reciprocal %58 {approx = true} : vector<16x8x1xf32> -> vector<16x8x1xf32>
    %60 = vector.broadcast %59 : vector<16x8x1xf32> to vector<16x8x8xf32>
    %61 = arith.mulf %56, %60 : vector<16x8x8xf32>
    %cst_22 = arith.constant dense<0.000000e+00> : vector<16x8x4xf32>
    %62 = tpu.matmul %61, %50, %cst_22 {dimension_numbers = #tpu.dot_dimension_numbers<[2], [1], [1], [2], [0, 0, 0, 1, 1, 2], [0], [0]>} : vector<16x8x8xf32>, vector<16x8x4xf32>, vector<16x8x4xf32> -> vector<16x8x4xf32>
    %63 = vector.shape_cast %62 : vector<16x8x4xf32> to vector<128x4xf32>
    %64 = vector.extract_strided_slice %8 {offsets = [8, 0], sizes = [4, 16], strides = [1, 1]} : vector<16x16xf32> to vector<4x16xf32>
    %cst_23 = arith.constant dense<0.000000e+00> : vector<128x16xf32>
    %65 = tpu.matmul %63, %64, %cst_23 {dimension_numbers = #tpu.dot_dimension_numbers<[1], [0], [0], [1], [0, 0, 1, 1], [], []>} : vector<128x4xf32>, vector<4x16xf32>, vector<128x16xf32> -> vector<128x16xf32>
    %66 = arith.addf %47, %65 : vector<128x16xf32>
    %67 = vector.extract_strided_slice %7 {offsets = [0, 0, 12], sizes = [16, 8, 4], strides = [1, 1, 1]} : vector<16x8x48xf32> to vector<16x8x4xf32>
    %68 = vector.extract_strided_slice %7 {offsets = [0, 0, 28], sizes = [16, 8, 4], strides = [1, 1, 1]} : vector<16x8x48xf32> to vector<16x8x4xf32>
    %69 = vector.extract_strided_slice %7 {offsets = [0, 0, 44], sizes = [16, 8, 4], strides = [1, 1, 1]} : vector<16x8x48xf32> to vector<16x8x4xf32>
    %cst_24 = arith.constant dense<0.000000e+00> : vector<16x8x8xf32>
    %70 = tpu.matmul %67, %68, %cst_24 {dimension_numbers = #tpu.dot_dimension_numbers<[2], [2], [1], [1], [0, 0, 0, 1, 1, 1], [0], [0]>} : vector<16x8x4xf32>, vector<16x8x4xf32>, vector<16x8x8xf32> -> vector<16x8x8xf32>
    %cst_25 = arith.constant dense<0xFF800000> : vector<16x8xf32>
    %71 = vector.multi_reduction <maximumf>, %70, %cst_25 [2] : vector<16x8x8xf32> to vector<16x8xf32>
    %72 = vector.shape_cast %71 : vector<16x8xf32> to vector<16x8x1xf32>
    %73 = vector.broadcast %72 : vector<16x8x1xf32> to vector<16x8x8xf32>
    %74 = arith.subf %70, %73 : vector<16x8x8xf32>
    %75 = math.exp %74 : vector<16x8x8xf32>
    %cst_26 = arith.constant dense<0.000000e+00> : vector<16x8xf32>
    %76 = vector.multi_reduction <add>, %75, %cst_26 [2] : vector<16x8x8xf32> to vector<16x8xf32>
    %77 = vector.shape_cast %76 : vector<16x8xf32> to vector<16x8x1xf32>
    %78 = tpu.reciprocal %77 {approx = true} : vector<16x8x1xf32> -> vector<16x8x1xf32>
    %79 = vector.broadcast %78 : vector<16x8x1xf32> to vector<16x8x8xf32>
    %80 = arith.mulf %75, %79 : vector<16x8x8xf32>
    %cst_27 = arith.constant dense<0.000000e+00> : vector<16x8x4xf32>
    %81 = tpu.matmul %80, %69, %cst_27 {dimension_numbers = #tpu.dot_dimension_numbers<[2], [1], [1], [2], [0, 0, 0, 1, 1, 2], [0], [0]>} : vector<16x8x8xf32>, vector<16x8x4xf32>, vector<16x8x4xf32> -> vector<16x8x4xf32>
    %82 = vector.shape_cast %81 : vector<16x8x4xf32> to vector<128x4xf32>
    %83 = vector.extract_strided_slice %8 {offsets = [12, 0], sizes = [4, 16], strides = [1, 1]} : vector<16x16xf32> to vector<4x16xf32>
    %cst_28 = arith.constant dense<0.000000e+00> : vector<128x16xf32>
    %84 = tpu.matmul %82, %83, %cst_28 {dimension_numbers = #tpu.dot_dimension_numbers<[1], [0], [0], [1], [0, 0, 1, 1], [], []>} : vector<128x4xf32>, vector<4x16xf32>, vector<128x16xf32> -> vector<128x16xf32>
    %85 = arith.addf %66, %84 : vector<128x16xf32>
    %c0_29 = arith.constant 0 : index
    %c0_30 = arith.constant 0 : index
    %86 = vector.load %arg5[%c0_29, %c0_30] : memref<1x16xf32, #tpu.memory_space<vmem>>, vector<1x16xf32>
    %87 = vector.broadcast %86 : vector<1x16xf32> to vector<128x16xf32>
    %88 = arith.addf %85, %87 : vector<128x16xf32>
    %89 = vector.shape_cast %88 : vector<128x16xf32> to vector<16x8x16xf32>
    %90 = arith.addf %89, %0 : vector<16x8x16xf32>
    %cst_31 = arith.constant dense<0.000000e+00> : vector<16x8xf32>
    %91 = vector.multi_reduction <add>, %90, %cst_31 [2] : vector<16x8x16xf32> to vector<16x8xf32>
    %92 = vector.shape_cast %91 : vector<16x8xf32> to vector<16x8x1xf32>
    %cst_32 = arith.constant 1.600000e+01 : f32
    %93 = vector.broadcast %cst_32 : f32 to vector<16x8x1xf32>
    %94 = arith.divf %92, %93 : vector<16x8x1xf32>
    %cst_33 = arith.constant dense<0.000000e+00> : vector<16x1xf32>
    %95 = vector.multi_reduction <add>, %94, %cst_33 [1] : vector<16x8x1xf32> to vector<16x1xf32>
    %96 = vector.shape_cast %95 : vector<16x1xf32> to vector<16x1x1xf32>
    %cst_34 = arith.constant 8.000000e+00 : f32
    %97 = vector.broadcast %cst_34 : f32 to vector<16x1x1xf32>
    %98 = arith.divf %96, %97 : vector<16x1x1xf32>
    %99 = vector.broadcast %98 : vector<16x1x1xf32> to vector<16x8x16xf32>
    %100 = arith.subf %90, %99 : vector<16x8x16xf32>
    %101 = arith.mulf %100, %100 : vector<16x8x16xf32>
    %cst_35 = arith.constant dense<0.000000e+00> : vector<16x8xf32>
    %102 = vector.multi_reduction <add>, %101, %cst_35 [2] : vector<16x8x16xf32> to vector<16x8xf32>
    %103 = vector.shape_cast %102 : vector<16x8xf32> to vector<16x8x1xf32>
    %cst_36 = arith.constant 1.600000e+01 : f32
    %104 = vector.broadcast %cst_36 : f32 to vector<16x8x1xf32>
    %105 = arith.divf %103, %104 : vector<16x8x1xf32>
    %cst_37 = arith.constant dense<0.000000e+00> : vector<16x1xf32>
    %106 = vector.multi_reduction <add>, %105, %cst_37 [1] : vector<16x8x1xf32> to vector<16x1xf32>
    %107 = vector.shape_cast %106 : vector<16x1xf32> to vector<16x1x1xf32>
    %cst_38 = arith.constant 8.000000e+00 : f32
    %108 = vector.broadcast %cst_38 : f32 to vector<16x1x1xf32>
    %109 = arith.divf %107, %108 : vector<16x1x1xf32>
    %cst_39 = arith.constant 9.99999996E-13 : f32
    %110 = vector.broadcast %cst_39 : f32 to vector<16x1x1xf32>
    %111 = arith.addf %109, %110 : vector<16x1x1xf32>
    %112 = math.rsqrt %111 : vector<16x1x1xf32>
    %113 = vector.broadcast %112 : vector<16x1x1xf32> to vector<16x8x16xf32>
    %114 = arith.mulf %100, %113 : vector<16x8x16xf32>
    %c0_40 = arith.constant 0 : index
    %c0_41 = arith.constant 0 : index
    %115 = vector.load %arg6[%c0_40, %c0_41] : memref<1x16xf32, #tpu.memory_space<vmem>>, vector<1x16xf32>
    %116 = vector.shape_cast %115 : vector<1x16xf32> to vector<1x1x16xf32>
    %117 = vector.broadcast %116 : vector<1x1x16xf32> to vector<16x8x16xf32>
    %118 = arith.mulf %114, %117 : vector<16x8x16xf32>
    %c0_42 = arith.constant 0 : index
    %c0_43 = arith.constant 0 : index
    %119 = vector.load %arg7[%c0_42, %c0_43] : memref<1x16xf32, #tpu.memory_space<vmem>>, vector<1x16xf32>
    %120 = vector.shape_cast %119 : vector<1x16xf32> to vector<1x1x16xf32>
    %121 = vector.broadcast %120 : vector<1x1x16xf32> to vector<16x8x16xf32>
    %122 = arith.addf %118, %121 : vector<16x8x16xf32>
    %c0_44 = arith.constant 0 : index
    %c0_45 = arith.constant 0 : index
    %c0_46 = arith.constant 0 : index
    %123 = vector.load %arg8[%c0_44, %c0_45, %c0_46] : memref<16x8x16xf32, #tpu.memory_space<vmem>>, vector<16x8x16xf32>
    tpu.vector_store %arg8[%c0_44, %c0_45, %c0_46], %122 {strides = array<i32>} : memref<16x8x16xf32, #tpu.memory_space<vmem>>, vector<16x8x16xf32>,
    return
  }
  func.func @transform_0(%arg0: i32) -> (i32, i32, i32) {
    %c0_i32 = arith.constant 0 : i32
    %c0_i32_0 = arith.constant 0 : i32
    %c0_i32_1 = arith.constant 0 : i32
    return %arg0, %c0_i32, %c0_i32_0 : i32, i32, i32
  }
  func.func @transform_1(%arg0: i32) -> (i32, i32) {
    %c0_i32 = arith.constant 0 : i32
    %c0_i32_0 = arith.constant 0 : i32
    %c0_i32_1 = arith.constant 0 : i32
    return %c0_i32, %c0_i32_0 : i32, i32
  }
  func.func @transform_2(%arg0: i32) -> (i32, i32) {
    %c0_i32 = arith.constant 0 : i32
    %c0_i32_0 = arith.constant 0 : i32
    %c0_i32_1 = arith.constant 0 : i32
    return %c0_i32, %c0_i32_0 : i32, i32
  }
  func.func @transform_3(%arg0: i32) -> (i32, i32) {
    %c0_i32 = arith.constant 0 : i32
    %c0_i32_0 = arith.constant 0 : i32
    %c0_i32_1 = arith.constant 0 : i32
    return %c0_i32, %c0_i32_0 : i32, i32
  }
  func.func @transform_4(%arg0: i32) -> (i32, i32) {
    %c0_i32 = arith.constant 0 : i32
    %c0_i32_0 = arith.constant 0 : i32
    %c0_i32_1 = arith.constant 0 : i32
    return %c0_i32, %c0_i32_0 : i32, i32
  }
  func.func @transform_5(%arg0: i32) -> (i32, i32) {
    %c0_i32 = arith.constant 0 : i32
    %c0_i32_0 = arith.constant 0 : i32
    %c0_i32_1 = arith.constant 0 : i32
    return %c0_i32, %c0_i32_0 : i32, i32
  }
  func.func @transform_6(%arg0: i32) -> (i32, i32) {
    %c0_i32 = arith.constant 0 : i32
    %c0_i32_0 = arith.constant 0 : i32
    %c0_i32_1 = arith.constant 0 : i32
    return %c0_i32, %c0_i32_0 : i32, i32
  }
  func.func @transform_7(%arg0: i32) -> (i32, i32, i32) {
    %c0_i32 = arith.constant 0 : i32
    %c0_i32_0 = arith.constant 0 : i32
    %c0_i32_1 = arith.constant 0 : i32
    return %arg0, %c0_i32, %c0_i32_0 : i32, i32, i32
  }
}

module attributes {stable_mosaic.version = 11 : i64} {
  func.func @ffn_block_kernel(%arg0: i32, %arg1: memref<8x16x16xf32, #tpu.memory_space<vmem>>, %arg2: memref<16x128xf32, #tpu.memory_space<vmem>>, %arg3: memref<32x128xf32, #tpu.memory_space<vmem>>, %arg4: memref<1x128xf32, #tpu.memory_space<vmem>>, %arg5: memref<16x128xf32, #tpu.memory_space<vmem>>, %arg6: memref<32x128xf32, #tpu.memory_space<vmem>>, %arg7: memref<1x128xf32, #tpu.memory_space<vmem>>, %arg8: memref<32x16xf32, #tpu.memory_space<vmem>>, %arg9: memref<32x16xf32, #tpu.memory_space<vmem>>, %arg10: memref<1x16xf32, #tpu.memory_space<vmem>>, %arg11: memref<1x16xf32, #tpu.memory_space<vmem>>, %arg12: memref<1x16xf32, #tpu.memory_space<vmem>>, %arg13: memref<8x16x16xf32, #tpu.memory_space<vmem>>, %arg14: memref<8x16x32xf32, #tpu.memory_space<vmem>>, %arg15: memref<8x16x32xf32, #tpu.memory_space<vmem>>) attributes {dimension_semantics = [#tpu.dimension_semantics<parallel>], iteration_bounds = array<i64: 1>, scalar_prefetch = 0 : i64, scratch_operands = 2 : i64, tpu.core_type = #tpu.core_type<tc>, window_params = [{transform_indices = @transform_0, window_bounds = array<i64: 8, 16, 16>}, {pipeline_mode = #tpu.pipeline_mode<synchronous>, transform_indices = @transform_1, window_bounds = array<i64: 16, 128>}, {pipeline_mode = #tpu.pipeline_mode<synchronous>, transform_indices = @transform_2, window_bounds = array<i64: 32, 128>}, {pipeline_mode = #tpu.pipeline_mode<synchronous>, transform_indices = @transform_3, window_bounds = array<i64: 1, 128>}, {pipeline_mode = #tpu.pipeline_mode<synchronous>, transform_indices = @transform_4, window_bounds = array<i64: 16, 128>}, {pipeline_mode = #tpu.pipeline_mode<synchronous>, transform_indices = @transform_5, window_bounds = array<i64: 32, 128>}, {pipeline_mode = #tpu.pipeline_mode<synchronous>, transform_indices = @transform_6, window_bounds = array<i64: 1, 128>}, {pipeline_mode = #tpu.pipeline_mode<synchronous>, transform_indices = @transform_7, window_bounds = array<i64: 32, 16>}, {pipeline_mode = #tpu.pipeline_mode<synchronous>, transform_indices = @transform_8, window_bounds = array<i64: 32, 16>}, {pipeline_mode = #tpu.pipeline_mode<synchronous>, transform_indices = @transform_9, window_bounds = array<i64: 1, 16>}, {pipeline_mode = #tpu.pipeline_mode<synchronous>, transform_indices = @transform_10, window_bounds = array<i64: 1, 16>}, {pipeline_mode = #tpu.pipeline_mode<synchronous>, transform_indices = @transform_11, window_bounds = array<i64: 1, 16>}, {transform_indices = @transform_12, window_bounds = array<i64: 8, 16, 16>}]} {
    %c0 = arith.constant 0 : index
    %c0_0 = arith.constant 0 : index
    %c0_1 = arith.constant 0 : index
    %0 = vector.load %arg1[%c0, %c0_0, %c0_1] : memref<8x16x16xf32, #tpu.memory_space<vmem>>, vector<8x16x16xf32>
    %1 = vector.shape_cast %0 : vector<8x16x16xf32> to vector<128x16xf32>
    %c0_2 = arith.constant 0 : index
    %c0_3 = arith.constant 0 : index
    %2 = vector.load %arg2[%c0_2, %c0_3] : memref<16x128xf32, #tpu.memory_space<vmem>>, vector<16x128xf32>
    %cst = arith.constant dense<0.000000e+00> : vector<128x128xf32>
    %3 = tpu.matmul %1, %2, %cst {dimension_numbers = #tpu.dot_dimension_numbers<[1], [0], [0], [1], [0, 0, 1, 1], [], []>} : vector<128x16xf32>, vector<16x128xf32>, vector<128x128xf32> -> vector<128x128xf32>
    %c0_4 = arith.constant 0 : index
    %c0_5 = arith.constant 0 : index
    %4 = vector.load %arg4[%c0_4, %c0_5] : memref<1x128xf32, #tpu.memory_space<vmem>>, vector<1x128xf32>
    %5 = vector.broadcast %4 : vector<1x128xf32> to vector<128x128xf32>
    %6 = arith.addf %3, %5 : vector<128x128xf32>
    %7 = vector.shape_cast %6 : vector<128x128xf32> to vector<8x16x128xf32>
    %c0_6 = arith.constant 0 : index
    %c0_7 = arith.constant 0 : index
    %8 = vector.load %arg5[%c0_6, %c0_7] : memref<16x128xf32, #tpu.memory_space<vmem>>, vector<16x128xf32>
    %cst_8 = arith.constant dense<0.000000e+00> : vector<128x128xf32>
    %9 = tpu.matmul %1, %8, %cst_8 {dimension_numbers = #tpu.dot_dimension_numbers<[1], [0], [0], [1], [0, 0, 1, 1], [], []>} : vector<128x16xf32>, vector<16x128xf32>, vector<128x128xf32> -> vector<128x128xf32>
    %c0_9 = arith.constant 0 : index
    %c0_10 = arith.constant 0 : index
    %10 = vector.load %arg7[%c0_9, %c0_10] : memref<1x128xf32, #tpu.memory_space<vmem>>, vector<1x128xf32>
    %11 = vector.broadcast %10 : vector<1x128xf32> to vector<128x128xf32>
    %12 = arith.addf %9, %11 : vector<128x128xf32>
    %13 = vector.shape_cast %12 : vector<128x128xf32> to vector<8x16x128xf32>
    %c0_11 = arith.constant 0 : index
    %c0_12 = arith.constant 0 : index
    %14 = vector.load %arg3[%c0_11, %c0_12] : memref<32x128xf32, #tpu.memory_space<vmem>>, vector<32x128xf32>
    %c0_13 = arith.constant 0 : index
    %c0_14 = arith.constant 0 : index
    %15 = vector.load %arg6[%c0_13, %c0_14] : memref<32x128xf32, #tpu.memory_space<vmem>>, vector<32x128xf32>
    %cst_15 = arith.constant 0.000000e+00 : f32
    %16 = vector.broadcast %cst_15 : f32 to vector<16x32xf32>
    %17 = vector.extract_strided_slice %7 {offsets = [0, 0, 0], sizes = [1, 16, 128], strides = [1, 1, 1]} : vector<8x16x128xf32> to vector<1x16x128xf32>
    %18 = vector.shape_cast %17 : vector<1x16x128xf32> to vector<16x128xf32>
    %cst_16 = arith.constant dense<0.000000e+00> : vector<16x128xf32>
    %19 = tpu.matmul %16, %14, %cst_16 {dimension_numbers = #tpu.dot_dimension_numbers<[1], [0], [0], [1], [0, 0, 1, 1], [], []>} : vector<16x32xf32>, vector<32x128xf32>, vector<16x128xf32> -> vector<16x128xf32>
    %20 = arith.addf %18, %19 : vector<16x128xf32>
    %21 = vector.extract_strided_slice %20 {offsets = [0, 0], sizes = [16, 32], strides = [1, 1]} : vector<16x128xf32> to vector<16x32xf32>
    %22 = arith.negf %21 : vector<16x32xf32>
    %23 = math.exp %22 : vector<16x32xf32>
    %cst_17 = arith.constant 1.000000e+00 : f32
    %24 = vector.broadcast %cst_17 : f32 to vector<16x32xf32>
    %25 = arith.addf %24, %23 : vector<16x32xf32>
    %26 = arith.divf %24, %25 : vector<16x32xf32>
    %27 = vector.extract_strided_slice %20 {offsets = [0, 32], sizes = [16, 32], strides = [1, 1]} : vector<16x128xf32> to vector<16x32xf32>
    %28 = arith.negf %27 : vector<16x32xf32>
    %29 = math.exp %28 : vector<16x32xf32>
    %cst_18 = arith.constant 1.000000e+00 : f32
    %30 = vector.broadcast %cst_18 : f32 to vector<16x32xf32>
    %31 = arith.addf %30, %29 : vector<16x32xf32>
    %32 = arith.divf %30, %31 : vector<16x32xf32>
    %33 = vector.extract_strided_slice %20 {offsets = [0, 64], sizes = [16, 32], strides = [1, 1]} : vector<16x128xf32> to vector<16x32xf32>
    %34 = math.tanh %33 : vector<16x32xf32>
    %35 = vector.extract_strided_slice %20 {offsets = [0, 96], sizes = [16, 32], strides = [1, 1]} : vector<16x128xf32> to vector<16x32xf32>
    %36 = arith.negf %35 : vector<16x32xf32>
    %37 = math.exp %36 : vector<16x32xf32>
    %cst_19 = arith.constant 1.000000e+00 : f32
    %38 = vector.broadcast %cst_19 : f32 to vector<16x32xf32>
    %39 = arith.addf %38, %37 : vector<16x32xf32>
    %40 = arith.divf %38, %39 : vector<16x32xf32>
    %41 = arith.mulf %32, %16 : vector<16x32xf32>
    %42 = arith.mulf %26, %34 : vector<16x32xf32>
    %43 = arith.addf %41, %42 : vector<16x32xf32>
    %44 = math.tanh %43 : vector<16x32xf32>
    %45 = arith.mulf %40, %44 : vector<16x32xf32>
    %c0_20 = arith.constant 0 : index
    %c0_21 = arith.constant 0 : index
    %c0_22 = arith.constant 0 : index
    %46 = vector.load %arg14[%c0_20, %c0_21, %c0_22] : memref<8x16x32xf32, #tpu.memory_space<vmem>>, vector<1x16x32xf32>
    %47 = vector.shape_cast %46 : vector<1x16x32xf32> to vector<16x32xf32>
    %48 = vector.shape_cast %45 : vector<16x32xf32> to vector<1x16x32xf32>
    tpu.vector_store %arg14[%c0_20, %c0_21, %c0_22], %48 {strides = array<i32>} : memref<8x16x32xf32, #tpu.memory_space<vmem>>, vector<1x16x32xf32>,
    %49 = vector.extract_strided_slice %7 {offsets = [1, 0, 0], sizes = [1, 16, 128], strides = [1, 1, 1]} : vector<8x16x128xf32> to vector<1x16x128xf32>
    %50 = vector.shape_cast %49 : vector<1x16x128xf32> to vector<16x128xf32>
    %cst_23 = arith.constant dense<0.000000e+00> : vector<16x128xf32>
    %51 = tpu.matmul %45, %14, %cst_23 {dimension_numbers = #tpu.dot_dimension_numbers<[1], [0], [0], [1], [0, 0, 1, 1], [], []>} : vector<16x32xf32>, vector<32x128xf32>, vector<16x128xf32> -> vector<16x128xf32>
    %52 = arith.addf %50, %51 : vector<16x128xf32>
    %53 = vector.extract_strided_slice %52 {offsets = [0, 0], sizes = [16, 32], strides = [1, 1]} : vector<16x128xf32> to vector<16x32xf32>
    %54 = arith.negf %53 : vector<16x32xf32>
    %55 = math.exp %54 : vector<16x32xf32>
    %cst_24 = arith.constant 1.000000e+00 : f32
    %56 = vector.broadcast %cst_24 : f32 to vector<16x32xf32>
    %57 = arith.addf %56, %55 : vector<16x32xf32>
    %58 = arith.divf %56, %57 : vector<16x32xf32>
    %59 = vector.extract_strided_slice %52 {offsets = [0, 32], sizes = [16, 32], strides = [1, 1]} : vector<16x128xf32> to vector<16x32xf32>
    %60 = arith.negf %59 : vector<16x32xf32>
    %61 = math.exp %60 : vector<16x32xf32>
    %cst_25 = arith.constant 1.000000e+00 : f32
    %62 = vector.broadcast %cst_25 : f32 to vector<16x32xf32>
    %63 = arith.addf %62, %61 : vector<16x32xf32>
    %64 = arith.divf %62, %63 : vector<16x32xf32>
    %65 = vector.extract_strided_slice %52 {offsets = [0, 64], sizes = [16, 32], strides = [1, 1]} : vector<16x128xf32> to vector<16x32xf32>
    %66 = math.tanh %65 : vector<16x32xf32>
    %67 = vector.extract_strided_slice %52 {offsets = [0, 96], sizes = [16, 32], strides = [1, 1]} : vector<16x128xf32> to vector<16x32xf32>
    %68 = arith.negf %67 : vector<16x32xf32>
    %69 = math.exp %68 : vector<16x32xf32>
    %cst_26 = arith.constant 1.000000e+00 : f32
    %70 = vector.broadcast %cst_26 : f32 to vector<16x32xf32>
    %71 = arith.addf %70, %69 : vector<16x32xf32>
    %72 = arith.divf %70, %71 : vector<16x32xf32>
    %73 = arith.mulf %64, %43 : vector<16x32xf32>
    %74 = arith.mulf %58, %66 : vector<16x32xf32>
    %75 = arith.addf %73, %74 : vector<16x32xf32>
    %76 = math.tanh %75 : vector<16x32xf32>
    %77 = arith.mulf %72, %76 : vector<16x32xf32>
    %c1 = arith.constant 1 : index
    %c0_27 = arith.constant 0 : index
    %c0_28 = arith.constant 0 : index
    %78 = vector.load %arg14[%c1, %c0_27, %c0_28] : memref<8x16x32xf32, #tpu.memory_space<vmem>>, vector<1x16x32xf32>
    %79 = vector.shape_cast %78 : vector<1x16x32xf32> to vector<16x32xf32>
    %80 = vector.shape_cast %77 : vector<16x32xf32> to vector<1x16x32xf32>
    tpu.vector_store %arg14[%c1, %c0_27, %c0_28], %80 {strides = array<i32>} : memref<8x16x32xf32, #tpu.memory_space<vmem>>, vector<1x16x32xf32>,
    %81 = vector.extract_strided_slice %7 {offsets = [2, 0, 0], sizes = [1, 16, 128], strides = [1, 1, 1]} : vector<8x16x128xf32> to vector<1x16x128xf32>
    %82 = vector.shape_cast %81 : vector<1x16x128xf32> to vector<16x128xf32>
    %cst_29 = arith.constant dense<0.000000e+00> : vector<16x128xf32>
    %83 = tpu.matmul %77, %14, %cst_29 {dimension_numbers = #tpu.dot_dimension_numbers<[1], [0], [0], [1], [0, 0, 1, 1], [], []>} : vector<16x32xf32>, vector<32x128xf32>, vector<16x128xf32> -> vector<16x128xf32>
    %84 = arith.addf %82, %83 : vector<16x128xf32>
    %85 = vector.extract_strided_slice %84 {offsets = [0, 0], sizes = [16, 32], strides = [1, 1]} : vector<16x128xf32> to vector<16x32xf32>
    %86 = arith.negf %85 : vector<16x32xf32>
    %87 = math.exp %86 : vector<16x32xf32>
    %cst_30 = arith.constant 1.000000e+00 : f32
    %88 = vector.broadcast %cst_30 : f32 to vector<16x32xf32>
    %89 = arith.addf %88, %87 : vector<16x32xf32>
    %90 = arith.divf %88, %89 : vector<16x32xf32>
    %91 = vector.extract_strided_slice %84 {offsets = [0, 32], sizes = [16, 32], strides = [1, 1]} : vector<16x128xf32> to vector<16x32xf32>
    %92 = arith.negf %91 : vector<16x32xf32>
    %93 = math.exp %92 : vector<16x32xf32>
    %cst_31 = arith.constant 1.000000e+00 : f32
    %94 = vector.broadcast %cst_31 : f32 to vector<16x32xf32>
    %95 = arith.addf %94, %93 : vector<16x32xf32>
    %96 = arith.divf %94, %95 : vector<16x32xf32>
    %97 = vector.extract_strided_slice %84 {offsets = [0, 64], sizes = [16, 32], strides = [1, 1]} : vector<16x128xf32> to vector<16x32xf32>
    %98 = math.tanh %97 : vector<16x32xf32>
    %99 = vector.extract_strided_slice %84 {offsets = [0, 96], sizes = [16, 32], strides = [1, 1]} : vector<16x128xf32> to vector<16x32xf32>
    %100 = arith.negf %99 : vector<16x32xf32>
    %101 = math.exp %100 : vector<16x32xf32>
    %cst_32 = arith.constant 1.000000e+00 : f32
    %102 = vector.broadcast %cst_32 : f32 to vector<16x32xf32>
    %103 = arith.addf %102, %101 : vector<16x32xf32>
    %104 = arith.divf %102, %103 : vector<16x32xf32>
    %105 = arith.mulf %96, %75 : vector<16x32xf32>
    %106 = arith.mulf %90, %98 : vector<16x32xf32>
    %107 = arith.addf %105, %106 : vector<16x32xf32>
    %108 = math.tanh %107 : vector<16x32xf32>
    %109 = arith.mulf %104, %108 : vector<16x32xf32>
    %c2 = arith.constant 2 : index
    %c0_33 = arith.constant 0 : index
    %c0_34 = arith.constant 0 : index
    %110 = vector.load %arg14[%c2, %c0_33, %c0_34] : memref<8x16x32xf32, #tpu.memory_space<vmem>>, vector<1x16x32xf32>
    %111 = vector.shape_cast %110 : vector<1x16x32xf32> to vector<16x32xf32>
    %112 = vector.shape_cast %109 : vector<16x32xf32> to vector<1x16x32xf32>
    tpu.vector_store %arg14[%c2, %c0_33, %c0_34], %112 {strides = array<i32>} : memref<8x16x32xf32, #tpu.memory_space<vmem>>, vector<1x16x32xf32>,
    %113 = vector.extract_strided_slice %7 {offsets = [3, 0, 0], sizes = [1, 16, 128], strides = [1, 1, 1]} : vector<8x16x128xf32> to vector<1x16x128xf32>
    %114 = vector.shape_cast %113 : vector<1x16x128xf32> to vector<16x128xf32>
    %cst_35 = arith.constant dense<0.000000e+00> : vector<16x128xf32>
    %115 = tpu.matmul %109, %14, %cst_35 {dimension_numbers = #tpu.dot_dimension_numbers<[1], [0], [0], [1], [0, 0, 1, 1], [], []>} : vector<16x32xf32>, vector<32x128xf32>, vector<16x128xf32> -> vector<16x128xf32>
    %116 = arith.addf %114, %115 : vector<16x128xf32>
    %117 = vector.extract_strided_slice %116 {offsets = [0, 0], sizes = [16, 32], strides = [1, 1]} : vector<16x128xf32> to vector<16x32xf32>
    %118 = arith.negf %117 : vector<16x32xf32>
    %119 = math.exp %118 : vector<16x32xf32>
    %cst_36 = arith.constant 1.000000e+00 : f32
    %120 = vector.broadcast %cst_36 : f32 to vector<16x32xf32>
    %121 = arith.addf %120, %119 : vector<16x32xf32>
    %122 = arith.divf %120, %121 : vector<16x32xf32>
    %123 = vector.extract_strided_slice %116 {offsets = [0, 32], sizes = [16, 32], strides = [1, 1]} : vector<16x128xf32> to vector<16x32xf32>
    %124 = arith.negf %123 : vector<16x32xf32>
    %125 = math.exp %124 : vector<16x32xf32>
    %cst_37 = arith.constant 1.000000e+00 : f32
    %126 = vector.broadcast %cst_37 : f32 to vector<16x32xf32>
    %127 = arith.addf %126, %125 : vector<16x32xf32>
    %128 = arith.divf %126, %127 : vector<16x32xf32>
    %129 = vector.extract_strided_slice %116 {offsets = [0, 64], sizes = [16, 32], strides = [1, 1]} : vector<16x128xf32> to vector<16x32xf32>
    %130 = math.tanh %129 : vector<16x32xf32>
    %131 = vector.extract_strided_slice %116 {offsets = [0, 96], sizes = [16, 32], strides = [1, 1]} : vector<16x128xf32> to vector<16x32xf32>
    %132 = arith.negf %131 : vector<16x32xf32>
    %133 = math.exp %132 : vector<16x32xf32>
    %cst_38 = arith.constant 1.000000e+00 : f32
    %134 = vector.broadcast %cst_38 : f32 to vector<16x32xf32>
    %135 = arith.addf %134, %133 : vector<16x32xf32>
    %136 = arith.divf %134, %135 : vector<16x32xf32>
    %137 = arith.mulf %128, %107 : vector<16x32xf32>
    %138 = arith.mulf %122, %130 : vector<16x32xf32>
    %139 = arith.addf %137, %138 : vector<16x32xf32>
    %140 = math.tanh %139 : vector<16x32xf32>
    %141 = arith.mulf %136, %140 : vector<16x32xf32>
    %c3 = arith.constant 3 : index
    %c0_39 = arith.constant 0 : index
    %c0_40 = arith.constant 0 : index
    %142 = vector.load %arg14[%c3, %c0_39, %c0_40] : memref<8x16x32xf32, #tpu.memory_space<vmem>>, vector<1x16x32xf32>
    %143 = vector.shape_cast %142 : vector<1x16x32xf32> to vector<16x32xf32>
    %144 = vector.shape_cast %141 : vector<16x32xf32> to vector<1x16x32xf32>
    tpu.vector_store %arg14[%c3, %c0_39, %c0_40], %144 {strides = array<i32>} : memref<8x16x32xf32, #tpu.memory_space<vmem>>, vector<1x16x32xf32>,
    %145 = vector.extract_strided_slice %7 {offsets = [4, 0, 0], sizes = [1, 16, 128], strides = [1, 1, 1]} : vector<8x16x128xf32> to vector<1x16x128xf32>
    %146 = vector.shape_cast %145 : vector<1x16x128xf32> to vector<16x128xf32>
    %cst_41 = arith.constant dense<0.000000e+00> : vector<16x128xf32>
    %147 = tpu.matmul %141, %14, %cst_41 {dimension_numbers = #tpu.dot_dimension_numbers<[1], [0], [0], [1], [0, 0, 1, 1], [], []>} : vector<16x32xf32>, vector<32x128xf32>, vector<16x128xf32> -> vector<16x128xf32>
    %148 = arith.addf %146, %147 : vector<16x128xf32>
    %149 = vector.extract_strided_slice %148 {offsets = [0, 0], sizes = [16, 32], strides = [1, 1]} : vector<16x128xf32> to vector<16x32xf32>
    %150 = arith.negf %149 : vector<16x32xf32>
    %151 = math.exp %150 : vector<16x32xf32>
    %cst_42 = arith.constant 1.000000e+00 : f32
    %152 = vector.broadcast %cst_42 : f32 to vector<16x32xf32>
    %153 = arith.addf %152, %151 : vector<16x32xf32>
    %154 = arith.divf %152, %153 : vector<16x32xf32>
    %155 = vector.extract_strided_slice %148 {offsets = [0, 32], sizes = [16, 32], strides = [1, 1]} : vector<16x128xf32> to vector<16x32xf32>
    %156 = arith.negf %155 : vector<16x32xf32>
    %157 = math.exp %156 : vector<16x32xf32>
    %cst_43 = arith.constant 1.000000e+00 : f32
    %158 = vector.broadcast %cst_43 : f32 to vector<16x32xf32>
    %159 = arith.addf %158, %157 : vector<16x32xf32>
    %160 = arith.divf %158, %159 : vector<16x32xf32>
    %161 = vector.extract_strided_slice %148 {offsets = [0, 64], sizes = [16, 32], strides = [1, 1]} : vector<16x128xf32> to vector<16x32xf32>
    %162 = math.tanh %161 : vector<16x32xf32>
    %163 = vector.extract_strided_slice %148 {offsets = [0, 96], sizes = [16, 32], strides = [1, 1]} : vector<16x128xf32> to vector<16x32xf32>
    %164 = arith.negf %163 : vector<16x32xf32>
    %165 = math.exp %164 : vector<16x32xf32>
    %cst_44 = arith.constant 1.000000e+00 : f32
    %166 = vector.broadcast %cst_44 : f32 to vector<16x32xf32>
    %167 = arith.addf %166, %165 : vector<16x32xf32>
    %168 = arith.divf %166, %167 : vector<16x32xf32>
    %169 = arith.mulf %160, %139 : vector<16x32xf32>
    %170 = arith.mulf %154, %162 : vector<16x32xf32>
    %171 = arith.addf %169, %170 : vector<16x32xf32>
    %172 = math.tanh %171 : vector<16x32xf32>
    %173 = arith.mulf %168, %172 : vector<16x32xf32>
    %c4 = arith.constant 4 : index
    %c0_45 = arith.constant 0 : index
    %c0_46 = arith.constant 0 : index
    %174 = vector.load %arg14[%c4, %c0_45, %c0_46] : memref<8x16x32xf32, #tpu.memory_space<vmem>>, vector<1x16x32xf32>
    %175 = vector.shape_cast %174 : vector<1x16x32xf32> to vector<16x32xf32>
    %176 = vector.shape_cast %173 : vector<16x32xf32> to vector<1x16x32xf32>
    tpu.vector_store %arg14[%c4, %c0_45, %c0_46], %176 {strides = array<i32>} : memref<8x16x32xf32, #tpu.memory_space<vmem>>, vector<1x16x32xf32>,
    %177 = vector.extract_strided_slice %7 {offsets = [5, 0, 0], sizes = [1, 16, 128], strides = [1, 1, 1]} : vector<8x16x128xf32> to vector<1x16x128xf32>
    %178 = vector.shape_cast %177 : vector<1x16x128xf32> to vector<16x128xf32>
    %cst_47 = arith.constant dense<0.000000e+00> : vector<16x128xf32>
    %179 = tpu.matmul %173, %14, %cst_47 {dimension_numbers = #tpu.dot_dimension_numbers<[1], [0], [0], [1], [0, 0, 1, 1], [], []>} : vector<16x32xf32>, vector<32x128xf32>, vector<16x128xf32> -> vector<16x128xf32>
    %180 = arith.addf %178, %179 : vector<16x128xf32>
    %181 = vector.extract_strided_slice %180 {offsets = [0, 0], sizes = [16, 32], strides = [1, 1]} : vector<16x128xf32> to vector<16x32xf32>
    %182 = arith.negf %181 : vector<16x32xf32>
    %183 = math.exp %182 : vector<16x32xf32>
    %cst_48 = arith.constant 1.000000e+00 : f32
    %184 = vector.broadcast %cst_48 : f32 to vector<16x32xf32>
    %185 = arith.addf %184, %183 : vector<16x32xf32>
    %186 = arith.divf %184, %185 : vector<16x32xf32>
    %187 = vector.extract_strided_slice %180 {offsets = [0, 32], sizes = [16, 32], strides = [1, 1]} : vector<16x128xf32> to vector<16x32xf32>
    %188 = arith.negf %187 : vector<16x32xf32>
    %189 = math.exp %188 : vector<16x32xf32>
    %cst_49 = arith.constant 1.000000e+00 : f32
    %190 = vector.broadcast %cst_49 : f32 to vector<16x32xf32>
    %191 = arith.addf %190, %189 : vector<16x32xf32>
    %192 = arith.divf %190, %191 : vector<16x32xf32>
    %193 = vector.extract_strided_slice %180 {offsets = [0, 64], sizes = [16, 32], strides = [1, 1]} : vector<16x128xf32> to vector<16x32xf32>
    %194 = math.tanh %193 : vector<16x32xf32>
    %195 = vector.extract_strided_slice %180 {offsets = [0, 96], sizes = [16, 32], strides = [1, 1]} : vector<16x128xf32> to vector<16x32xf32>
    %196 = arith.negf %195 : vector<16x32xf32>
    %197 = math.exp %196 : vector<16x32xf32>
    %cst_50 = arith.constant 1.000000e+00 : f32
    %198 = vector.broadcast %cst_50 : f32 to vector<16x32xf32>
    %199 = arith.addf %198, %197 : vector<16x32xf32>
    %200 = arith.divf %198, %199 : vector<16x32xf32>
    %201 = arith.mulf %192, %171 : vector<16x32xf32>
    %202 = arith.mulf %186, %194 : vector<16x32xf32>
    %203 = arith.addf %201, %202 : vector<16x32xf32>
    %204 = math.tanh %203 : vector<16x32xf32>
    %205 = arith.mulf %200, %204 : vector<16x32xf32>
    %c5 = arith.constant 5 : index
    %c0_51 = arith.constant 0 : index
    %c0_52 = arith.constant 0 : index
    %206 = vector.load %arg14[%c5, %c0_51, %c0_52] : memref<8x16x32xf32, #tpu.memory_space<vmem>>, vector<1x16x32xf32>
    %207 = vector.shape_cast %206 : vector<1x16x32xf32> to vector<16x32xf32>
    %208 = vector.shape_cast %205 : vector<16x32xf32> to vector<1x16x32xf32>
    tpu.vector_store %arg14[%c5, %c0_51, %c0_52], %208 {strides = array<i32>} : memref<8x16x32xf32, #tpu.memory_space<vmem>>, vector<1x16x32xf32>,
    %209 = vector.extract_strided_slice %7 {offsets = [6, 0, 0], sizes = [1, 16, 128], strides = [1, 1, 1]} : vector<8x16x128xf32> to vector<1x16x128xf32>
    %210 = vector.shape_cast %209 : vector<1x16x128xf32> to vector<16x128xf32>
    %cst_53 = arith.constant dense<0.000000e+00> : vector<16x128xf32>
    %211 = tpu.matmul %205, %14, %cst_53 {dimension_numbers = #tpu.dot_dimension_numbers<[1], [0], [0], [1], [0, 0, 1, 1], [], []>} : vector<16x32xf32>, vector<32x128xf32>, vector<16x128xf32> -> vector<16x128xf32>
    %212 = arith.addf %210, %211 : vector<16x128xf32>
    %213 = vector.extract_strided_slice %212 {offsets = [0, 0], sizes = [16, 32], strides = [1, 1]} : vector<16x128xf32> to vector<16x32xf32>
    %214 = arith.negf %213 : vector<16x32xf32>
    %215 = math.exp %214 : vector<16x32xf32>
    %cst_54 = arith.constant 1.000000e+00 : f32
    %216 = vector.broadcast %cst_54 : f32 to vector<16x32xf32>
    %217 = arith.addf %216, %215 : vector<16x32xf32>
    %218 = arith.divf %216, %217 : vector<16x32xf32>
    %219 = vector.extract_strided_slice %212 {offsets = [0, 32], sizes = [16, 32], strides = [1, 1]} : vector<16x128xf32> to vector<16x32xf32>
    %220 = arith.negf %219 : vector<16x32xf32>
    %221 = math.exp %220 : vector<16x32xf32>
    %cst_55 = arith.constant 1.000000e+00 : f32
    %222 = vector.broadcast %cst_55 : f32 to vector<16x32xf32>
    %223 = arith.addf %222, %221 : vector<16x32xf32>
    %224 = arith.divf %222, %223 : vector<16x32xf32>
    %225 = vector.extract_strided_slice %212 {offsets = [0, 64], sizes = [16, 32], strides = [1, 1]} : vector<16x128xf32> to vector<16x32xf32>
    %226 = math.tanh %225 : vector<16x32xf32>
    %227 = vector.extract_strided_slice %212 {offsets = [0, 96], sizes = [16, 32], strides = [1, 1]} : vector<16x128xf32> to vector<16x32xf32>
    %228 = arith.negf %227 : vector<16x32xf32>
    %229 = math.exp %228 : vector<16x32xf32>
    %cst_56 = arith.constant 1.000000e+00 : f32
    %230 = vector.broadcast %cst_56 : f32 to vector<16x32xf32>
    %231 = arith.addf %230, %229 : vector<16x32xf32>
    %232 = arith.divf %230, %231 : vector<16x32xf32>
    %233 = arith.mulf %224, %203 : vector<16x32xf32>
    %234 = arith.mulf %218, %226 : vector<16x32xf32>
    %235 = arith.addf %233, %234 : vector<16x32xf32>
    %236 = math.tanh %235 : vector<16x32xf32>
    %237 = arith.mulf %232, %236 : vector<16x32xf32>
    %c6 = arith.constant 6 : index
    %c0_57 = arith.constant 0 : index
    %c0_58 = arith.constant 0 : index
    %238 = vector.load %arg14[%c6, %c0_57, %c0_58] : memref<8x16x32xf32, #tpu.memory_space<vmem>>, vector<1x16x32xf32>
    %239 = vector.shape_cast %238 : vector<1x16x32xf32> to vector<16x32xf32>
    %240 = vector.shape_cast %237 : vector<16x32xf32> to vector<1x16x32xf32>
    tpu.vector_store %arg14[%c6, %c0_57, %c0_58], %240 {strides = array<i32>} : memref<8x16x32xf32, #tpu.memory_space<vmem>>, vector<1x16x32xf32>,
    %241 = vector.extract_strided_slice %7 {offsets = [7, 0, 0], sizes = [1, 16, 128], strides = [1, 1, 1]} : vector<8x16x128xf32> to vector<1x16x128xf32>
    %242 = vector.shape_cast %241 : vector<1x16x128xf32> to vector<16x128xf32>
    %cst_59 = arith.constant dense<0.000000e+00> : vector<16x128xf32>
    %243 = tpu.matmul %237, %14, %cst_59 {dimension_numbers = #tpu.dot_dimension_numbers<[1], [0], [0], [1], [0, 0, 1, 1], [], []>} : vector<16x32xf32>, vector<32x128xf32>, vector<16x128xf32> -> vector<16x128xf32>
    %244 = arith.addf %242, %243 : vector<16x128xf32>
    %245 = vector.extract_strided_slice %244 {offsets = [0, 0], sizes = [16, 32], strides = [1, 1]} : vector<16x128xf32> to vector<16x32xf32>
    %246 = arith.negf %245 : vector<16x32xf32>
    %247 = math.exp %246 : vector<16x32xf32>
    %cst_60 = arith.constant 1.000000e+00 : f32
    %248 = vector.broadcast %cst_60 : f32 to vector<16x32xf32>
    %249 = arith.addf %248, %247 : vector<16x32xf32>
    %250 = arith.divf %248, %249 : vector<16x32xf32>
    %251 = vector.extract_strided_slice %244 {offsets = [0, 32], sizes = [16, 32], strides = [1, 1]} : vector<16x128xf32> to vector<16x32xf32>
    %252 = arith.negf %251 : vector<16x32xf32>
    %253 = math.exp %252 : vector<16x32xf32>
    %cst_61 = arith.constant 1.000000e+00 : f32
    %254 = vector.broadcast %cst_61 : f32 to vector<16x32xf32>
    %255 = arith.addf %254, %253 : vector<16x32xf32>
    %256 = arith.divf %254, %255 : vector<16x32xf32>
    %257 = vector.extract_strided_slice %244 {offsets = [0, 64], sizes = [16, 32], strides = [1, 1]} : vector<16x128xf32> to vector<16x32xf32>
    %258 = math.tanh %257 : vector<16x32xf32>
    %259 = vector.extract_strided_slice %244 {offsets = [0, 96], sizes = [16, 32], strides = [1, 1]} : vector<16x128xf32> to vector<16x32xf32>
    %260 = arith.negf %259 : vector<16x32xf32>
    %261 = math.exp %260 : vector<16x32xf32>
    %cst_62 = arith.constant 1.000000e+00 : f32
    %262 = vector.broadcast %cst_62 : f32 to vector<16x32xf32>
    %263 = arith.addf %262, %261 : vector<16x32xf32>
    %264 = arith.divf %262, %263 : vector<16x32xf32>
    %265 = arith.mulf %256, %235 : vector<16x32xf32>
    %266 = arith.mulf %250, %258 : vector<16x32xf32>
    %267 = arith.addf %265, %266 : vector<16x32xf32>
    %268 = math.tanh %267 : vector<16x32xf32>
    %269 = arith.mulf %264, %268 : vector<16x32xf32>
    %c7 = arith.constant 7 : index
    %c0_63 = arith.constant 0 : index
    %c0_64 = arith.constant 0 : index
    %270 = vector.load %arg14[%c7, %c0_63, %c0_64] : memref<8x16x32xf32, #tpu.memory_space<vmem>>, vector<1x16x32xf32>
    %271 = vector.shape_cast %270 : vector<1x16x32xf32> to vector<16x32xf32>
    %272 = vector.shape_cast %269 : vector<16x32xf32> to vector<1x16x32xf32>
    tpu.vector_store %arg14[%c7, %c0_63, %c0_64], %272 {strides = array<i32>} : memref<8x16x32xf32, #tpu.memory_space<vmem>>, vector<1x16x32xf32>,
    %273 = vector.extract_strided_slice %13 {offsets = [7, 0, 0], sizes = [1, 16, 128], strides = [1, 1, 1]} : vector<8x16x128xf32> to vector<1x16x128xf32>
    %274 = vector.shape_cast %273 : vector<1x16x128xf32> to vector<16x128xf32>
    %cst_65 = arith.constant dense<0.000000e+00> : vector<16x128xf32>
    %275 = tpu.matmul %16, %15, %cst_65 {dimension_numbers = #tpu.dot_dimension_numbers<[1], [0], [0], [1], [0, 0, 1, 1], [], []>} : vector<16x32xf32>, vector<32x128xf32>, vector<16x128xf32> -> vector<16x128xf32>
    %276 = arith.addf %274, %275 : vector<16x128xf32>
    %277 = vector.extract_strided_slice %276 {offsets = [0, 0], sizes = [16, 32], strides = [1, 1]} : vector<16x128xf32> to vector<16x32xf32>
    %278 = arith.negf %277 : vector<16x32xf32>
    %279 = math.exp %278 : vector<16x32xf32>
    %cst_66 = arith.constant 1.000000e+00 : f32
    %280 = vector.broadcast %cst_66 : f32 to vector<16x32xf32>
    %281 = arith.addf %280, %279 : vector<16x32xf32>
    %282 = arith.divf %280, %281 : vector<16x32xf32>
    %283 = vector.extract_strided_slice %276 {offsets = [0, 32], sizes = [16, 32], strides = [1, 1]} : vector<16x128xf32> to vector<16x32xf32>
    %284 = arith.negf %283 : vector<16x32xf32>
    %285 = math.exp %284 : vector<16x32xf32>
    %cst_67 = arith.constant 1.000000e+00 : f32
    %286 = vector.broadcast %cst_67 : f32 to vector<16x32xf32>
    %287 = arith.addf %286, %285 : vector<16x32xf32>
    %288 = arith.divf %286, %287 : vector<16x32xf32>
    %289 = vector.extract_strided_slice %276 {offsets = [0, 64], sizes = [16, 32], strides = [1, 1]} : vector<16x128xf32> to vector<16x32xf32>
    %290 = math.tanh %289 : vector<16x32xf32>
    %291 = vector.extract_strided_slice %276 {offsets = [0, 96], sizes = [16, 32], strides = [1, 1]} : vector<16x128xf32> to vector<16x32xf32>
    %292 = arith.negf %291 : vector<16x32xf32>
    %293 = math.exp %292 : vector<16x32xf32>
    %cst_68 = arith.constant 1.000000e+00 : f32
    %294 = vector.broadcast %cst_68 : f32 to vector<16x32xf32>
    %295 = arith.addf %294, %293 : vector<16x32xf32>
    %296 = arith.divf %294, %295 : vector<16x32xf32>
    %297 = arith.mulf %288, %16 : vector<16x32xf32>
    %298 = arith.mulf %282, %290 : vector<16x32xf32>
    %299 = arith.addf %297, %298 : vector<16x32xf32>
    %300 = math.tanh %299 : vector<16x32xf32>
    %301 = arith.mulf %296, %300 : vector<16x32xf32>
    %c7_69 = arith.constant 7 : index
    %c0_70 = arith.constant 0 : index
    %c0_71 = arith.constant 0 : index
    %302 = vector.load %arg15[%c7_69, %c0_70, %c0_71] : memref<8x16x32xf32, #tpu.memory_space<vmem>>, vector<1x16x32xf32>
    %303 = vector.shape_cast %302 : vector<1x16x32xf32> to vector<16x32xf32>
    %304 = vector.shape_cast %301 : vector<16x32xf32> to vector<1x16x32xf32>
    tpu.vector_store %arg15[%c7_69, %c0_70, %c0_71], %304 {strides = array<i32>} : memref<8x16x32xf32, #tpu.memory_space<vmem>>, vector<1x16x32xf32>,
    %305 = vector.extract_strided_slice %13 {offsets = [6, 0, 0], sizes = [1, 16, 128], strides = [1, 1, 1]} : vector<8x16x128xf32> to vector<1x16x128xf32>
    %306 = vector.shape_cast %305 : vector<1x16x128xf32> to vector<16x128xf32>
    %cst_72 = arith.constant dense<0.000000e+00> : vector<16x128xf32>
    %307 = tpu.matmul %301, %15, %cst_72 {dimension_numbers = #tpu.dot_dimension_numbers<[1], [0], [0], [1], [0, 0, 1, 1], [], []>} : vector<16x32xf32>, vector<32x128xf32>, vector<16x128xf32> -> vector<16x128xf32>
    %308 = arith.addf %306, %307 : vector<16x128xf32>
    %309 = vector.extract_strided_slice %308 {offsets = [0, 0], sizes = [16, 32], strides = [1, 1]} : vector<16x128xf32> to vector<16x32xf32>
    %310 = arith.negf %309 : vector<16x32xf32>
    %311 = math.exp %310 : vector<16x32xf32>
    %cst_73 = arith.constant 1.000000e+00 : f32
    %312 = vector.broadcast %cst_73 : f32 to vector<16x32xf32>
    %313 = arith.addf %312, %311 : vector<16x32xf32>
    %314 = arith.divf %312, %313 : vector<16x32xf32>
    %315 = vector.extract_strided_slice %308 {offsets = [0, 32], sizes = [16, 32], strides = [1, 1]} : vector<16x128xf32> to vector<16x32xf32>
    %316 = arith.negf %315 : vector<16x32xf32>
    %317 = math.exp %316 : vector<16x32xf32>
    %cst_74 = arith.constant 1.000000e+00 : f32
    %318 = vector.broadcast %cst_74 : f32 to vector<16x32xf32>
    %319 = arith.addf %318, %317 : vector<16x32xf32>
    %320 = arith.divf %318, %319 : vector<16x32xf32>
    %321 = vector.extract_strided_slice %308 {offsets = [0, 64], sizes = [16, 32], strides = [1, 1]} : vector<16x128xf32> to vector<16x32xf32>
    %322 = math.tanh %321 : vector<16x32xf32>
    %323 = vector.extract_strided_slice %308 {offsets = [0, 96], sizes = [16, 32], strides = [1, 1]} : vector<16x128xf32> to vector<16x32xf32>
    %324 = arith.negf %323 : vector<16x32xf32>
    %325 = math.exp %324 : vector<16x32xf32>
    %cst_75 = arith.constant 1.000000e+00 : f32
    %326 = vector.broadcast %cst_75 : f32 to vector<16x32xf32>
    %327 = arith.addf %326, %325 : vector<16x32xf32>
    %328 = arith.divf %326, %327 : vector<16x32xf32>
    %329 = arith.mulf %320, %299 : vector<16x32xf32>
    %330 = arith.mulf %314, %322 : vector<16x32xf32>
    %331 = arith.addf %329, %330 : vector<16x32xf32>
    %332 = math.tanh %331 : vector<16x32xf32>
    %333 = arith.mulf %328, %332 : vector<16x32xf32>
    %c6_76 = arith.constant 6 : index
    %c0_77 = arith.constant 0 : index
    %c0_78 = arith.constant 0 : index
    %334 = vector.load %arg15[%c6_76, %c0_77, %c0_78] : memref<8x16x32xf32, #tpu.memory_space<vmem>>, vector<1x16x32xf32>
    %335 = vector.shape_cast %334 : vector<1x16x32xf32> to vector<16x32xf32>
    %336 = vector.shape_cast %333 : vector<16x32xf32> to vector<1x16x32xf32>
    tpu.vector_store %arg15[%c6_76, %c0_77, %c0_78], %336 {strides = array<i32>} : memref<8x16x32xf32, #tpu.memory_space<vmem>>, vector<1x16x32xf32>,
    %337 = vector.extract_strided_slice %13 {offsets = [5, 0, 0], sizes = [1, 16, 128], strides = [1, 1, 1]} : vector<8x16x128xf32> to vector<1x16x128xf32>
    %338 = vector.shape_cast %337 : vector<1x16x128xf32> to vector<16x128xf32>
    %cst_79 = arith.constant dense<0.000000e+00> : vector<16x128xf32>
    %339 = tpu.matmul %333, %15, %cst_79 {dimension_numbers = #tpu.dot_dimension_numbers<[1], [0], [0], [1], [0, 0, 1, 1], [], []>} : vector<16x32xf32>, vector<32x128xf32>, vector<16x128xf32> -> vector<16x128xf32>
    %340 = arith.addf %338, %339 : vector<16x128xf32>
    %341 = vector.extract_strided_slice %340 {offsets = [0, 0], sizes = [16, 32], strides = [1, 1]} : vector<16x128xf32> to vector<16x32xf32>
    %342 = arith.negf %341 : vector<16x32xf32>
    %343 = math.exp %342 : vector<16x32xf32>
    %cst_80 = arith.constant 1.000000e+00 : f32
    %344 = vector.broadcast %cst_80 : f32 to vector<16x32xf32>
    %345 = arith.addf %344, %343 : vector<16x32xf32>
    %346 = arith.divf %344, %345 : vector<16x32xf32>
    %347 = vector.extract_strided_slice %340 {offsets = [0, 32], sizes = [16, 32], strides = [1, 1]} : vector<16x128xf32> to vector<16x32xf32>
    %348 = arith.negf %347 : vector<16x32xf32>
    %349 = math.exp %348 : vector<16x32xf32>
    %cst_81 = arith.constant 1.000000e+00 : f32
    %350 = vector.broadcast %cst_81 : f32 to vector<16x32xf32>
    %351 = arith.addf %350, %349 : vector<16x32xf32>
    %352 = arith.divf %350, %351 : vector<16x32xf32>
    %353 = vector.extract_strided_slice %340 {offsets = [0, 64], sizes = [16, 32], strides = [1, 1]} : vector<16x128xf32> to vector<16x32xf32>
    %354 = math.tanh %353 : vector<16x32xf32>
    %355 = vector.extract_strided_slice %340 {offsets = [0, 96], sizes = [16, 32], strides = [1, 1]} : vector<16x128xf32> to vector<16x32xf32>
    %356 = arith.negf %355 : vector<16x32xf32>
    %357 = math.exp %356 : vector<16x32xf32>
    %cst_82 = arith.constant 1.000000e+00 : f32
    %358 = vector.broadcast %cst_82 : f32 to vector<16x32xf32>
    %359 = arith.addf %358, %357 : vector<16x32xf32>
    %360 = arith.divf %358, %359 : vector<16x32xf32>
    %361 = arith.mulf %352, %331 : vector<16x32xf32>
    %362 = arith.mulf %346, %354 : vector<16x32xf32>
    %363 = arith.addf %361, %362 : vector<16x32xf32>
    %364 = math.tanh %363 : vector<16x32xf32>
    %365 = arith.mulf %360, %364 : vector<16x32xf32>
    %c5_83 = arith.constant 5 : index
    %c0_84 = arith.constant 0 : index
    %c0_85 = arith.constant 0 : index
    %366 = vector.load %arg15[%c5_83, %c0_84, %c0_85] : memref<8x16x32xf32, #tpu.memory_space<vmem>>, vector<1x16x32xf32>
    %367 = vector.shape_cast %366 : vector<1x16x32xf32> to vector<16x32xf32>
    %368 = vector.shape_cast %365 : vector<16x32xf32> to vector<1x16x32xf32>
    tpu.vector_store %arg15[%c5_83, %c0_84, %c0_85], %368 {strides = array<i32>} : memref<8x16x32xf32, #tpu.memory_space<vmem>>, vector<1x16x32xf32>,
    %369 = vector.extract_strided_slice %13 {offsets = [4, 0, 0], sizes = [1, 16, 128], strides = [1, 1, 1]} : vector<8x16x128xf32> to vector<1x16x128xf32>
    %370 = vector.shape_cast %369 : vector<1x16x128xf32> to vector<16x128xf32>
    %cst_86 = arith.constant dense<0.000000e+00> : vector<16x128xf32>
    %371 = tpu.matmul %365, %15, %cst_86 {dimension_numbers = #tpu.dot_dimension_numbers<[1], [0], [0], [1], [0, 0, 1, 1], [], []>} : vector<16x32xf32>, vector<32x128xf32>, vector<16x128xf32> -> vector<16x128xf32>
    %372 = arith.addf %370, %371 : vector<16x128xf32>
    %373 = vector.extract_strided_slice %372 {offsets = [0, 0], sizes = [16, 32], strides = [1, 1]} : vector<16x128xf32> to vector<16x32xf32>
    %374 = arith.negf %373 : vector<16x32xf32>
    %375 = math.exp %374 : vector<16x32xf32>
    %cst_87 = arith.constant 1.000000e+00 : f32
    %376 = vector.broadcast %cst_87 : f32 to vector<16x32xf32>
    %377 = arith.addf %376, %375 : vector<16x32xf32>
    %378 = arith.divf %376, %377 : vector<16x32xf32>
    %379 = vector.extract_strided_slice %372 {offsets = [0, 32], sizes = [16, 32], strides = [1, 1]} : vector<16x128xf32> to vector<16x32xf32>
    %380 = arith.negf %379 : vector<16x32xf32>
    %381 = math.exp %380 : vector<16x32xf32>
    %cst_88 = arith.constant 1.000000e+00 : f32
    %382 = vector.broadcast %cst_88 : f32 to vector<16x32xf32>
    %383 = arith.addf %382, %381 : vector<16x32xf32>
    %384 = arith.divf %382, %383 : vector<16x32xf32>
    %385 = vector.extract_strided_slice %372 {offsets = [0, 64], sizes = [16, 32], strides = [1, 1]} : vector<16x128xf32> to vector<16x32xf32>
    %386 = math.tanh %385 : vector<16x32xf32>
    %387 = vector.extract_strided_slice %372 {offsets = [0, 96], sizes = [16, 32], strides = [1, 1]} : vector<16x128xf32> to vector<16x32xf32>
    %388 = arith.negf %387 : vector<16x32xf32>
    %389 = math.exp %388 : vector<16x32xf32>
    %cst_89 = arith.constant 1.000000e+00 : f32
    %390 = vector.broadcast %cst_89 : f32 to vector<16x32xf32>
    %391 = arith.addf %390, %389 : vector<16x32xf32>
    %392 = arith.divf %390, %391 : vector<16x32xf32>
    %393 = arith.mulf %384, %363 : vector<16x32xf32>
    %394 = arith.mulf %378, %386 : vector<16x32xf32>
    %395 = arith.addf %393, %394 : vector<16x32xf32>
    %396 = math.tanh %395 : vector<16x32xf32>
    %397 = arith.mulf %392, %396 : vector<16x32xf32>
    %c4_90 = arith.constant 4 : index
    %c0_91 = arith.constant 0 : index
    %c0_92 = arith.constant 0 : index
    %398 = vector.load %arg15[%c4_90, %c0_91, %c0_92] : memref<8x16x32xf32, #tpu.memory_space<vmem>>, vector<1x16x32xf32>
    %399 = vector.shape_cast %398 : vector<1x16x32xf32> to vector<16x32xf32>
    %400 = vector.shape_cast %397 : vector<16x32xf32> to vector<1x16x32xf32>
    tpu.vector_store %arg15[%c4_90, %c0_91, %c0_92], %400 {strides = array<i32>} : memref<8x16x32xf32, #tpu.memory_space<vmem>>, vector<1x16x32xf32>,
    %401 = vector.extract_strided_slice %13 {offsets = [3, 0, 0], sizes = [1, 16, 128], strides = [1, 1, 1]} : vector<8x16x128xf32> to vector<1x16x128xf32>
    %402 = vector.shape_cast %401 : vector<1x16x128xf32> to vector<16x128xf32>
    %cst_93 = arith.constant dense<0.000000e+00> : vector<16x128xf32>
    %403 = tpu.matmul %397, %15, %cst_93 {dimension_numbers = #tpu.dot_dimension_numbers<[1], [0], [0], [1], [0, 0, 1, 1], [], []>} : vector<16x32xf32>, vector<32x128xf32>, vector<16x128xf32> -> vector<16x128xf32>
    %404 = arith.addf %402, %403 : vector<16x128xf32>
    %405 = vector.extract_strided_slice %404 {offsets = [0, 0], sizes = [16, 32], strides = [1, 1]} : vector<16x128xf32> to vector<16x32xf32>
    %406 = arith.negf %405 : vector<16x32xf32>
    %407 = math.exp %406 : vector<16x32xf32>
    %cst_94 = arith.constant 1.000000e+00 : f32
    %408 = vector.broadcast %cst_94 : f32 to vector<16x32xf32>
    %409 = arith.addf %408, %407 : vector<16x32xf32>
    %410 = arith.divf %408, %409 : vector<16x32xf32>
    %411 = vector.extract_strided_slice %404 {offsets = [0, 32], sizes = [16, 32], strides = [1, 1]} : vector<16x128xf32> to vector<16x32xf32>
    %412 = arith.negf %411 : vector<16x32xf32>
    %413 = math.exp %412 : vector<16x32xf32>
    %cst_95 = arith.constant 1.000000e+00 : f32
    %414 = vector.broadcast %cst_95 : f32 to vector<16x32xf32>
    %415 = arith.addf %414, %413 : vector<16x32xf32>
    %416 = arith.divf %414, %415 : vector<16x32xf32>
    %417 = vector.extract_strided_slice %404 {offsets = [0, 64], sizes = [16, 32], strides = [1, 1]} : vector<16x128xf32> to vector<16x32xf32>
    %418 = math.tanh %417 : vector<16x32xf32>
    %419 = vector.extract_strided_slice %404 {offsets = [0, 96], sizes = [16, 32], strides = [1, 1]} : vector<16x128xf32> to vector<16x32xf32>
    %420 = arith.negf %419 : vector<16x32xf32>
    %421 = math.exp %420 : vector<16x32xf32>
    %cst_96 = arith.constant 1.000000e+00 : f32
    %422 = vector.broadcast %cst_96 : f32 to vector<16x32xf32>
    %423 = arith.addf %422, %421 : vector<16x32xf32>
    %424 = arith.divf %422, %423 : vector<16x32xf32>
    %425 = arith.mulf %416, %395 : vector<16x32xf32>
    %426 = arith.mulf %410, %418 : vector<16x32xf32>
    %427 = arith.addf %425, %426 : vector<16x32xf32>
    %428 = math.tanh %427 : vector<16x32xf32>
    %429 = arith.mulf %424, %428 : vector<16x32xf32>
    %c3_97 = arith.constant 3 : index
    %c0_98 = arith.constant 0 : index
    %c0_99 = arith.constant 0 : index
    %430 = vector.load %arg15[%c3_97, %c0_98, %c0_99] : memref<8x16x32xf32, #tpu.memory_space<vmem>>, vector<1x16x32xf32>
    %431 = vector.shape_cast %430 : vector<1x16x32xf32> to vector<16x32xf32>
    %432 = vector.shape_cast %429 : vector<16x32xf32> to vector<1x16x32xf32>
    tpu.vector_store %arg15[%c3_97, %c0_98, %c0_99], %432 {strides = array<i32>} : memref<8x16x32xf32, #tpu.memory_space<vmem>>, vector<1x16x32xf32>,
    %433 = vector.extract_strided_slice %13 {offsets = [2, 0, 0], sizes = [1, 16, 128], strides = [1, 1, 1]} : vector<8x16x128xf32> to vector<1x16x128xf32>
    %434 = vector.shape_cast %433 : vector<1x16x128xf32> to vector<16x128xf32>
    %cst_100 = arith.constant dense<0.000000e+00> : vector<16x128xf32>
    %435 = tpu.matmul %429, %15, %cst_100 {dimension_numbers = #tpu.dot_dimension_numbers<[1], [0], [0], [1], [0, 0, 1, 1], [], []>} : vector<16x32xf32>, vector<32x128xf32>, vector<16x128xf32> -> vector<16x128xf32>
    %436 = arith.addf %434, %435 : vector<16x128xf32>
    %437 = vector.extract_strided_slice %436 {offsets = [0, 0], sizes = [16, 32], strides = [1, 1]} : vector<16x128xf32> to vector<16x32xf32>
    %438 = arith.negf %437 : vector<16x32xf32>
    %439 = math.exp %438 : vector<16x32xf32>
    %cst_101 = arith.constant 1.000000e+00 : f32
    %440 = vector.broadcast %cst_101 : f32 to vector<16x32xf32>
    %441 = arith.addf %440, %439 : vector<16x32xf32>
    %442 = arith.divf %440, %441 : vector<16x32xf32>
    %443 = vector.extract_strided_slice %436 {offsets = [0, 32], sizes = [16, 32], strides = [1, 1]} : vector<16x128xf32> to vector<16x32xf32>
    %444 = arith.negf %443 : vector<16x32xf32>
    %445 = math.exp %444 : vector<16x32xf32>
    %cst_102 = arith.constant 1.000000e+00 : f32
    %446 = vector.broadcast %cst_102 : f32 to vector<16x32xf32>
    %447 = arith.addf %446, %445 : vector<16x32xf32>
    %448 = arith.divf %446, %447 : vector<16x32xf32>
    %449 = vector.extract_strided_slice %436 {offsets = [0, 64], sizes = [16, 32], strides = [1, 1]} : vector<16x128xf32> to vector<16x32xf32>
    %450 = math.tanh %449 : vector<16x32xf32>
    %451 = vector.extract_strided_slice %436 {offsets = [0, 96], sizes = [16, 32], strides = [1, 1]} : vector<16x128xf32> to vector<16x32xf32>
    %452 = arith.negf %451 : vector<16x32xf32>
    %453 = math.exp %452 : vector<16x32xf32>
    %cst_103 = arith.constant 1.000000e+00 : f32
    %454 = vector.broadcast %cst_103 : f32 to vector<16x32xf32>
    %455 = arith.addf %454, %453 : vector<16x32xf32>
    %456 = arith.divf %454, %455 : vector<16x32xf32>
    %457 = arith.mulf %448, %427 : vector<16x32xf32>
    %458 = arith.mulf %442, %450 : vector<16x32xf32>
    %459 = arith.addf %457, %458 : vector<16x32xf32>
    %460 = math.tanh %459 : vector<16x32xf32>
    %461 = arith.mulf %456, %460 : vector<16x32xf32>
    %c2_104 = arith.constant 2 : index
    %c0_105 = arith.constant 0 : index
    %c0_106 = arith.constant 0 : index
    %462 = vector.load %arg15[%c2_104, %c0_105, %c0_106] : memref<8x16x32xf32, #tpu.memory_space<vmem>>, vector<1x16x32xf32>
    %463 = vector.shape_cast %462 : vector<1x16x32xf32> to vector<16x32xf32>
    %464 = vector.shape_cast %461 : vector<16x32xf32> to vector<1x16x32xf32>
    tpu.vector_store %arg15[%c2_104, %c0_105, %c0_106], %464 {strides = array<i32>} : memref<8x16x32xf32, #tpu.memory_space<vmem>>, vector<1x16x32xf32>,
    %465 = vector.extract_strided_slice %13 {offsets = [1, 0, 0], sizes = [1, 16, 128], strides = [1, 1, 1]} : vector<8x16x128xf32> to vector<1x16x128xf32>
    %466 = vector.shape_cast %465 : vector<1x16x128xf32> to vector<16x128xf32>
    %cst_107 = arith.constant dense<0.000000e+00> : vector<16x128xf32>
    %467 = tpu.matmul %461, %15, %cst_107 {dimension_numbers = #tpu.dot_dimension_numbers<[1], [0], [0], [1], [0, 0, 1, 1], [], []>} : vector<16x32xf32>, vector<32x128xf32>, vector<16x128xf32> -> vector<16x128xf32>
    %468 = arith.addf %466, %467 : vector<16x128xf32>
    %469 = vector.extract_strided_slice %468 {offsets = [0, 0], sizes = [16, 32], strides = [1, 1]} : vector<16x128xf32> to vector<16x32xf32>
    %470 = arith.negf %469 : vector<16x32xf32>
    %471 = math.exp %470 : vector<16x32xf32>
    %cst_108 = arith.constant 1.000000e+00 : f32
    %472 = vector.broadcast %cst_108 : f32 to vector<16x32xf32>
    %473 = arith.addf %472, %471 : vector<16x32xf32>
    %474 = arith.divf %472, %473 : vector<16x32xf32>
    %475 = vector.extract_strided_slice %468 {offsets = [0, 32], sizes = [16, 32], strides = [1, 1]} : vector<16x128xf32> to vector<16x32xf32>
    %476 = arith.negf %475 : vector<16x32xf32>
    %477 = math.exp %476 : vector<16x32xf32>
    %cst_109 = arith.constant 1.000000e+00 : f32
    %478 = vector.broadcast %cst_109 : f32 to vector<16x32xf32>
    %479 = arith.addf %478, %477 : vector<16x32xf32>
    %480 = arith.divf %478, %479 : vector<16x32xf32>
    %481 = vector.extract_strided_slice %468 {offsets = [0, 64], sizes = [16, 32], strides = [1, 1]} : vector<16x128xf32> to vector<16x32xf32>
    %482 = math.tanh %481 : vector<16x32xf32>
    %483 = vector.extract_strided_slice %468 {offsets = [0, 96], sizes = [16, 32], strides = [1, 1]} : vector<16x128xf32> to vector<16x32xf32>
    %484 = arith.negf %483 : vector<16x32xf32>
    %485 = math.exp %484 : vector<16x32xf32>
    %cst_110 = arith.constant 1.000000e+00 : f32
    %486 = vector.broadcast %cst_110 : f32 to vector<16x32xf32>
    %487 = arith.addf %486, %485 : vector<16x32xf32>
    %488 = arith.divf %486, %487 : vector<16x32xf32>
    %489 = arith.mulf %480, %459 : vector<16x32xf32>
    %490 = arith.mulf %474, %482 : vector<16x32xf32>
    %491 = arith.addf %489, %490 : vector<16x32xf32>
    %492 = math.tanh %491 : vector<16x32xf32>
    %493 = arith.mulf %488, %492 : vector<16x32xf32>
    %c1_111 = arith.constant 1 : index
    %c0_112 = arith.constant 0 : index
    %c0_113 = arith.constant 0 : index
    %494 = vector.load %arg15[%c1_111, %c0_112, %c0_113] : memref<8x16x32xf32, #tpu.memory_space<vmem>>, vector<1x16x32xf32>
    %495 = vector.shape_cast %494 : vector<1x16x32xf32> to vector<16x32xf32>
    %496 = vector.shape_cast %493 : vector<16x32xf32> to vector<1x16x32xf32>
    tpu.vector_store %arg15[%c1_111, %c0_112, %c0_113], %496 {strides = array<i32>} : memref<8x16x32xf32, #tpu.memory_space<vmem>>, vector<1x16x32xf32>,
    %497 = vector.extract_strided_slice %13 {offsets = [0, 0, 0], sizes = [1, 16, 128], strides = [1, 1, 1]} : vector<8x16x128xf32> to vector<1x16x128xf32>
    %498 = vector.shape_cast %497 : vector<1x16x128xf32> to vector<16x128xf32>
    %cst_114 = arith.constant dense<0.000000e+00> : vector<16x128xf32>
    %499 = tpu.matmul %493, %15, %cst_114 {dimension_numbers = #tpu.dot_dimension_numbers<[1], [0], [0], [1], [0, 0, 1, 1], [], []>} : vector<16x32xf32>, vector<32x128xf32>, vector<16x128xf32> -> vector<16x128xf32>
    %500 = arith.addf %498, %499 : vector<16x128xf32>
    %501 = vector.extract_strided_slice %500 {offsets = [0, 0], sizes = [16, 32], strides = [1, 1]} : vector<16x128xf32> to vector<16x32xf32>
    %502 = arith.negf %501 : vector<16x32xf32>
    %503 = math.exp %502 : vector<16x32xf32>
    %cst_115 = arith.constant 1.000000e+00 : f32
    %504 = vector.broadcast %cst_115 : f32 to vector<16x32xf32>
    %505 = arith.addf %504, %503 : vector<16x32xf32>
    %506 = arith.divf %504, %505 : vector<16x32xf32>
    %507 = vector.extract_strided_slice %500 {offsets = [0, 32], sizes = [16, 32], strides = [1, 1]} : vector<16x128xf32> to vector<16x32xf32>
    %508 = arith.negf %507 : vector<16x32xf32>
    %509 = math.exp %508 : vector<16x32xf32>
    %cst_116 = arith.constant 1.000000e+00 : f32
    %510 = vector.broadcast %cst_116 : f32 to vector<16x32xf32>
    %511 = arith.addf %510, %509 : vector<16x32xf32>
    %512 = arith.divf %510, %511 : vector<16x32xf32>
    %513 = vector.extract_strided_slice %500 {offsets = [0, 64], sizes = [16, 32], strides = [1, 1]} : vector<16x128xf32> to vector<16x32xf32>
    %514 = math.tanh %513 : vector<16x32xf32>
    %515 = vector.extract_strided_slice %500 {offsets = [0, 96], sizes = [16, 32], strides = [1, 1]} : vector<16x128xf32> to vector<16x32xf32>
    %516 = arith.negf %515 : vector<16x32xf32>
    %517 = math.exp %516 : vector<16x32xf32>
    %cst_117 = arith.constant 1.000000e+00 : f32
    %518 = vector.broadcast %cst_117 : f32 to vector<16x32xf32>
    %519 = arith.addf %518, %517 : vector<16x32xf32>
    %520 = arith.divf %518, %519 : vector<16x32xf32>
    %521 = arith.mulf %512, %491 : vector<16x32xf32>
    %522 = arith.mulf %506, %514 : vector<16x32xf32>
    %523 = arith.addf %521, %522 : vector<16x32xf32>
    %524 = math.tanh %523 : vector<16x32xf32>
    %525 = arith.mulf %520, %524 : vector<16x32xf32>
    %c0_118 = arith.constant 0 : index
    %c0_119 = arith.constant 0 : index
    %c0_120 = arith.constant 0 : index
    %526 = vector.load %arg15[%c0_118, %c0_119, %c0_120] : memref<8x16x32xf32, #tpu.memory_space<vmem>>, vector<1x16x32xf32>
    %527 = vector.shape_cast %526 : vector<1x16x32xf32> to vector<16x32xf32>
    %528 = vector.shape_cast %525 : vector<16x32xf32> to vector<1x16x32xf32>
    tpu.vector_store %arg15[%c0_118, %c0_119, %c0_120], %528 {strides = array<i32>} : memref<8x16x32xf32, #tpu.memory_space<vmem>>, vector<1x16x32xf32>,
    %c0_121 = arith.constant 0 : index
    %c0_122 = arith.constant 0 : index
    %c0_123 = arith.constant 0 : index
    %529 = vector.load %arg14[%c0_121, %c0_122, %c0_123] : memref<8x16x32xf32, #tpu.memory_space<vmem>>, vector<8x16x32xf32>
    %cst_124 = arith.constant 0.000000e+00 : f32
    %530 = vector.broadcast %cst_124 : f32 to vector<8x16x32xf32>
    %531 = arith.maximumf %529, %530 : vector<8x16x32xf32>
    %532 = vector.shape_cast %531 : vector<8x16x32xf32> to vector<128x32xf32>
    %c0_125 = arith.constant 0 : index
    %c0_126 = arith.constant 0 : index
    %c0_127 = arith.constant 0 : index
    %533 = vector.load %arg15[%c0_125, %c0_126, %c0_127] : memref<8x16x32xf32, #tpu.memory_space<vmem>>, vector<8x16x32xf32>
    %cst_128 = arith.constant 0.000000e+00 : f32
    %534 = vector.broadcast %cst_128 : f32 to vector<8x16x32xf32>
    %535 = arith.maximumf %533, %534 : vector<8x16x32xf32>
    %536 = vector.shape_cast %535 : vector<8x16x32xf32> to vector<128x32xf32>
    %c0_129 = arith.constant 0 : index
    %c0_130 = arith.constant 0 : index
    %537 = vector.load %arg8[%c0_129, %c0_130] : memref<32x16xf32, #tpu.memory_space<vmem>>, vector<32x16xf32>
    %cst_131 = arith.constant dense<0.000000e+00> : vector<128x16xf32>
    %538 = tpu.matmul %532, %537, %cst_131 {dimension_numbers = #tpu.dot_dimension_numbers<[1], [0], [0], [1], [0, 0, 1, 1], [], []>} : vector<128x32xf32>, vector<32x16xf32>, vector<128x16xf32> -> vector<128x16xf32>
    %c0_132 = arith.constant 0 : index
    %c0_133 = arith.constant 0 : index
    %539 = vector.load %arg9[%c0_132, %c0_133] : memref<32x16xf32, #tpu.memory_space<vmem>>, vector<32x16xf32>
    %cst_134 = arith.constant dense<0.000000e+00> : vector<128x16xf32>
    %540 = tpu.matmul %536, %539, %cst_134 {dimension_numbers = #tpu.dot_dimension_numbers<[1], [0], [0], [1], [0, 0, 1, 1], [], []>} : vector<128x32xf32>, vector<32x16xf32>, vector<128x16xf32> -> vector<128x16xf32>
    %541 = arith.addf %538, %540 : vector<128x16xf32>
    %c0_135 = arith.constant 0 : index
    %c0_136 = arith.constant 0 : index
    %542 = vector.load %arg10[%c0_135, %c0_136] : memref<1x16xf32, #tpu.memory_space<vmem>>, vector<1x16xf32>
    %543 = vector.broadcast %542 : vector<1x16xf32> to vector<128x16xf32>
    %544 = arith.addf %541, %543 : vector<128x16xf32>
    %545 = arith.addf %544, %1 : vector<128x16xf32>
    %546 = vector.shape_cast %545 : vector<128x16xf32> to vector<8x16x16xf32>
    %cst_137 = arith.constant dense<0.000000e+00> : vector<8x16xf32>
    %547 = vector.multi_reduction <add>, %546, %cst_137 [2] : vector<8x16x16xf32> to vector<8x16xf32>
    %548 = vector.shape_cast %547 : vector<8x16xf32> to vector<8x16x1xf32>
    %cst_138 = arith.constant 1.600000e+01 : f32
    %549 = vector.broadcast %cst_138 : f32 to vector<8x16x1xf32>
    %550 = arith.divf %548, %549 : vector<8x16x1xf32>
    %cst_139 = arith.constant dense<0.000000e+00> : vector<16x1xf32>
    %551 = vector.multi_reduction <add>, %550, %cst_139 [0] : vector<8x16x1xf32> to vector<16x1xf32>
    %552 = vector.shape_cast %551 : vector<16x1xf32> to vector<1x16x1xf32>
    %cst_140 = arith.constant 8.000000e+00 : f32
    %553 = vector.broadcast %cst_140 : f32 to vector<1x16x1xf32>
    %554 = arith.divf %552, %553 : vector<1x16x1xf32>
    %555 = vector.broadcast %554 : vector<1x16x1xf32> to vector<8x16x16xf32>
    %556 = arith.subf %546, %555 : vector<8x16x16xf32>
    %557 = arith.mulf %556, %556 : vector<8x16x16xf32>
    %cst_141 = arith.constant dense<0.000000e+00> : vector<8x16xf32>
    %558 = vector.multi_reduction <add>, %557, %cst_141 [2] : vector<8x16x16xf32> to vector<8x16xf32>
    %559 = vector.shape_cast %558 : vector<8x16xf32> to vector<8x16x1xf32>
    %cst_142 = arith.constant 1.600000e+01 : f32
    %560 = vector.broadcast %cst_142 : f32 to vector<8x16x1xf32>
    %561 = arith.divf %559, %560 : vector<8x16x1xf32>
    %cst_143 = arith.constant dense<0.000000e+00> : vector<16x1xf32>
    %562 = vector.multi_reduction <add>, %561, %cst_143 [0] : vector<8x16x1xf32> to vector<16x1xf32>
    %563 = vector.shape_cast %562 : vector<16x1xf32> to vector<1x16x1xf32>
    %cst_144 = arith.constant 8.000000e+00 : f32
    %564 = vector.broadcast %cst_144 : f32 to vector<1x16x1xf32>
    %565 = arith.divf %563, %564 : vector<1x16x1xf32>
    %cst_145 = arith.constant 9.99999996E-13 : f32
    %566 = vector.broadcast %cst_145 : f32 to vector<1x16x1xf32>
    %567 = arith.addf %565, %566 : vector<1x16x1xf32>
    %568 = math.rsqrt %567 : vector<1x16x1xf32>
    %569 = vector.broadcast %568 : vector<1x16x1xf32> to vector<8x16x16xf32>
    %570 = arith.mulf %556, %569 : vector<8x16x16xf32>
    %c0_146 = arith.constant 0 : index
    %c0_147 = arith.constant 0 : index
    %571 = vector.load %arg11[%c0_146, %c0_147] : memref<1x16xf32, #tpu.memory_space<vmem>>, vector<1x16xf32>
    %572 = vector.shape_cast %571 : vector<1x16xf32> to vector<1x1x16xf32>
    %573 = vector.broadcast %572 : vector<1x1x16xf32> to vector<8x16x16xf32>
    %574 = arith.mulf %570, %573 : vector<8x16x16xf32>
    %c0_148 = arith.constant 0 : index
    %c0_149 = arith.constant 0 : index
    %575 = vector.load %arg12[%c0_148, %c0_149] : memref<1x16xf32, #tpu.memory_space<vmem>>, vector<1x16xf32>
    %576 = vector.shape_cast %575 : vector<1x16xf32> to vector<1x1x16xf32>
    %577 = vector.broadcast %576 : vector<1x1x16xf32> to vector<8x16x16xf32>
    %578 = arith.addf %574, %577 : vector<8x16x16xf32>
    %c0_150 = arith.constant 0 : index
    %c0_151 = arith.constant 0 : index
    %c0_152 = arith.constant 0 : index
    %579 = vector.load %arg13[%c0_150, %c0_151, %c0_152] : memref<8x16x16xf32, #tpu.memory_space<vmem>>, vector<8x16x16xf32>
    tpu.vector_store %arg13[%c0_150, %c0_151, %c0_152], %578 {strides = array<i32>} : memref<8x16x16xf32, #tpu.memory_space<vmem>>, vector<8x16x16xf32>,
    return
  }
  func.func @transform_0(%arg0: i32) -> (i32, i32, i32) {
    %c0_i32 = arith.constant 0 : i32
    %c0_i32_0 = arith.constant 0 : i32
    %c0_i32_1 = arith.constant 0 : i32
    return %c0_i32, %arg0, %c0_i32_0 : i32, i32, i32
  }
  func.func @transform_1(%arg0: i32) -> (i32, i32) {
    %c0_i32 = arith.constant 0 : i32
    %c0_i32_0 = arith.constant 0 : i32
    %c0_i32_1 = arith.constant 0 : i32
    return %c0_i32, %c0_i32_0 : i32, i32
  }
  func.func @transform_2(%arg0: i32) -> (i32, i32) {
    %c0_i32 = arith.constant 0 : i32
    %c0_i32_0 = arith.constant 0 : i32
    %c0_i32_1 = arith.constant 0 : i32
    return %c0_i32, %c0_i32_0 : i32, i32
  }
  func.func @transform_3(%arg0: i32) -> (i32, i32) {
    %c0_i32 = arith.constant 0 : i32
    %c0_i32_0 = arith.constant 0 : i32
    %c0_i32_1 = arith.constant 0 : i32
    return %c0_i32, %c0_i32_0 : i32, i32
  }
  func.func @transform_4(%arg0: i32) -> (i32, i32) {
    %c0_i32 = arith.constant 0 : i32
    %c0_i32_0 = arith.constant 0 : i32
    %c0_i32_1 = arith.constant 0 : i32
    return %c0_i32, %c0_i32_0 : i32, i32
  }
  func.func @transform_5(%arg0: i32) -> (i32, i32) {
    %c0_i32 = arith.constant 0 : i32
    %c0_i32_0 = arith.constant 0 : i32
    %c0_i32_1 = arith.constant 0 : i32
    return %c0_i32, %c0_i32_0 : i32, i32
  }
  func.func @transform_6(%arg0: i32) -> (i32, i32) {
    %c0_i32 = arith.constant 0 : i32
    %c0_i32_0 = arith.constant 0 : i32
    %c0_i32_1 = arith.constant 0 : i32
    return %c0_i32, %c0_i32_0 : i32, i32
  }
  func.func @transform_7(%arg0: i32) -> (i32, i32) {
    %c0_i32 = arith.constant 0 : i32
    %c0_i32_0 = arith.constant 0 : i32
    %c0_i32_1 = arith.constant 0 : i32
    return %c0_i32, %c0_i32_0 : i32, i32
  }
  func.func @transform_8(%arg0: i32) -> (i32, i32) {
    %c0_i32 = arith.constant 0 : i32
    %c0_i32_0 = arith.constant 0 : i32
    %c0_i32_1 = arith.constant 0 : i32
    return %c0_i32, %c0_i32_0 : i32, i32
  }
  func.func @transform_9(%arg0: i32) -> (i32, i32) {
    %c0_i32 = arith.constant 0 : i32
    %c0_i32_0 = arith.constant 0 : i32
    %c0_i32_1 = arith.constant 0 : i32
    return %c0_i32, %c0_i32_0 : i32, i32
  }
  func.func @transform_10(%arg0: i32) -> (i32, i32) {
    %c0_i32 = arith.constant 0 : i32
    %c0_i32_0 = arith.constant 0 : i32
    %c0_i32_1 = arith.constant 0 : i32
    return %c0_i32, %c0_i32_0 : i32, i32
  }
  func.func @transform_11(%arg0: i32) -> (i32, i32) {
    %c0_i32 = arith.constant 0 : i32
    %c0_i32_0 = arith.constant 0 : i32
    %c0_i32_1 = arith.constant 0 : i32
    return %c0_i32, %c0_i32_0 : i32, i32
  }
  func.func @transform_12(%arg0: i32) -> (i32, i32, i32) {
    %c0_i32 = arith.constant 0 : i32
    %c0_i32_0 = arith.constant 0 : i32
    %c0_i32_1 = arith.constant 0 : i32
    return %c0_i32, %arg0, %c0_i32_0 : i32, i32, i32
  }
}

</mosaic_0001>

<bundles_post_ra>
// kernel: dual_path_transformer_block.5
= control target key start
LH: loop header
LB: loop body
LE: loop exit
PB: predicated region body
PF: predicated region fallthrough
CT: control target
= control target key end

     0   :  { %vm66_vm0 = vcmask 130048   ;;  %v4543_v34 = vmov 0.0   ;;  %s4544_s17 = smov 64   ;;  %s4545_s18 = smov 32   ;;  %vm422_vm1 = vcmask 261120   ;;  %s5570_s1 = inlined_call_operand.vmem [shape: f32[16,128], index: 1, kind: input, shape index: {}]   ;;  %s5571_s4 = inlined_call_operand.vmem [shape: f32[16,128], index: 4, kind: input, shape index: {}]   ;;  %s5572_s0 = inlined_call_operand.vmem [shape: f32[8,16,16], index: 0, kind: input, shape index: {}]   ;;  %s5573_s5 = inlined_call_operand.vmem [shape: f32[32,128], index: 5, kind: input, shape index: {}]   ;;  %s5574_s2 = inlined_call_operand.vmem [shape: f32[32,128], index: 2, kind: input, shape index: {}]   ;;  %s5575_s3 = inlined_call_operand.vmem [shape: f32[1,128], index: 3, kind: input, shape index: {}]   ;;  %s5576_s6 = inlined_call_operand.vmem [shape: f32[1,128], index: 6, kind: input, shape index: {}]   ;;  %s5577_s7 = inlined_call_operand.vmem [shape: f32[32,16], index: 7, kind: input, shape index: {}]   ;;  %s5578_s8 = inlined_call_operand.vmem [shape: f32[32,16], index: 8, kind: input, shape index: {}]   ;;  %s5579_s9 = inlined_call_operand.vmem [shape: f32[1,16], index: 9, kind: input, shape index: {}]   ;;  %s5580_s10 = inlined_call_operand.vmem [shape: f32[1,16], index: 10, kind: input, shape index: {}]   ;;  %s5581_s11 = inlined_call_operand.vmem [shape: f32[1,16], index: 11, kind: input, shape index: {}]   ;;  %s5582_s12 = inlined_call_operand.vmem [shape: f32[8,16,16], index: 12, kind: output, shape index: {}]  }
   0x1   :  { %v57_v0 = vld [vmem:[%s5570_s1] sm:$0xff]  ;;  %v58_v1 = vld [vmem:[%s5570_s1 + $0x8] sm:$0xff]  ;;  %v43_v11 = vld [vmem:[%s5572_s0 + $0x10] sm:$0xff] }
   0x2   :  { %v260_v2 = vld [vmem:[%s5571_s4] sm:$0xff]  ;;  %v4030_v3 = vpack.c.bf16 %v58_v1, %v57_v0  ;;  %v261_v4 = vld [vmem:[%s5571_s4 + $0x8] sm:$0xff]  ;;  %v420_v12 = vld [vmem:[%s5573_s5 + $0x10] sm:$0xff] }
   0x3   :  { %v41_v5 = vld [vmem:[%s5572_s0] sm:$0xff]  ;;  %v4034_v6 = vpack.c.bf16 %v261_v4, %v260_v2  ;;  %v419_v8 = vld [vmem:[%s5573_s5 + $0x8] sm:$0xff]  ;;  %v421_v13 = vld [vmem:[%s5573_s5 + $0x18] sm:$0xff] }
   0x4   :  { %3738 = vmatprep.mubr.msk.f32.mxu0 %vm66_vm0, %v41_v5  ;;  %3766 = vmatprep.mubr.msk.f32.mxu1 %vm66_vm0, %v41_v5  ;;  %v418_v7 = vld [vmem:[%s5573_s5] sm:$0xff]  ;;  %v42_v10 = vld [vmem:[%s5572_s0 + $0x8] sm:$0xff]  ;;  %v4649_v14 = vpack.c.bf16 %v421_v13, %v420_v12  ;;  %v44_v17 = vld [vmem:[%s5572_s0 + $0x18] sm:$0xff] }
   0x5   :  { %4031 = vmatprep.subr.bf16.mxu0 %v4030_v3  ;;  %v4634_v9 = vpack.c.bf16 %v419_v8, %v418_v7  ;;  %4035 = vmatprep.subr.bf16.mxu1 %v4034_v6  ;;  %v414_v15 = vld [vmem:[%s5574_s2] sm:$0xff]  ;;  %v415_v16 = vld [vmem:[%s5574_s2 + $0x8] sm:$0xff]  ;;  %v416_v19 = vld [vmem:[%s5574_s2 + $0x10] sm:$0xff] }
   0x6   :  { %4033 = vmatpush3.bf16.msra.mxu0 %v4030_v3  ;;  %4037 = vmatpush3.bf16.msra.mxu1 %v4034_v6  ;;  %v4663_v18 = vpack.c.bf16 %v415_v16, %v414_v15  ;;  %v45_v20 = vld [vmem:[%s5572_s0 + $0x20] sm:$0xff]  ;;  %v417_v21 = vld [vmem:[%s5574_s2 + $0x18] sm:$0xff]  ;;  %v46_v23 = vld [vmem:[%s5572_s0 + $0x28] sm:$0xff] }
   0x7   :  { %4103 = vmatprep.subr.bf16.mxu1 %v4634_v9  ;;  %v4679_v22 = vpack.c.bf16 %v417_v21, %v416_v19  ;;  %v47_v24 = vld [vmem:[%s5572_s0 + $0x30] sm:$0xff]  ;;  %v48_v25 = vld [vmem:[%s5572_s0 + $0x38] sm:$0xff]  ;;  %v49_v26 = vld [vmem:[%s5572_s0 + $0x40] sm:$0xff] }
   0x8   :  { %4039 = vmatprep.subr.bf16.mxu0 %v4663_v18  ;;  %v50_v27 = vld [vmem:[%s5572_s0 + $0x48] sm:$0xff]  ;;  %v51_v28 = vld [vmem:[%s5572_s0 + $0x50] sm:$0xff]  ;;  %v52_v29 = vld [vmem:[%s5572_s0 + $0x58] sm:$0xff] }
   0x9   :  { %3739 = vmatmul.mubr.msk.f32.vlgmr.msra.gmra.mrb[0].mxu0 %vm66_vm0, %v42_v10  ;;  %3767 = vmatmul.mubr.msk.f32.vlgmr.msra.gmra.mrb[0].mxu1 %vm66_vm0, %v42_v10  ;;  %v53_v30 = vld [vmem:[%s5572_s0 + $0x60] sm:$0xff]  ;;  %v54_v31 = vld [vmem:[%s5572_s0 + $0x68] sm:$0xff]  ;;  %v55_v32 = vld [vmem:[%s5572_s0 + $0x70] sm:$0xff] }
   0xa   :  { %3741 = vmatprep.mubr.msk.f32.mxu0 %vm66_vm0, %v43_v11  ;;  %4105 = vmatpush3.bf16.msra.mxu1 %v4634_v9  ;;  %v56_v33 = vld [vmem:[%s5572_s0 + $0x78] sm:$0xff]  ;;  %v4756_v35 = vld [vmem:[%s5575_s3] ss:$0 sm:$0xff] }
   0xb   :  { %3769 = vmatprep.mubr.msk.f32.mxu1 %vm66_vm0, %v43_v11  ;;  %4107 = vmatprep.subr.bf16.mxu1 %v4649_v14  ;;  %v4763_v40 = vld [vmem:[%s5576_s6] ss:$0 sm:$0xff] }
   0xc   :  { %4041 = vmatpush3.bf16.msra.mxu0 %v4663_v18 }
   0xd   :  { %3742 = vmatmul.mubr.msk.f32.gmra.mrb[2].mxu0 %vm66_vm0, %v44_v17  ;;  %3770 = vmatmul.mubr.msk.f32.gmra.mrb[2].mxu1 %vm66_vm0, %v44_v17 }
   0xe   :  { %3744 = vmatprep.mubr.msk.f32.mxu0 %vm66_vm0, %v45_v20  ;;  %3772 = vmatprep.mubr.msk.f32.mxu1 %vm66_vm0, %v45_v20 }
   0xf   :  { %4109 = vmatpush3.bf16.msra.mxu1 %v4649_v14  ;;  %4043 = vmatprep.subr.bf16.mxu0 %v4679_v22 }
  0x10   :  { %4111 = vmatprep.subr.bf16.mxu1 %v4634_v9  ;;  %4045 = vmatpush3.bf16.msra.mxu0 %v4679_v22 }
  0x11   :  { %3745 = vmatmul.mubr.msk.f32.gmra.mrb[4].mxu0 %vm66_vm0, %v46_v23  ;;  %3773 = vmatmul.mubr.msk.f32.gmra.mrb[4].mxu1 %vm66_vm0, %v46_v23 }
  0x12   :  { %3747 = vmatprep.mubr.msk.f32.mxu0 %vm66_vm0, %v47_v24  ;;  %3775 = vmatprep.mubr.msk.f32.mxu1 %vm66_vm0, %v47_v24 }
  0x13   :  { %4047 = vmatprep.subr.bf16.mxu0 %v4663_v18 }
  0x15   :  { %3748 = vmatmul.mubr.msk.f32.gmra.mrb[6].mxu0 %vm66_vm0, %v48_v25  ;;  %3776 = vmatmul.mubr.msk.f32.gmra.mrb[6].mxu1 %vm66_vm0, %v48_v25 }
  0x16   :  { %3750 = vmatprep.mubr.msk.f32.mxu0 %vm66_vm0, %v49_v26  ;;  %3778 = vmatprep.mubr.msk.f32.mxu1 %vm66_vm0, %v49_v26 }
  0x19   :  { %3751 = vmatmul.mubr.msk.f32.gmra.mrb[8].mxu0 %vm66_vm0, %v50_v27  ;;  %3779 = vmatmul.mubr.msk.f32.gmra.mrb[8].mxu1 %vm66_vm0, %v50_v27 }
  0x1a   :  { %3753 = vmatprep.mubr.msk.f32.mxu0 %vm66_vm0, %v51_v28  ;;  %3781 = vmatprep.mubr.msk.f32.mxu1 %vm66_vm0, %v51_v28 }
  0x1d   :  { %3754 = vmatmul.mubr.msk.f32.gmra.mrb[10].mxu0 %vm66_vm0, %v52_v29  ;;  %3782 = vmatmul.mubr.msk.f32.gmra.mrb[10].mxu1 %vm66_vm0, %v52_v29 }
  0x1e   :  { %3756 = vmatprep.mubr.msk.f32.mxu0 %vm66_vm0, %v53_v30  ;;  %3784 = vmatprep.mubr.msk.f32.mxu1 %vm66_vm0, %v53_v30 }
  0x21   :  { %3757 = vmatmul.mubr.msk.f32.gmra.mrb[12].mxu0 %vm66_vm0, %v54_v31  ;;  %3785 = vmatmul.mubr.msk.f32.gmra.mrb[12].mxu1 %vm66_vm0, %v54_v31 }
  0x22   :  { %3759 = vmatprep.mubr.msk.f32.mxu0 %vm66_vm0, %v55_v32  ;;  %3787 = vmatprep.mubr.msk.f32.mxu1 %vm66_vm0, %v55_v32 }
  0x25   :  { %3760 = vmatmul.mubr.msk.f32.gmra.mrb[14].mxu0 %vm66_vm0, %v56_v33  ;;  %3788 = vmatmul.mubr.msk.f32.gmra.mrb[14].mxu1 %vm66_vm0, %v56_v33 }
  0x26   :  { %3798 = vmatprep.mubr.f32.mxu0 %v4543_v34  ;;  %3886 = vmatprep.mubr.f32.mxu1 %v4543_v34 }
  0x29   :  { %3799 = vmatmul.mubr.f32.vlgmr.msra.gmra.mrb[0].mxu0 %v4543_v34 }
  0x2a   :  { %4049 = vmatpush3.bf16.msra.mxu0 %v4663_v18 }
  0x2b   :  { %4051 = vmatprep.subr.bf16.mxu0 %v4679_v22 }
  0x2d   :  { %3887 = vmatmul.mubr.f32.vlgmr.msra.gmra.mrb[14].mxu1 %v4543_v34 }
  0x2e   :  { %4053 = vmatpush3.bf16.msra.mxu0 %v4679_v22  ;;  %4113 = vmatpush3.bf16.msra.mxu1 %v4634_v9 }
  0x2f   :  { %4055 = vmatprep.subr.bf16.mxu0 %v4663_v18  ;;  %4115 = vmatprep.subr.bf16.mxu1 %v4649_v14 }
  0x32   :  { %4117 = vmatpush3.bf16.msra.mxu1 %v4649_v14 }
  0x33   :  { %4119 = vmatprep.subr.bf16.mxu1 %v4634_v9 }
  0xfc   :  { %v3800_v36 = vpop.f32.mrb[0].mxu0 }
  0xfd   :  { %v492_v37 = vpop.f32.mrb[1].mxu0  ;;  %v4182_v38 = vadd.f32 %v3800_v36, %v4756_v35 }
  0xfe   :  { %v4183_v39 = vadd.f32 %v4756_v35, %v492_v37 }
  0xff   :  { %v3468_v52 = vmul.f32 -1.442695, %v4182_v38 }
 0x100   :  { %4265 = vtanh.f32 %v4183_v39  ;;  %v3888_v41 = vpop.f32.mrb[14].mxu1  ;;  %v3467_v50 = vmul.f32 -1.442695, %v4183_v39 }
 0x101   :  { %4267 = vtanh.f32 %v4182_v38  ;;  %v1607_v42 = vpop.f32.mrb[15].mxu1  ;;  %v4212_v44 = vadd.f32 %v3888_v41, %v4763_v40 }
 0x102   :  { %v4213_v43 = vadd.f32 %v4763_v40, %v1607_v42 }
 0x103   :  { %v3498_v51 = vmul.f32 -1.442695, %v4212_v44 }
 0x104   :  { %4269 = vtanh.f32 %v4213_v43  ;;  %v3497_v49 = vmul.f32 -1.442695, %v4213_v43 }
 0x105   :  { %4271 = vtanh.f32 %v4212_v44 }
 0x106   :  { %4273 = vpow2.f32 %v3497_v49 }
 0x107   :  { %4275 = vpow2.f32 %v3467_v50 }
 0x108   :  { %4277 = vpow2.f32 %v3498_v51 }
 0x109   :  { %4279 = vpow2.f32 %v3468_v52 }
 0x10a   :  { %v4266_v45 = vpop.eup %4265 }
 0x10b   :  { %521 = vrot.lane.b32.xlu1 %v4266_v45, %s4544_s17  ;;  %v4268_v46 = vpop.eup %4267 }
 0x10e   :  { %v4270_v47 = vpop.eup %4269 }
 0x10f   :  { %523 = vrot.lane.b32.xlu1 %v4268_v46, %s4544_s17  ;;  %1636 = vrot.lane.b32.xlu0 %v4270_v47, %s4544_s17  ;;  %v4272_v48 = vpop.eup %4271 }
 0x110   :  { %v4274_v53 = vpop.eup %4273 }
 0x111   :  { %v4276_v54 = vpop.eup %4275  ;;  %v1624_v55 = vadd.f32 1.0, %v4274_v53 }
 0x112   :  { %v4278_v56 = vpop.eup %4277  ;;  %v509_v57 = vadd.f32 1.0, %v4276_v54 }
 0x113   :  { %1638 = vrot.lane.b32.xlu0 %v4272_v48, %s4544_s17  ;;  %v1625_v58 = vadd.f32 1.0, %v4278_v56  ;;  %4281 = vrcp.f32 %v1624_v55  ;;  %v4280_v59 = vpop.eup %4279 }
 0x114   :  { %4283 = vrcp.f32 %v509_v57  ;;  %v510_v60 = vadd.f32 1.0, %v4280_v59 }
 0x115   :  { %4285 = vrcp.f32 %v1625_v58 }
 0x116   :  { %4287 = vrcp.f32 %v510_v60 }
 0x11d   :  { %v4282_v61 = vpop.eup %4281 }
 0x11e   :  { %v4284_v1 = vpop.eup %4283  ;;  %v1632_v10 = vmul.f32 0.0, %v4282_v61 }
 0x11f   :  { %v4286_v2 = vpop.eup %4285  ;;  %v517_v15 = vmul.f32 0.0, %v4284_v1 }
 0x120   :  { %v4288_v7 = vpop.eup %4287  ;;  %v1633_v13 = vmul.f32 0.0, %v4286_v2 }
 0x121   :  { %v518_v21 = vmul.f32 0.0, %v4288_v7 }
 0x17d   :  { %v522_v62 = vpop.permute.xlu1 %521 }
 0x17e   :  { %v527_v4 = vmul.f32 %v4284_v1, %v522_v62 }
 0x181   :  { %v1637_v63 = vpop.permute.xlu0 %1636  ;;  %v524_v6 = vpop.permute.xlu1 %523 }
 0x182   :  { %v1642_v0 = vmul.f32 %v4282_v61, %v1637_v63  ;;  %v528_v8 = vmul.f32 %v4288_v7, %v524_v6 }
 0x184   :  { %1646 = vrot.lane.b32.xlu0 %v1642_v0, %s4545_s18 }
 0x185   :  { %v1639_v3 = vpop.permute.xlu0 %1638 }
 0x186   :  { %v1643_v5 = vmul.f32 %v4286_v2, %v1639_v3 }
 0x188   :  { %1648 = vrot.lane.b32.xlu1 %v1643_v5, %s4545_s18  ;;  %531 = vrot.lane.b32.xlu0 %v527_v4, %s4545_s18 }
 0x18c   :  { %533 = vrot.lane.b32.xlu1 %v528_v8, %s4545_s18 }
 0x1f6   :  { %v1647_v11 = vpop.permute.xlu0 %1646 }
 0x1f7   :  { %v4775_v12 = vadd.f32 %v1647_v11, %v1632_v10 }
 0x1f9   :  { %4289 = vtanh.f32 %v4775_v12 }
 0x1fa   :  { %v1649_v16 = vpop.permute.xlu1 %1648  ;;  %v532_v17 = vpop.permute.xlu0 %531 }
 0x1fb   :  { %v4778_v19 = vadd.f32 %v1649_v16, %v1633_v13  ;;  %v4780_v20 = vadd.f32 %v532_v17, %v517_v15 }
 0x1fd   :  { %4291 = vtanh.f32 %v4778_v19 }
 0x1fe   :  { %4293 = vtanh.f32 %v4780_v20  ;;  %v534_v23 = vpop.permute.xlu1 %533 }
 0x1ff   :  { %v4784_v24 = vadd.f32 %v534_v23, %v518_v21 }
 0x201   :  { %4295 = vtanh.f32 %v4784_v24 }
 0x203   :  { %v4290_v25 = vpop.eup %4289 }
 0x204   :  { %1658 = vrot.lane.b32.xlu0 %v4290_v25, %s4544_s17 }
 0x207   :  { %v4292_v26 = vpop.eup %4291 }
 0x208   :  { %v4294_v27 = vpop.eup %4293  ;;  %1660 = vrot.lane.b32.xlu1 %v4292_v26, %s4544_s17 }
 0x209   :  { %543 = vrot.lane.b32.xlu0 %v4294_v27, %s4544_s17 }
 0x20b   :  { %v4296_v28 = vpop.eup %4295 }
 0x20c   :  { %545 = vrot.lane.b32.xlu1 %v4296_v28, %s4544_s17 }
 0x276   :  { %v1659_v29 = vpop.permute.xlu0 %1658 }
 0x277   :  { %v1664_v30 = vmul.f32 %v4282_v61, %v1659_v29 }
 0x279   :  { %1668 = vrot.lane.b32.xlu0 %v1664_v30, %s4545_s18 }
 0x27a   :  { %v1661_v31 = vpop.permute.xlu1 %1660 }
 0x27b   :  { %v1665_v32 = vmul.f32 %v4286_v2, %v1661_v31  ;;  %v544_v33 = vpop.permute.xlu0 %543 }
 0x27c   :  { %v549_v34 = vmul.f32 %v4284_v1, %v544_v33 }
 0x27d   :  { %1670 = vrot.lane.b32.xlu1 %v1665_v32, %s4545_s18 }
 0x27e   :  { %553 = vrot.lane.b32.xlu0 %v549_v34, %s4545_s18  ;;  %v546_v36 = vpop.permute.xlu1 %545 }
 0x27f   :  { %v550_v37 = vmul.f32 %v4288_v7, %v546_v36 }
 0x281   :  { %555 = vrot.lane.b32.xlu1 %v550_v37, %s4545_s18 }
 0x2eb   :  { %v1669_v38 = vpop.permute.xlu0 %1668 }
 0x2ec   :  { %1675 = vst.msk [vmem:[#allocation3 + $0x70] sm:$0xff] %vm422_vm1, %v1669_v38  ;;  %3897 = vmatprep.mubr.msk.f32.mxu1 %vm422_vm1, %v1669_v38 }
 0x2ef   :  { %v1671_v39 = vpop.permute.xlu1 %1670 }
 0x2f0   :  { %1676 = vst.msk [vmem:[#allocation3 + $0x78] sm:$0xff] %vm422_vm1, %v1671_v39  ;;  %v554_v41 = vpop.permute.xlu0 %553  ;;  %3898 = vmatmul.mubr.msk.f32.vlgmr.msra.gmra.mrb[12].mxu1 %vm422_vm1, %v1671_v39 }
 0x2f1   :  { %559 = vst.msk [vmem:[#allocation2] sm:$0xff] %vm422_vm1, %v554_v41  ;;  %3809 = vmatprep.mubr.msk.f32.mxu0 %vm422_vm1, %v554_v41  ;;  %4121 = vmatpush3.bf16.msra.mxu1 %v4634_v9 }
 0x2f2   :  { %4123 = vmatprep.subr.bf16.mxu1 %v4649_v14 }
 0x2f3   :  { %v556_v42 = vpop.permute.xlu1 %555 }
 0x2f4   :  { %560 = vst.msk [vmem:[#allocation2 + $0x8] sm:$0xff] %vm422_vm1, %v556_v42  ;;  %3810 = vmatmul.mubr.msk.f32.vlgmr.msra.gmra.mrb[2].mxu0 %vm422_vm1, %v556_v42 }
 0x2f5   :  { %4057 = vmatpush3.bf16.msra.mxu0 %v4663_v18  ;;  %4125 = vmatpush3.bf16.msra.mxu1 %v4649_v14 }
 0x2f6   :  { %4059 = vmatprep.subr.bf16.mxu0 %v4679_v22  ;;  %4127 = vmatprep.subr.bf16.mxu1 %v4634_v9 }
 0x2f9   :  { %4061 = vmatpush3.bf16.msra.mxu0 %v4679_v22 }
 0x2fa   :  { %4063 = vmatprep.subr.bf16.mxu0 %v4663_v18 }
 0x3c3   :  { %v3899_v43 = vpop.f32.mrb[12].mxu1 }
 0x3c4   :  { %v4210_v44 = vadd.f32 %v3899_v43, %v4763_v40  ;;  %v1747_v45 = vpop.f32.mrb[13].mxu1 }
 0x3c5   :  { %v4211_v46 = vadd.f32 %v4763_v40, %v1747_v45 }
 0x3c6   :  { %4297 = vtanh.f32 %v4210_v44  ;;  %v3502_v55 = vmul.f32 -1.442695, %v4210_v44 }
 0x3c7   :  { %4299 = vtanh.f32 %v4211_v46  ;;  %v3811_v47 = vpop.f32.mrb[2].mxu0  ;;  %v3501_v56 = vmul.f32 -1.442695, %v4211_v46 }
 0x3c8   :  { %v4184_v48 = vadd.f32 %v3811_v47, %v4756_v35  ;;  %v631_v49 = vpop.f32.mrb[3].mxu0 }
 0x3c9   :  { %v4185_v50 = vadd.f32 %v4756_v35, %v631_v49 }
 0x3ca   :  { %4301 = vtanh.f32 %v4184_v48  ;;  %v3472_v57 = vmul.f32 -1.442695, %v4184_v48 }
 0x3cb   :  { %4303 = vtanh.f32 %v4185_v50  ;;  %v3471_v58 = vmul.f32 -1.442695, %v4185_v50 }
 0x3cc   :  { %4305 = vpow2.f32 %v3502_v55 }
 0x3cd   :  { %4307 = vpow2.f32 %v3501_v56 }
 0x3ce   :  { %4309 = vpow2.f32 %v3472_v57 }
 0x3cf   :  { %4311 = vpow2.f32 %v3471_v58 }
 0x3d0   :  { %v4298_v51 = vpop.eup %4297 }
 0x3d1   :  { %v4300_v52 = vpop.eup %4299  ;;  %1778 = vrot.lane.b32.xlu1 %v4298_v51, %s4544_s17 }
 0x3d2   :  { %1776 = vrot.lane.b32.xlu0 %v4300_v52, %s4544_s17 }
 0x3d4   :  { %v4302_v53 = vpop.eup %4301 }
 0x3d5   :  { %v4304_v54 = vpop.eup %4303  ;;  %662 = vrot.lane.b32.xlu1 %v4302_v53, %s4544_s17 }
 0x3d6   :  { %660 = vrot.lane.b32.xlu0 %v4304_v54, %s4544_s17  ;;  %v4306_v59 = vpop.eup %4305 }
 0x3d7   :  { %v4308_v60 = vpop.eup %4307  ;;  %v1765_v61 = vadd.f32 1.0, %v4306_v59 }
 0x3d8   :  { %v4310_v62 = vpop.eup %4309  ;;  %v1764_v63 = vadd.f32 1.0, %v4308_v60 }
 0x3d9   :  { %v4312_v0 = vpop.eup %4311  ;;  %4313 = vrcp.f32 %v1765_v61  ;;  %v649_v1 = vadd.f32 1.0, %v4310_v62 }
 0x3da   :  { %4315 = vrcp.f32 %v1764_v63  ;;  %v648_v2 = vadd.f32 1.0, %v4312_v0 }
 0x3db   :  { %4317 = vrcp.f32 %v649_v1 }
 0x3dc   :  { %4319 = vrcp.f32 %v648_v2 }
 0x3e3   :  { %v4314_v3 = vpop.eup %4313 }
 0x3e4   :  { %v4316_v5 = vpop.eup %4315  ;;  %v1773_v21 = vmul.f32 %v4314_v3, %v4778_v19 }
 0x3e5   :  { %v4318_v10 = vpop.eup %4317  ;;  %v1772_v25 = vmul.f32 %v4316_v5, %v4775_v12 }
 0x3e6   :  { %v4320_v13 = vpop.eup %4319  ;;  %v657_v29 = vmul.f32 %v4318_v10, %v4784_v24 }
 0x3e7   :  { %v656_v31 = vmul.f32 %v4320_v13, %v4780_v20 }
 0x443   :  { %v1779_v4 = vpop.permute.xlu1 %1778 }
 0x444   :  { %v1783_v6 = vmul.f32 %v4314_v3, %v1779_v4  ;;  %v1777_v7 = vpop.permute.xlu0 %1776 }
 0x445   :  { %v1782_v8 = vmul.f32 %v4316_v5, %v1777_v7 }
 0x446   :  { %1788 = vrot.lane.b32.xlu1 %v1783_v6, %s4545_s18 }
 0x447   :  { %v663_v11 = vpop.permute.xlu1 %662  ;;  %1786 = vrot.lane.b32.xlu0 %v1782_v8, %s4545_s18 }
 0x448   :  { %v667_v15 = vmul.f32 %v4318_v10, %v663_v11  ;;  %v661_v16 = vpop.permute.xlu0 %660 }
 0x449   :  { %v666_v17 = vmul.f32 %v4320_v13, %v661_v16 }
 0x44a   :  { %672 = vrot.lane.b32.xlu1 %v667_v15, %s4545_s18 }
 0x44b   :  { %670 = vrot.lane.b32.xlu0 %v666_v17, %s4545_s18 }
 0x4b8   :  { %v1789_v23 = vpop.permute.xlu1 %1788 }
 0x4b9   :  { %v4825_v26 = vadd.f32 %v1789_v23, %v1773_v21  ;;  %v1787_v27 = vpop.permute.xlu0 %1786 }
 0x4ba   :  { %v4827_v28 = vadd.f32 %v1787_v27, %v1772_v25 }
 0x4bb   :  { %4321 = vtanh.f32 %v4825_v26 }
 0x4bc   :  { %4323 = vtanh.f32 %v4827_v28  ;;  %v673_v30 = vpop.permute.xlu1 %672 }
 0x4bd   :  { %v4833_v32 = vadd.f32 %v673_v30, %v657_v29  ;;  %v671_v19 = vpop.permute.xlu0 %670 }
 0x4be   :  { %v4835_v33 = vadd.f32 %v671_v19, %v656_v31 }
 0x4bf   :  { %4325 = vtanh.f32 %v4833_v32 }
 0x4c0   :  { %4327 = vtanh.f32 %v4835_v33 }
 0x4c5   :  { %v4322_v12 = vpop.eup %4321 }
 0x4c6   :  { %v4324_v34 = vpop.eup %4323  ;;  %1800 = vrot.lane.b32.xlu1 %v4322_v12, %s4544_s17 }
 0x4c7   :  { %1798 = vrot.lane.b32.xlu0 %v4324_v34, %s4544_s17 }
 0x4c9   :  { %v4326_v24 = vpop.eup %4325 }
 0x4ca   :  { %v4328_v36 = vpop.eup %4327  ;;  %684 = vrot.lane.b32.xlu1 %v4326_v24, %s4544_s17 }
 0x4cb   :  { %682 = vrot.lane.b32.xlu0 %v4328_v36, %s4544_s17 }
 0x538   :  { %v1801_v20 = vpop.permute.xlu1 %1800 }
 0x539   :  { %v1805_v37 = vmul.f32 %v4314_v3, %v1801_v20  ;;  %v1799_v38 = vpop.permute.xlu0 %1798 }
 0x53a   :  { %v1804_v39 = vmul.f32 %v4316_v5, %v1799_v38 }
 0x53b   :  { %1810 = vrot.lane.b32.xlu1 %v1805_v37, %s4545_s18 }
 0x53c   :  { %v685_v41 = vpop.permute.xlu1 %684  ;;  %1808 = vrot.lane.b32.xlu0 %v1804_v39, %s4545_s18 }
 0x53d   :  { %v689_v42 = vmul.f32 %v4318_v10, %v685_v41  ;;  %v683_v43 = vpop.permute.xlu0 %682 }
 0x53e   :  { %v688_v44 = vmul.f32 %v4320_v13, %v683_v43 }
 0x53f   :  { %694 = vrot.lane.b32.xlu1 %v689_v42, %s4545_s18 }
 0x540   :  { %692 = vrot.lane.b32.xlu0 %v688_v44, %s4545_s18 }
 0x5ad   :  { %v1811_v45 = vpop.permute.xlu1 %1810 }
 0x5ae   :  { %1816 = vst.msk [vmem:[#allocation3 + $0x68] sm:$0xff] %vm422_vm1, %v1811_v45  ;;  %v1809_v46 = vpop.permute.xlu0 %1808 }
 0x5af   :  { %1815 = vst.msk [vmem:[#allocation3 + $0x60] sm:$0xff] %vm422_vm1, %v1809_v46  ;;  %3908 = vmatprep.mubr.msk.f32.mxu1 %vm422_vm1, %v1809_v46 }
 0x5b0   :  { %3909 = vmatmul.mubr.msk.f32.vlgmr.msra.gmra.mrb[10].mxu1 %vm422_vm1, %v1811_v45 }
 0x5b1   :  { %v695_v47 = vpop.permute.xlu1 %694  ;;  %4129 = vmatpush3.bf16.msra.mxu1 %v4634_v9 }
 0x5b2   :  { %700 = vst.msk [vmem:[#allocation2 + $0x18] sm:$0xff] %vm422_vm1, %v695_v47  ;;  %v693_v48 = vpop.permute.xlu0 %692  ;;  %4131 = vmatprep.subr.bf16.mxu1 %v4649_v14 }
 0x5b3   :  { %699 = vst.msk [vmem:[#allocation2 + $0x10] sm:$0xff] %vm422_vm1, %v693_v48  ;;  %3820 = vmatprep.mubr.msk.f32.mxu0 %vm422_vm1, %v693_v48 }
 0x5b4   :  { %3821 = vmatmul.mubr.msk.f32.vlgmr.msra.gmra.mrb[4].mxu0 %vm422_vm1, %v695_v47 }
 0x5b5   :  { %4065 = vmatpush3.bf16.msra.mxu0 %v4663_v18  ;;  %4133 = vmatpush3.bf16.msra.mxu1 %v4649_v14 }
 0x5b6   :  { %4067 = vmatprep.subr.bf16.mxu0 %v4679_v22  ;;  %4135 = vmatprep.subr.bf16.mxu1 %v4634_v9 }
 0x5b9   :  { %4069 = vmatpush3.bf16.msra.mxu0 %v4679_v22 }
 0x5ba   :  { %4071 = vmatprep.subr.bf16.mxu0 %v4663_v18 }
 0x683   :  { %v3910_v49 = vpop.f32.mrb[10].mxu1 }
 0x684   :  { %v4208_v50 = vadd.f32 %v3910_v49, %v4763_v40  ;;  %v1887_v51 = vpop.f32.mrb[11].mxu1 }
 0x685   :  { %v4209_v52 = vadd.f32 %v4763_v40, %v1887_v51 }
 0x686   :  { %4329 = vtanh.f32 %v4208_v50  ;;  %v3506_v61 = vmul.f32 -1.442695, %v4208_v50 }
 0x687   :  { %4331 = vtanh.f32 %v4209_v52  ;;  %v3822_v53 = vpop.f32.mrb[4].mxu0  ;;  %v3505_v62 = vmul.f32 -1.442695, %v4209_v52 }
 0x688   :  { %v4186_v54 = vadd.f32 %v3822_v53, %v4756_v35  ;;  %v771_v55 = vpop.f32.mrb[5].mxu0 }
 0x689   :  { %v4187_v56 = vadd.f32 %v4756_v35, %v771_v55 }
 0x68a   :  { %4333 = vtanh.f32 %v4186_v54  ;;  %v3476_v63 = vmul.f32 -1.442695, %v4186_v54 }
 0x68b   :  { %4335 = vtanh.f32 %v4187_v56  ;;  %v3475_v0 = vmul.f32 -1.442695, %v4187_v56 }
 0x68c   :  { %4337 = vpow2.f32 %v3506_v61 }
 0x68d   :  { %4339 = vpow2.f32 %v3505_v62 }
 0x68e   :  { %4341 = vpow2.f32 %v3476_v63 }
 0x68f   :  { %4343 = vpow2.f32 %v3475_v0 }
 0x690   :  { %v4330_v57 = vpop.eup %4329 }
 0x691   :  { %v4332_v58 = vpop.eup %4331  ;;  %1918 = vrot.lane.b32.xlu1 %v4330_v57, %s4544_s17 }
 0x692   :  { %1916 = vrot.lane.b32.xlu0 %v4332_v58, %s4544_s17 }
 0x694   :  { %v4334_v59 = vpop.eup %4333 }
 0x695   :  { %v4336_v60 = vpop.eup %4335  ;;  %802 = vrot.lane.b32.xlu1 %v4334_v59, %s4544_s17 }
 0x696   :  { %800 = vrot.lane.b32.xlu0 %v4336_v60, %s4544_s17  ;;  %v4338_v1 = vpop.eup %4337 }
 0x697   :  { %v4340_v2 = vpop.eup %4339  ;;  %v1905_v3 = vadd.f32 1.0, %v4338_v1 }
 0x698   :  { %v4342_v4 = vpop.eup %4341  ;;  %v1904_v5 = vadd.f32 1.0, %v4340_v2 }
 0x699   :  { %v4344_v6 = vpop.eup %4343  ;;  %4345 = vrcp.f32 %v1905_v3  ;;  %v789_v7 = vadd.f32 1.0, %v4342_v4 }
 0x69a   :  { %4347 = vrcp.f32 %v1904_v5  ;;  %v788_v8 = vadd.f32 1.0, %v4344_v6 }
 0x69b   :  { %4349 = vrcp.f32 %v789_v7 }
 0x69c   :  { %4351 = vrcp.f32 %v788_v8 }
 0x6a3   :  { %v4346_v10 = vpop.eup %4345 }
 0x6a4   :  { %v4348_v13 = vpop.eup %4347  ;;  %v1913_v31 = vmul.f32 %v4346_v10, %v4825_v26 }
 0x6a5   :  { %v4350_v21 = vpop.eup %4349  ;;  %v1912_v12 = vmul.f32 %v4348_v13, %v4827_v28 }
 0x6a6   :  { %v4352_v25 = vpop.eup %4351  ;;  %v797_v20 = vmul.f32 %v4350_v21, %v4833_v32 }
 0x6a7   :  { %v796_v38 = vmul.f32 %v4352_v25, %v4835_v33 }
 0x703   :  { %v1919_v11 = vpop.permute.xlu1 %1918 }
 0x704   :  { %v1923_v15 = vmul.f32 %v4346_v10, %v1919_v11  ;;  %v1917_v16 = vpop.permute.xlu0 %1916 }
 0x705   :  { %v1922_v17 = vmul.f32 %v4348_v13, %v1917_v16 }
 0x706   :  { %1928 = vrot.lane.b32.xlu1 %v1923_v15, %s4545_s18 }
 0x707   :  { %v803_v23 = vpop.permute.xlu1 %802  ;;  %1926 = vrot.lane.b32.xlu0 %v1922_v17, %s4545_s18 }
 0x708   :  { %v807_v27 = vmul.f32 %v4350_v21, %v803_v23  ;;  %v801_v29 = vpop.permute.xlu0 %800 }
 0x709   :  { %v806_v30 = vmul.f32 %v4352_v25, %v801_v29 }
 0x70a   :  { %812 = vrot.lane.b32.xlu1 %v807_v27, %s4545_s18 }
 0x70b   :  { %810 = vrot.lane.b32.xlu0 %v806_v30, %s4545_s18 }
 0x778   :  { %v1929_v19 = vpop.permute.xlu1 %1928 }
 0x779   :  { %v4877_v34 = vadd.f32 %v1929_v19, %v1913_v31  ;;  %v1927_v24 = vpop.permute.xlu0 %1926 }
 0x77a   :  { %v4879_v36 = vadd.f32 %v1927_v24, %v1912_v12 }
 0x77b   :  { %4353 = vtanh.f32 %v4877_v34 }
 0x77c   :  { %4355 = vtanh.f32 %v4879_v36  ;;  %v813_v37 = vpop.permute.xlu1 %812 }
 0x77d   :  { %v4885_v39 = vadd.f32 %v813_v37, %v797_v20  ;;  %v811_v26 = vpop.permute.xlu0 %810 }
 0x77e   :  { %v4887_v41 = vadd.f32 %v811_v26, %v796_v38 }
 0x77f   :  { %4357 = vtanh.f32 %v4885_v39 }
 0x780   :  { %4359 = vtanh.f32 %v4887_v41 }
 0x785   :  { %v4354_v28 = vpop.eup %4353 }
 0x786   :  { %v4356_v42 = vpop.eup %4355  ;;  %1940 = vrot.lane.b32.xlu1 %v4354_v28, %s4544_s17 }
 0x787   :  { %1938 = vrot.lane.b32.xlu0 %v4356_v42, %s4544_s17 }
 0x789   :  { %v4358_v32 = vpop.eup %4357 }
 0x78a   :  { %v4360_v43 = vpop.eup %4359  ;;  %824 = vrot.lane.b32.xlu1 %v4358_v32, %s4544_s17 }
 0x78b   :  { %822 = vrot.lane.b32.xlu0 %v4360_v43, %s4544_s17 }
 0x7f8   :  { %v1941_v33 = vpop.permute.xlu1 %1940 }
 0x7f9   :  { %v1945_v44 = vmul.f32 %v4346_v10, %v1941_v33  ;;  %v1939_v45 = vpop.permute.xlu0 %1938 }
 0x7fa   :  { %v1944_v46 = vmul.f32 %v4348_v13, %v1939_v45 }
 0x7fb   :  { %1950 = vrot.lane.b32.xlu1 %v1945_v44, %s4545_s18 }
 0x7fc   :  { %v825_v47 = vpop.permute.xlu1 %824  ;;  %1948 = vrot.lane.b32.xlu0 %v1944_v46, %s4545_s18 }
 0x7fd   :  { %v829_v48 = vmul.f32 %v4350_v21, %v825_v47  ;;  %v823_v49 = vpop.permute.xlu0 %822 }
 0x7fe   :  { %v828_v50 = vmul.f32 %v4352_v25, %v823_v49 }
 0x7ff   :  { %834 = vrot.lane.b32.xlu1 %v829_v48, %s4545_s18 }
 0x800   :  { %832 = vrot.lane.b32.xlu0 %v828_v50, %s4545_s18 }
 0x86d   :  { %v1951_v51 = vpop.permute.xlu1 %1950 }
 0x86e   :  { %1956 = vst.msk [vmem:[#allocation3 + $0x58] sm:$0xff] %vm422_vm1, %v1951_v51  ;;  %v1949_v52 = vpop.permute.xlu0 %1948 }
 0x86f   :  { %1955 = vst.msk [vmem:[#allocation3 + $0x50] sm:$0xff] %vm422_vm1, %v1949_v52  ;;  %3919 = vmatprep.mubr.msk.f32.mxu1 %vm422_vm1, %v1949_v52 }
 0x870   :  { %3920 = vmatmul.mubr.msk.f32.vlgmr.msra.gmra.mrb[8].mxu1 %vm422_vm1, %v1951_v51 }
 0x871   :  { %v835_v53 = vpop.permute.xlu1 %834  ;;  %4137 = vmatpush3.bf16.msra.mxu1 %v4634_v9 }
 0x872   :  { %840 = vst.msk [vmem:[#allocation2 + $0x28] sm:$0xff] %vm422_vm1, %v835_v53  ;;  %v833_v54 = vpop.permute.xlu0 %832  ;;  %4139 = vmatprep.subr.bf16.mxu1 %v4649_v14 }
 0x873   :  { %839 = vst.msk [vmem:[#allocation2 + $0x20] sm:$0xff] %vm422_vm1, %v833_v54  ;;  %3831 = vmatprep.mubr.msk.f32.mxu0 %vm422_vm1, %v833_v54 }
 0x874   :  { %3832 = vmatmul.mubr.msk.f32.vlgmr.msra.gmra.mrb[6].mxu0 %vm422_vm1, %v835_v53 }
 0x875   :  { %4073 = vmatpush3.bf16.msra.mxu0 %v4663_v18  ;;  %4141 = vmatpush3.bf16.msra.mxu1 %v4649_v14 }
 0x876   :  { %4075 = vmatprep.subr.bf16.mxu0 %v4679_v22  ;;  %4143 = vmatprep.subr.bf16.mxu1 %v4634_v9 }
 0x879   :  { %4077 = vmatpush3.bf16.msra.mxu0 %v4679_v22 }
 0x87a   :  { %4079 = vmatprep.subr.bf16.mxu0 %v4663_v18 }
 0x943   :  { %v3921_v55 = vpop.f32.mrb[8].mxu1 }
 0x944   :  { %v4206_v56 = vadd.f32 %v3921_v55, %v4763_v40  ;;  %v2027_v57 = vpop.f32.mrb[9].mxu1 }
 0x945   :  { %v4207_v58 = vadd.f32 %v4763_v40, %v2027_v57 }
 0x946   :  { %4361 = vtanh.f32 %v4206_v56  ;;  %v3510_v3 = vmul.f32 -1.442695, %v4206_v56 }
 0x947   :  { %4363 = vtanh.f32 %v4207_v58  ;;  %v3833_v59 = vpop.f32.mrb[6].mxu0  ;;  %v3509_v4 = vmul.f32 -1.442695, %v4207_v58 }
 0x948   :  { %v4188_v60 = vadd.f32 %v3833_v59, %v4756_v35  ;;  %v911_v61 = vpop.f32.mrb[7].mxu0 }
 0x949   :  { %v4189_v62 = vadd.f32 %v4756_v35, %v911_v61 }
 0x94a   :  { %4365 = vtanh.f32 %v4188_v60  ;;  %v3480_v5 = vmul.f32 -1.442695, %v4188_v60 }
 0x94b   :  { %4367 = vtanh.f32 %v4189_v62  ;;  %v3479_v6 = vmul.f32 -1.442695, %v4189_v62 }
 0x94c   :  { %4369 = vpow2.f32 %v3510_v3 }
 0x94d   :  { %4371 = vpow2.f32 %v3509_v4 }
 0x94e   :  { %4373 = vpow2.f32 %v3480_v5 }
 0x94f   :  { %4375 = vpow2.f32 %v3479_v6 }
 0x950   :  { %v4362_v63 = vpop.eup %4361 }
 0x951   :  { %v4364_v0 = vpop.eup %4363  ;;  %2058 = vrot.lane.b32.xlu1 %v4362_v63, %s4544_s17 }
 0x952   :  { %2056 = vrot.lane.b32.xlu0 %v4364_v0, %s4544_s17 }
 0x954   :  { %v4366_v1 = vpop.eup %4365 }
 0x955   :  { %v4368_v2 = vpop.eup %4367  ;;  %942 = vrot.lane.b32.xlu1 %v4366_v1, %s4544_s17 }
 0x956   :  { %940 = vrot.lane.b32.xlu0 %v4368_v2, %s4544_s17  ;;  %v4370_v7 = vpop.eup %4369 }
 0x957   :  { %v4372_v8 = vpop.eup %4371  ;;  %v2045_v10 = vadd.f32 1.0, %v4370_v7 }
 0x958   :  { %v4374_v11 = vpop.eup %4373  ;;  %v2044_v13 = vadd.f32 1.0, %v4372_v8 }
 0x959   :  { %v4376_v15 = vpop.eup %4375  ;;  %4377 = vrcp.f32 %v2045_v10  ;;  %v929_v16 = vadd.f32 1.0, %v4374_v11 }
 0x95a   :  { %4379 = vrcp.f32 %v2044_v13  ;;  %v928_v17 = vadd.f32 1.0, %v4376_v15 }
 0x95b   :  { %4381 = vrcp.f32 %v929_v16 }
 0x95c   :  { %4383 = vrcp.f32 %v928_v17 }
 0x963   :  { %v4378_v21 = vpop.eup %4377 }
 0x964   :  { %v4380_v25 = vpop.eup %4379  ;;  %v2053_v38 = vmul.f32 %v4378_v21, %v4877_v34 }
 0x965   :  { %v4382_v31 = vpop.eup %4381  ;;  %v2052_v28 = vmul.f32 %v4380_v25, %v4879_v36 }
 0x966   :  { %v4384_v12 = vpop.eup %4383  ;;  %v937_v33 = vmul.f32 %v4382_v31, %v4885_v39 }
 0x967   :  { %v936_v45 = vmul.f32 %v4384_v12, %v4887_v41 }
 0x9c3   :  { %v2059_v23 = vpop.permute.xlu1 %2058 }
 0x9c4   :  { %v2063_v27 = vmul.f32 %v4378_v21, %v2059_v23  ;;  %v2057_v29 = vpop.permute.xlu0 %2056 }
 0x9c5   :  { %v2062_v30 = vmul.f32 %v4380_v25, %v2057_v29 }
 0x9c6   :  { %2068 = vrot.lane.b32.xlu1 %v2063_v27, %s4545_s18 }
 0x9c7   :  { %v943_v19 = vpop.permute.xlu1 %942  ;;  %2066 = vrot.lane.b32.xlu0 %v2062_v30, %s4545_s18 }
 0x9c8   :  { %v947_v24 = vmul.f32 %v4382_v31, %v943_v19  ;;  %v941_v20 = vpop.permute.xlu0 %940 }
 0x9c9   :  { %v946_v37 = vmul.f32 %v4384_v12, %v941_v20 }
 0x9ca   :  { %952 = vrot.lane.b32.xlu1 %v947_v24, %s4545_s18 }
 0x9cb   :  { %950 = vrot.lane.b32.xlu0 %v946_v37, %s4545_s18 }
 0xa38   :  { %v2069_v26 = vpop.permute.xlu1 %2068 }
 0xa39   :  { %v4929_v42 = vadd.f32 %v2069_v26, %v2053_v38  ;;  %v2067_v32 = vpop.permute.xlu0 %2066 }
 0xa3a   :  { %v4931_v43 = vadd.f32 %v2067_v32, %v2052_v28 }
 0xa3b   :  { %4385 = vtanh.f32 %v4929_v42 }
 0xa3c   :  { %4387 = vtanh.f32 %v4931_v43  ;;  %v953_v44 = vpop.permute.xlu1 %952 }
 0xa3d   :  { %v4937_v46 = vadd.f32 %v953_v44, %v937_v33  ;;  %v951_v34 = vpop.permute.xlu0 %950 }
 0xa3e   :  { %v4939_v47 = vadd.f32 %v951_v34, %v936_v45 }
 0xa3f   :  { %4389 = vtanh.f32 %v4937_v46 }
 0xa40   :  { %4391 = vtanh.f32 %v4939_v47 }
 0xa45   :  { %v4386_v36 = vpop.eup %4385 }
 0xa46   :  { %v4388_v48 = vpop.eup %4387  ;;  %2080 = vrot.lane.b32.xlu1 %v4386_v36, %s4544_s17 }
 0xa47   :  { %2078 = vrot.lane.b32.xlu0 %v4388_v48, %s4544_s17 }
 0xa49   :  { %v4390_v39 = vpop.eup %4389 }
 0xa4a   :  { %v4392_v49 = vpop.eup %4391  ;;  %964 = vrot.lane.b32.xlu1 %v4390_v39, %s4544_s17 }
 0xa4b   :  { %962 = vrot.lane.b32.xlu0 %v4392_v49, %s4544_s17 }
 0xab8   :  { %v2081_v41 = vpop.permute.xlu1 %2080 }
 0xab9   :  { %v2085_v50 = vmul.f32 %v4378_v21, %v2081_v41  ;;  %v2079_v51 = vpop.permute.xlu0 %2078 }
 0xaba   :  { %v2084_v52 = vmul.f32 %v4380_v25, %v2079_v51 }
 0xabb   :  { %2090 = vrot.lane.b32.xlu1 %v2085_v50, %s4545_s18 }
 0xabc   :  { %v965_v53 = vpop.permute.xlu1 %964  ;;  %2088 = vrot.lane.b32.xlu0 %v2084_v52, %s4545_s18 }
 0xabd   :  { %v969_v54 = vmul.f32 %v4382_v31, %v965_v53  ;;  %v963_v55 = vpop.permute.xlu0 %962 }
 0xabe   :  { %v968_v56 = vmul.f32 %v4384_v12, %v963_v55 }
 0xabf   :  { %974 = vrot.lane.b32.xlu1 %v969_v54, %s4545_s18 }
 0xac0   :  { %972 = vrot.lane.b32.xlu0 %v968_v56, %s4545_s18 }
 0xb2d   :  { %v2091_v57 = vpop.permute.xlu1 %2090 }
 0xb2e   :  { %2096 = vst.msk [vmem:[#allocation3 + $0x48] sm:$0xff] %vm422_vm1, %v2091_v57  ;;  %v2089_v58 = vpop.permute.xlu0 %2088 }
 0xb2f   :  { %2095 = vst.msk [vmem:[#allocation3 + $0x40] sm:$0xff] %vm422_vm1, %v2089_v58  ;;  %3930 = vmatprep.mubr.msk.f32.mxu1 %vm422_vm1, %v2089_v58 }
 0xb30   :  { %3931 = vmatmul.mubr.msk.f32.vlgmr.msra.gmra.mrb[6].mxu1 %vm422_vm1, %v2091_v57 }
 0xb31   :  { %v975_v59 = vpop.permute.xlu1 %974  ;;  %4145 = vmatpush3.bf16.msra.mxu1 %v4634_v9 }
 0xb32   :  { %980 = vst.msk [vmem:[#allocation2 + $0x38] sm:$0xff] %vm422_vm1, %v975_v59  ;;  %v973_v60 = vpop.permute.xlu0 %972  ;;  %4147 = vmatprep.subr.bf16.mxu1 %v4649_v14 }
 0xb33   :  { %979 = vst.msk [vmem:[#allocation2 + $0x30] sm:$0xff] %vm422_vm1, %v973_v60  ;;  %3842 = vmatprep.mubr.msk.f32.mxu0 %vm422_vm1, %v973_v60 }
 0xb34   :  { %3843 = vmatmul.mubr.msk.f32.vlgmr.msra.gmra.mrb[8].mxu0 %vm422_vm1, %v975_v59 }
 0xb35   :  { %4081 = vmatpush3.bf16.msra.mxu0 %v4663_v18  ;;  %4149 = vmatpush3.bf16.msra.mxu1 %v4649_v14 }
 0xb36   :  { %4083 = vmatprep.subr.bf16.mxu0 %v4679_v22  ;;  %4151 = vmatprep.subr.bf16.mxu1 %v4634_v9 }
 0xb39   :  { %4085 = vmatpush3.bf16.msra.mxu0 %v4679_v22 }
 0xb3a   :  { %4087 = vmatprep.subr.bf16.mxu0 %v4663_v18 }
 0xc03   :  { %v3932_v61 = vpop.f32.mrb[6].mxu1 }
 0xc04   :  { %v4204_v62 = vadd.f32 %v3932_v61, %v4763_v40  ;;  %v2167_v63 = vpop.f32.mrb[7].mxu1 }
 0xc05   :  { %v4205_v0 = vadd.f32 %v4763_v40, %v2167_v63 }
 0xc06   :  { %4393 = vtanh.f32 %v4204_v62  ;;  %v3514_v40 = vmul.f32 -1.442695, %v4204_v62 }
 0xc07   :  { %4395 = vtanh.f32 %v4205_v0  ;;  %v3844_v1 = vpop.f32.mrb[8].mxu0  ;;  %v3513_v10 = vmul.f32 -1.442695, %v4205_v0 }
 0xc08   :  { %v4190_v2 = vadd.f32 %v3844_v1, %v4756_v35  ;;  %v1051_v3 = vpop.f32.mrb[9].mxu0 }
 0xc09   :  { %v4191_v4 = vadd.f32 %v4756_v35, %v1051_v3 }
 0xc0a   :  { %4397 = vtanh.f32 %v4190_v2  ;;  %v3484_v11 = vmul.f32 -1.442695, %v4190_v2  ;;  %v5022_v2 = vld [vmem:[%s5576_s6] ss:$0 sm:$0xff] }
 0xc0b   :  { %4399 = vtanh.f32 %v4191_v4  ;;  %v3483_v35 = vmul.f32 -1.442695, %v4191_v4 }
 0xc0c   :  { %4401 = vpow2.f32 %v3514_v40 }
 0xc0d   :  { %4403 = vpow2.f32 %v3513_v10 }
 0xc0e   :  { %4405 = vpow2.f32 %v3484_v11 }
 0xc0f   :  { %4407 = vpow2.f32 %v3483_v35 }
 0xc10   :  { %v4394_v5 = vpop.eup %4393 }
 0xc11   :  { %v4396_v6 = vpop.eup %4395  ;;  %2198 = vrot.lane.b32.xlu1 %v4394_v5, %s4544_s17 }
 0xc12   :  { %2196 = vrot.lane.b32.xlu0 %v4396_v6, %s4544_s17 }
 0xc14   :  { %v4398_v7 = vpop.eup %4397 }
 0xc15   :  { %v4400_v8 = vpop.eup %4399  ;;  %1082 = vrot.lane.b32.xlu1 %v4398_v7, %s4544_s17  ;;  %v5029_v7 = vld [vmem:[%s5575_s3] ss:$0 sm:$0xff] }
 0xc16   :  { %1080 = vrot.lane.b32.xlu0 %v4400_v8, %s4544_s17  ;;  %v4402_v13 = vpop.eup %4401 }
 0xc17   :  { %v4404_v15 = vpop.eup %4403  ;;  %v2185_v16 = vadd.f32 1.0, %v4402_v13 }
 0xc18   :  { %v4406_v17 = vpop.eup %4405  ;;  %v2184_v21 = vadd.f32 1.0, %v4404_v15 }
 0xc19   :  { %v4408_v23 = vpop.eup %4407  ;;  %4409 = vrcp.f32 %v2185_v16  ;;  %v1069_v25 = vadd.f32 1.0, %v4406_v17 }
 0xc1a   :  { %4411 = vrcp.f32 %v2184_v21  ;;  %v1068_v27 = vadd.f32 1.0, %v4408_v23 }
 0xc1b   :  { %4413 = vrcp.f32 %v1069_v25 }
 0xc1c   :  { %4415 = vrcp.f32 %v1068_v27 }
 0xc23   :  { %v4410_v29 = vpop.eup %4409 }
 0xc24   :  { %v4412_v31 = vpop.eup %4411  ;;  %v2193_v33 = vmul.f32 %v4410_v29, %v4929_v42 }
 0xc25   :  { %v4414_v20 = vpop.eup %4413  ;;  %v2192_v45 = vmul.f32 %v4412_v31, %v4931_v43 }
 0xc26   :  { %v4416_v38 = vpop.eup %4415  ;;  %v1077_v39 = vmul.f32 %v4414_v20, %v4937_v46 }
 0xc27   :  { %v1076_v41 = vmul.f32 %v4416_v38, %v4939_v47 }
 0xc83   :  { %v2199_v30 = vpop.permute.xlu1 %2198 }
 0xc84   :  { %v2203_v19 = vmul.f32 %v4410_v29, %v2199_v30  ;;  %v2197_v12 = vpop.permute.xlu0 %2196 }
 0xc85   :  { %v2202_v24 = vmul.f32 %v4412_v31, %v2197_v12 }
 0xc86   :  { %2208 = vrot.lane.b32.xlu1 %v2203_v19, %s4545_s18 }
 0xc87   :  { %v1083_v37 = vpop.permute.xlu1 %1082  ;;  %2206 = vrot.lane.b32.xlu0 %v2202_v24, %s4545_s18 }
 0xc88   :  { %v1087_v26 = vmul.f32 %v4414_v20, %v1083_v37  ;;  %v1081_v28 = vpop.permute.xlu0 %1080 }
 0xc89   :  { %v1086_v32 = vmul.f32 %v4416_v38, %v1081_v28 }
 0xc8a   :  { %1092 = vrot.lane.b32.xlu1 %v1087_v26, %s4545_s18 }
 0xc8b   :  { %1090 = vrot.lane.b32.xlu0 %v1086_v32, %s4545_s18 }
 0xcf8   :  { %v2209_v44 = vpop.permute.xlu1 %2208 }
 0xcf9   :  { %v4981_v34 = vadd.f32 %v2209_v44, %v2193_v33  ;;  %v2207_v36 = vpop.permute.xlu0 %2206 }
 0xcfa   :  { %v4983_v48 = vadd.f32 %v2207_v36, %v2192_v45 }
 0xcfb   :  { %4417 = vtanh.f32 %v4981_v34 }
 0xcfc   :  { %4419 = vtanh.f32 %v4983_v48  ;;  %v1093_v49 = vpop.permute.xlu1 %1092 }
 0xcfd   :  { %v4989_v50 = vadd.f32 %v1093_v49, %v1077_v39  ;;  %v1091_v42 = vpop.permute.xlu0 %1090 }
 0xcfe   :  { %v4991_v51 = vadd.f32 %v1091_v42, %v1076_v41 }
 0xcff   :  { %4421 = vtanh.f32 %v4989_v50 }
 0xd00   :  { %4423 = vtanh.f32 %v4991_v51 }
 0xd05   :  { %v4418_v43 = vpop.eup %4417 }
 0xd06   :  { %v4420_v52 = vpop.eup %4419  ;;  %2220 = vrot.lane.b32.xlu1 %v4418_v43, %s4544_s17 }
 0xd07   :  { %2218 = vrot.lane.b32.xlu0 %v4420_v52, %s4544_s17 }
 0xd09   :  { %v4422_v46 = vpop.eup %4421 }
 0xd0a   :  { %v4424_v53 = vpop.eup %4423  ;;  %1104 = vrot.lane.b32.xlu1 %v4422_v46, %s4544_s17 }
 0xd0b   :  { %1102 = vrot.lane.b32.xlu0 %v4424_v53, %s4544_s17 }
 0xd78   :  { %v2221_v47 = vpop.permute.xlu1 %2220 }
 0xd79   :  { %v2225_v54 = vmul.f32 %v4410_v29, %v2221_v47  ;;  %v2219_v55 = vpop.permute.xlu0 %2218 }
 0xd7a   :  { %v2224_v56 = vmul.f32 %v4412_v31, %v2219_v55 }
 0xd7b   :  { %2230 = vrot.lane.b32.xlu1 %v2225_v54, %s4545_s18 }
 0xd7c   :  { %v1105_v57 = vpop.permute.xlu1 %1104  ;;  %2228 = vrot.lane.b32.xlu0 %v2224_v56, %s4545_s18 }
 0xd7d   :  { %v1109_v58 = vmul.f32 %v4414_v20, %v1105_v57  ;;  %v1103_v59 = vpop.permute.xlu0 %1102 }
 0xd7e   :  { %v1108_v60 = vmul.f32 %v4416_v38, %v1103_v59 }
 0xd7f   :  { %1114 = vrot.lane.b32.xlu1 %v1109_v58, %s4545_s18 }
 0xd80   :  { %1112 = vrot.lane.b32.xlu0 %v1108_v60, %s4545_s18 }
 0xded   :  { %v2231_v61 = vpop.permute.xlu1 %2230 }
 0xdee   :  { %2236 = vst.msk [vmem:[#allocation3 + $0x38] sm:$0xff] %vm422_vm1, %v2231_v61  ;;  %v2229_v62 = vpop.permute.xlu0 %2228 }
 0xdef   :  { %2235 = vst.msk [vmem:[#allocation3 + $0x30] sm:$0xff] %vm422_vm1, %v2229_v62  ;;  %3941 = vmatprep.mubr.msk.f32.mxu1 %vm422_vm1, %v2229_v62 }
 0xdf0   :  { %3942 = vmatmul.mubr.msk.f32.vlgmr.msra.gmra.mrb[4].mxu1 %vm422_vm1, %v2231_v61 }
 0xdf1   :  { %v1115_v63 = vpop.permute.xlu1 %1114  ;;  %4153 = vmatpush3.bf16.msra.mxu1 %v4634_v9 }
 0xdf2   :  { %1120 = vst.msk [vmem:[#allocation2 + $0x48] sm:$0xff] %vm422_vm1, %v1115_v63  ;;  %v1113_v0 = vpop.permute.xlu0 %1112  ;;  %4155 = vmatprep.subr.bf16.mxu1 %v4649_v14 }
 0xdf3   :  { %1119 = vst.msk [vmem:[#allocation2 + $0x40] sm:$0xff] %vm422_vm1, %v1113_v0  ;;  %3853 = vmatprep.mubr.msk.f32.mxu0 %vm422_vm1, %v1113_v0 }
 0xdf4   :  { %3854 = vmatmul.mubr.msk.f32.vlgmr.msra.gmra.mrb[10].mxu0 %vm422_vm1, %v1115_v63 }
 0xdf5   :  { %4089 = vmatpush3.bf16.msra.mxu0 %v4663_v18  ;;  %4157 = vmatpush3.bf16.msra.mxu1 %v4649_v14 }
 0xdf6   :  { %4091 = vmatprep.subr.bf16.mxu0 %v4679_v22  ;;  %4159 = vmatprep.subr.bf16.mxu1 %v4634_v9 }
 0xdf9   :  { %4093 = vmatpush3.bf16.msra.mxu0 %v4679_v22 }
 0xdfa   :  { %4095 = vmatprep.subr.bf16.mxu0 %v4663_v18 }
 0xec3   :  { %v3943_v1 = vpop.f32.mrb[4].mxu1 }
 0xec4   :  { %v4202_v3 = vadd.f32 %v5022_v2, %v3943_v1  ;;  %v2307_v4 = vpop.f32.mrb[5].mxu1 }
 0xec5   :  { %v4203_v5 = vadd.f32 %v5022_v2, %v2307_v4 }
 0xec6   :  { %4425 = vtanh.f32 %v4202_v3  ;;  %v3518_v16 = vmul.f32 -1.442695, %v4202_v3 }
 0xec7   :  { %4427 = vtanh.f32 %v4203_v5  ;;  %v3855_v6 = vpop.f32.mrb[10].mxu0  ;;  %v3517_v17 = vmul.f32 -1.442695, %v4203_v5 }
 0xec8   :  { %v4192_v8 = vadd.f32 %v5029_v7, %v3855_v6  ;;  %v1191_v40 = vpop.f32.mrb[11].mxu0 }
 0xec9   :  { %v4193_v10 = vadd.f32 %v5029_v7, %v1191_v40 }
 0xeca   :  { %4429 = vtanh.f32 %v4192_v8  ;;  %v3488_v21 = vmul.f32 -1.442695, %v4192_v8 }
 0xecb   :  { %4431 = vtanh.f32 %v4193_v10  ;;  %v3487_v23 = vmul.f32 -1.442695, %v4193_v10 }
 0xecc   :  { %4433 = vpow2.f32 %v3518_v16 }
 0xecd   :  { %4435 = vpow2.f32 %v3517_v17 }
 0xece   :  { %4437 = vpow2.f32 %v3488_v21 }
 0xecf   :  { %4439 = vpow2.f32 %v3487_v23 }
 0xed0   :  { %v4426_v11 = vpop.eup %4425 }
 0xed1   :  { %v4428_v35 = vpop.eup %4427  ;;  %2338 = vrot.lane.b32.xlu1 %v4426_v11, %s4544_s17 }
 0xed2   :  { %2336 = vrot.lane.b32.xlu0 %v4428_v35, %s4544_s17 }
 0xed4   :  { %v4430_v13 = vpop.eup %4429 }
 0xed5   :  { %v4432_v15 = vpop.eup %4431  ;;  %1222 = vrot.lane.b32.xlu1 %v4430_v13, %s4544_s17 }
 0xed6   :  { %1220 = vrot.lane.b32.xlu0 %v4432_v15, %s4544_s17  ;;  %v4434_v25 = vpop.eup %4433 }
 0xed7   :  { %v4436_v27 = vpop.eup %4435  ;;  %v2325_v29 = vadd.f32 1.0, %v4434_v25 }
 0xed8   :  { %v4438_v30 = vpop.eup %4437  ;;  %v2324_v31 = vadd.f32 1.0, %v4436_v27 }
 0xed9   :  { %v4440_v19 = vpop.eup %4439  ;;  %4441 = vrcp.f32 %v2325_v29  ;;  %v1209_v12 = vadd.f32 1.0, %v4438_v30 }
 0xeda   :  { %4443 = vrcp.f32 %v2324_v31  ;;  %v1208_v24 = vadd.f32 1.0, %v4440_v19 }
 0xedb   :  { %4445 = vrcp.f32 %v1209_v12 }
 0xedc   :  { %4447 = vrcp.f32 %v1208_v24 }
 0xee3   :  { %v4442_v20 = vpop.eup %4441 }
 0xee4   :  { %v4444_v38 = vpop.eup %4443  ;;  %v2333_v41 = vmul.f32 %v4442_v20, %v4981_v34 }
 0xee5   :  { %v4446_v33 = vpop.eup %4445  ;;  %v2332_v43 = vmul.f32 %v4444_v38, %v4983_v48 }
 0xee6   :  { %v4448_v45 = vpop.eup %4447  ;;  %v1217_v47 = vmul.f32 %v4446_v33, %v4989_v50 }
 0xee7   :  { %v1216_v55 = vmul.f32 %v4448_v45, %v4991_v51 }
 0xf43   :  { %v2339_v37 = vpop.permute.xlu1 %2338 }
 0xf44   :  { %v2343_v26 = vmul.f32 %v4442_v20, %v2339_v37  ;;  %v2337_v28 = vpop.permute.xlu0 %2336 }
 0xf45   :  { %v2342_v32 = vmul.f32 %v4444_v38, %v2337_v28 }
 0xf46   :  { %2348 = vrot.lane.b32.xlu1 %v2343_v26, %s4545_s18 }
 0xf47   :  { %v1223_v44 = vpop.permute.xlu1 %1222  ;;  %2346 = vrot.lane.b32.xlu0 %v2342_v32, %s4545_s18 }
 0xf48   :  { %v1227_v36 = vmul.f32 %v4446_v33, %v1223_v44  ;;  %v1221_v39 = vpop.permute.xlu0 %1220 }
 0xf49   :  { %v1226_v49 = vmul.f32 %v4448_v45, %v1221_v39 }
 0xf4a   :  { %1232 = vrot.lane.b32.xlu1 %v1227_v36, %s4545_s18 }
 0xf4b   :  { %1230 = vrot.lane.b32.xlu0 %v1226_v49, %s4545_s18 }
 0xfb8   :  { %v2349_v42 = vpop.permute.xlu1 %2348 }
 0xfb9   :  { %v5043_v52 = vadd.f32 %v2349_v42, %v2333_v41  ;;  %v2347_v46 = vpop.permute.xlu0 %2346 }
 0xfba   :  { %v5045_v53 = vadd.f32 %v2347_v46, %v2332_v43 }
 0xfbb   :  { %4449 = vtanh.f32 %v5043_v52 }
 0xfbc   :  { %4451 = vtanh.f32 %v5045_v53  ;;  %v1233_v54 = vpop.permute.xlu1 %1232 }
 0xfbd   :  { %v5051_v56 = vadd.f32 %v1233_v54, %v1217_v47  ;;  %v1231_v34 = vpop.permute.xlu0 %1230 }
 0xfbe   :  { %v5053_v57 = vadd.f32 %v1231_v34, %v1216_v55 }
 0xfbf   :  { %4453 = vtanh.f32 %v5051_v56 }
 0xfc0   :  { %4455 = vtanh.f32 %v5053_v57 }
 0xfc5   :  { %v4450_v48 = vpop.eup %4449 }
 0xfc6   :  { %v4452_v58 = vpop.eup %4451  ;;  %2360 = vrot.lane.b32.xlu1 %v4450_v48, %s4544_s17 }
 0xfc7   :  { %2358 = vrot.lane.b32.xlu0 %v4452_v58, %s4544_s17 }
 0xfc9   :  { %v4454_v50 = vpop.eup %4453 }
 0xfca   :  { %v4456_v59 = vpop.eup %4455  ;;  %1244 = vrot.lane.b32.xlu1 %v4454_v50, %s4544_s17 }
 0xfcb   :  { %1242 = vrot.lane.b32.xlu0 %v4456_v59, %s4544_s17 }
0x1038   :  { %v2361_v51 = vpop.permute.xlu1 %2360 }
0x1039   :  { %v2365_v60 = vmul.f32 %v4442_v20, %v2361_v51  ;;  %v2359_v61 = vpop.permute.xlu0 %2358 }
0x103a   :  { %v2364_v62 = vmul.f32 %v4444_v38, %v2359_v61 }
0x103b   :  { %2370 = vrot.lane.b32.xlu1 %v2365_v60, %s4545_s18 }
0x103c   :  { %v1245_v63 = vpop.permute.xlu1 %1244  ;;  %2368 = vrot.lane.b32.xlu0 %v2364_v62, %s4545_s18  ;;  %v2721_v62 = vld [vmem:[%s5577_s7 + $0x8] sm:$0xff] }
0x103d   :  { %v1249_v0 = vmul.f32 %v4446_v33, %v1245_v63  ;;  %v1243_v1 = vpop.permute.xlu0 %1242 }
0x103e   :  { %v1248_v3 = vmul.f32 %v4448_v45, %v1243_v1 }
0x103f   :  { %1254 = vrot.lane.b32.xlu1 %v1249_v0, %s4545_s18 }
0x1040   :  { %1252 = vrot.lane.b32.xlu0 %v1248_v3, %s4545_s18 }
0x10ad   :  { %v2371_v4 = vpop.permute.xlu1 %2370 }
0x10ae   :  { %2376 = vst.msk [vmem:[#allocation3 + $0x28] sm:$0xff] %vm422_vm1, %v2371_v4  ;;  %v2369_v5 = vpop.permute.xlu0 %2368 }
0x10af   :  { %2375 = vst.msk [vmem:[#allocation3 + $0x20] sm:$0xff] %vm422_vm1, %v2369_v5  ;;  %3952 = vmatprep.mubr.msk.f32.mxu1 %vm422_vm1, %v2369_v5 }
0x10b0   :  { %3953 = vmatmul.mubr.msk.f32.vlgmr.msra.gmra.mrb[2].mxu1 %vm422_vm1, %v2371_v4 }
0x10b1   :  { %v1255_v6 = vpop.permute.xlu1 %1254  ;;  %4161 = vmatpush3.bf16.msra.mxu1 %v4634_v9 }
0x10b2   :  { %1260 = vst.msk [vmem:[#allocation2 + $0x58] sm:$0xff] %vm422_vm1, %v1255_v6  ;;  %v1253_v8 = vpop.permute.xlu0 %1252  ;;  %4163 = vmatprep.subr.bf16.mxu1 %v4649_v14 }
0x10b3   :  { %1259 = vst.msk [vmem:[#allocation2 + $0x50] sm:$0xff] %vm422_vm1, %v1253_v8  ;;  %3864 = vmatprep.mubr.msk.f32.mxu0 %vm422_vm1, %v1253_v8 }
0x10b4   :  { %3865 = vmatmul.mubr.msk.f32.vlgmr.msra.gmra.mrb[12].mxu0 %vm422_vm1, %v1255_v6 }
0x10b5   :  { %4097 = vmatpush3.bf16.msra.mxu0 %v4663_v18  ;;  %4165 = vmatpush3.bf16.msra.mxu1 %v4649_v14 }
0x10b6   :  { %4099 = vmatprep.subr.bf16.mxu0 %v4679_v22 }
0x10b9   :  { %4101 = vmatpush3.bf16.msra.mxu0 %v4679_v22 }
0x1183   :  { %v3954_v9 = vpop.f32.mrb[2].mxu1 }
0x1184   :  { %v4200_v40 = vadd.f32 %v5022_v2, %v3954_v9  ;;  %v2447_v10 = vpop.f32.mrb[3].mxu1 }
0x1185   :  { %v4201_v11 = vadd.f32 %v5022_v2, %v2447_v10 }
0x1186   :  { %4457 = vtanh.f32 %v4200_v40  ;;  %v3522_v21 = vmul.f32 -1.442695, %v4200_v40 }
0x1187   :  { %4459 = vtanh.f32 %v4201_v11  ;;  %v3866_v35 = vpop.f32.mrb[12].mxu0  ;;  %v3521_v23 = vmul.f32 -1.442695, %v4201_v11  ;;  %v2722_v11 = vld [vmem:[%s5577_s7 + $0x10] sm:$0xff] }
0x1188   :  { %v4194_v13 = vadd.f32 %v5029_v7, %v3866_v35  ;;  %v1331_v15 = vpop.f32.mrb[13].mxu0  ;;  %v2723_v35 = vld [vmem:[%s5577_s7 + $0x18] sm:$0xff] }
0x1189   :  { %v4195_v18 = vadd.f32 %v5029_v7, %v1331_v15 }
0x118a   :  { %4461 = vtanh.f32 %v4194_v13  ;;  %v3492_v25 = vmul.f32 -1.442695, %v4194_v13  ;;  %v2656_v13 = vld [vmem:[#allocation2] sm:$0xff] }
0x118b   :  { %4463 = vtanh.f32 %v4195_v18  ;;  %v3491_v27 = vmul.f32 -1.442695, %v4195_v18 }
0x118c   :  { %4465 = vpow2.f32 %v3522_v21 }
0x118d   :  { %4467 = vpow2.f32 %v3521_v23 }
0x118e   :  { %4469 = vpow2.f32 %v3492_v25  ;;  %v2659_v25 = vld [vmem:[#allocation2 + $0x18] sm:$0xff] }
0x118f   :  { %4471 = vpow2.f32 %v3491_v27  ;;  %v2660_v27 = vld [vmem:[#allocation2 + $0x20] sm:$0xff] }
0x1190   :  { %v4458_v14 = vpop.eup %4457 }
0x1191   :  { %v4460_v16 = vpop.eup %4459  ;;  %2478 = vrot.lane.b32.xlu1 %v4458_v14, %s4544_s17  ;;  %v4178_v14 = vpack.c.bf16 %v2723_v35, %v2722_v11 }
0x1192   :  { %2476 = vrot.lane.b32.xlu0 %v4460_v16, %s4544_s17  ;;  %v2672_v16 = vmax.f32 %v2656_v13, 0.0 }
0x1194   :  { %v4462_v22 = vpop.eup %4461 }
0x1195   :  { %v4464_v17 = vpop.eup %4463  ;;  %1362 = vrot.lane.b32.xlu1 %v4462_v22, %s4544_s17  ;;  %v2657_v22 = vld [vmem:[#allocation2 + $0x8] sm:$0xff] }
0x1196   :  { %1360 = vrot.lane.b32.xlu0 %v4464_v17, %s4544_s17  ;;  %v4466_v29 = vpop.eup %4465  ;;  %v2658_v17 = vld [vmem:[#allocation2 + $0x10] sm:$0xff]  ;;  %v2673_v21 = vmax.f32 %v2657_v22, 0.0 }
0x1197   :  { %v4468_v30 = vpop.eup %4467  ;;  %v2465_v31 = vadd.f32 1.0, %v4466_v29  ;;  %v2674_v23 = vmax.f32 %v2658_v17, 0.0  ;;  %v2675_v29 = vmax.f32 %v2659_v25, 0.0 }
0x1198   :  { %v4470_v19 = vpop.eup %4469  ;;  %v2464_v12 = vadd.f32 1.0, %v4468_v30  ;;  %v2676_v30 = vmax.f32 %v2660_v27, 0.0 }
0x1199   :  { %v4472_v24 = vpop.eup %4471  ;;  %4473 = vrcp.f32 %v2465_v31  ;;  %v1349_v20 = vadd.f32 1.0, %v4470_v19  ;;  %v2661_v31 = vld [vmem:[#allocation2 + $0x28] sm:$0xff]  ;;  %v2662_v19 = vld [vmem:[#allocation2 + $0x30] sm:$0xff] }
0x119a   :  { %4475 = vrcp.f32 %v2464_v12  ;;  %v1348_v37 = vadd.f32 1.0, %v4472_v24  ;;  %v2677_v12 = vmax.f32 %v2661_v31, 0.0  ;;  %v2678_v24 = vmax.f32 %v2662_v19, 0.0 }
0x119b   :  { %4477 = vrcp.f32 %v1349_v20  ;;  %v2663_v20 = vld [vmem:[#allocation2 + $0x38] sm:$0xff] }
0x119c   :  { %4479 = vrcp.f32 %v1348_v37  ;;  %v2664_v37 = vld [vmem:[#allocation2 + $0x40] sm:$0xff] }
0x11a3   :  { %v4474_v38 = vpop.eup %4473 }
0x11a4   :  { %v4476_v28 = vpop.eup %4475  ;;  %v2473_v43 = vmul.f32 %v4474_v38, %v5043_v52 }
0x11a5   :  { %v4478_v45 = vpop.eup %4477  ;;  %v2472_v47 = vmul.f32 %v4476_v28, %v5045_v53 }
0x11a6   :  { %v4480_v39 = vpop.eup %4479  ;;  %v1357_v48 = vmul.f32 %v4478_v45, %v5051_v56 }
0x11a7   :  { %v1356_v50 = vmul.f32 %v4480_v39, %v5053_v57  ;;  %v2720_v57 = vld [vmem:[%s5577_s7] sm:$0xff] }
0x11a8   :  { %v4174_v63 = vpack.c.bf16 %v2721_v62, %v2720_v57 }
0x11aa   :  { %4175 = vmatprep.subr.bf16.mxu0 %v4174_v63 }
0x1203   :  { %v2479_v26 = vpop.permute.xlu1 %2478 }
0x1204   :  { %v2483_v32 = vmul.f32 %v4474_v38, %v2479_v26  ;;  %v2477_v33 = vpop.permute.xlu0 %2476  ;;  %v2680_v26 = vmax.f32 %v2664_v37, 0.0 }
0x1205   :  { %v2482_v44 = vmul.f32 %v4476_v28, %v2477_v33 }
0x1206   :  { %2488 = vrot.lane.b32.xlu1 %v2483_v32, %s4545_s18  ;;  %v2666_v32 = vld [vmem:[#allocation2 + $0x50] sm:$0xff] }
0x1207   :  { %v1363_v36 = vpop.permute.xlu1 %1362  ;;  %2486 = vrot.lane.b32.xlu0 %v2482_v44, %s4545_s18  ;;  %v2682_v44 = vmax.f32 %v2666_v32, 0.0 }
0x1208   :  { %v1367_v49 = vmul.f32 %v4478_v45, %v1363_v36  ;;  %v1361_v41 = vpop.permute.xlu0 %1360 }
0x1209   :  { %v1366_v42 = vmul.f32 %v4480_v39, %v1361_v41 }
0x120a   :  { %1372 = vrot.lane.b32.xlu1 %v1367_v49, %s4545_s18 }
0x120b   :  { %1370 = vrot.lane.b32.xlu0 %v1366_v42, %s4545_s18 }
0x1278   :  { %v2489_v46 = vpop.permute.xlu1 %2488 }
0x1279   :  { %v5093_v54 = vadd.f32 %v2489_v46, %v2473_v43  ;;  %v2487_v55 = vpop.permute.xlu0 %2486 }
0x127a   :  { %v5095_v34 = vadd.f32 %v2487_v55, %v2472_v47 }
0x127b   :  { %4481 = vtanh.f32 %v5093_v54 }
0x127c   :  { %4483 = vtanh.f32 %v5095_v34  ;;  %v1373_v58 = vpop.permute.xlu1 %1372 }
0x127d   :  { %v5101_v59 = vadd.f32 %v1373_v58, %v1357_v48  ;;  %v1371_v52 = vpop.permute.xlu0 %1370 }
0x127e   :  { %v5103_v51 = vadd.f32 %v1371_v52, %v1356_v50 }
0x127f   :  { %4485 = vtanh.f32 %v5101_v59 }
0x1280   :  { %4487 = vtanh.f32 %v5103_v51 }
0x1285   :  { %v4482_v53 = vpop.eup %4481 }
0x1286   :  { %v4484_v60 = vpop.eup %4483  ;;  %2500 = vrot.lane.b32.xlu1 %v4482_v53, %s4544_s17 }
0x1287   :  { %2498 = vrot.lane.b32.xlu0 %v4484_v60, %s4544_s17 }
0x1289   :  { %v4486_v56 = vpop.eup %4485 }
0x128a   :  { %v4488_v61 = vpop.eup %4487  ;;  %1384 = vrot.lane.b32.xlu1 %v4486_v56, %s4544_s17 }
0x128b   :  { %1382 = vrot.lane.b32.xlu0 %v4488_v61, %s4544_s17 }
0x12f8   :  { %v2501_v0 = vpop.permute.xlu1 %2500 }
0x12f9   :  { %v2505_v1 = vmul.f32 %v4474_v38, %v2501_v0  ;;  %v2499_v3 = vpop.permute.xlu0 %2498  ;;  %v2679_v38 = vmax.f32 %v2663_v20, 0.0 }
0x12fa   :  { %v2504_v4 = vmul.f32 %v4476_v28, %v2499_v3  ;;  %v2665_v28 = vld [vmem:[#allocation2 + $0x48] sm:$0xff] }
0x12fb   :  { %2510 = vrot.lane.b32.xlu1 %v2505_v1, %s4545_s18  ;;  %v2681_v33 = vmax.f32 %v2665_v28, 0.0 }
0x12fc   :  { %v1385_v5 = vpop.permute.xlu1 %1384  ;;  %2508 = vrot.lane.b32.xlu0 %v2504_v4, %s4545_s18 }
0x12fd   :  { %v1389_v6 = vmul.f32 %v4478_v45, %v1385_v5  ;;  %v1383_v8 = vpop.permute.xlu0 %1382  ;;  %v2667_v45 = vld [vmem:[#allocation2 + $0x58] sm:$0xff] }
0x12fe   :  { %v1388_v9 = vmul.f32 %v4480_v39, %v1383_v8  ;;  %v2683_v39 = vmax.f32 %v2667_v45, 0.0 }
0x12ff   :  { %1394 = vrot.lane.b32.xlu1 %v1389_v6, %s4545_s18 }
0x1300   :  { %1392 = vrot.lane.b32.xlu0 %v1388_v9, %s4545_s18 }
0x136d   :  { %v2511_v40 = vpop.permute.xlu1 %2510 }
0x136e   :  { %2516 = vst.msk [vmem:[#allocation3 + $0x18] sm:$0xff] %vm422_vm1, %v2511_v40  ;;  %v2509_v10 = vpop.permute.xlu0 %2508 }
0x136f   :  { %2515 = vst.msk [vmem:[#allocation3 + $0x10] sm:$0xff] %vm422_vm1, %v2509_v10  ;;  %3963 = vmatprep.mubr.msk.f32.mxu1 %vm422_vm1, %v2509_v10 }
0x1370   :  { %3964 = vmatmul.mubr.msk.f32.vlgmr.msra.gmra.mrb[0].mxu1 %vm422_vm1, %v2511_v40 }
0x1371   :  { %v1395_v15 = vpop.permute.xlu1 %1394 }
0x1372   :  { %1400 = vst.msk [vmem:[#allocation2 + $0x68] sm:$0xff] %vm422_vm1, %v1395_v15  ;;  %v1393_v18 = vpop.permute.xlu0 %1392 }
0x1373   :  { %1399 = vst.msk [vmem:[#allocation2 + $0x60] sm:$0xff] %vm422_vm1, %v1393_v18  ;;  %3875 = vmatprep.mubr.msk.f32.mxu0 %vm422_vm1, %v1393_v18 }
0x1374   :  { %3876 = vmatmul.mubr.msk.f32.vlgmr.msra.gmra.mrb[14].mxu0 %vm422_vm1, %v1395_v15 }
0x1375   :  { %4177 = vmatpush3.bf16.msra.mxu0 %v4174_v63  ;;  %4006 = vmatprep.mubr.msk.f32.mxu0 %vm422_vm1, %v2672_v16 }
0x1376   :  { %4179 = vmatprep.subr.bf16.mxu0 %v4178_v14 }
0x1379   :  { %4181 = vmatpush3.bf16.msra.mxu0 %v4178_v14  ;;  %v2669_v41 = vld [vmem:[#allocation2 + $0x68] sm:$0xff] }
0x137a   :  { %v2668_v36 = vld [vmem:[#allocation2 + $0x60] sm:$0xff]  ;;  %v2685_v42 = vmax.f32 %v2669_v41, 0.0 }
0x137b   :  { %v2684_v49 = vmax.f32 %v2668_v36, 0.0 }
0x137c   :  { %4007 = vmatmul.mubr.msk.f32.vlgmr.msra.gmra.mrb[16].mxu0 %vm422_vm1, %v2673_v21 }
0x137d   :  { %4009 = vmatprep.mubr.msk.f32.mxu0 %vm422_vm1, %v2674_v23 }
0x1380   :  { %4010 = vmatmul.mubr.msk.f32.gmra.mrb[18].mxu0 %vm422_vm1, %v2675_v29 }
0x1381   :  { %4012 = vmatprep.mubr.msk.f32.mxu0 %vm422_vm1, %v2676_v30 }
0x1384   :  { %4013 = vmatmul.mubr.msk.f32.gmra.mrb[20].mxu0 %vm422_vm1, %v2677_v12 }
0x1385   :  { %4015 = vmatprep.mubr.msk.f32.mxu0 %vm422_vm1, %v2678_v24 }
0x1388   :  { %4016 = vmatmul.mubr.msk.f32.gmra.mrb[22].mxu0 %vm422_vm1, %v2679_v38 }
0x1389   :  { %4018 = vmatprep.mubr.msk.f32.mxu0 %vm422_vm1, %v2680_v26 }
0x138c   :  { %4019 = vmatmul.mubr.msk.f32.gmra.mrb[24].mxu0 %vm422_vm1, %v2681_v33 }
0x138d   :  { %4021 = vmatprep.mubr.msk.f32.mxu0 %vm422_vm1, %v2682_v44 }
0x1390   :  { %4022 = vmatmul.mubr.msk.f32.gmra.mrb[26].mxu0 %vm422_vm1, %v2683_v39 }
0x1391   :  { %4024 = vmatprep.mubr.msk.f32.mxu0 %vm422_vm1, %v2684_v49 }
0x1394   :  { %4025 = vmatmul.mubr.msk.f32.gmra.mrb[28].mxu0 %vm422_vm1, %v2685_v42 }
0x1443   :  { %v3965_v43 = vpop.f32.mrb[0].mxu1 }
0x1444   :  { %v4198_v46 = vadd.f32 %v5022_v2, %v3965_v43  ;;  %v2587_v47 = vpop.f32.mrb[1].mxu1 }
0x1445   :  { %v4199_v55 = vadd.f32 %v5022_v2, %v2587_v47 }
0x1446   :  { %4489 = vtanh.f32 %v4198_v46  ;;  %v3526_v10 = vmul.f32 -1.442695, %v4198_v46 }
0x1447   :  { %4491 = vtanh.f32 %v4199_v55  ;;  %v3877_v48 = vpop.f32.mrb[14].mxu0  ;;  %v3525_v11 = vmul.f32 -1.442695, %v4199_v55 }
0x1448   :  { %v4196_v58 = vadd.f32 %v5029_v7, %v3877_v48  ;;  %v1471_v50 = vpop.f32.mrb[15].mxu0 }
0x1449   :  { %v4197_v52 = vadd.f32 %v5029_v7, %v1471_v50  ;;  %v2727_v50 = vld [vmem:[%s5578_s8 + $0x18] sm:$0xff] }
0x144a   :  { %4493 = vtanh.f32 %v4196_v58  ;;  %v3496_v35 = vmul.f32 -1.442695, %v4196_v58  ;;  %v2726_v58 = vld [vmem:[%s5578_s8 + $0x10] sm:$0xff] }
0x144b   :  { %4495 = vtanh.f32 %v4197_v52  ;;  %v3495_v13 = vmul.f32 -1.442695, %v4197_v52  ;;  %v4170_v52 = vpack.c.bf16 %v2727_v50, %v2726_v58 }
0x144c   :  { %4497 = vpow2.f32 %v3526_v10 }
0x144d   :  { %4499 = vpow2.f32 %v3525_v11 }
0x144e   :  { %4501 = vpow2.f32 %v3496_v35 }
0x144f   :  { %v5153_v53 = vpop.f32.mrb[16].mxu0  ;;  %4503 = vpow2.f32 %v3495_v13 }
0x1450   :  { %v4490_v60 = vpop.eup %4489  ;;  %v5155_v56 = vpop.f32.mrb[17].mxu0 }
0x1451   :  { %v4492_v61 = vpop.eup %4491  ;;  %2618 = vrot.lane.b32.xlu1 %v4490_v60, %s4544_s17 }
0x1452   :  { %2616 = vrot.lane.b32.xlu0 %v4492_v61, %s4544_s17 }
0x1453   :  { %v5159_v2 = vpop.f32.mrb[18].mxu0 }
0x1454   :  { %v4494_v57 = vpop.eup %4493  ;;  %v5161_v62 = vpop.f32.mrb[19].mxu0 }
0x1455   :  { %v4496_v63 = vpop.eup %4495  ;;  %1502 = vrot.lane.b32.xlu1 %v4494_v57, %s4544_s17 }
0x1456   :  { %1500 = vrot.lane.b32.xlu0 %v4496_v63, %s4544_s17  ;;  %v4498_v15 = vpop.eup %4497 }
0x1457   :  { %v5165_v7 = vpop.f32.mrb[20].mxu0  ;;  %v4500_v18 = vpop.eup %4499  ;;  %v2605_v14 = vadd.f32 1.0, %v4498_v15 }
0x1458   :  { %v5167_v0 = vpop.f32.mrb[21].mxu0  ;;  %v4502_v16 = vpop.eup %4501  ;;  %v2604_v22 = vadd.f32 1.0, %v4500_v18 }
0x1459   :  { %v4504_v17 = vpop.eup %4503  ;;  %4505 = vrcp.f32 %v2605_v14  ;;  %v1489_v21 = vadd.f32 1.0, %v4502_v16 }
0x145a   :  { %4507 = vrcp.f32 %v2604_v22  ;;  %v1488_v23 = vadd.f32 1.0, %v4504_v17 }
0x145b   :  { %v5169_v1 = vpop.f32.mrb[22].mxu0  ;;  %4509 = vrcp.f32 %v1489_v21  ;;  %v2690_v21 = vld [vmem:[#allocation3 + $0x10] sm:$0xff] }
0x145c   :  { %v5171_v3 = vpop.f32.mrb[23].mxu0  ;;  %4511 = vrcp.f32 %v1488_v23 }
0x145f   :  { %v5173_v4 = vpop.f32.mrb[24].mxu0 }
0x1460   :  { %v5175_v5 = vpop.f32.mrb[25].mxu0 }
0x1463   :  { %v5177_v6 = vpop.f32.mrb[26].mxu0  ;;  %v4506_v25 = vpop.eup %4505 }
0x1464   :  { %v5179_v8 = vpop.f32.mrb[27].mxu0  ;;  %v4508_v29 = vpop.eup %4507  ;;  %v2613_v28 = vmul.f32 %v4506_v25, %v5093_v54 }
0x1465   :  { %v4510_v12 = vpop.eup %4509  ;;  %v2612_v33 = vmul.f32 %v4508_v29, %v5095_v34 }
0x1466   :  { %v4512_v20 = vpop.eup %4511  ;;  %v1497_v39 = vmul.f32 %v4510_v12, %v5101_v59  ;;  %v2724_v59 = vld [vmem:[%s5578_s8] sm:$0xff] }
0x1467   :  { %v5181_v9 = vpop.f32.mrb[28].mxu0  ;;  %v1496_v41 = vmul.f32 %v4512_v20, %v5103_v51  ;;  %v2725_v51 = vld [vmem:[%s5578_s8 + $0x8] sm:$0xff] }
0x1468   :  { %v5183_v40 = vpop.f32.mrb[29].mxu0  ;;  %v4166_v48 = vpack.c.bf16 %v2725_v51, %v2724_v59 }
0x146a   :  { %4167 = vmatprep.subr.bf16.mxu1 %v4166_v48 }
0x146b   :  { %4169 = vmatpush3.bf16.msra.mxu1 %v4166_v48  ;;  %v2703_v48 = vld [vmem:[#allocation3 + $0x78] sm:$0xff] }
0x146c   :  { %4171 = vmatprep.subr.bf16.mxu1 %v4170_v52  ;;  %v2719_v58 = vmax.f32 %v2703_v48, 0.0 }
0x146f   :  { %4173 = vmatpush3.bf16.msra.mxu1 %v4170_v52  ;;  %v5238_v52 = vld [vmem:[%s5579_s9] ss:$0 sm:$0xff] }
0x14c3   :  { %v2619_v27 = vpop.permute.xlu1 %2618 }
0x14c4   :  { %v2623_v30 = vmul.f32 %v4506_v25, %v2619_v27  ;;  %v2617_v31 = vpop.permute.xlu0 %2616  ;;  %v2706_v27 = vmax.f32 %v2690_v21, 0.0 }
0x14c5   :  { %v2622_v19 = vmul.f32 %v4508_v29, %v2617_v31 }
0x14c6   :  { %2628 = vrot.lane.b32.xlu1 %v2623_v30, %s4545_s18 }
0x14c7   :  { %v1503_v24 = vpop.permute.xlu1 %1502  ;;  %2626 = vrot.lane.b32.xlu0 %v2622_v19, %s4545_s18  ;;  %v2692_v19 = vld [vmem:[#allocation3 + $0x20] sm:$0xff] }
0x14c8   :  { %v1507_v37 = vmul.f32 %v4510_v12, %v1503_v24  ;;  %v1501_v38 = vpop.permute.xlu0 %1500 }
0x14c9   :  { %v1506_v26 = vmul.f32 %v4512_v20, %v1501_v38  ;;  %v2693_v38 = vld [vmem:[#allocation3 + $0x28] sm:$0xff] }
0x14ca   :  { %1512 = vrot.lane.b32.xlu1 %v1507_v37, %s4545_s18  ;;  %v2708_v37 = vmax.f32 %v2692_v19, 0.0 }
0x14cb   :  { %1510 = vrot.lane.b32.xlu0 %v1506_v26, %s4545_s18  ;;  %v2694_v26 = vld [vmem:[#allocation3 + $0x30] sm:$0xff] }
0x1538   :  { %v2629_v32 = vpop.permute.xlu1 %2628 }
0x1539   :  { %v2633_v44 = vadd.f32 %v2629_v32, %v2613_v28  ;;  %v2627_v45 = vpop.permute.xlu0 %2626  ;;  %v2709_v28 = vmax.f32 %v2693_v38, 0.0  ;;  %v2710_v32 = vmax.f32 %v2694_v26, 0.0 }
0x153a   :  { %v2632_v36 = vadd.f32 %v2627_v45, %v2612_v33  ;;  %v2695_v33 = vld [vmem:[#allocation3 + $0x38] sm:$0xff] }
0x153b   :  { %4513 = vtanh.f32 %v2633_v44  ;;  %v2696_v44 = vld [vmem:[#allocation3 + $0x40] sm:$0xff]  ;;  %v2711_v45 = vmax.f32 %v2695_v33, 0.0  ;;  %v4532_v33 = vld [vmem:[%s5572_s0 + $0x28] sm:$0xff] }
0x153c   :  { %4515 = vtanh.f32 %v2632_v36  ;;  %v1513_v49 = vpop.permute.xlu1 %1512  ;;  %v2712_v36 = vmax.f32 %v2696_v44, 0.0 }
0x153d   :  { %v1517_v42 = vadd.f32 %v1513_v49, %v1497_v39  ;;  %v1511_v43 = vpop.permute.xlu0 %1510  ;;  %v2697_v39 = vld [vmem:[#allocation3 + $0x48] sm:$0xff]  ;;  %v2698_v49 = vld [vmem:[#allocation3 + $0x50] sm:$0xff] }
0x153e   :  { %v1516_v46 = vadd.f32 %v1511_v43, %v1496_v41  ;;  %v2713_v41 = vmax.f32 %v2697_v39, 0.0  ;;  %v2699_v43 = vld [vmem:[#allocation3 + $0x58] sm:$0xff] }
0x153f   :  { %4517 = vtanh.f32 %v1517_v42  ;;  %v2714_v42 = vmax.f32 %v2698_v49, 0.0 }
0x1540   :  { %4519 = vtanh.f32 %v1516_v46  ;;  %v2700_v46 = vld [vmem:[#allocation3 + $0x60] sm:$0xff] }
0x1545   :  { %v4514_v47 = vpop.eup %4513 }
0x1546   :  { %v4516_v54 = vpop.eup %4515  ;;  %2640 = vrot.lane.b32.xlu1 %v4514_v47, %s4544_s17  ;;  %v2715_v47 = vmax.f32 %v2699_v43, 0.0  ;;  %v4533_v43 = vld [vmem:[%s5572_s0 + $0x30] sm:$0xff] }
0x1547   :  { %2638 = vrot.lane.b32.xlu0 %v4516_v54, %s4544_s17  ;;  %v2716_v54 = vmax.f32 %v2700_v46, 0.0 }
0x1549   :  { %v4518_v34 = vpop.eup %4517 }
0x154a   :  { %v4520_v55 = vpop.eup %4519  ;;  %1524 = vrot.lane.b32.xlu1 %v4518_v34, %s4544_s17  ;;  %v2701_v34 = vld [vmem:[#allocation3 + $0x68] sm:$0xff] }
0x154b   :  { %1522 = vrot.lane.b32.xlu0 %v4520_v55, %s4544_s17  ;;  %v2702_v55 = vld [vmem:[#allocation3 + $0x70] sm:$0xff]  ;;  %v2717_v59 = vmax.f32 %v2701_v34, 0.0 }
0x154c   :  { %v2718_v51 = vmax.f32 %v2702_v55, 0.0 }
0x15b8   :  { %v2641_v60 = vpop.permute.xlu1 %2640 }
0x15b9   :  { %v2645_v61 = vmul.f32 %v4506_v25, %v2641_v60  ;;  %v2639_v57 = vpop.permute.xlu0 %2638 }
0x15ba   :  { %v2644_v63 = vmul.f32 %v4508_v29, %v2639_v57  ;;  %v2691_v29 = vld [vmem:[#allocation3 + $0x18] sm:$0xff] }
0x15bb   :  { %2650 = vrot.lane.b32.xlu1 %v2645_v61, %s4545_s18  ;;  %v2707_v24 = vmax.f32 %v2691_v29, 0.0  ;;  %v4529_v29 = vld [vmem:[%s5572_s0 + $0x18] sm:$0xff] }
0x15bc   :  { %v1525_v10 = vpop.permute.xlu1 %1524  ;;  %2648 = vrot.lane.b32.xlu0 %v2644_v63, %s4545_s18 }
0x15bd   :  { %v1529_v11 = vmul.f32 %v4510_v12, %v1525_v10  ;;  %v1523_v35 = vpop.permute.xlu0 %1522 }
0x15be   :  { %v1528_v13 = vmul.f32 %v4512_v20, %v1523_v35 }
0x15bf   :  { %1534 = vrot.lane.b32.xlu1 %v1529_v11, %s4545_s18 }
0x15c0   :  { %1532 = vrot.lane.b32.xlu0 %v1528_v13, %s4545_s18 }
0x162d   :  { %v2651_v15 = vpop.permute.xlu1 %2650 }
0x162e   :  { %2655 = vst.msk [vmem:[#allocation3 + $0x8] sm:$0xff] %vm422_vm1, %v2651_v15  ;;  %v2649_v18 = vpop.permute.xlu0 %2648 }
0x162f   :  { %2654 = vst.msk [vmem:[#allocation3] sm:$0xff] %vm422_vm1, %v2649_v18 }
0x1631   :  { %v1535_v14 = vpop.permute.xlu1 %1534 }
0x1632   :  { %1540 = vst.msk [vmem:[#allocation2 + $0x78] sm:$0xff] %vm422_vm1, %v1535_v14  ;;  %v1533_v16 = vpop.permute.xlu0 %1532  ;;  %v4527_v14 = vld [vmem:[%s5572_s0 + $0x8] sm:$0xff] }
0x1633   :  { %1539 = vst.msk [vmem:[#allocation2 + $0x70] sm:$0xff] %vm422_vm1, %v1533_v16  ;;  %v4528_v16 = vld [vmem:[%s5572_s0] sm:$0xff] }
0x1635   :  { %v2689_v22 = vld [vmem:[#allocation3 + $0x8] sm:$0xff] }
0x1636   :  { %v2688_v17 = vld [vmem:[#allocation3] sm:$0xff]  ;;  %v2705_v25 = vmax.f32 %v2689_v22, 0.0 }
0x1637   :  { %v2704_v23 = vmax.f32 %v2688_v17, 0.0 }
0x1639   :  { %3974 = vmatprep.mubr.msk.f32.mxu1 %vm422_vm1, %v2704_v23  ;;  %v2671_v30 = vld [vmem:[#allocation2 + $0x78] sm:$0xff] }
0x163a   :  { %3975 = vmatmul.mubr.msk.f32.vlgmr.msra.gmra.mrb[16].mxu1 %vm422_vm1, %v2705_v25  ;;  %v2670_v31 = vld [vmem:[#allocation2 + $0x70] sm:$0xff]  ;;  %v2687_v20 = vmax.f32 %v2671_v30, 0.0 }
0x163b   :  { %3977 = vmatprep.mubr.msk.f32.mxu1 %vm422_vm1, %v2706_v27  ;;  %v2686_v12 = vmax.f32 %v2670_v31, 0.0 }
0x163d   :  { %4027 = vmatprep.mubr.msk.f32.mxu0 %vm422_vm1, %v2686_v12 }
0x163e   :  { %3978 = vmatmul.mubr.msk.f32.gmra.mrb[18].mxu1 %vm422_vm1, %v2707_v24  ;;  %4028 = vmatmul.mubr.msk.f32.gmra.mrb[30].mxu0 %vm422_vm1, %v2687_v20 }
0x163f   :  { %3980 = vmatprep.mubr.msk.f32.mxu1 %vm422_vm1, %v2708_v37 }
0x1642   :  { %3981 = vmatmul.mubr.msk.f32.gmra.mrb[20].mxu1 %vm422_vm1, %v2709_v28  ;;  %v4531_v28 = vld [vmem:[%s5572_s0 + $0x20] sm:$0xff] }
0x1643   :  { %3983 = vmatprep.mubr.msk.f32.mxu1 %vm422_vm1, %v2710_v32 }
0x1646   :  { %3984 = vmatmul.mubr.msk.f32.gmra.mrb[22].mxu1 %vm422_vm1, %v2711_v45 }
0x1647   :  { %3986 = vmatprep.mubr.msk.f32.mxu1 %vm422_vm1, %v2712_v36 }
0x164a   :  { %3987 = vmatmul.mubr.msk.f32.gmra.mrb[24].mxu1 %vm422_vm1, %v2713_v41 }
0x164b   :  { %3989 = vmatprep.mubr.msk.f32.mxu1 %vm422_vm1, %v2714_v42 }
0x164e   :  { %3990 = vmatmul.mubr.msk.f32.gmra.mrb[26].mxu1 %vm422_vm1, %v2715_v47 }
0x164f   :  { %3992 = vmatprep.mubr.msk.f32.mxu1 %vm422_vm1, %v2716_v54 }
0x1652   :  { %3993 = vmatmul.mubr.msk.f32.gmra.mrb[28].mxu1 %vm422_vm1, %v2717_v59 }
0x1653   :  { %3995 = vmatprep.mubr.msk.f32.mxu1 %vm422_vm1, %v2718_v51 }
0x1656   :  { %3996 = vmatmul.mubr.msk.f32.gmra.mrb[30].mxu1 %vm422_vm1, %v2719_v58 }
0x170d   :  { %v3976_v50 = vpop.f32.mrb[16].mxu1 }
0x170e   :  { %v3041_v60 = vadd.f32 %v5153_v53, %v3976_v50  ;;  %v2842_v61 = vpop.f32.mrb[17].mxu1  ;;  %v4535_v50 = vld [vmem:[%s5572_s0 + $0x40] sm:$0xff] }
0x170f   :  { %v3036_v57 = vadd.f32 %v5155_v56, %v2842_v61 }
0x1710   :  { %v3122_v63 = vadd.f32 %v5238_v52, %v3041_v60 }
0x1711   :  { %v3121_v10 = vadd.f32 %v5238_v52, %v3036_v57  ;;  %v3979_v11 = vpop.f32.mrb[18].mxu1  ;;  %v5244_v35 = vpop.f32.mrb[30].mxu0 }
0x1712   :  { %v3051_v13 = vadd.f32 %v5159_v2, %v3979_v11  ;;  %v2852_v15 = vpop.f32.mrb[19].mxu1  ;;  %v5247_v18 = vpop.f32.mrb[31].mxu0  ;;  %v5252_v53 = vadd.f32 %v4527_v14, %v3122_v63 }
0x1713   :  { %v3046_v56 = vadd.f32 %v5161_v62, %v2852_v15  ;;  %v5258_v22 = vadd.f32 %v4528_v16, %v3121_v10 }
0x1714   :  { %v3124_v17 = vadd.f32 %v5238_v52, %v3051_v13  ;;  %v3156_v2 = vsel %vm66_vm0, %v5252_v53, 0.0 }
0x1715   :  { %v3123_v21 = vadd.f32 %v5238_v52, %v3046_v56  ;;  %3157 = vadd.xlane.f32.xlu1 %v3156_v2  ;;  %v3982_v23 = vpop.f32.mrb[20].mxu1  ;;  %v3153_v25 = vsel %vm66_vm0, %v5258_v22, 0.0  ;;  %v4537_v56 = vld [vmem:[%s5572_s0 + $0x50] sm:$0xff] }
0x1716   :  { %v3061_v62 = vadd.f32 %v5165_v7, %v3982_v23  ;;  %3154 = vadd.xlane.f32.xlu0 %v3153_v25  ;;  %v2862_v27 = vpop.f32.mrb[21].mxu1  ;;  %v5270_v30 = vadd.f32 %v4529_v29, %v3124_v17  ;;  %v4530_v7 = vld [vmem:[%s5572_s0 + $0x10] sm:$0xff]  ;;  %v4538_v17 = vld [vmem:[%s5572_s0 + $0x58] sm:$0xff] }
0x1717   :  { %v3056_v31 = vadd.f32 %v5167_v0, %v2862_v27  ;;  %v5280_v37 = vadd.f32 %v4530_v7, %v3123_v21 }
0x1718   :  { %v3126_v19 = vadd.f32 %v5238_v52, %v3061_v62  ;;  %v3162_v12 = vsel %vm66_vm0, %v5270_v30, 0.0 }
0x1719   :  { %v3125_v24 = vadd.f32 %v5238_v52, %v3056_v31  ;;  %v3985_v20 = vpop.f32.mrb[22].mxu1  ;;  %v4539_v31 = vld [vmem:[%s5572_s0 + $0x60] sm:$0xff] }
0x171a   :  { %v3071_v38 = vadd.f32 %v5169_v1, %v3985_v20  ;;  %3163 = vadd.xlane.f32.xlu0 %v3162_v12  ;;  %v2872_v26 = vpop.f32.mrb[23].mxu1  ;;  %v5292_v44 = vadd.f32 %v4532_v33, %v3126_v19 }
0x171b   :  { %v3066_v0 = vadd.f32 %v5171_v3, %v2872_v26  ;;  %v5287_v32 = vadd.f32 %v4531_v28, %v3125_v24  ;;  %v3159_v3 = vsel %vm66_vm0, %v5280_v37, 0.0  ;;  %v4542_v28 = vld [vmem:[%s5572_s0 + $0x78] sm:$0xff] }
0x171c   :  { %v3128_v45 = vadd.f32 %v5238_v52, %v3071_v38  ;;  %v3168_v47 = vsel %vm66_vm0, %v5292_v44, 0.0  ;;  %v4541_v38 = vld [vmem:[%s5572_s0 + $0x70] sm:$0xff] }
0x171d   :  { %v3127_v1 = vadd.f32 %v5238_v52, %v3066_v0  ;;  %v3988_v36 = vpop.f32.mrb[24].mxu1  ;;  %v3165_v39 = vsel %vm66_vm0, %v5287_v32, 0.0 }
0x171e   :  { %v3081_v49 = vadd.f32 %v5173_v4, %v3988_v36  ;;  %3160 = vadd.xlane.f32.xlu0 %v3159_v3  ;;  %3166 = vadd.xlane.f32.xlu1 %v3165_v39  ;;  %v2882_v41 = vpop.f32.mrb[25].mxu1 }
0x171f   :  { %v3076_v42 = vadd.f32 %v5175_v5, %v2882_v41  ;;  %v5305_v46 = vadd.f32 %v4533_v43, %v3127_v1  ;;  %v4534_v5 = vld [vmem:[%s5572_s0 + $0x38] sm:$0xff] }
0x1720   :  { %v3130_v54 = vadd.f32 %v5238_v52, %v3081_v49  ;;  %v5316_v59 = vadd.f32 %v4534_v5, %v3128_v45 }
0x1721   :  { %v3129_v34 = vadd.f32 %v5238_v52, %v3076_v42  ;;  %v3991_v55 = vpop.f32.mrb[26].mxu1  ;;  %v3171_v4 = vsel %vm66_vm0, %v5305_v46, 0.0 }
0x1722   :  { %v3091_v51 = vadd.f32 %v5177_v6, %v3991_v55  ;;  %3169 = vadd.xlane.f32.xlu0 %v3168_v47  ;;  %3172 = vadd.xlane.f32.xlu1 %v3171_v4  ;;  %v2892_v48 = vpop.f32.mrb[27].mxu1  ;;  %v3174_v10 = vsel %vm66_vm0, %v5316_v59, 0.0 }
0x1723   :  { %v3086_v58 = vadd.f32 %v5179_v8, %v2892_v48  ;;  %v5323_v60 = vadd.f32 %v4535_v50, %v3129_v34  ;;  %v4536_v8 = vld [vmem:[%s5572_s0 + $0x48] sm:$0xff] }
0x1724   :  { %v3132_v61 = vadd.f32 %v5238_v52, %v3091_v51  ;;  %v5334_v11 = vadd.f32 %v4536_v8, %v3130_v54 }
0x1725   :  { %v3131_v57 = vadd.f32 %v5238_v52, %v3086_v58  ;;  %v3994_v63 = vpop.f32.mrb[28].mxu1  ;;  %v3177_v6 = vsel %vm66_vm0, %v5323_v60, 0.0 }
0x1726   :  { %v3101_v13 = vadd.f32 %v5181_v9, %v3994_v63  ;;  %3175 = vadd.xlane.f32.xlu0 %v3174_v10  ;;  %3178 = vadd.xlane.f32.xlu1 %v3177_v6  ;;  %v2902_v15 = vpop.f32.mrb[29].mxu1  ;;  %v5346_v2 = vadd.f32 %v4538_v17, %v3132_v61 }
0x1727   :  { %v3096_v14 = vadd.f32 %v5183_v40, %v2902_v15  ;;  %v5341_v16 = vadd.f32 %v4537_v56, %v3131_v57  ;;  %v3180_v40 = vsel %vm66_vm0, %v5334_v11, 0.0 }
0x1728   :  { %v3134_v21 = vadd.f32 %v5238_v52, %v3101_v13  ;;  %v3186_v12 = vsel %vm66_vm0, %v5346_v2, 0.0 }
0x1729   :  { %v3133_v9 = vadd.f32 %v5238_v52, %v3096_v14  ;;  %v3997_v23 = vpop.f32.mrb[30].mxu1  ;;  %v3183_v25 = vsel %vm66_vm0, %v5341_v16, 0.0 }
0x172a   :  { %v3111_v62 = vadd.f32 %v5244_v35, %v3997_v23  ;;  %3181 = vadd.xlane.f32.xlu0 %v3180_v40  ;;  %3184 = vadd.xlane.f32.xlu1 %v3183_v25  ;;  %v2912_v27 = vpop.f32.mrb[31].mxu1 }
0x172b   :  { %v3106_v29 = vadd.f32 %v5247_v18, %v2912_v27  ;;  %v5359_v19 = vadd.f32 %v4539_v31, %v3133_v9  ;;  %v4540_v18 = vld [vmem:[%s5572_s0 + $0x68] sm:$0xff] }
0x172c   :  { %v3136_v24 = vadd.f32 %v5238_v52, %v3111_v62  ;;  %v5370_v7 = vadd.f32 %v4540_v18, %v3134_v21 }
0x172d   :  { %v3135_v20 = vadd.f32 %v5238_v52, %v3106_v29  ;;  %v3189_v35 = vsel %vm66_vm0, %v5359_v19, 0.0 }
0x172e   :  { %3187 = vadd.xlane.f32.xlu0 %v3186_v12  ;;  %3190 = vadd.xlane.f32.xlu1 %v3189_v35  ;;  %v3192_v52 = vsel %vm66_vm0, %v5370_v7, 0.0  ;;  %v5384_v33 = vadd.f32 %v4542_v28, %v3136_v24 }
0x172f   :  { %v5375_v26 = vadd.f32 %v4541_v38, %v3135_v20 }
0x1730   :  { %v3198_v45 = vsel %vm66_vm0, %v5384_v33, 0.0 }
0x1731   :  { %v3195_v0 = vsel %vm66_vm0, %v5375_v26, 0.0 }
0x1732   :  { %3193 = vadd.xlane.f32.xlu0 %v3192_v52  ;;  %3196 = vadd.xlane.f32.xlu1 %v3195_v0 }
0x1736   :  { %3199 = vadd.xlane.f32.xlu0 %v3198_v45 }
0x17a2   :  { %v3158_v36 = vpop.xlane.xlu1 %3157 }
0x17a3   :  { %v3155_v1 = vpop.xlane.xlu0 %3154  ;;  %v3203_v61 = vmul.f32 0.0625, %v3158_v36 }
0x17a4   :  { %v3202_v47 = vmul.f32 0.0625, %v3155_v1 }
0x17a7   :  { %v3164_v3 = vpop.xlane.xlu0 %3163 }
0x17a8   :  { %v3205_v5 = vmul.f32 0.0625, %v3164_v3 }
0x17aa   :  { %v3225_v10 = vadd.f32 %v3205_v5, %v3203_v61 }
0x17ab   :  { %v3167_v39 = vpop.xlane.xlu1 %3166  ;;  %v3161_v49 = vpop.xlane.xlu0 %3160 }
0x17ac   :  { %v3204_v41 = vmul.f32 0.0625, %v3161_v49  ;;  %v3206_v4 = vmul.f32 0.0625, %v3167_v39 }
0x17ae   :  { %v3218_v54 = vadd.f32 %v3204_v41, %v3202_v47 }
0x17af   :  { %v3173_v42 = vpop.xlane.xlu1 %3172  ;;  %v3170_v43 = vpop.xlane.xlu0 %3169 }
0x17b0   :  { %v3208_v51 = vmul.f32 0.0625, %v3173_v42  ;;  %v3219_v48 = vadd.f32 %v3218_v54, %v3206_v4  ;;  %v3207_v57 = vmul.f32 0.0625, %v3170_v43 }
0x17b2   :  { %v3220_v6 = vadd.f32 %v3219_v48, %v3208_v51  ;;  %v3226_v56 = vadd.f32 %v3225_v10, %v3207_v57 }
0x17b3   :  { %v3179_v34 = vpop.xlane.xlu1 %3178  ;;  %v3176_v55 = vpop.xlane.xlu0 %3175 }
0x17b4   :  { %v3210_v63 = vmul.f32 0.0625, %v3179_v34  ;;  %v3209_v8 = vmul.f32 0.0625, %v3176_v55 }
0x17b6   :  { %v3221_v17 = vadd.f32 %v3220_v6, %v3210_v63  ;;  %v3227_v23 = vadd.f32 %v3226_v56, %v3209_v8 }
0x17b7   :  { %v3185_v58 = vpop.xlane.xlu1 %3184  ;;  %v3182_v50 = vpop.xlane.xlu0 %3181 }
0x17b8   :  { %v3212_v13 = vmul.f32 0.0625, %v3185_v58  ;;  %v3211_v21 = vmul.f32 0.0625, %v3182_v50 }
0x17ba   :  { %v3222_v40 = vadd.f32 %v3221_v17, %v3212_v13  ;;  %v3228_v29 = vadd.f32 %v3227_v23, %v3211_v21 }
0x17bb   :  { %v3191_v15 = vpop.xlane.xlu1 %3190  ;;  %v3188_v14 = vpop.xlane.xlu0 %3187 }
0x17bc   :  { %v3214_v9 = vmul.f32 0.0625, %v3191_v15  ;;  %v3213_v25 = vmul.f32 0.0625, %v3188_v14 }
0x17be   :  { %v3223_v31 = vadd.f32 %v3222_v40, %v3214_v9  ;;  %v3229_v20 = vadd.f32 %v3228_v29, %v3213_v25 }
0x17bf   :  { %v3197_v62 = vpop.xlane.xlu1 %3196  ;;  %v3194_v27 = vpop.xlane.xlu0 %3193 }
0x17c0   :  { %v3216_v12 = vmul.f32 0.0625, %v3197_v62  ;;  %v3215_v24 = vmul.f32 0.0625, %v3194_v27 }
0x17c2   :  { %v3224_v35 = vadd.f32 %v3223_v31, %v3216_v12  ;;  %v3230_v52 = vadd.f32 %v3229_v20, %v3215_v24 }
0x17c3   :  { %v3200_v18 = vpop.xlane.xlu0 %3199 }
0x17c4   :  { %v3233_v38 = vmul.f32 0.125, %v3224_v35  ;;  %v3217_v0 = vmul.f32 0.0625, %v3200_v18 }
0x17c6   :  { %v3231_v28 = vadd.f32 %v3230_v52, %v3217_v0  ;;  %v5389_v45 = vsub.f32 %v5258_v22, %v3233_v38  ;;  %v5392_v1 = vsub.f32 %v5280_v37, %v3233_v38  ;;  %v5397_v39 = vsub.f32 %v5287_v32, %v3233_v38 }
0x17c7   :  { %v5413_v32 = vsub.f32 %v5305_v46, %v3233_v38  ;;  %v5425_v55 = vsub.f32 %v5323_v60, %v3233_v38  ;;  %v5437_v48 = vsub.f32 %v5341_v16, %v3233_v38  ;;  %v5449_v57 = vsub.f32 %v5359_v19, %v3233_v38 }
0x17c8   :  { %v3234_v36 = vmul.f32 0.125, %v3231_v28  ;;  %v3251_v3 = vmul.f32 %v5389_v45, %v5389_v45  ;;  %v3253_v41 = vmul.f32 %v5392_v1, %v5392_v1  ;;  %v3255_v43 = vmul.f32 %v5397_v39, %v5397_v39 }
0x17c9   :  { %v3263_v8 = vmul.f32 %v5449_v57, %v5449_v57  ;;  %v5465_v15 = vsub.f32 %v5375_v26, %v3233_v38 }
0x17ca   :  { %v3267_v49 = vsel %vm66_vm0, %v3251_v3, 0.0  ;;  %v5403_v42 = vsub.f32 %v5252_v53, %v3234_v36  ;;  %v5406_v22 = vsub.f32 %v5270_v30, %v3234_v36  ;;  %v3273_v47 = vsel %vm66_vm0, %v3253_v41, 0.0 }
0x17cb   :  { %3268 = vadd.xlane.f32.xlu1 %v3267_v49  ;;  %v5420_v34 = vsub.f32 %v5292_v44, %v3234_v36  ;;  %v3257_v30 = vmul.f32 %v5413_v32, %v5413_v32  ;;  %v3279_v46 = vsel %vm66_vm0, %v3255_v43, 0.0  ;;  %v5432_v51 = vsub.f32 %v5316_v59, %v3234_v36 }
0x17cc   :  { %v3252_v37 = vmul.f32 %v5403_v42, %v5403_v42  ;;  %v3254_v53 = vmul.f32 %v5406_v22, %v5406_v22  ;;  %v3259_v44 = vmul.f32 %v5425_v55, %v5425_v55  ;;  %v5444_v61 = vsub.f32 %v5334_v11, %v3234_v36 }
0x17cd   :  { %v3256_v5 = vmul.f32 %v5420_v34, %v5420_v34  ;;  %v3285_v60 = vsel %vm66_vm0, %v3257_v30, 0.0  ;;  %v3258_v50 = vmul.f32 %v5432_v51, %v5432_v51  ;;  %v3261_v59 = vmul.f32 %v5437_v48, %v5437_v48 }
0x17ce   :  { %v3270_v54 = vsel %vm66_vm0, %v3252_v37, 0.0  ;;  %v3276_v4 = vsel %vm66_vm0, %v3254_v53, 0.0  ;;  %v3291_v16 = vsel %vm66_vm0, %v3259_v44, 0.0  ;;  %v3260_v10 = vmul.f32 %v5444_v61, %v5444_v61 }
0x17cf   :  { %3274 = vadd.xlane.f32.xlu1 %v3273_v47  ;;  %3271 = vadd.xlane.f32.xlu0 %v3270_v54  ;;  %v3282_v58 = vsel %vm66_vm0, %v3256_v5, 0.0  ;;  %v3288_v63 = vsel %vm66_vm0, %v3258_v50, 0.0  ;;  %v5456_v6 = vsub.f32 %v5346_v2, %v3234_v36  ;;  %v3297_v11 = vsel %vm66_vm0, %v3261_v59, 0.0 }
0x17d0   :  { %v3294_v19 = vsel %vm66_vm0, %v3260_v10, 0.0  ;;  %v5468_v14 = vsub.f32 %v5370_v7, %v3234_v36  ;;  %v3303_v2 = vsel %vm66_vm0, %v3263_v8, 0.0  ;;  %v3265_v17 = vmul.f32 %v5465_v15, %v5465_v15 }
0x17d1   :  { %v3262_v13 = vmul.f32 %v5456_v6, %v5456_v6  ;;  %v5477_v9 = vsub.f32 %v5384_v33, %v3234_v36 }
0x17d2   :  { %v3264_v21 = vmul.f32 %v5468_v14, %v5468_v14  ;;  %v3309_v7 = vsel %vm66_vm0, %v3265_v17, 0.0 }
0x17d3   :  { %3280 = vadd.xlane.f32.xlu1 %v3279_v46  ;;  %3277 = vadd.xlane.f32.xlu0 %v3276_v4  ;;  %v3300_v56 = vsel %vm66_vm0, %v3262_v13, 0.0  ;;  %v3266_v23 = vmul.f32 %v5477_v9, %v5477_v9 }
0x17d4   :  { %v3306_v26 = vsel %vm66_vm0, %v3264_v21, 0.0 }
0x17d5   :  { %v3312_v40 = vsel %vm66_vm0, %v3266_v23, 0.0 }
0x17d7   :  { %3286 = vadd.xlane.f32.xlu1 %v3285_v60  ;;  %3283 = vadd.xlane.f32.xlu0 %v3282_v58 }
0x17db   :  { %3292 = vadd.xlane.f32.xlu1 %v3291_v16  ;;  %3289 = vadd.xlane.f32.xlu0 %v3288_v63 }
0x17df   :  { %3298 = vadd.xlane.f32.xlu1 %v3297_v11  ;;  %3295 = vadd.xlane.f32.xlu0 %v3294_v19 }
0x17e3   :  { %3304 = vadd.xlane.f32.xlu1 %v3303_v2  ;;  %3301 = vadd.xlane.f32.xlu0 %v3300_v56 }
0x17e7   :  { %3310 = vadd.xlane.f32.xlu1 %v3309_v7  ;;  %3307 = vadd.xlane.f32.xlu0 %v3306_v26 }
0x17eb   :  { %3313 = vadd.xlane.f32.xlu0 %v3312_v40 }
0x1858   :  { %v3269_v25 = vpop.xlane.xlu1 %3268 }
0x1859   :  { %v3315_v18 = vmul.f32 0.0625, %v3269_v25 }
0x185c   :  { %v3275_v62 = vpop.xlane.xlu1 %3274  ;;  %v3272_v27 = vpop.xlane.xlu0 %3271 }
0x185d   :  { %v3317_v24 = vmul.f32 0.0625, %v3275_v62  ;;  %v3316_v49 = vmul.f32 0.0625, %v3272_v27 }
0x185f   :  { %v3331_v52 = vadd.f32 %v3317_v24, %v3315_v18 }
0x1860   :  { %v3281_v29 = vpop.xlane.xlu1 %3280  ;;  %v3278_v33 = vpop.xlane.xlu0 %3277 }
0x1861   :  { %v3319_v38 = vmul.f32 0.0625, %v3281_v29  ;;  %v3318_v0 = vmul.f32 0.0625, %v3278_v33  ;;  %v3560_v29 = vld [vmem:[%s5580_s10] ss:$0 sm:$0xff] }
0x1863   :  { %v3332_v41 = vadd.f32 %v3331_v52, %v3319_v38  ;;  %v3338_v47 = vadd.f32 %v3318_v0, %v3316_v49 }
0x1864   :  { %v3287_v31 = vpop.xlane.xlu1 %3286  ;;  %v3284_v12 = vpop.xlane.xlu0 %3283 }
0x1865   :  { %v3321_v28 = vmul.f32 0.0625, %v3287_v31  ;;  %v3320_v37 = vmul.f32 0.0625, %v3284_v12 }
0x1867   :  { %v3333_v54 = vadd.f32 %v3332_v41, %v3321_v28  ;;  %v3339_v5 = vadd.f32 %v3338_v47, %v3320_v37 }
0x1868   :  { %v3293_v20 = vpop.xlane.xlu1 %3292  ;;  %v3290_v35 = vpop.xlane.xlu0 %3289 }
0x1869   :  { %v3323_v43 = vmul.f32 0.0625, %v3293_v20  ;;  %v3322_v53 = vmul.f32 0.0625, %v3290_v35  ;;  %v3561_v20 = vld [vmem:[%s5581_s11] ss:$0 sm:$0xff] }
0x186b   :  { %v3334_v44 = vadd.f32 %v3333_v54, %v3323_v43  ;;  %v3340_v50 = vadd.f32 %v3339_v5, %v3322_v53 }
0x186c   :  { %v3299_v36 = vpop.xlane.xlu1 %3298  ;;  %v3296_v3 = vpop.xlane.xlu0 %3295 }
0x186d   :  { %v3325_v30 = vmul.f32 0.0625, %v3299_v36  ;;  %v3324_v60 = vmul.f32 0.0625, %v3296_v3 }
0x186f   :  { %v3335_v59 = vadd.f32 %v3334_v44, %v3325_v30  ;;  %v3341_v11 = vadd.f32 %v3340_v50, %v3324_v60 }
0x1870   :  { %v3305_v46 = vpop.xlane.xlu1 %3304  ;;  %v3302_v4 = vpop.xlane.xlu0 %3301 }
0x1871   :  { %v3327_v58 = vmul.f32 0.0625, %v3305_v46  ;;  %v3326_v16 = vmul.f32 0.0625, %v3302_v4 }
0x1873   :  { %v3336_v8 = vadd.f32 %v3335_v59, %v3327_v58  ;;  %v3342_v2 = vadd.f32 %v3341_v11, %v3326_v16 }
0x1874   :  { %v3311_v63 = vpop.xlane.xlu1 %3310  ;;  %v3308_v10 = vpop.xlane.xlu0 %3307 }
0x1875   :  { %v3329_v19 = vmul.f32 0.0625, %v3311_v63  ;;  %v3328_v13 = vmul.f32 0.0625, %v3308_v10 }
0x1877   :  { %v3337_v56 = vadd.f32 %v3336_v8, %v3329_v19  ;;  %v3343_v7 = vadd.f32 %v3342_v2, %v3328_v13 }
0x1878   :  { %v3314_v17 = vpop.xlane.xlu0 %3313 }
0x1879   :  { %v3345_v21 = vmul.f32 0.125, %v3337_v56  ;;  %v3330_v26 = vmul.f32 0.0625, %v3314_v17 }
0x187b   :  { %v3347_v23 = vadd.f32 1e-12, %v3345_v21  ;;  %v3344_v40 = vadd.f32 %v3343_v7, %v3330_v26 }
0x187d   :  { %4521 = vrsqrt.f32 %v3347_v23  ;;  %v3346_v25 = vmul.f32 0.125, %v3344_v40 }
0x187f   :  { %v3348_v62 = vadd.f32 1e-12, %v3346_v25 }
0x1881   :  { %4523 = vrsqrt.f32 %v3348_v62 }
0x1887   :  { %v4522_v27 = vpop.eup %4521 }
0x1888   :  { %v3351_v33 = vmul.f32 %v4522_v27, %v5389_v45  ;;  %v3353_v31 = vmul.f32 %v4522_v27, %v5392_v1  ;;  %v3355_v12 = vmul.f32 %v4522_v27, %v5397_v39  ;;  %v3357_v24 = vmul.f32 %v4522_v27, %v5413_v32 }
0x1889   :  { %v3359_v35 = vmul.f32 %v4522_v27, %v5425_v55  ;;  %v3361_v18 = vmul.f32 %v4522_v27, %v5437_v48  ;;  %v3363_v38 = vmul.f32 %v4522_v27, %v5449_v57  ;;  %v3365_v52 = vmul.f32 %v4522_v27, %v5465_v15 }
0x188a   :  { %v3374_v0 = vmul.f32 %v3560_v29, %v3351_v33  ;;  %v3376_v45 = vmul.f32 %v3560_v29, %v3353_v31  ;;  %v3378_v28 = vmul.f32 %v3560_v29, %v3355_v12  ;;  %v3380_v1 = vmul.f32 %v3560_v29, %v3357_v24 }
0x188b   :  { %v4524_v36 = vpop.eup %4523  ;;  %v3382_v39 = vmul.f32 %v3560_v29, %v3359_v35  ;;  %v3384_v3 = vmul.f32 %v3560_v29, %v3361_v18  ;;  %v3386_v32 = vmul.f32 %v3560_v29, %v3363_v38  ;;  %v3388_v49 = vmul.f32 %v3560_v29, %v3365_v52 }
0x188c   :  { %v3397_v41 = vadd.f32 %v3561_v20, %v3374_v0  ;;  %v3399_v37 = vadd.f32 %v3561_v20, %v3376_v45  ;;  %v3401_v43 = vadd.f32 %v3561_v20, %v3378_v28  ;;  %v3403_v47 = vadd.f32 %v3561_v20, %v3380_v1 }
0x188d   :  { %v3405_v55 = vadd.f32 %v3561_v20, %v3382_v39  ;;  %v3407_v54 = vadd.f32 %v3561_v20, %v3384_v3  ;;  %v3409_v48 = vadd.f32 %v3561_v20, %v3386_v32  ;;  %v3411_v53 = vadd.f32 %v3561_v20, %v3388_v49 }
0x188e   :  { %3413 = vst.msk [vmem:[%s5582_s12] sm:$0xff] %vm66_vm0, %v3397_v41  ;;  %3415 = vst.msk [vmem:[%s5582_s12 + $0x10] sm:$0xff] %vm66_vm0, %v3399_v37  ;;  %v3352_v57 = vmul.f32 %v4524_v36, %v5403_v42  ;;  %v3354_v15 = vmul.f32 %v4524_v36, %v5406_v22  ;;  %v3356_v30 = vmul.f32 %v4524_v36, %v5420_v34 }
0x188f   :  { %3417 = vst.msk [vmem:[%s5582_s12 + $0x20] sm:$0xff] %vm66_vm0, %v3401_v43  ;;  %3419 = vst.msk [vmem:[%s5582_s12 + $0x30] sm:$0xff] %vm66_vm0, %v3403_v47  ;;  %v3358_v46 = vmul.f32 %v4524_v36, %v5432_v51  ;;  %v3360_v42 = vmul.f32 %v4524_v36, %v5444_v61  ;;  %v3362_v22 = vmul.f32 %v4524_v36, %v5456_v6 }
0x1890   :  { %3421 = vst.msk [vmem:[%s5582_s12 + $0x40] sm:$0xff] %vm66_vm0, %v3405_v55  ;;  %3423 = vst.msk [vmem:[%s5582_s12 + $0x50] sm:$0xff] %vm66_vm0, %v3407_v54  ;;  %v3364_v34 = vmul.f32 %v4524_v36, %v5468_v14  ;;  %v3366_v51 = vmul.f32 %v4524_v36, %v5477_v9  ;;  %v3375_v4 = vmul.f32 %v3560_v29, %v3352_v57 }
0x1891   :  { %3425 = vst.msk [vmem:[%s5582_s12 + $0x60] sm:$0xff] %vm66_vm0, %v3409_v48  ;;  %3427 = vst.msk [vmem:[%s5582_s12 + $0x70] sm:$0xff] %vm66_vm0, %v3411_v53  ;;  %v3377_v5 = vmul.f32 %v3560_v29, %v3354_v15  ;;  %v3379_v44 = vmul.f32 %v3560_v29, %v3356_v30  ;;  %v3381_v60 = vmul.f32 %v3560_v29, %v3358_v46 }
0x1892   :  { %v3383_v58 = vmul.f32 %v3560_v29, %v3360_v42  ;;  %v3385_v50 = vmul.f32 %v3560_v29, %v3362_v22  ;;  %v3387_v59 = vmul.f32 %v3560_v29, %v3364_v34  ;;  %v3389_v16 = vmul.f32 %v3560_v29, %v3366_v51 }
0x1893   :  { %v3398_v63 = vadd.f32 %v3561_v20, %v3375_v4  ;;  %v3400_v10 = vadd.f32 %v3561_v20, %v3377_v5  ;;  %v3402_v11 = vadd.f32 %v3561_v20, %v3379_v44  ;;  %v3404_v8 = vadd.f32 %v3561_v20, %v3381_v60 }
0x1894   :  { %v3406_v19 = vadd.f32 %v3561_v20, %v3383_v58  ;;  %v3408_v61 = vadd.f32 %v3561_v20, %v3385_v50  ;;  %v3410_v13 = vadd.f32 %v3561_v20, %v3387_v59  ;;  %v3412_v6 = vadd.f32 %v3561_v20, %v3389_v16 }
0x1895   :  { %3414 = vst.msk [vmem:[%s5582_s12 + $0x8] sm:$0xff] %vm66_vm0, %v3398_v63  ;;  %3416 = vst.msk [vmem:[%s5582_s12 + $0x18] sm:$0xff] %vm66_vm0, %v3400_v10 }
0x1896   :  { %3418 = vst.msk [vmem:[%s5582_s12 + $0x28] sm:$0xff] %vm66_vm0, %v3402_v11  ;;  %3420 = vst.msk [vmem:[%s5582_s12 + $0x38] sm:$0xff] %vm66_vm0, %v3404_v8 }
0x1897   :  { %3422 = vst.msk [vmem:[%s5582_s12 + $0x48] sm:$0xff] %vm66_vm0, %v3406_v19  ;;  %3424 = vst.msk [vmem:[%s5582_s12 + $0x58] sm:$0xff] %vm66_vm0, %v3408_v61 }
0x1898   :  { %3426 = vst.msk [vmem:[%s5582_s12 + $0x68] sm:$0xff] %vm66_vm0, %v3410_v13  ;;  %3428 = vst.msk [vmem:[%s5582_s12 + $0x78] sm:$0xff] %vm66_vm0, %v3412_v6 }

// kernel: dual_path_transformer_block.4
= control target key start
LH: loop header
LB: loop body
LE: loop exit
PB: predicated region body
PF: predicated region fallthrough
CT: control target
= control target key end

     0   :  { %vm51_vm0 = vcmask 130048   ;;  %v16340_v19 = vmov 0.0   ;;  %vm13915_vm1 = vmmov 0   ;;  %s13916_s14 = smov 112   ;;  %s13918_s15 = smov 108   ;;  %vm250_vm2 = vcmask 31744   ;;  %s16332_s1 = inlined_call_operand.vmem [shape: f32[16,48], index: 1, kind: input, shape index: {}]   ;;  %s16333_s0 = inlined_call_operand.vmem [shape: f32[16,8,16], index: 0, kind: input, shape index: {}]   ;;  %s16334_s2 = inlined_call_operand.vmem [shape: f32[1,48], index: 2, kind: input, shape index: {}]   ;;  %s16335_s3 = inlined_call_operand.vmem [shape: f32[16,16], index: 3, kind: input, shape index: {}]   ;;  %s16336_s4 = inlined_call_operand.vmem [shape: f32[1,16], index: 4, kind: input, shape index: {}]   ;;  %s16337_s5 = inlined_call_operand.vmem [shape: f32[1,16], index: 5, kind: input, shape index: {}]   ;;  %s16338_s6 = inlined_call_operand.vmem [shape: f32[1,16], index: 6, kind: input, shape index: {}]   ;;  %s16339_s7 = inlined_call_operand.vmem [shape: f32[16,8,16], index: 7, kind: output, shape index: {}]  }
   0x1   :  { %v42_v0 = vld [vmem:[%s16332_s1] sm:$0xff]  ;;  %v43_v1 = vld [vmem:[%s16332_s1 + $0x8] sm:$0xff]  ;;  %v28_v7 = vld [vmem:[%s16333_s0 + $0x10] sm:$0xff]  ;;  %s13919_s16 = smov 124   ;;  %vm1480_vm3 = vcmask 64512   ;;  %s13920_s17 = smov 92  }
   0x2   :  { %v26_v2 = vld [vmem:[%s16333_s0] sm:$0xff]  ;;  %v13543_v3 = vpack.c.bf16 %v43_v1, %v42_v0  ;;  %v27_v5 = vld [vmem:[%s16333_s0 + $0x8] sm:$0xff]  ;;  %v36_v8 = vld [vmem:[%s16333_s0 + $0x50] sm:$0xff]  ;;  %s13921_s18 = smov 104   ;;  %s13922_s19 = smov 120   ;;  %vm5563_vm4 = vcmask 1043456  }
   0x3   :  { %12775 = vmatprep.mubr.msk.f32.mxu0 %vm51_vm0, %v26_v2  ;;  %v34_v4 = vld [vmem:[%s16333_s0 + $0x40] sm:$0xff]  ;;  %v35_v6 = vld [vmem:[%s16333_s0 + $0x48] sm:$0xff]  ;;  %v29_v9 = vld [vmem:[%s16333_s0 + $0x18] sm:$0xff]  ;;  %s13923_s20 = smov 88   ;;  %s13924_s23 = smov 116  }
   0x4   :  { %13544 = vmatprep.subr.bf16.mxu0 %v13543_v3  ;;  %13547 = vmatprep.subr.bf16.mxu1 %v13543_v3  ;;  %v37_v10 = vld [vmem:[%s16333_s0 + $0x58] sm:$0xff]  ;;  %v30_v11 = vld [vmem:[%s16333_s0 + $0x20] sm:$0xff]  ;;  %v31_v13 = vld [vmem:[%s16333_s0 + $0x28] sm:$0xff]  ;;  %s13925_s24 = smov 100  }
   0x5   :  { %13546 = vmatpush3.bf16.msra.mxu0 %v13543_v3  ;;  %13548 = vmatpush3.bf16.msra.mxu1 %v13543_v3  ;;  %v38_v12 = vld [vmem:[%s16333_s0 + $0x60] sm:$0xff]  ;;  %v39_v14 = vld [vmem:[%s16333_s0 + $0x68] sm:$0xff]  ;;  %v32_v15 = vld [vmem:[%s16333_s0 + $0x30] sm:$0xff] }
   0x6   :  { %12787 = vmatprep.mubr.msk.f32.mxu1 %vm51_vm0, %v34_v4  ;;  %v40_v16 = vld [vmem:[%s16333_s0 + $0x70] sm:$0xff]  ;;  %v33_v17 = vld [vmem:[%s16333_s0 + $0x38] sm:$0xff]  ;;  %12799 = vmatprep.subr.mxu1 %v16340_v19  ;;  %v12149_v20 = vld [vmem:[%s16334_s2] ss:$0 sm:$0xff]  ;;  %s13917_s2 = smov 96  }
   0x7   :  { %v41_v18 = vld [vmem:[%s16333_s0 + $0x78] sm:$0xff]  ;;  %12839 = vmatprep.subr.mxu0 %v16340_v19 }
   0x8   :  { %12776 = vmatmul.mubr.msk.f32.vlgmr.msra.gmra.mrb[0].mxu0 %vm51_vm0, %v27_v5  ;;  %12788 = vmatmul.mubr.msk.f32.vlgmr.msra.gmra.mrb[0].mxu1 %vm51_vm0, %v35_v6 }
   0x9   :  { %12778 = vmatprep.mubr.msk.f32.mxu0 %vm51_vm0, %v28_v7  ;;  %12790 = vmatprep.mubr.msk.f32.mxu1 %vm51_vm0, %v36_v8 }
   0xc   :  { %12779 = vmatmul.mubr.msk.f32.gmra.mrb[2].mxu0 %vm51_vm0, %v29_v9  ;;  %12791 = vmatmul.mubr.msk.f32.gmra.mrb[2].mxu1 %vm51_vm0, %v37_v10 }
   0xd   :  { %12781 = vmatprep.mubr.msk.f32.mxu0 %vm51_vm0, %v30_v11  ;;  %12793 = vmatprep.mubr.msk.f32.mxu1 %vm51_vm0, %v38_v12 }
  0x10   :  { %12782 = vmatmul.mubr.msk.f32.gmra.mrb[4].mxu0 %vm51_vm0, %v31_v13  ;;  %12794 = vmatmul.mubr.msk.f32.gmra.mrb[4].mxu1 %vm51_vm0, %v39_v14 }
  0x11   :  { %12784 = vmatprep.mubr.msk.f32.mxu0 %vm51_vm0, %v32_v15  ;;  %12796 = vmatprep.mubr.msk.f32.mxu1 %vm51_vm0, %v40_v16 }
  0x14   :  { %12785 = vmatmul.mubr.msk.f32.gmra.mrb[6].mxu0 %vm51_vm0, %v33_v17  ;;  %12797 = vmatmul.mubr.msk.f32.gmra.mrb[6].mxu1 %vm51_vm0, %v41_v18 }
  0x15   :  { %12801 = vmatprep.mubr.msk.f32.mxu1 %vm13915_vm1, %v16340_v19  ;;  %12841 = vmatprep.mubr.msk.f32.mxu0 %vm13915_vm1, %v16340_v19 }
  0xdb   :  { %v12777_v21 = vpop.f32.mrb[0].mxu0  ;;  %v12789_v22 = vpop.f32.mrb[0].mxu1 }
  0xdc   :  { %v166_v23 = vpop.f32.mrb[1].mxu0  ;;  %v206_v24 = vpop.f32.mrb[1].mxu1  ;;  %v14050_v30 = vadd.f32 %v12777_v21, %v12149_v20  ;;  %v14076_v45 = vadd.f32 %v12789_v22, %v12149_v20 }
  0xdd   :  { %v14046_v25 = vadd.f32 %v12149_v20, %v166_v23  ;;  %v14086_v48 = vadd.f32 %v12149_v20, %v206_v24 }
  0xde   :  { %16365 = vst [vmem:[#allocation2_spill] sm:$0xff] %v14050_v30  ;;  %16370 = vst [vmem:[#allocation7_spill] sm:$0xff] %v14076_v45 }
  0xdf   :  { %v12780_v26 = vpop.f32.mrb[2].mxu0  ;;  %248 = vrot.lane.b32.xlu0 %v14046_v25, %s13916_s14  ;;  %v12792_v27 = vpop.f32.mrb[2].mxu1  ;;  %16373 = vst [vmem:[#allocation10_spill] sm:$0xff] %v14086_v48 }
  0xe0   :  { %v176_v28 = vpop.f32.mrb[3].mxu0  ;;  %v216_v29 = vpop.f32.mrb[3].mxu1  ;;  %v14054_v32 = vadd.f32 %v12780_v26, %v12149_v20  ;;  %v14078_v46 = vadd.f32 %v12792_v27, %v12149_v20 }
  0xe1   :  { %v14052_v31 = vadd.f32 %v12149_v20, %v176_v28  ;;  %v14094_v50 = vadd.f32 %v12149_v20, %v216_v29 }
  0xe2   :  { %16367 = vst [vmem:[#allocation4_spill] sm:$0xff] %v14054_v32  ;;  %16371 = vst [vmem:[#allocation8_spill] sm:$0xff] %v14078_v46 }
  0xe3   :  { %16366 = vst [vmem:[#allocation3_spill] sm:$0xff] %v14052_v31  ;;  %v12783_v33 = vpop.f32.mrb[4].mxu0  ;;  %403 = vrot.lane.b32.xlu1 %v14052_v31, %s13916_s14  ;;  %326 = vrot.lane.b32.xlu0 %v14050_v30, %s13916_s14  ;;  %v12795_v34 = vpop.f32.mrb[4].mxu1  ;;  %16375 = vst [vmem:[#allocation12_spill] sm:$0xff] %v14094_v50 }
  0xe4   :  { %v186_v35 = vpop.f32.mrb[5].mxu0  ;;  %v226_v36 = vpop.f32.mrb[5].mxu1  ;;  %v14062_v38 = vadd.f32 %v12783_v33, %v12149_v20  ;;  %v14084_v47 = vadd.f32 %v12795_v34, %v12149_v20 }
  0xe5   :  { %v14060_v37 = vadd.f32 %v12149_v20, %v186_v35  ;;  %v14096_v51 = vadd.f32 %v12149_v20, %v226_v36 }
  0xe6   :  { %16368 = vst [vmem:[#allocation5_spill] sm:$0xff] %v14062_v38  ;;  %16372 = vst [vmem:[#allocation9_spill] sm:$0xff] %v14084_v47 }
  0xe7   :  { %v12786_v39 = vpop.f32.mrb[6].mxu0  ;;  %480 = vrot.lane.b32.xlu1 %v14054_v32, %s13916_s14  ;;  %557 = vrot.lane.b32.xlu0 %v14060_v37, %s13916_s14  ;;  %v12798_v40 = vpop.f32.mrb[6].mxu1 }
  0xe8   :  { %v196_v41 = vpop.f32.mrb[7].mxu0  ;;  %v236_v42 = vpop.f32.mrb[7].mxu1  ;;  %v14070_v44 = vadd.f32 %v12786_v39, %v12149_v20  ;;  %v14092_v49 = vadd.f32 %v12798_v40, %v12149_v20 }
  0xe9   :  { %v14068_v43 = vadd.f32 %v12149_v20, %v196_v41  ;;  %v14106_v52 = vadd.f32 %v12149_v20, %v236_v42 }
  0xea   :  { %16369 = vst [vmem:[#allocation6_spill] sm:$0xff] %v14070_v44  ;;  %16374 = vst [vmem:[#allocation11_spill] sm:$0xff] %v14092_v49 }
  0xeb   :  { %634 = vrot.lane.b32.xlu1 %v14062_v38, %s13916_s14  ;;  %711 = vrot.lane.b32.xlu0 %v14068_v43, %s13916_s14 }
  0xef   :  { %788 = vrot.lane.b32.xlu1 %v14070_v44, %s13916_s14  ;;  %942 = vrot.lane.b32.xlu0 %v14076_v45, %s13916_s14 }
  0xf3   :  { %1096 = vrot.lane.b32.xlu1 %v14078_v46, %s13916_s14  ;;  %1250 = vrot.lane.b32.xlu0 %v14084_v47, %s13916_s14 }
  0xf7   :  { %1404 = vrot.lane.b32.xlu1 %v14092_v49, %s13916_s14  ;;  %865 = vrot.lane.b32.xlu0 %v14086_v48, %s13916_s14 }
  0xfb   :  { %1019 = vrot.lane.b32.xlu1 %v14094_v50, %s13916_s14  ;;  %1173 = vrot.lane.b32.xlu0 %v14096_v51, %s13916_s14 }
  0xff   :  { %1327 = vrot.lane.b32.xlu1 %v14106_v52, %s13916_s14  ;;  %1733 = vrot.lane.b32.xlu0 %v14050_v30, %s13917_s2 }
 0x103   :  { %1885 = vrot.lane.b32.xlu1 %v14054_v32, %s13917_s2  ;;  %2037 = vrot.lane.b32.xlu0 %v14062_v38, %s13917_s2 }
 0x107   :  { %2189 = vrot.lane.b32.xlu1 %v14070_v44, %s13917_s2  ;;  %2341 = vrot.lane.b32.xlu0 %v14076_v45, %s13917_s2 }
 0x10b   :  { %2493 = vrot.lane.b32.xlu1 %v14078_v46, %s13917_s2  ;;  %2645 = vrot.lane.b32.xlu0 %v14084_v47, %s13917_s2 }
 0x10f   :  { %2797 = vrot.lane.b32.xlu1 %v14092_v49, %s13917_s2  ;;  %2953 = vrot.lane.b32.xlu0 %v14050_v30, %s13918_s15 }
 0x113   :  { %2951 = vrot.lane.b32.xlu1 %v14050_v30, %s13919_s16  ;;  %3109 = vrot.lane.b32.xlu0 %v14054_v32, %s13918_s15 }
 0x117   :  { %3107 = vrot.lane.b32.xlu1 %v14054_v32, %s13919_s16  ;;  %3265 = vrot.lane.b32.xlu0 %v14062_v38, %s13918_s15 }
 0x11b   :  { %3263 = vrot.lane.b32.xlu1 %v14062_v38, %s13919_s16  ;;  %3421 = vrot.lane.b32.xlu0 %v14070_v44, %s13918_s15 }
 0x151   :  { %v249_v53 = vpop.permute.xlu0 %248 }
 0x152   :  { %12800 = vmatpush3.xpose.msk.msra.mxu1 %vm250_vm2, %v249_v53 }
 0x153   :  { %12804 = vmatprep.subr.mxu1 %v16340_v19 }
 0x155   :  { %v404_v54 = vpop.permute.xlu1 %403  ;;  %12802 = vmatmul.mubr.msk.f32.vlgmr.msra.gmra.mrb[8].mxu1 %vm250_vm2, %v14046_v25  ;;  %v327_v55 = vpop.permute.xlu0 %326 }
 0x156   :  { %12805 = vmatpush3.xpose.msk.msra.mxu1 %vm250_vm2, %v327_v55  ;;  %12806 = vmatprep.mubr.msk.f32.mxu1 %vm13915_vm1, %v16340_v19 }
 0x157   :  { %12809 = vmatprep.subr.mxu1 %v16340_v19 }
 0x159   :  { %v481_v56 = vpop.permute.xlu1 %480  ;;  %12807 = vmatmul.mubr.msk.f32.vlgmr.msra.gmra.mrb[10].mxu1 %vm250_vm2, %v14050_v30  ;;  %v558_v57 = vpop.permute.xlu0 %557 }
 0x15a   :  { %12810 = vmatpush3.xpose.msk.msra.mxu1 %vm250_vm2, %v404_v54  ;;  %12811 = vmatprep.mubr.msk.f32.mxu1 %vm13915_vm1, %v16340_v19 }
 0x15b   :  { %12814 = vmatprep.subr.mxu1 %v16340_v19 }
 0x15d   :  { %v635_v58 = vpop.permute.xlu1 %634  ;;  %12812 = vmatmul.mubr.msk.f32.vlgmr.msra.gmra.mrb[12].mxu1 %vm250_vm2, %v14052_v31  ;;  %v712_v59 = vpop.permute.xlu0 %711 }
 0x15e   :  { %12815 = vmatpush3.xpose.msk.msra.mxu1 %vm250_vm2, %v481_v56  ;;  %12816 = vmatprep.mubr.msk.f32.mxu1 %vm13915_vm1, %v16340_v19 }
 0x15f   :  { %12819 = vmatprep.subr.mxu1 %v16340_v19 }
 0x161   :  { %v789_v60 = vpop.permute.xlu1 %788  ;;  %12817 = vmatmul.mubr.msk.f32.vlgmr.msra.gmra.mrb[14].mxu1 %vm250_vm2, %v14054_v32  ;;  %v943_v61 = vpop.permute.xlu0 %942 }
 0x162   :  { %12820 = vmatpush3.xpose.msk.msra.mxu1 %vm250_vm2, %v558_v57  ;;  %12821 = vmatprep.mubr.msk.f32.mxu1 %vm13915_vm1, %v16340_v19 }
 0x163   :  { %12824 = vmatprep.subr.mxu1 %v16340_v19 }
 0x165   :  { %v1097_v62 = vpop.permute.xlu1 %1096  ;;  %12822 = vmatmul.mubr.msk.f32.vlgmr.msra.gmra.mrb[16].mxu1 %vm250_vm2, %v14060_v37  ;;  %v1251_v63 = vpop.permute.xlu0 %1250 }
 0x166   :  { %12825 = vmatpush3.xpose.msk.msra.mxu1 %vm250_vm2, %v635_v58  ;;  %12826 = vmatprep.mubr.msk.f32.mxu1 %vm13915_vm1, %v16340_v19 }
 0x167   :  { %12829 = vmatprep.subr.mxu1 %v16340_v19 }
 0x169   :  { %v1405_v0 = vpop.permute.xlu1 %1404  ;;  %12827 = vmatmul.mubr.msk.f32.vlgmr.msra.gmra.mrb[18].mxu1 %vm250_vm2, %v14062_v38  ;;  %v866_v1 = vpop.permute.xlu0 %865 }
 0x16a   :  { %12830 = vmatpush3.xpose.msk.msra.mxu1 %vm250_vm2, %v712_v59  ;;  %12840 = vmatpush3.xpose.msk.msra.mxu0 %vm250_vm2, %v866_v1 }
 0x16b   :  { %12831 = vmatprep.mubr.msk.f32.mxu1 %vm13915_vm1, %v16340_v19  ;;  %12834 = vmatprep.subr.mxu1 %v16340_v19 }
 0x16c   :  { %12849 = vmatprep.subr.mxu0 %v16340_v19 }
 0x16d   :  { %v1020_v2 = vpop.permute.xlu1 %1019  ;;  %12832 = vmatmul.mubr.msk.f32.vlgmr.msra.gmra.mrb[20].mxu1 %vm250_vm2, %v14068_v43  ;;  %12842 = vmatmul.mubr.msk.f32.vlgmr.msra.gmra.mrb[8].mxu0 %vm250_vm2, %v14086_v48  ;;  %v1174_v3 = vpop.permute.xlu0 %1173 }
 0x16e   :  { %12835 = vmatpush3.xpose.msk.msra.mxu1 %vm250_vm2, %v789_v60  ;;  %12850 = vmatpush3.xpose.msk.msra.mxu0 %vm250_vm2, %v1020_v2 }
 0x16f   :  { %12836 = vmatprep.mubr.msk.f32.mxu1 %vm13915_vm1, %v16340_v19  ;;  %12851 = vmatprep.mubr.msk.f32.mxu0 %vm13915_vm1, %v16340_v19 }
 0x170   :  { %12844 = vmatprep.subr.mxu1 %v16340_v19  ;;  %12859 = vmatprep.subr.mxu0 %v16340_v19 }
 0x171   :  { %12837 = vmatmul.mubr.msk.f32.vlgmr.msra.gmra.mrb[22].mxu1 %vm250_vm2, %v14070_v44  ;;  %12852 = vmatmul.mubr.msk.f32.vlgmr.msra.gmra.mrb[10].mxu0 %vm250_vm2, %v14094_v50  ;;  %v1328_v4 = vpop.permute.xlu1 %1327  ;;  %v1734_v5 = vpop.permute.xlu0 %1733 }
 0x172   :  { %12845 = vmatpush3.xpose.msk.msra.mxu1 %vm250_vm2, %v943_v61  ;;  %12860 = vmatpush3.xpose.msk.msra.mxu0 %vm250_vm2, %v1174_v3 }
 0x173   :  { %12846 = vmatprep.mubr.msk.f32.mxu1 %vm13915_vm1, %v16340_v19  ;;  %12861 = vmatprep.mubr.msk.f32.mxu0 %vm13915_vm1, %v16340_v19 }
 0x174   :  { %12854 = vmatprep.subr.mxu1 %v16340_v19  ;;  %12869 = vmatprep.subr.mxu0 %v16340_v19 }
 0x175   :  { %12847 = vmatmul.mubr.msk.f32.vlgmr.msra.gmra.mrb[24].mxu1 %vm250_vm2, %v14076_v45  ;;  %12862 = vmatmul.mubr.msk.f32.vlgmr.msra.gmra.mrb[12].mxu0 %vm250_vm2, %v14096_v51  ;;  %v14284_v1 = vpop.permute.xlu1 %1885 }
 0x176   :  { %12855 = vmatpush3.xpose.msk.msra.mxu1 %vm250_vm2, %v1097_v62  ;;  %12870 = vmatpush3.xpose.msk.msra.mxu0 %vm250_vm2, %v1328_v4 }
 0x177   :  { %12856 = vmatprep.mubr.msk.f32.mxu1 %vm13915_vm1, %v16340_v19  ;;  %12871 = vmatprep.mubr.msk.f32.mxu0 %vm13915_vm1, %v16340_v19 }
 0x178   :  { %12864 = vmatprep.subr.mxu1 %v16340_v19  ;;  %12879 = vmatprep.subr.mxu0 %v16340_v19 }
 0x179   :  { %12857 = vmatmul.mubr.msk.f32.vlgmr.msra.gmra.mrb[26].mxu1 %vm250_vm2, %v14078_v46  ;;  %12872 = vmatmul.mubr.msk.f32.vlgmr.msra.gmra.mrb[14].mxu0 %vm250_vm2, %v14106_v52  ;;  %v14288_v3 = vpop.permute.xlu1 %2189 }
 0x17a   :  { %12865 = vmatpush3.xpose.msk.msra.mxu1 %vm250_vm2, %v1251_v63  ;;  %12866 = vmatprep.mubr.msk.f32.mxu1 %vm13915_vm1, %v16340_v19  ;;  %v14280_v63 = vpop.permute.xlu0 %2037 }
 0x17b   :  { %12874 = vmatprep.subr.mxu1 %v16340_v19  ;;  %12881 = vmatprep.mubr.msk.f32.mxu0 %vm13915_vm1, %v16340_v19 }
 0x17d   :  { %12867 = vmatmul.mubr.msk.f32.vlgmr.msra.gmra.mrb[28].mxu1 %vm250_vm2, %v14084_v47 }
 0x17e   :  { %12875 = vmatpush3.xpose.msk.msra.mxu1 %vm250_vm2, %v1405_v0  ;;  %12876 = vmatprep.mubr.msk.f32.mxu1 %vm13915_vm1, %v16340_v19  ;;  %v14282_v0 = vpop.permute.xlu0 %2341 }
 0x17f   :  { %12884 = vmatprep.subr.mxu1 %v16340_v19 }
 0x181   :  { %12877 = vmatmul.mubr.msk.f32.vlgmr.msra.gmra.mrb[30].mxu1 %vm250_vm2, %v14092_v49 }
 0x182   :  { %12885 = vmatpush3.msra.mxu1 %v1734_v5  ;;  %12886 = vmatprep.mubr.msk.f32.mxu1 %vm13915_vm1, %v16340_v19  ;;  %v14286_v2 = vpop.permute.xlu0 %2645  ;;  %v14292_v5 = vpop.permute.xlu1 %2493 }
 0x183   :  { %12894 = vmatprep.subr.mxu1 %v16340_v19 }
 0x186   :  { %v14290_v4 = vpop.permute.xlu0 %2953 }
 0x228   :  { %v14237_v6 = vpop.f32.mrb[8].mxu1 }
 0x229   :  { %v12803_v7 = vpop.f32.mrb[9].mxu1 }
 0x22a   :  { %v14294_v7 = vpop.permute.xlu0 %3109 }
 0x22c   :  { %v14239_v8 = vpop.f32.mrb[10].mxu1 }
 0x22d   :  { %v12808_v9 = vpop.f32.mrb[11].mxu1  ;;  %v1484_v10 = vsel %vm1480_vm3, %v14239_v8, -inf }
 0x22e   :  { %1485 = vmax.xlane.f32.xlu0 %v1484_v10  ;;  %v14296_v9 = vpop.permute.xlu1 %2797  ;;  %v14298_v10 = vpop.permute.xlu0 %3265 }
 0x230   :  { %v14243_v11 = vpop.f32.mrb[12].mxu1 }
 0x231   :  { %v12813_v12 = vpop.f32.mrb[13].mxu1 }
 0x232   :  { %v14300_v12 = vpop.permute.xlu1 %2951 }
 0x234   :  { %v552_v13 = vpop.f32.mrb[14].mxu1 }
 0x235   :  { %v12818_v14 = vpop.f32.mrb[15].mxu1  ;;  %v1490_v15 = vsel %vm1480_vm3, %v552_v13, -inf }
 0x236   :  { %1491 = vmax.xlane.f32.xlu1 %v1490_v15  ;;  %v14302_v14 = vpop.permute.xlu0 %3421  ;;  %v14304_v15 = vpop.permute.xlu1 %3107 }
 0x238   :  { %v14246_v16 = vpop.f32.mrb[16].mxu1 }
 0x239   :  { %v12823_v17 = vpop.f32.mrb[17].mxu1 }
 0x23c   :  { %v14248_v18 = vpop.f32.mrb[18].mxu1 }
 0x23d   :  { %v12828_v20 = vpop.f32.mrb[19].mxu1  ;;  %v1496_v21 = vsel %vm1480_vm3, %v14248_v18, -inf }
 0x23e   :  { %1497 = vmax.xlane.f32.xlu0 %v1496_v21 }
 0x240   :  { %v14252_v22 = vpop.f32.mrb[20].mxu1  ;;  %v14254_v23 = vpop.f32.mrb[8].mxu0 }
 0x241   :  { %v12833_v24 = vpop.f32.mrb[21].mxu1  ;;  %v12843_v26 = vpop.f32.mrb[9].mxu0 }
 0x242   :  { %v14307_v24 = vpop.permute.xlu1 %3263 }
 0x244   :  { %v860_v27 = vpop.f32.mrb[22].mxu1  ;;  %v14256_v28 = vpop.f32.mrb[10].mxu0 }
 0x245   :  { %v12838_v29 = vpop.f32.mrb[23].mxu1  ;;  %v12853_v33 = vpop.f32.mrb[11].mxu0  ;;  %v1502_v34 = vsel %vm1480_vm3, %v860_v27, -inf }
 0x246   :  { %1503 = vmax.xlane.f32.xlu0 %v1502_v34 }
 0x248   :  { %v1014_v35 = vpop.f32.mrb[24].mxu1  ;;  %v14259_v36 = vpop.f32.mrb[12].mxu0 }
 0x249   :  { %v12848_v39 = vpop.f32.mrb[25].mxu1  ;;  %v12863_v40 = vpop.f32.mrb[13].mxu0  ;;  %v1508_v41 = vsel %vm1480_vm3, %v1014_v35, -inf }
 0x24a   :  { %1509 = vmax.xlane.f32.xlu1 %v1508_v41 }
 0x24c   :  { %v14262_v42 = vpop.f32.mrb[26].mxu1  ;;  %v14264_v53 = vpop.f32.mrb[14].mxu0 }
 0x24d   :  { %v12858_v54 = vpop.f32.mrb[27].mxu1  ;;  %v12873_v55 = vpop.f32.mrb[15].mxu0  ;;  %v1514_v56 = vsel %vm1480_vm3, %v14262_v42, -inf }
 0x24e   :  { %1515 = vmax.xlane.f32.xlu0 %v1514_v56 }
 0x250   :  { %v14268_v57 = vpop.f32.mrb[28].mxu1 }
 0x251   :  { %v12868_v58 = vpop.f32.mrb[29].mxu1  ;;  %v1520_v59 = vsel %vm1480_vm3, %v14268_v57, -inf }
 0x252   :  { %1521 = vmax.xlane.f32.xlu1 %v1520_v59 }
 0x254   :  { %v14272_v60 = vpop.f32.mrb[30].mxu1 }
 0x255   :  { %v12878_v61 = vpop.f32.mrb[31].mxu1  ;;  %v1526_v62 = vsel %vm1480_vm3, %v14272_v60, -inf }
 0x256   :  { %1527 = vmax.xlane.f32.xlu0 %v1526_v62 }
 0x263   :  { %3419 = vrot.lane.b32.xlu1 %v14070_v44, %s13919_s16 }
 0x26c   :  { %3577 = vrot.lane.b32.xlu0 %v14076_v45, %s13918_s15 }
 0x2bb   :  { %v1486_v17 = vpop.xlane.xlu0 %1485 }
 0x2bc   :  { %v1530_v20 = vsub.f32 %v14239_v8, %v1486_v17 }
 0x2be   :  { %v1547_v21 = vmul.f32 1.442695, %v1530_v20 }
 0x2c0   :  { %13610 = vpow2.f32 %v1547_v21 }
 0x2c3   :  { %v1492_v26 = vpop.xlane.xlu1 %1491 }
 0x2c4   :  { %v1532_v29 = vsub.f32 %v552_v13, %v1492_v26 }
 0x2c6   :  { %v1551_v33 = vmul.f32 1.442695, %v1532_v29 }
 0x2c8   :  { %13612 = vpow2.f32 %v1551_v33 }
 0x2ca   :  { %v14309_v34 = vpop.eup %13610 }
 0x2cb   :  { %v1498_v39 = vpop.xlane.xlu0 %1497  ;;  %v1580_v40 = vsel %vm1480_vm3, %v14309_v34, 0.0 }
 0x2cc   :  { %v1534_v41 = vsub.f32 %v14248_v18, %v1498_v39  ;;  %1581 = vadd.xlane.f32.xlu1 %v1580_v40 }
 0x2ce   :  { %v1555_v54 = vmul.f32 1.442695, %v1534_v41 }
 0x2d0   :  { %13614 = vpow2.f32 %v1555_v54 }
 0x2d2   :  { %v14314_v8 = vpop.eup %13612 }
 0x2d3   :  { %v1504_v55 = vpop.xlane.xlu0 %1503  ;;  %v1586_v56 = vsel %vm1480_vm3, %v14314_v8, 0.0 }
 0x2d4   :  { %v1536_v13 = vsub.f32 %v860_v27, %v1504_v55  ;;  %1587 = vadd.xlane.f32.xlu0 %v1586_v56 }
 0x2d6   :  { %v1559_v58 = vmul.f32 1.442695, %v1536_v13 }
 0x2d7   :  { %v1510_v59 = vpop.xlane.xlu1 %1509 }
 0x2d8   :  { %13616 = vpow2.f32 %v1559_v58  ;;  %v1538_v61 = vsub.f32 %v1014_v35, %v1510_v59 }
 0x2da   :  { %v14318_v62 = vpop.eup %13614  ;;  %v1563_v17 = vmul.f32 1.442695, %v1538_v61  ;;  %v1481_v61 = vsel %vm1480_vm3, %v14237_v6, -inf }
 0x2db   :  { %v1592_v18 = vsel %vm1480_vm3, %v14318_v62, 0.0  ;;  %v1516_v35 = vpop.xlane.xlu0 %1515 }
 0x2dc   :  { %13618 = vpow2.f32 %v1563_v17  ;;  %1593 = vadd.xlane.f32.xlu1 %v1592_v18  ;;  %v1540_v29 = vsub.f32 %v14262_v42, %v1516_v35 }
 0x2de   :  { %v1567_v39 = vmul.f32 1.442695, %v1540_v29  ;;  %v1493_v29 = vsel %vm1480_vm3, %v14246_v16, -inf }
 0x2df   :  { %v1522_v33 = vpop.xlane.xlu1 %1521 }
 0x2e0   :  { %v1542_v40 = vsub.f32 %v14268_v57, %v1522_v33  ;;  %13620 = vpow2.f32 %v1567_v39  ;;  %v1499_v39 = vsel %vm1480_vm3, %v14252_v22, -inf }
 0x2e2   :  { %v14322_v20 = vpop.eup %13616  ;;  %v1571_v54 = vmul.f32 1.442695, %v1542_v40 }
 0x2e3   :  { %v1598_v21 = vsel %vm1480_vm3, %v14322_v20, 0.0  ;;  %v1528_v41 = vpop.xlane.xlu0 %1527  ;;  %v14359_v17 = vpop.permute.xlu1 %3419 }
 0x2e4   :  { %1599 = vadd.xlane.f32.xlu0 %v1598_v21  ;;  %v1544_v55 = vsub.f32 %v14272_v60, %v1528_v41  ;;  %13622 = vpow2.f32 %v1571_v54  ;;  %v1505_v54 = vsel %vm1480_vm3, %v14254_v23, -inf }
 0x2e6   :  { %v14326_v27 = vpop.eup %13618  ;;  %v1575_v56 = vmul.f32 1.442695, %v1544_v55 }
 0x2e7   :  { %v1604_v26 = vsel %vm1480_vm3, %v14326_v27, 0.0  ;;  %v14361_v21 = vpop.permute.xlu0 %3577 }
 0x2e8   :  { %1605 = vadd.xlane.f32.xlu1 %v1604_v26  ;;  %13624 = vpow2.f32 %v1575_v56  ;;  %v1487_v26 = vsel %vm1480_vm3, %v14243_v11, -inf }
 0x2ea   :  { %v14337_v13 = vpop.eup %13620 }
 0x2eb   :  { %v1610_v58 = vsel %vm1480_vm3, %v14337_v13, 0.0 }
 0x2ee   :  { %v14341_v59 = vpop.eup %13622 }
 0x2ef   :  { %v1616_v42 = vsel %vm1480_vm3, %v14341_v59, 0.0 }
 0x2f2   :  { %v14345_v57 = vpop.eup %13624 }
 0x2f3   :  { %v1622_v60 = vsel %vm1480_vm3, %v14345_v57, 0.0 }
 0x2f9   :  { %3575 = vrot.lane.b32.xlu1 %v14076_v45, %s13919_s16 }
 0x2fa   :  { %3733 = vrot.lane.b32.xlu0 %v14078_v46, %s13918_s15 }
 0x319   :  { %1611 = vadd.xlane.f32.xlu0 %v1610_v58  ;;  %v1523_v58 = vsel %vm1480_vm3, %v14264_v53, -inf }
 0x31d   :  { %1617 = vadd.xlane.f32.xlu1 %v1616_v42 }
 0x321   :  { %1623 = vadd.xlane.f32.xlu1 %v1622_v60 }
 0x32f   :  { %3889 = vrot.lane.b32.xlu0 %v14084_v47, %s13918_s15 }
 0x332   :  { %3731 = vrot.lane.b32.xlu1 %v14078_v46, %s13919_s16 }
 0x336   :  { %3887 = vrot.lane.b32.xlu1 %v14084_v47, %s13919_s16 }
 0x33a   :  { %4045 = vrot.lane.b32.xlu1 %v14092_v49, %s13918_s15 }
 0x34e   :  { %1482 = vmax.xlane.f32.xlu0 %v1481_v61 }
 0x359   :  { %v1582_v18 = vpop.xlane.xlu1 %1581 }
 0x35a   :  { %13626 = vrcp.f32 %v1582_v18 }
 0x35e   :  { %1488 = vmax.xlane.f32.xlu1 %v1487_v26 }
 0x361   :  { %v1588_v35 = vpop.xlane.xlu0 %1587 }
 0x362   :  { %13628 = vrcp.f32 %v1588_v35  ;;  %1494 = vmax.xlane.f32.xlu1 %v1493_v29 }
 0x364   :  { %v13627_v33 = vpop.eup %13626  ;;  %4043 = vrot.lane.b32.xlu0 %v14092_v49, %s13919_s16 }
 0x365   :  { %v1642_v40 = vmul.f32 %v13627_v33, %v14309_v34  ;;  %v1511_v34 = vsel %vm1480_vm3, %v14256_v28, -inf }
 0x366   :  { %1500 = vmax.xlane.f32.xlu1 %v1499_v39 }
 0x367   :  { %12887 = vmatmul.mubr.msk.f32.vlgmr.msra.gmra.mrb[32].mxu1 %vm1480_vm3, %v1642_v40 }
 0x368   :  { %12895 = vmatpush3.msra.mxu1 %v14284_v1  ;;  %12896 = vmatprep.mubr.msk.f32.mxu1 %vm13915_vm1, %v16340_v19 }
 0x369   :  { %v1594_v41 = vpop.xlane.xlu1 %1593  ;;  %12904 = vmatprep.subr.mxu1 %v16340_v19 }
 0x36a   :  { %13630 = vrcp.f32 %v1594_v41  ;;  %1506 = vmax.xlane.f32.xlu1 %v1505_v54 }
 0x36c   :  { %v13629_v55 = vpop.eup %13628 }
 0x36d   :  { %v1644_v56 = vmul.f32 %v13629_v55, %v14314_v8 }
 0x36e   :  { %1512 = vmax.xlane.f32.xlu1 %v1511_v34 }
 0x36f   :  { %12897 = vmatmul.mubr.msk.f32.vlgmr.msra.gmra.mrb[34].mxu1 %vm1480_vm3, %v1644_v56 }
 0x370   :  { %12905 = vmatpush3.msra.mxu1 %v14280_v63  ;;  %12906 = vmatprep.mubr.msk.f32.mxu1 %vm13915_vm1, %v16340_v19 }
 0x371   :  { %v1600_v1 = vpop.xlane.xlu0 %1599  ;;  %12914 = vmatprep.subr.mxu1 %v16340_v19 }
 0x372   :  { %13632 = vrcp.f32 %v1600_v1  ;;  %1524 = vmax.xlane.f32.xlu1 %v1523_v58 }
 0x374   :  { %v13631_v42 = vpop.eup %13630 }
 0x375   :  { %v1606_v60 = vpop.xlane.xlu1 %1605  ;;  %v1646_v8 = vmul.f32 %v13631_v42, %v14318_v62  ;;  %v1517_v62 = vsel %vm1480_vm3, %v14259_v36, -inf }
 0x376   :  { %13634 = vrcp.f32 %v1606_v60 }
 0x377   :  { %12907 = vmatmul.mubr.msk.f32.vlgmr.msra.gmra.mrb[36].mxu1 %vm1480_vm3, %v1646_v8 }
 0x378   :  { %12915 = vmatpush3.msra.mxu1 %v14288_v3  ;;  %12916 = vmatprep.mubr.msk.f32.mxu1 %vm13915_vm1, %v16340_v19 }
 0x379   :  { %12924 = vmatprep.subr.mxu1 %v16340_v19 }
 0x37c   :  { %v13633_v63 = vpop.eup %13632 }
 0x37d   :  { %v1648_v61 = vmul.f32 %v13633_v63, %v14322_v20  ;;  %v3576_v20 = vpop.permute.xlu1 %3575 }
 0x37f   :  { %12917 = vmatmul.mubr.msk.f32.vlgmr.msra.gmra.mrb[38].mxu1 %vm1480_vm3, %v1648_v61 }
 0x380   :  { %v13635_v18 = vpop.eup %13634  ;;  %12925 = vmatpush3.msra.mxu1 %v14282_v0  ;;  %12926 = vmatprep.mubr.msk.f32.mxu1 %vm13915_vm1, %v16340_v19  ;;  %v3734_v0 = vpop.permute.xlu0 %3733 }
 0x381   :  { %12934 = vmatprep.subr.mxu1 %v16340_v19  ;;  %v1650_v3 = vmul.f32 %v13635_v18, %v14326_v27 }
 0x383   :  { %1518 = vmax.xlane.f32.xlu0 %v1517_v62  ;;  %12927 = vmatmul.mubr.msk.f32.vlgmr.msra.gmra.mrb[40].mxu1 %vm1480_vm3, %v1650_v3 }
 0x384   :  { %12935 = vmatpush3.msra.mxu1 %v14292_v5  ;;  %12936 = vmatprep.mubr.msk.f32.mxu1 %vm13915_vm1, %v16340_v19 }
 0x385   :  { %12944 = vmatprep.subr.mxu1 %v16340_v19 }
 0x3a6   :  { %v1612_v26 = vpop.xlane.xlu0 %1611 }
 0x3a7   :  { %13636 = vrcp.f32 %v1612_v26 }
 0x3aa   :  { %v1618_v35 = vpop.xlane.xlu1 %1617 }
 0x3ab   :  { %13638 = vrcp.f32 %v1618_v35 }
 0x3ae   :  { %v1624_v27 = vpop.xlane.xlu1 %1623 }
 0x3af   :  { %13640 = vrcp.f32 %v1624_v27 }
 0x3b1   :  { %v13637_v29 = vpop.eup %13636 }
 0x3b2   :  { %v1652_v33 = vmul.f32 %v13637_v29, %v14337_v13 }
 0x3b4   :  { %12937 = vmatmul.mubr.msk.f32.vlgmr.msra.gmra.mrb[42].mxu1 %vm1480_vm3, %v1652_v33 }
 0x3b5   :  { %v13639_v39 = vpop.eup %13638  ;;  %12945 = vmatpush3.msra.mxu1 %v14286_v2  ;;  %12946 = vmatprep.mubr.msk.f32.mxu1 %vm13915_vm1, %v16340_v19  ;;  %v3732_v2 = vpop.permute.xlu1 %3731 }
 0x3b6   :  { %12954 = vmatprep.subr.mxu1 %v16340_v19  ;;  %v1654_v5 = vmul.f32 %v13639_v39, %v14341_v59 }
 0x3b8   :  { %12947 = vmatmul.mubr.msk.f32.vlgmr.msra.gmra.mrb[44].mxu1 %vm1480_vm3, %v1654_v5 }
 0x3b9   :  { %v13641_v40 = vpop.eup %13640  ;;  %12955 = vmatpush3.msra.mxu1 %v14296_v9  ;;  %12956 = vmatprep.mubr.msk.f32.mxu1 %vm13915_vm1, %v16340_v19 }
 0x3ba   :  { %v1656_v13 = vmul.f32 %v13641_v40, %v14345_v57  ;;  %12964 = vmatprep.subr.mxu1 %v16340_v19 }
 0x3bc   :  { %12957 = vmatmul.mubr.msk.f32.vlgmr.msra.gmra.mrb[46].mxu1 %vm1480_vm3, %v1656_v13 }
 0x3bd   :  { %12966 = vmatprep.mubr.msk.f32.mxu1 %vm13915_vm1, %v16340_v19 }
 0x3c0   :  { %12965 = vmatpush3.xpose.msk.msra.mxu1 %vm250_vm2, %v14290_v4  ;;  %v3888_v4 = vpop.permute.xlu1 %3887 }
 0x3c1   :  { %12974 = vmatprep.subr.mxu1 %v16340_v19 }
 0x3c3   :  { %12967 = vmatmul.mubr.msk.f32.vlgmr.msra.gmra.mrb[48].mxu1 %vm250_vm2, %v14300_v12 }
 0x3c4   :  { %12975 = vmatpush3.xpose.msk.msra.mxu1 %vm250_vm2, %v14294_v7  ;;  %12976 = vmatprep.mubr.msk.f32.mxu1 %vm13915_vm1, %v16340_v19  ;;  %v3890_v7 = vpop.permute.xlu0 %3889  ;;  %v4046_v9 = vpop.permute.xlu1 %4045 }
 0x3c5   :  { %12984 = vmatprep.subr.mxu1 %v16340_v19 }
 0x3c7   :  { %12977 = vmatmul.mubr.msk.f32.vlgmr.msra.gmra.mrb[50].mxu1 %vm250_vm2, %v14304_v15 }
 0x3c8   :  { %12985 = vmatpush3.xpose.msk.msra.mxu1 %vm250_vm2, %v14298_v10  ;;  %12986 = vmatprep.mubr.msk.f32.mxu1 %vm13915_vm1, %v16340_v19 }
 0x3c9   :  { %12994 = vmatprep.subr.mxu1 %v16340_v19 }
 0x3cb   :  { %12987 = vmatmul.mubr.msk.f32.vlgmr.msra.gmra.mrb[52].mxu1 %vm250_vm2, %v14307_v24 }
 0x3cc   :  { %12995 = vmatpush3.xpose.msk.msra.mxu1 %vm250_vm2, %v14302_v14  ;;  %12996 = vmatprep.mubr.msk.f32.mxu1 %vm13915_vm1, %v16340_v19 }
 0x3cd   :  { %13004 = vmatprep.subr.mxu1 %v16340_v19 }
 0x3cf   :  { %12997 = vmatmul.mubr.msk.f32.vlgmr.msra.gmra.mrb[54].mxu1 %vm250_vm2, %v14359_v17 }
 0x3d0   :  { %13005 = vmatpush3.xpose.msk.msra.mxu1 %vm250_vm2, %v14361_v21  ;;  %13006 = vmatprep.mubr.msk.f32.mxu1 %vm13915_vm1, %v16340_v19 }
 0x3d1   :  { %13014 = vmatprep.subr.mxu1 %v16340_v19 }
 0x3d3   :  { %13007 = vmatmul.mubr.msk.f32.vlgmr.msra.gmra.mrb[56].mxu1 %vm250_vm2, %v3576_v20 }
 0x3d4   :  { %13015 = vmatpush3.xpose.msk.msra.mxu1 %vm250_vm2, %v3734_v0  ;;  %13016 = vmatprep.mubr.msk.f32.mxu1 %vm13915_vm1, %v16340_v19 }
 0x3d5   :  { %13024 = vmatprep.subr.mxu1 %v16340_v19 }
 0x3d7   :  { %13017 = vmatmul.mubr.msk.f32.vlgmr.msra.gmra.mrb[58].mxu1 %vm250_vm2, %v3732_v2 }
 0x3d8   :  { %13025 = vmatpush3.xpose.msk.msra.mxu1 %vm250_vm2, %v3890_v7  ;;  %13026 = vmatprep.mubr.msk.f32.mxu1 %vm13915_vm1, %v16340_v19 }
 0x3d9   :  { %13034 = vmatprep.subr.mxu1 %v16340_v19 }
 0x3db   :  { %13027 = vmatmul.mubr.msk.f32.vlgmr.msra.gmra.mrb[60].mxu1 %vm250_vm2, %v3888_v4  ;;  %v1483_v10 = vpop.xlane.xlu0 %1482 }
 0x3dc   :  { %13035 = vmatpush3.xpose.msk.msra.mxu1 %vm250_vm2, %v4046_v9  ;;  %v1529_v12 = vsub.f32 %v14237_v6, %v1483_v10  ;;  %13036 = vmatprep.mubr.msk.f32.mxu1 %vm13915_vm1, %v16340_v19 }
 0x3dd   :  { %13044 = vmatprep.subr.mxu1 %v16340_v19 }
 0x3de   :  { %v1545_v14 = vmul.f32 1.442695, %v1529_v12 }
 0x3df   :  { %v4044_v15 = vpop.permute.xlu0 %4043 }
 0x3e0   :  { %13642 = vpow2.f32 %v1545_v14  ;;  %13037 = vmatmul.mubr.msk.f32.vlgmr.msra.gmra.mrb[62].mxu1 %vm250_vm2, %v4044_v15 }
 0x3e1   :  { %13046 = vmatprep.mubr.msk.f32.mxu1 %vm13915_vm1, %v16340_v19 }
 0x3ea   :  { %v14475_v24 = vpop.eup %13642 }
 0x3eb   :  { %v1489_v59 = vpop.xlane.xlu1 %1488  ;;  %v1577_v57 = vsel %vm1480_vm3, %v14475_v24, 0.0 }
 0x3ec   :  { %v1531_v6 = vsub.f32 %v14243_v11, %v1489_v59  ;;  %1578 = vadd.xlane.f32.xlu1 %v1577_v57 }
 0x3ee   :  { %v1549_v17 = vmul.f32 1.442695, %v1531_v6 }
 0x3ef   :  { %v1495_v21 = vpop.xlane.xlu1 %1494 }
 0x3f0   :  { %13644 = vpow2.f32 %v1549_v17  ;;  %v1533_v41 = vsub.f32 %v14246_v16, %v1495_v21 }
 0x3f2   :  { %v1553_v54 = vmul.f32 1.442695, %v1533_v41 }
 0x3f3   :  { %v1501_v55 = vpop.xlane.xlu1 %1500 }
 0x3f4   :  { %13646 = vpow2.f32 %v1553_v54  ;;  %v1535_v34 = vsub.f32 %v14252_v22, %v1501_v55 }
 0x3f6   :  { %v1557_v56 = vmul.f32 1.442695, %v1535_v34 }
 0x3f7   :  { %v1507_v1 = vpop.xlane.xlu1 %1506 }
 0x3f8   :  { %13648 = vpow2.f32 %v1557_v56  ;;  %v1537_v58 = vsub.f32 %v14254_v23, %v1507_v1 }
 0x3fa   :  { %v14483_v42 = vpop.eup %13644  ;;  %v1561_v60 = vmul.f32 1.442695, %v1537_v58 }
 0x3fb   :  { %v1513_v11 = vpop.xlane.xlu1 %1512  ;;  %v1583_v8 = vsel %vm1480_vm3, %v14483_v42, 0.0 }
 0x3fc   :  { %13650 = vpow2.f32 %v1561_v60  ;;  %v1539_v16 = vsub.f32 %v14256_v28, %v1513_v11  ;;  %1584 = vadd.xlane.f32.xlu1 %v1583_v8 }
 0x3fe   :  { %v14488_v63 = vpop.eup %13646  ;;  %v1565_v61 = vmul.f32 1.442695, %v1539_v16 }
 0x3ff   :  { %v1589_v22 = vsel %vm1480_vm3, %v14488_v63, 0.0  ;;  %v1525_v20 = vpop.xlane.xlu1 %1524 }
 0x400   :  { %13652 = vpow2.f32 %v1565_v61  ;;  %1590 = vadd.xlane.f32.xlu1 %v1589_v22  ;;  %v1543_v26 = vsub.f32 %v14264_v53, %v1525_v20 }
 0x402   :  { %v14492_v23 = vpop.eup %13648  ;;  %v1573_v29 = vmul.f32 1.442695, %v1543_v26 }
 0x403   :  { %v1595_v18 = vsel %vm1480_vm3, %v14492_v23, 0.0 }
 0x404   :  { %1596 = vadd.xlane.f32.xlu1 %v1595_v18 }
 0x406   :  { %v14496_v3 = vpop.eup %13650 }
 0x407   :  { %v1601_v28 = vsel %vm1480_vm3, %v14496_v3, 0.0 }
 0x408   :  { %1602 = vadd.xlane.f32.xlu1 %v1601_v28 }
 0x40a   :  { %v14500_v62 = vpop.eup %13652 }
 0x40b   :  { %v1607_v0 = vsel %vm1480_vm3, %v14500_v62, 0.0 }
 0x40c   :  { %1608 = vadd.xlane.f32.xlu1 %v1607_v0 }
 0x410   :  { %v1519_v35 = vpop.xlane.xlu0 %1518 }
 0x411   :  { %v1541_v27 = vsub.f32 %v14259_v36, %v1519_v35 }
 0x413   :  { %v1569_v33 = vmul.f32 1.442695, %v1541_v27 }
 0x415   :  { %13654 = vpow2.f32 %v1569_v33 }
 0x416   :  { %13656 = vpow2.f32 %v1573_v29 }
 0x41d   :  { %1657 = vrot.lane.b32.xlu1 %v14046_v25, %s13917_s2 }
 0x41f   :  { %v14508_v39 = vpop.eup %13654 }
 0x420   :  { %v1613_v5 = vsel %vm1480_vm3, %v14508_v39, 0.0  ;;  %v14512_v40 = vpop.eup %13656 }
 0x421   :  { %1961 = vrot.lane.b32.xlu1 %v14060_v37, %s13917_s2  ;;  %1614 = vadd.xlane.f32.xlu0 %v1613_v5  ;;  %v1619_v36 = vsel %vm1480_vm3, %v14512_v40, 0.0 }
 0x425   :  { %2113 = vrot.lane.b32.xlu1 %v14068_v43, %s13917_s2  ;;  %1620 = vadd.xlane.f32.xlu0 %v1619_v36 }
 0x429   :  { %2265 = vrot.lane.b32.xlu1 %v14086_v48, %s13917_s2 }
 0x42d   :  { %2417 = vrot.lane.b32.xlu1 %v14094_v50, %s13917_s2 }
 0x431   :  { %2721 = vrot.lane.b32.xlu1 %v14106_v52, %s13917_s2 }
 0x435   :  { %2873 = vrot.lane.b32.xlu1 %v14046_v25, %s13919_s16 }
 0x439   :  { %3029 = vrot.lane.b32.xlu1 %v14052_v31, %s13919_s16 }
 0x43a   :  { %v14530_v53 = vpop.f32.mrb[32].mxu1 }
 0x43b   :  { %16376 = vst [vmem:[#allocation13_spill] sm:$0xff] %v14530_v53  ;;  %v12888_v13 = vpop.f32.mrb[33].mxu1  ;;  %1809 = vrot.lane.b32.xlu0 %v14052_v31, %s13917_s2 }
 0x43d   :  { %3185 = vrot.lane.b32.xlu1 %v14060_v37, %s13919_s16 }
 0x43f   :  { %2569 = vrot.lane.b32.xlu0 %v14096_v51, %s13917_s2 }
 0x441   :  { %3341 = vrot.lane.b32.xlu1 %v14068_v43, %s13919_s16 }
 0x442   :  { %v14540_v2 = vpop.f32.mrb[34].mxu1 }
 0x443   :  { %16377 = vst [vmem:[#allocation14_spill] sm:$0xff] %v14540_v2  ;;  %v12898_v4 = vpop.f32.mrb[35].mxu1  ;;  %2875 = vrot.lane.b32.xlu0 %v14046_v25, %s13918_s15 }
 0x445   :  { %3497 = vrot.lane.b32.xlu1 %v14086_v48, %s13919_s16 }
 0x447   :  { %3031 = vrot.lane.b32.xlu0 %v14052_v31, %s13918_s15 }
 0x449   :  { %3653 = vrot.lane.b32.xlu1 %v14094_v50, %s13919_s16 }
 0x44a   :  { %v14550_v7 = vpop.f32.mrb[36].mxu1 }
 0x44b   :  { %16378 = vst [vmem:[#allocation15_spill] sm:$0xff] %v14550_v7  ;;  %v12908_v9 = vpop.f32.mrb[37].mxu1  ;;  %3187 = vrot.lane.b32.xlu0 %v14060_v37, %s13918_s15 }
 0x44d   :  { %3809 = vrot.lane.b32.xlu1 %v14096_v51, %s13919_s16 }
 0x44f   :  { %3343 = vrot.lane.b32.xlu0 %v14068_v43, %s13918_s15 }
 0x451   :  { %3965 = vrot.lane.b32.xlu1 %v14106_v52, %s13919_s16 }
 0x452   :  { %v14560_v10 = vpop.f32.mrb[38].mxu1 }
 0x453   :  { %16379 = vst [vmem:[#allocation16_spill] sm:$0xff] %v14560_v10  ;;  %v12918_v12 = vpop.f32.mrb[39].mxu1  ;;  %3499 = vrot.lane.b32.xlu0 %v14086_v48, %s13918_s15 }
 0x455   :  { %4373 = vrot.lane.b32.xlu1 %v14050_v30, %s13920_s17 }
 0x456   :  { %v14566_v14 = vpop.f32.mrb[40].mxu1 }
 0x457   :  { %16380 = vst [vmem:[#allocation17_spill] sm:$0xff] %v14566_v14  ;;  %v12928_v15 = vpop.f32.mrb[41].mxu1  ;;  %3655 = vrot.lane.b32.xlu0 %v14094_v50, %s13918_s15 }
 0x459   :  { %4677 = vrot.lane.b32.xlu1 %v14062_v38, %s13920_s17 }
 0x45b   :  { %3811 = vrot.lane.b32.xlu0 %v14096_v51, %s13918_s15 }
 0x45d   :  { %4829 = vrot.lane.b32.xlu1 %v14070_v44, %s13920_s17 }
 0x45f   :  { %3967 = vrot.lane.b32.xlu0 %v14106_v52, %s13918_s15 }
 0x461   :  { %4981 = vrot.lane.b32.xlu1 %v14076_v45, %s13920_s17 }
 0x463   :  { %4525 = vrot.lane.b32.xlu0 %v14054_v32, %s13920_s17 }
 0x465   :  { %5133 = vrot.lane.b32.xlu1 %v14078_v46, %s13920_s17 }
 0x467   :  { %5285 = vrot.lane.b32.xlu0 %v14084_v47, %s13920_s17 }
 0x469   :  { %5437 = vrot.lane.b32.xlu1 %v14092_v49, %s13920_s17 }
 0x46b   :  { %5908 = vrot.lane.b32.xlu0 %v14046_v25, %s13921_s18 }
 0x46d   :  { %5906 = vrot.lane.b32.xlu1 %v14046_v25, %s13922_s19 }
 0x46f   :  { %5986 = vrot.lane.b32.xlu0 %v14050_v30, %s13921_s18 }
 0x471   :  { %5984 = vrot.lane.b32.xlu1 %v14050_v30, %s13922_s19 }
 0x473   :  { %6064 = vrot.lane.b32.xlu0 %v14052_v31, %s13921_s18 }
 0x475   :  { %6062 = vrot.lane.b32.xlu1 %v14052_v31, %s13922_s19 }
 0x477   :  { %6142 = vrot.lane.b32.xlu0 %v14054_v32, %s13921_s18 }
 0x479   :  { %6140 = vrot.lane.b32.xlu1 %v14054_v32, %s13922_s19  ;;  %v1579_v59 = vpop.xlane.xlu1 %1578 }
 0x47a   :  { %13658 = vrcp.f32 %v1579_v59 }
 0x47b   :  { %6220 = vrot.lane.b32.xlu0 %v14060_v37, %s13921_s18 }
 0x47d   :  { %6218 = vrot.lane.b32.xlu1 %v14060_v37, %s13922_s19 }
 0x47f   :  { %6298 = vrot.lane.b32.xlu0 %v14062_v38, %s13921_s18 }
 0x481   :  { %6296 = vrot.lane.b32.xlu1 %v14062_v38, %s13922_s19 }
 0x483   :  { %6376 = vrot.lane.b32.xlu0 %v14068_v43, %s13921_s18 }
 0x484   :  { %v13659_v8 = vpop.eup %13658 }
 0x485   :  { %6374 = vrot.lane.b32.xlu1 %v14068_v43, %s13922_s19  ;;  %v1641_v18 = vmul.f32 %v13659_v8, %v14475_v24 }
 0x487   :  { %v14616_v57 = vpop.f32.mrb[42].mxu1  ;;  %6532 = vrot.lane.b32.xlu0 %v14086_v48, %s13921_s18 }
 0x488   :  { %16381 = vst [vmem:[#allocation18_spill] sm:$0xff] %v14616_v57  ;;  %v12938_v6 = vpop.f32.mrb[43].mxu1 }
 0x489   :  { %6454 = vrot.lane.b32.xlu1 %v14070_v44, %s13921_s18  ;;  %v1585_v17 = vpop.xlane.xlu1 %1584 }
 0x48a   :  { %13660 = vrcp.f32 %v1585_v17 }
 0x48b   :  { %v14622_v21 = vpop.f32.mrb[44].mxu1 }
 0x48c   :  { %16382 = vst [vmem:[#allocation19_spill] sm:$0xff] %v14622_v21  ;;  %v12948_v41 = vpop.f32.mrb[45].mxu1 }
 0x48d   :  { %6452 = vrot.lane.b32.xlu1 %v14070_v44, %s13922_s19  ;;  %v1591_v54 = vpop.xlane.xlu1 %1590 }
 0x48e   :  { %13662 = vrcp.f32 %v1591_v54 }
 0x48f   :  { %v14626_v55 = vpop.f32.mrb[46].mxu1 }
 0x490   :  { %16383 = vst [vmem:[#allocation20_spill] sm:$0xff] %v14626_v55  ;;  %v12958_v34 = vpop.f32.mrb[47].mxu1 }
 0x491   :  { %v1597_v56 = vpop.xlane.xlu1 %1596 }
 0x492   :  { %13664 = vrcp.f32 %v1597_v56 }
 0x494   :  { %v13661_v6 = vpop.eup %13660 }
 0x495   :  { %v1603_v1 = vpop.xlane.xlu1 %1602  ;;  %v1643_v8 = vmul.f32 %v13661_v6, %v14483_v42 }
 0x496   :  { %v14628_v58 = vpop.f32.mrb[48].mxu1  ;;  %13666 = vrcp.f32 %v1603_v1 }
 0x497   :  { %v12968_v60 = vpop.f32.mrb[49].mxu1 }
 0x499   :  { %v1609_v11 = vpop.xlane.xlu1 %1608 }
 0x49a   :  { %v14630_v16 = vpop.f32.mrb[50].mxu1  ;;  %13668 = vrcp.f32 %v1609_v11 }
 0x49b   :  { %v12978_v61 = vpop.f32.mrb[51].mxu1 }
 0x49c   :  { %v13663_v61 = vpop.eup %13662 }
 0x49d   :  { %v1658_v22 = vpop.permute.xlu1 %1657  ;;  %v1645_v56 = vmul.f32 %v13663_v61, %v14488_v63  ;;  %v13665_v1 = vpop.eup %13664 }
 0x49e   :  { %v14633_v28 = vpop.f32.mrb[52].mxu1  ;;  %12880 = vmatpush3.msra.mxu0 %v1658_v22  ;;  %v1647_v11 = vmul.f32 %v13665_v1, %v14492_v23 }
 0x49f   :  { %v12988_v0 = vpop.f32.mrb[53].mxu1  ;;  %12882 = vmatmul.mubr.msk.f32.vlgmr.msra.gmra.mrb[16].mxu0 %vm1480_vm3, %v1641_v18  ;;  %12889 = vmatprep.subr.mxu0 %v16340_v19 }
 0x4a0   :  { %12891 = vmatprep.mubr.msk.f32.mxu0 %vm13915_vm1, %v16340_v19  ;;  %v13667_v22 = vpop.eup %13666 }
 0x4a1   :  { %v1962_v20 = vpop.permute.xlu1 %1961  ;;  %v1649_v0 = vmul.f32 %v13667_v22, %v14496_v3 }
 0x4a2   :  { %v14639_v26 = vpop.f32.mrb[54].mxu1 }
 0x4a3   :  { %v12998_v35 = vpop.f32.mrb[55].mxu1 }
 0x4a5   :  { %v2114_v27 = vpop.permute.xlu1 %2113 }
 0x4a6   :  { %v14641_v29 = vpop.f32.mrb[56].mxu1 }
 0x4a7   :  { %v13008_v33 = vpop.f32.mrb[57].mxu1 }
 0x4a9   :  { %v2266_v24 = vpop.permute.xlu1 %2265 }
 0x4aa   :  { %v14643_v5 = vpop.f32.mrb[58].mxu1 }
 0x4ab   :  { %v13018_v36 = vpop.f32.mrb[59].mxu1 }
 0x4ad   :  { %v2418_v13 = vpop.permute.xlu1 %2417 }
 0x4ae   :  { %v14645_v4 = vpop.f32.mrb[60].mxu1  ;;  %v1615_v9 = vpop.xlane.xlu0 %1614 }
 0x4af   :  { %v13028_v12 = vpop.f32.mrb[61].mxu1  ;;  %13670 = vrcp.f32 %v1615_v9 }
 0x4b1   :  { %v2722_v15 = vpop.permute.xlu1 %2721 }
 0x4b2   :  { %v1621_v59 = vpop.xlane.xlu0 %1620 }
 0x4b3   :  { %v14647_v41 = vpop.f32.mrb[62].mxu1  ;;  %13672 = vrcp.f32 %v1621_v59 }
 0x4b4   :  { %v13038_v34 = vpop.f32.mrb[63].mxu1 }
 0x4b5   :  { %v2874_v60 = vpop.permute.xlu1 %2873 }
 0x4b6   :  { %v1810_v17 = vpop.permute.xlu0 %1809 }
 0x4b7   :  { %12890 = vmatpush3.msra.mxu0 %v1810_v17 }
 0x4b8   :  { %12892 = vmatmul.mubr.msk.f32.vlgmr.msra.gmra.mrb[18].mxu0 %vm1480_vm3, %v1643_v8  ;;  %12899 = vmatprep.subr.mxu0 %v16340_v19 }
 0x4b9   :  { %v3030_v54 = vpop.permute.xlu1 %3029  ;;  %12900 = vmatpush3.msra.mxu0 %v1962_v20  ;;  %12901 = vmatprep.mubr.msk.f32.mxu0 %vm13915_vm1, %v16340_v19  ;;  %v13669_v20 = vpop.eup %13668 }
 0x4ba   :  { %12909 = vmatprep.subr.mxu0 %v16340_v19  ;;  %v2570_v18 = vpop.permute.xlu0 %2569  ;;  %v13671_v33 = vpop.eup %13670 }
 0x4bb   :  { %v1653_v3 = vmul.f32 %v13671_v33, %v14508_v39 }
 0x4bc   :  { %12902 = vmatmul.mubr.msk.f32.vlgmr.msra.gmra.mrb[20].mxu0 %vm1480_vm3, %v1645_v56 }
 0x4bd   :  { %12910 = vmatpush3.msra.mxu0 %v2114_v27  ;;  %v3186_v42 = vpop.permute.xlu1 %3185  ;;  %12911 = vmatprep.mubr.msk.f32.mxu0 %vm13915_vm1, %v16340_v19  ;;  %v1651_v27 = vmul.f32 %v13669_v20, %v14500_v62  ;;  %v13673_v36 = vpop.eup %13672 }
 0x4be   :  { %12919 = vmatprep.subr.mxu0 %v16340_v19  ;;  %v2876_v35 = vpop.permute.xlu0 %2875  ;;  %v1655_v62 = vmul.f32 %v13673_v36, %v14512_v40 }
 0x4c0   :  { %12912 = vmatmul.mubr.msk.f32.vlgmr.msra.gmra.mrb[22].mxu0 %vm1480_vm3, %v1647_v11 }
 0x4c1   :  { %12920 = vmatpush3.msra.mxu0 %v2266_v24  ;;  %v3342_v63 = vpop.permute.xlu1 %3341  ;;  %12921 = vmatprep.mubr.msk.f32.mxu0 %vm13915_vm1, %v16340_v19 }
 0x4c2   :  { %12929 = vmatprep.subr.mxu0 %v16340_v19 }
 0x4c4   :  { %12922 = vmatmul.mubr.msk.f32.vlgmr.msra.gmra.mrb[24].mxu0 %vm1480_vm3, %v1649_v0 }
 0x4c5   :  { %12930 = vmatpush3.msra.mxu0 %v2418_v13  ;;  %v3498_v23 = vpop.permute.xlu1 %3497  ;;  %12931 = vmatprep.mubr.msk.f32.mxu0 %vm13915_vm1, %v16340_v19  ;;  %v3032_v13 = vpop.permute.xlu0 %3031 }
 0x4c6   :  { %12939 = vmatprep.subr.mxu0 %v16340_v19 }
 0x4c8   :  { %12932 = vmatmul.mubr.msk.f32.vlgmr.msra.gmra.mrb[26].mxu0 %vm1480_vm3, %v1651_v27 }
 0x4c9   :  { %12940 = vmatpush3.msra.mxu0 %v2570_v18  ;;  %v3654_v24 = vpop.permute.xlu1 %3653  ;;  %12941 = vmatprep.mubr.msk.f32.mxu0 %vm13915_vm1, %v16340_v19  ;;  %v3188_v12 = vpop.permute.xlu0 %3187 }
 0x4ca   :  { %12949 = vmatprep.subr.mxu0 %v16340_v19 }
 0x4cc   :  { %12942 = vmatmul.mubr.msk.f32.vlgmr.msra.gmra.mrb[28].mxu0 %vm1480_vm3, %v1653_v3 }
 0x4cd   :  { %12950 = vmatpush3.msra.mxu0 %v2722_v15  ;;  %v3810_v9 = vpop.permute.xlu1 %3809  ;;  %12951 = vmatprep.mubr.msk.f32.mxu0 %vm13915_vm1, %v16340_v19  ;;  %v3344_v15 = vpop.permute.xlu0 %3343 }
 0x4ce   :  { %12959 = vmatprep.subr.mxu0 %v16340_v19 }
 0x4d0   :  { %12952 = vmatmul.mubr.msk.f32.vlgmr.msra.gmra.mrb[30].mxu0 %vm1480_vm3, %v1655_v62 }
 0x4d1   :  { %v3966_v59 = vpop.permute.xlu1 %3965  ;;  %12961 = vmatprep.mubr.msk.f32.mxu0 %vm13915_vm1, %v16340_v19  ;;  %v3500_v40 = vpop.permute.xlu0 %3499 }
 0x4d4   :  { %12960 = vmatpush3.xpose.msk.msra.mxu0 %vm250_vm2, %v2876_v35 }
 0x4d5   :  { %v4374_v39 = vpop.permute.xlu1 %4373  ;;  %12969 = vmatprep.subr.mxu0 %v16340_v19  ;;  %v3656_v6 = vpop.permute.xlu0 %3655 }
 0x4d6   :  { %13045 = vmatpush3.msra.mxu1 %v4374_v39  ;;  %v4136_v39 = vsel %vm1480_vm3, %v14633_v28, -inf }
 0x4d7   :  { %12962 = vmatmul.mubr.msk.f32.vlgmr.msra.gmra.mrb[32].mxu0 %vm250_vm2, %v2874_v60  ;;  %13054 = vmatprep.subr.mxu1 %v16340_v19 }
 0x4d8   :  { %12970 = vmatpush3.xpose.msk.msra.mxu0 %vm250_vm2, %v3032_v13  ;;  %12971 = vmatprep.mubr.msk.f32.mxu0 %vm13915_vm1, %v16340_v19 }
 0x4d9   :  { %12979 = vmatprep.subr.mxu0 %v16340_v19  ;;  %v3812_v34 = vpop.permute.xlu0 %3811 }
 0x4db   :  { %12972 = vmatmul.mubr.msk.f32.vlgmr.msra.gmra.mrb[34].mxu0 %vm250_vm2, %v3030_v54 }
 0x4dc   :  { %12980 = vmatpush3.xpose.msk.msra.mxu0 %vm250_vm2, %v3188_v12  ;;  %12981 = vmatprep.mubr.msk.f32.mxu0 %vm13915_vm1, %v16340_v19 }
 0x4dd   :  { %12989 = vmatprep.subr.mxu0 %v16340_v19  ;;  %v3968_v60 = vpop.permute.xlu0 %3967 }
 0x4df   :  { %12982 = vmatmul.mubr.msk.f32.vlgmr.msra.gmra.mrb[36].mxu0 %vm250_vm2, %v3186_v42 }
 0x4e0   :  { %12990 = vmatpush3.xpose.msk.msra.mxu0 %vm250_vm2, %v3344_v15  ;;  %12991 = vmatprep.mubr.msk.f32.mxu0 %vm13915_vm1, %v16340_v19  ;;  %v4130_v15 = vsel %vm1480_vm3, %v14630_v16, -inf }
 0x4e1   :  { %12999 = vmatprep.subr.mxu0 %v16340_v19 }
 0x4e3   :  { %12992 = vmatmul.mubr.msk.f32.vlgmr.msra.gmra.mrb[38].mxu0 %vm250_vm2, %v3342_v63 }
 0x4e4   :  { %13000 = vmatpush3.xpose.msk.msra.mxu0 %vm250_vm2, %v3500_v40  ;;  %13001 = vmatprep.mubr.msk.f32.mxu0 %vm13915_vm1, %v16340_v19 }
 0x4e5   :  { %13009 = vmatprep.subr.mxu0 %v16340_v19 }
 0x4e7   :  { %13002 = vmatmul.mubr.msk.f32.vlgmr.msra.gmra.mrb[40].mxu0 %vm250_vm2, %v3498_v23 }
 0x4e8   :  { %13010 = vmatpush3.xpose.msk.msra.mxu0 %vm250_vm2, %v3656_v6  ;;  %13011 = vmatprep.mubr.msk.f32.mxu0 %vm13915_vm1, %v16340_v19 }
 0x4e9   :  { %13019 = vmatprep.subr.mxu0 %v16340_v19 }
 0x4eb   :  { %13012 = vmatmul.mubr.msk.f32.vlgmr.msra.gmra.mrb[42].mxu0 %vm250_vm2, %v3654_v24 }
 0x4ec   :  { %13020 = vmatpush3.xpose.msk.msra.mxu0 %vm250_vm2, %v3812_v34  ;;  %13021 = vmatprep.mubr.msk.f32.mxu0 %vm13915_vm1, %v16340_v19  ;;  %v4142_v34 = vsel %vm1480_vm3, %v14639_v26, -inf }
 0x4ed   :  { %13029 = vmatprep.subr.mxu0 %v16340_v19 }
 0x4ef   :  { %13022 = vmatmul.mubr.msk.f32.vlgmr.msra.gmra.mrb[44].mxu0 %vm250_vm2, %v3810_v9  ;;  %v4124_v9 = vsel %vm1480_vm3, %v14628_v58, -inf }
 0x4f0   :  { %13030 = vmatpush3.xpose.msk.msra.mxu0 %vm250_vm2, %v3968_v60  ;;  %13031 = vmatprep.mubr.msk.f32.mxu0 %vm13915_vm1, %v16340_v19  ;;  %v4154_v60 = vsel %vm1480_vm3, %v14643_v5, -inf }
 0x4f1   :  { %13039 = vmatprep.subr.mxu0 %v16340_v19 }
 0x4f3   :  { %13032 = vmatmul.mubr.msk.f32.vlgmr.msra.gmra.mrb[46].mxu0 %vm250_vm2, %v3966_v59 }
 0x4f4   :  { %13041 = vmatprep.mubr.msk.f32.mxu0 %vm13915_vm1, %v16340_v19 }
 0x572   :  { %v14725_v17 = vpop.f32.mrb[16].mxu0 }
 0x573   :  { %16384 = vst [vmem:[#allocation21_spill] sm:$0xff] %v14725_v17  ;;  %v12883_v8 = vpop.f32.mrb[17].mxu0 }
 0x58b   :  { %v14727_v61 = vpop.f32.mrb[18].mxu0 }
 0x58c   :  { %16385 = vst [vmem:[#allocation22_spill] sm:$0xff] %v14727_v61  ;;  %v12893_v54 = vpop.f32.mrb[19].mxu0 }
 0x58f   :  { %v14729_v56 = vpop.f32.mrb[20].mxu0 }
 0x590   :  { %16386 = vst [vmem:[#allocation23_spill] sm:$0xff] %v14729_v56  ;;  %v12903_v1 = vpop.f32.mrb[21].mxu0 }
 0x591   :  { %v4148_v1 = vsel %vm1480_vm3, %v14641_v29, -inf }
 0x593   :  { %v14731_v42 = vpop.f32.mrb[22].mxu0 }
 0x594   :  { %16387 = vst [vmem:[#allocation24_spill] sm:$0xff] %v14731_v42  ;;  %v12913_v11 = vpop.f32.mrb[23].mxu0 }
 0x597   :  { %v14733_v22 = vpop.f32.mrb[24].mxu0 }
 0x598   :  { %16388 = vst [vmem:[#allocation25_spill] sm:$0xff] %v14733_v22  ;;  %v12923_v18 = vpop.f32.mrb[25].mxu0 }
 0x59b   :  { %v14735_v63 = vpop.f32.mrb[26].mxu0 }
 0x59c   :  { %16389 = vst [vmem:[#allocation26_spill] sm:$0xff] %v14735_v63  ;;  %v12933_v0 = vpop.f32.mrb[27].mxu0 }
 0x59f   :  { %v14737_v20 = vpop.f32.mrb[28].mxu0 }
 0x5a0   :  { %16390 = vst [vmem:[#allocation27_spill] sm:$0xff] %v14737_v20  ;;  %v12943_v35 = vpop.f32.mrb[29].mxu0 }
 0x5a3   :  { %v14739_v23 = vpop.f32.mrb[30].mxu0 }
 0x5a4   :  { %16391 = vst [vmem:[#allocation28_spill] sm:$0xff] %v14739_v23  ;;  %v12953_v27 = vpop.f32.mrb[31].mxu0 }
 0x5aa   :  { %v14741_v33 = vpop.f32.mrb[32].mxu0 }
 0x5ab   :  { %v12963_v24 = vpop.f32.mrb[33].mxu0  ;;  %v4121_v3 = vsel %vm1480_vm3, %v14741_v33, -inf }
 0x5ac   :  { %4122 = vmax.xlane.f32.xlu0 %v4121_v3  ;;  %v4160_v24 = vsel %vm1480_vm3, %v14645_v4, -inf }
 0x5ae   :  { %v14745_v36 = vpop.f32.mrb[34].mxu0 }
 0x5af   :  { %v12973_v13 = vpop.f32.mrb[35].mxu0  ;;  %v4127_v62 = vsel %vm1480_vm3, %v14745_v36, -inf }
 0x5b0   :  { %4125 = vmax.xlane.f32.xlu0 %v4124_v9  ;;  %4128 = vmax.xlane.f32.xlu1 %v4127_v62  ;;  %v14783_v9 = vpop.permute.xlu1 %4677  ;;  %v4166_v62 = vsel %vm1480_vm3, %v14647_v41, -inf }
 0x5b2   :  { %v14751_v12 = vpop.f32.mrb[36].mxu0 }
 0x5b3   :  { %v12983_v59 = vpop.f32.mrb[37].mxu0  ;;  %v4133_v0 = vsel %vm1480_vm3, %v14751_v12, -inf }
 0x5b4   :  { %4137 = vmax.xlane.f32.xlu0 %v4136_v39  ;;  %4131 = vmax.xlane.f32.xlu1 %v4130_v15  ;;  %v14787_v59 = vpop.permute.xlu1 %4829 }
 0x5b6   :  { %v14757_v40 = vpop.f32.mrb[38].mxu0 }
 0x5b7   :  { %v12993_v6 = vpop.f32.mrb[39].mxu0  ;;  %v4139_v23 = vsel %vm1480_vm3, %v14757_v40, -inf }
 0x5b8   :  { %4143 = vmax.xlane.f32.xlu0 %v4142_v34  ;;  %4155 = vmax.xlane.f32.xlu1 %v4154_v60  ;;  %v14789_v39 = vpop.permute.xlu1 %4981  ;;  %v14795_v6 = vpop.permute.xlu0 %4525 }
 0x5ba   :  { %v14763_v8 = vpop.f32.mrb[40].mxu0 }
 0x5bb   :  { %v13003_v54 = vpop.f32.mrb[41].mxu0  ;;  %v4145_v57 = vsel %vm1480_vm3, %v14763_v8, -inf }
 0x5bc   :  { %4149 = vmax.xlane.f32.xlu0 %v4148_v1  ;;  %v14791_v15 = vpop.permute.xlu1 %5133  ;;  %v14801_v60 = vpop.permute.xlu0 %5285 }
 0x5be   :  { %v14767_v11 = vpop.f32.mrb[42].mxu0 }
 0x5bf   :  { %v13013_v18 = vpop.f32.mrb[43].mxu0 }
 0x5c0   :  { %4134 = vmax.xlane.f32.xlu0 %v4133_v0  ;;  %v14799_v34 = vpop.permute.xlu1 %5437  ;;  %v14805_v1 = vpop.permute.xlu0 %5908 }
 0x5c2   :  { %v14771_v35 = vpop.f32.mrb[44].mxu0 }
 0x5c3   :  { %v13023_v27 = vpop.f32.mrb[45].mxu0 }
 0x5c4   :  { %4161 = vmax.xlane.f32.xlu0 %v4160_v24  ;;  %v14803_v54 = vpop.permute.xlu1 %5906  ;;  %v14809_v0 = vpop.permute.xlu0 %5986 }
 0x5c6   :  { %v14775_v3 = vpop.f32.mrb[46].mxu0 }
 0x5c7   :  { %v13033_v13 = vpop.f32.mrb[47].mxu0 }
 0x5c8   :  { %v14807_v18 = vpop.permute.xlu1 %5984  ;;  %v14813_v24 = vpop.permute.xlu0 %6064 }
 0x5c9   :  { %6530 = vrot.lane.b32.xlu1 %v14086_v48, %s13922_s19 }
 0x5cc   :  { %v14811_v27 = vpop.permute.xlu1 %6062 }
 0x5d0   :  { %v14815_v13 = vpop.permute.xlu1 %6140 }
 0x5d4   :  { %v14819_v19 = vpop.permute.xlu1 %6218 }
 0x5d8   :  { %v14825_v21 = vpop.permute.xlu1 %6296 }
 0x5da   :  { %6688 = vrot.lane.b32.xlu0 %v14094_v50, %s13921_s18 }
 0x5dc   :  { %v14831_v63 = vpop.permute.xlu1 %6374 }
 0x5de   :  { %6686 = vrot.lane.b32.xlu0 %v14094_v50, %s13922_s19 }
 0x5e0   :  { %v14835_v22 = vpop.permute.xlu1 %6454 }
 0x5e4   :  { %v14839_v42 = vpop.permute.xlu1 %6452 }
 0x5ed   :  { %4167 = vmax.xlane.f32.xlu1 %v4166_v62  ;;  %v14817_v62 = vpop.permute.xlu0 %6142 }
 0x5f1   :  { %v14821_v55 = vpop.permute.xlu0 %6220 }
 0x5f5   :  { %v14827_v20 = vpop.permute.xlu0 %6298 }
 0x5f9   :  { %v14833_v14 = vpop.permute.xlu0 %6376 }
 0x5fd   :  { %v14837_v10 = vpop.permute.xlu0 %6532 }
 0x5fe   :  { %6610 = vrot.lane.b32.xlu1 %v14076_v45, %s13921_s18 }
 0x602   :  { %6608 = vrot.lane.b32.xlu1 %v14076_v45, %s13922_s19 }
 0x626   :  { %4140 = vmax.xlane.f32.xlu1 %v4139_v23 }
 0x62a   :  { %4146 = vmax.xlane.f32.xlu1 %v4145_v57 }
 0x639   :  { %v14841_v7 = vpop.xlane.xlu0 %4122 }
 0x63d   :  { %v14843_v23 = vpop.xlane.xlu1 %4128  ;;  %v4126_v56 = vpop.xlane.xlu0 %4125 }
 0x63e   :  { %v4170_v2 = vsub.f32 %v14628_v58, %v4126_v56 }
 0x640   :  { %v4187_v61 = vmul.f32 1.442695, %v4170_v2 }
 0x641   :  { %v4132_v53 = vpop.xlane.xlu1 %4131  ;;  %v4138_v57 = vpop.xlane.xlu0 %4137 }
 0x642   :  { %v4172_v17 = vsub.f32 %v14630_v16, %v4132_v53  ;;  %v4174_v45 = vsub.f32 %v14633_v28, %v4138_v57  ;;  %13674 = vpow2.f32 %v4187_v61 }
 0x644   :  { %v4191_v44 = vmul.f32 1.442695, %v4172_v17  ;;  %v4195_v38 = vmul.f32 1.442695, %v4174_v45 }
 0x645   :  { %v4156_v32 = vpop.xlane.xlu1 %4155  ;;  %v4144_v30 = vpop.xlane.xlu0 %4143 }
 0x646   :  { %13676 = vpow2.f32 %v4191_v44  ;;  %v4180_v50 = vsub.f32 %v14643_v5, %v4156_v32  ;;  %v4176_v31 = vsub.f32 %v14639_v26, %v4144_v30 }
 0x647   :  { %13678 = vpow2.f32 %v4195_v38 }
 0x648   :  { %v4199_v48 = vmul.f32 1.442695, %v4176_v31  ;;  %v4207_v58 = vmul.f32 1.442695, %v4180_v50 }
 0x649   :  { %v4150_v2 = vpop.xlane.xlu0 %4149 }
 0x64a   :  { %v4178_v56 = vsub.f32 %v14641_v29, %v4150_v2  ;;  %13680 = vpow2.f32 %v4199_v48  ;;  %v14888_v2 = vpop.permute.xlu1 %6530 }
 0x64b   :  { %13682 = vpow2.f32 %v4207_v58 }
 0x64c   :  { %v4203_v53 = vmul.f32 1.442695, %v4178_v56  ;;  %v14851_v16 = vpop.eup %13674 }
 0x64d   :  { %v14853_v28 = vpop.xlane.xlu0 %4134  ;;  %v4220_v44 = vsel %vm1480_vm3, %v14851_v16, 0.0 }
 0x64e   :  { %13684 = vpow2.f32 %v4203_v53  ;;  %4221 = vadd.xlane.f32.xlu0 %v4220_v44 }
 0x650   :  { %v14857_v32 = vpop.eup %13676 }
 0x651   :  { %v14859_v30 = vpop.eup %13678  ;;  %v4162_v31 = vpop.xlane.xlu0 %4161  ;;  %v4226_v38 = vsel %vm1480_vm3, %v14857_v32, 0.0 }
 0x652   :  { %v4182_v45 = vsub.f32 %v14645_v4, %v4162_v31  ;;  %4227 = vadd.xlane.f32.xlu1 %v4226_v38  ;;  %v4232_v48 = vsel %vm1480_vm3, %v14859_v30, 0.0 }
 0x653   :  { %4233 = vadd.xlane.f32.xlu0 %v4232_v48  ;;  %v4171_v48 = vsub.f32 %v14745_v36, %v14843_v23 }
 0x654   :  { %v4211_v50 = vmul.f32 1.442695, %v4182_v45  ;;  %v14866_v26 = vpop.eup %13680  ;;  %v4157_v45 = vsel %vm1480_vm3, %v14771_v35, -inf }
 0x655   :  { %v4238_v29 = vsel %vm1480_vm3, %v14866_v26, 0.0  ;;  %v14870_v5 = vpop.eup %13682 }
 0x656   :  { %13686 = vpow2.f32 %v4211_v50  ;;  %4239 = vadd.xlane.f32.xlu1 %v4238_v29  ;;  %v4250_v61 = vsel %vm1480_vm3, %v14870_v5, 0.0  ;;  %v4189_v50 = vmul.f32 1.442695, %v4171_v48  ;;  %v4169_v48 = vsub.f32 %v14741_v33, %v14841_v7 }
 0x658   :  { %v14872_v17 = vpop.eup %13684 }
 0x659   :  { %v4244_v4 = vsel %vm1480_vm3, %v14872_v17, 0.0 }
 0x65a   :  { %4245 = vadd.xlane.f32.xlu0 %v4244_v4  ;;  %4251 = vadd.xlane.f32.xlu1 %v4250_v61  ;;  %v14915_v61 = vpop.permute.xlu0 %6688 }
 0x660   :  { %v14878_v57 = vpop.eup %13686 }
 0x661   :  { %v4256_v58 = vsel %vm1480_vm3, %v14878_v57, 0.0 }
 0x662   :  { %4257 = vadd.xlane.f32.xlu0 %v4256_v58 }
 0x66b   :  { %6764 = vrot.lane.b32.xlu1 %v14078_v46, %s13922_s19 }
 0x66f   :  { %6844 = vrot.lane.b32.xlu1 %v14096_v51, %s13921_s18 }
 0x673   :  { %6842 = vrot.lane.b32.xlu1 %v14096_v51, %s13922_s19 }
 0x67a   :  { %v4168_v56 = vpop.xlane.xlu1 %4167 }
 0x67b   :  { %v4184_v53 = vsub.f32 %v14647_v41, %v4168_v56  ;;  %v4151_v41 = vsel %vm1480_vm3, %v14767_v11, -inf }
 0x67d   :  { %v4215_v44 = vmul.f32 1.442695, %v4184_v53  ;;  %v14921_v53 = vpop.permute.xlu0 %6686 }
 0x67e   :  { %v14911_v29 = vpop.permute.xlu1 %6610 }
 0x67f   :  { %13688 = vpow2.f32 %v4215_v44 }
 0x680   :  { %13690 = vpow2.f32 %v4189_v50 }
 0x682   :  { %v14913_v4 = vpop.permute.xlu1 %6608 }
 0x689   :  { %v14891_v31 = vpop.eup %13688 }
 0x68a   :  { %v4262_v38 = vsel %vm1480_vm3, %v14891_v31, 0.0  ;;  %v14917_v58 = vpop.eup %13690 }
 0x68b   :  { %4263 = vadd.xlane.f32.xlu0 %v4262_v38  ;;  %16392 = vst [vmem:[#allocation29_spill] sm:$0xff] %v14917_v58  ;;  %v4223_v44 = vsel %vm1480_vm3, %v14917_v58, 0.0  ;;  %v4185_v58 = vmul.f32 1.442695, %v4169_v48 }
 0x697   :  { %4158 = vmax.xlane.f32.xlu1 %v4157_v45 }
 0x6a1   :  { %6766 = vrot.lane.b32.xlu0 %v14078_v46, %s13921_s18 }
 0x6a8   :  { %7000 = vrot.lane.b32.xlu1 %v14106_v52, %s13921_s18 }
 0x6ac   :  { %6998 = vrot.lane.b32.xlu1 %v14106_v52, %s13922_s19 }
 0x6b0   :  { %7078 = vrot.lane.b32.xlu1 %v14092_v49, %s13921_s18 }
 0x6b3   :  { %v4141_v56 = vpop.xlane.xlu1 %4140 }
 0x6b4   :  { %7076 = vrot.lane.b32.xlu1 %v14092_v49, %s13922_s19 }
 0x6b7   :  { %v4147_v36 = vpop.xlane.xlu1 %4146 }
 0x6c0   :  { %4152 = vmax.xlane.f32.xlu0 %v4151_v41 }
 0x6d6   :  { %6922 = vrot.lane.b32.xlu0 %v14084_v47, %s13921_s18 }
 0x6d8   :  { %4224 = vadd.xlane.f32.xlu1 %v4223_v44 }
 0x6da   :  { %6920 = vrot.lane.b32.xlu0 %v14084_v47, %s13922_s19  ;;  %v4173_v47 = vsub.f32 %v14751_v12, %v14853_v28  ;;  %v4175_v12 = vsub.f32 %v14757_v40, %v4141_v56  ;;  %v4177_v28 = vsub.f32 %v14763_v8, %v4147_v36 }
 0x6db   :  { %v4222_v23 = vpop.xlane.xlu0 %4221 }
 0x6dc   :  { %13692 = vrcp.f32 %v4222_v23  ;;  %v16393_v23 = vmov 0.0  }
 0x6df   :  { %v4228_v38 = vpop.xlane.xlu1 %4227 }
 0x6e0   :  { %13694 = vrcp.f32 %v4228_v38  ;;  %v4234_v45 = vpop.xlane.xlu0 %4233 }
 0x6e1   :  { %13696 = vrcp.f32 %v4234_v45 }
 0x6e3   :  { %v4240_v41 = vpop.xlane.xlu1 %4239 }
 0x6e4   :  { %13698 = vrcp.f32 %v4240_v41 }
 0x6e6   :  { %v13693_v50 = vpop.eup %13692 }
 0x6e7   :  { %v4246_v49 = vpop.xlane.xlu0 %4245  ;;  %v4282_v46 = vmul.f32 %v13693_v50, %v14851_v16  ;;  %v4252_v33 = vpop.xlane.xlu1 %4251  ;;  %v4193_v16 = vmul.f32 1.442695, %v4173_v47  ;;  %v4197_v47 = vmul.f32 1.442695, %v4175_v12  ;;  %v16399_v12 = vld [vmem:[#allocation5_spill] sm:$0xff] }
 0x6e8   :  { %13700 = vrcp.f32 %v4246_v49 }
 0x6e9   :  { %13047 = vmatmul.mubr.msk.f32.vlgmr.msra.gmra.mrb[64].mxu1 %vm1480_vm3, %v4282_v46  ;;  %13702 = vpow2.f32 %v4185_v58 }
 0x6ea   :  { %v13695_v44 = vpop.eup %13694  ;;  %13055 = vmatpush3.msra.mxu1 %v14795_v6  ;;  %13056 = vmatprep.mubr.msk.f32.mxu1 %vm13915_vm1, %v16393_v23  ;;  %13704 = vrcp.f32 %v4252_v33  ;;  %v16398_v33 = vld [vmem:[#allocation4_spill] sm:$0xff] }
 0x6eb   :  { %v4284_v7 = vmul.f32 %v13695_v44, %v14857_v32  ;;  %13064 = vmatprep.subr.mxu1 %v16393_v23  ;;  %v13697_v38 = vpop.eup %13696  ;;  %13706 = vpow2.f32 %v4193_v16  ;;  %v4201_v32 = vmul.f32 1.442695, %v4177_v28  ;;  %v16396_v44 = vld [vmem:[#allocation12_spill] sm:$0xff] }
 0x6ec   :  { %v4286_v49 = vmul.f32 %v13697_v38, %v14859_v30 }
 0x6ed   :  { %13057 = vmatmul.mubr.msk.f32.vlgmr.msra.gmra.mrb[66].mxu1 %vm1480_vm3, %v4284_v7  ;;  %v16397_v7 = vld [vmem:[#allocation2_spill] sm:$0xff] }
 0x6ee   :  { %13065 = vmatpush3.msra.mxu1 %v14783_v9  ;;  %13066 = vmatprep.mubr.msk.f32.mxu1 %vm13915_vm1, %v16393_v23  ;;  %v13699_v6 = vpop.eup %13698 }
 0x6ef   :  { %v4258_v46 = vpop.xlane.xlu0 %4257  ;;  %13074 = vmatprep.subr.mxu1 %v16393_v23  ;;  %v4288_v40 = vmul.f32 %v13699_v6, %v14866_v26  ;;  %v16400_v6 = vld [vmem:[#allocation6_spill] sm:$0xff] }
 0x6f0   :  { %13708 = vrcp.f32 %v4258_v46 }
 0x6f1   :  { %13067 = vmatmul.mubr.msk.f32.vlgmr.msra.gmra.mrb[68].mxu1 %vm1480_vm3, %v4286_v49  ;;  %13710 = vpow2.f32 %v4197_v47 }
 0x6f2   :  { %13075 = vmatpush3.msra.mxu1 %v14787_v59  ;;  %13076 = vmatprep.mubr.msk.f32.mxu1 %vm13915_vm1, %v16393_v23  ;;  %v13701_v9 = vpop.eup %13700  ;;  %v4163_v59 = vsel %vm1480_vm3, %v14775_v3, -inf  ;;  %13712 = vpow2.f32 %v4201_v32 }
 0x6f3   :  { %13084 = vmatprep.subr.mxu1 %v16393_v23  ;;  %v14956_v8 = vpop.eup %13702  ;;  %v4290_v30 = vmul.f32 %v13701_v9, %v14872_v17 }
 0x6f4   :  { %v13705_v26 = vpop.eup %13704  ;;  %v4217_v58 = vsel %vm1480_vm3, %v14956_v8, 0.0 }
 0x6f5   :  { %13077 = vmatmul.mubr.msk.f32.vlgmr.msra.gmra.mrb[70].mxu1 %vm1480_vm3, %v4288_v40  ;;  %v4292_v56 = vmul.f32 %v13705_v26, %v14870_v5  ;;  %v16401_v40 = vld [vmem:[#allocation7_spill] sm:$0xff] }
 0x6f6   :  { %13085 = vmatpush3.msra.mxu1 %v14789_v39  ;;  %13086 = vmatprep.mubr.msk.f32.mxu1 %vm13915_vm1, %v16393_v23  ;;  %v14966_v39 = vpop.eup %13706 }
 0x6f7   :  { %13094 = vmatprep.subr.mxu1 %v16393_v23 }
 0x6f9   :  { %4164 = vmax.xlane.f32.xlu0 %v4163_v59  ;;  %13087 = vmatmul.mubr.msk.f32.vlgmr.msra.gmra.mrb[72].mxu1 %vm1480_vm3, %v4290_v30 }
 0x6fa   :  { %13095 = vmatpush3.msra.mxu1 %v14791_v15  ;;  %13096 = vmatprep.mubr.msk.f32.mxu1 %vm13915_vm1, %v16393_v23  ;;  %v13709_v17 = vpop.eup %13708  ;;  %v4229_v15 = vsel %vm1480_vm3, %v14966_v39, 0.0 }
 0x6fb   :  { %13104 = vmatprep.subr.mxu1 %v16393_v23  ;;  %v4294_v36 = vmul.f32 %v13709_v17, %v14878_v57  ;;  %v14980_v45 = vpop.eup %13710 }
 0x6fc   :  { %v14989_v5 = vpop.eup %13712 }
 0x6fd   :  { %4218 = vadd.xlane.f32.xlu0 %v4217_v58  ;;  %13097 = vmatmul.mubr.msk.f32.vlgmr.msra.gmra.mrb[74].mxu1 %vm1480_vm3, %v4292_v56  ;;  %v4241_v57 = vsel %vm1480_vm3, %v14989_v5, 0.0 }
 0x6fe   :  { %13105 = vmatpush3.msra.mxu1 %v14801_v60  ;;  %13106 = vmatprep.mubr.msk.f32.mxu1 %vm13915_vm1, %v16393_v23  ;;  %v4235_v60 = vsel %vm1480_vm3, %v14980_v45, 0.0 }
 0x6ff   :  { %13114 = vmatprep.subr.mxu1 %v16393_v23 }
 0x701   :  { %4230 = vadd.xlane.f32.xlu0 %v4229_v15  ;;  %13107 = vmatmul.mubr.msk.f32.vlgmr.msra.gmra.mrb[76].mxu1 %vm1480_vm3, %v4294_v36 }
 0x702   :  { %13115 = vmatpush3.msra.mxu1 %v14799_v34  ;;  %13116 = vmatprep.mubr.msk.f32.mxu1 %vm13915_vm1, %v16393_v23 }
 0x703   :  { %13171 = vmatprep.subr.mxu1 %v16393_v23 }
 0x705   :  { %4236 = vadd.xlane.f32.xlu0 %v4235_v60 }
 0x709   :  { %4242 = vadd.xlane.f32.xlu0 %v4241_v57 }
 0x718   :  { %v4264_v41 = vpop.xlane.xlu0 %4263 }
 0x719   :  { %13714 = vrcp.f32 %v4264_v41 }
 0x723   :  { %v13715_v48 = vpop.eup %13714 }
 0x724   :  { %v4296_v34 = vmul.f32 %v13715_v48, %v14891_v31  ;;  %v16394_v31 = vld [vmem:[#allocation10_spill] sm:$0xff] }
 0x726   :  { %13117 = vmatmul.mubr.msk.f32.vlgmr.msra.gmra.mrb[78].mxu1 %vm1480_vm3, %v4296_v34 }
 0x727   :  { %13172 = vmatpush3.xpose.msk.msra.mxu1 %vm250_vm2, %v14805_v1  ;;  %13173 = vmatprep.mubr.msk.f32.mxu1 %vm13915_vm1, %v16393_v23 }
 0x728   :  { %13176 = vmatprep.subr.mxu1 %v16393_v23 }
 0x72a   :  { %13174 = vmatmul.mubr.msk.f32.vlgmr.msra.gmra.mrb[80].mxu1 %vm250_vm2, %v14803_v54  ;;  %v6765_v54 = vpop.permute.xlu1 %6764 }
 0x72b   :  { %13177 = vmatpush3.xpose.msk.msra.mxu1 %vm250_vm2, %v14809_v0  ;;  %13178 = vmatprep.mubr.msk.f32.mxu1 %vm13915_vm1, %v16393_v23 }
 0x72c   :  { %13181 = vmatprep.subr.mxu1 %v16393_v23 }
 0x72e   :  { %13179 = vmatmul.mubr.msk.f32.vlgmr.msra.gmra.mrb[82].mxu1 %vm250_vm2, %v14807_v18 }
 0x72f   :  { %13182 = vmatpush3.xpose.msk.msra.mxu1 %vm250_vm2, %v14813_v24  ;;  %13183 = vmatprep.mubr.msk.f32.mxu1 %vm13915_vm1, %v16393_v23 }
 0x730   :  { %13186 = vmatprep.subr.mxu1 %v16393_v23 }
 0x732   :  { %13184 = vmatmul.mubr.msk.f32.vlgmr.msra.gmra.mrb[84].mxu1 %vm250_vm2, %v14811_v27 }
 0x733   :  { %13187 = vmatpush3.xpose.msk.msra.mxu1 %vm250_vm2, %v14817_v62  ;;  %13188 = vmatprep.mubr.msk.f32.mxu1 %vm13915_vm1, %v16393_v23 }
 0x734   :  { %13191 = vmatprep.subr.mxu1 %v16393_v23 }
 0x736   :  { %13189 = vmatmul.mubr.msk.f32.vlgmr.msra.gmra.mrb[86].mxu1 %vm250_vm2, %v14815_v13 }
 0x737   :  { %13192 = vmatpush3.xpose.msk.msra.mxu1 %vm250_vm2, %v14821_v55  ;;  %13193 = vmatprep.mubr.msk.f32.mxu1 %vm13915_vm1, %v16393_v23  ;;  %v6845_v55 = vpop.permute.xlu1 %6844 }
 0x738   :  { %13196 = vmatprep.subr.mxu1 %v16393_v23 }
 0x73a   :  { %13194 = vmatmul.mubr.msk.f32.vlgmr.msra.gmra.mrb[88].mxu1 %vm250_vm2, %v14819_v19 }
 0x73b   :  { %13197 = vmatpush3.xpose.msk.msra.mxu1 %vm250_vm2, %v14827_v20  ;;  %13198 = vmatprep.mubr.msk.f32.mxu1 %vm13915_vm1, %v16393_v23  ;;  %v6843_v19 = vpop.permute.xlu1 %6842 }
 0x73c   :  { %13201 = vmatprep.subr.mxu1 %v16393_v23 }
 0x73e   :  { %13199 = vmatmul.mubr.msk.f32.vlgmr.msra.gmra.mrb[90].mxu1 %vm250_vm2, %v14825_v21 }
 0x73f   :  { %13202 = vmatpush3.xpose.msk.msra.mxu1 %vm250_vm2, %v14833_v14  ;;  %13203 = vmatprep.mubr.msk.f32.mxu1 %vm13915_vm1, %v16393_v23  ;;  %v6767_v14 = vpop.permute.xlu0 %6766  ;;  %v4159_v21 = vpop.xlane.xlu1 %4158 }
 0x740   :  { %13206 = vmatprep.subr.mxu1 %v16393_v23 }
 0x742   :  { %13204 = vmatmul.mubr.msk.f32.vlgmr.msra.gmra.mrb[92].mxu1 %vm250_vm2, %v14831_v63 }
 0x743   :  { %13207 = vmatpush3.xpose.msk.msra.mxu1 %vm250_vm2, %v14835_v22  ;;  %13208 = vmatprep.mubr.msk.f32.mxu1 %vm13915_vm1, %v16393_v23 }
 0x744   :  { %13211 = vmatprep.subr.mxu1 %v16393_v23 }
 0x746   :  { %13209 = vmatmul.mubr.msk.f32.vlgmr.msra.gmra.mrb[94].mxu1 %vm250_vm2, %v14839_v42  ;;  %v4181_v42 = vsub.f32 %v14771_v35, %v4159_v21  ;;  %v7001_v35 = vpop.permute.xlu1 %7000 }
 0x747   :  { %13212 = vmatpush3.xpose.msk.msra.mxu1 %vm250_vm2, %v14837_v10  ;;  %13213 = vmatprep.mubr.msk.f32.mxu1 %vm13915_vm1, %v16393_v23 }
 0x748   :  { %13216 = vmatprep.subr.mxu1 %v16393_v23  ;;  %v4209_v63 = vmul.f32 1.442695, %v4181_v42 }
 0x74a   :  { %13214 = vmatmul.mubr.msk.f32.vlgmr.msra.gmra.mrb[96].mxu1 %vm250_vm2, %v14888_v2  ;;  %v6999_v1 = vpop.permute.xlu1 %6998 }
 0x74b   :  { %13217 = vmatpush3.xpose.msk.msra.mxu1 %vm250_vm2, %v14911_v29  ;;  %13218 = vmatprep.mubr.msk.f32.mxu1 %vm13915_vm1, %v16393_v23 }
 0x74c   :  { %13221 = vmatprep.subr.mxu1 %v16393_v23 }
 0x74d   :  { %v4153_v10 = vpop.xlane.xlu0 %4152 }
 0x74e   :  { %v4179_v22 = vsub.f32 %v14767_v11, %v4153_v10  ;;  %13219 = vmatmul.mubr.msk.f32.vlgmr.msra.gmra.mrb[98].mxu1 %vm250_vm2, %v14913_v4  ;;  %v7079_v13 = vpop.permute.xlu1 %7078 }
 0x74f   :  { %13222 = vmatpush3.xpose.msk.msra.mxu1 %vm250_vm2, %v14915_v61  ;;  %13223 = vmatprep.mubr.msk.f32.mxu1 %vm13915_vm1, %v16393_v23 }
 0x750   :  { %v4205_v20 = vmul.f32 1.442695, %v4179_v22  ;;  %13226 = vmatprep.subr.mxu1 %v16393_v23 }
 0x751   :  { %v6923_v11 = vpop.permute.xlu0 %6922 }
 0x752   :  { %13716 = vpow2.f32 %v4205_v20  ;;  %13224 = vmatmul.mubr.msk.f32.vlgmr.msra.gmra.mrb[100].mxu1 %vm250_vm2, %v14921_v53  ;;  %v7077_v2 = vpop.permute.xlu1 %7076  ;;  %v16395_v53 = vld [vmem:[#allocation3_spill] sm:$0xff] }
 0x753   :  { %13227 = vmatpush3.xpose.msk.msra.mxu1 %vm250_vm2, %v6767_v14  ;;  %13228 = vmatprep.mubr.msk.f32.mxu1 %vm13915_vm1, %v16393_v23  ;;  %13718 = vpow2.f32 %v4209_v63 }
 0x754   :  { %13231 = vmatprep.subr.mxu1 %v16393_v23 }
 0x755   :  { %v6921_v0 = vpop.permute.xlu0 %6920 }
 0x756   :  { %13229 = vmatmul.mubr.msk.f32.vlgmr.msra.gmra.mrb[102].mxu1 %vm250_vm2, %v6765_v54 }
 0x757   :  { %13232 = vmatpush3.xpose.msk.msra.mxu1 %vm250_vm2, %v6845_v55  ;;  %13233 = vmatprep.mubr.msk.f32.mxu1 %vm13915_vm1, %v16393_v23 }
 0x758   :  { %13236 = vmatprep.subr.mxu1 %v16393_v23 }
 0x75a   :  { %13234 = vmatmul.mubr.msk.f32.vlgmr.msra.gmra.mrb[104].mxu1 %vm250_vm2, %v6843_v19 }
 0x75b   :  { %13237 = vmatpush3.xpose.msk.msra.mxu1 %vm250_vm2, %v6923_v11  ;;  %13238 = vmatprep.mubr.msk.f32.mxu1 %vm13915_vm1, %v16393_v23 }
 0x75c   :  { %v15087_v18 = vpop.eup %13716  ;;  %13241 = vmatprep.subr.mxu1 %v16393_v23 }
 0x75d   :  { %v4247_v27 = vsel %vm1480_vm3, %v15087_v18, 0.0  ;;  %v15092_v24 = vpop.eup %13718 }
 0x75e   :  { %4248 = vadd.xlane.f32.xlu0 %v4247_v27  ;;  %13239 = vmatmul.mubr.msk.f32.vlgmr.msra.gmra.mrb[106].mxu1 %vm250_vm2, %v6921_v0  ;;  %v4253_v62 = vsel %vm1480_vm3, %v15092_v24, 0.0 }
 0x75f   :  { %13242 = vmatpush3.xpose.msk.msra.mxu1 %vm250_vm2, %v7001_v35  ;;  %13243 = vmatprep.mubr.msk.f32.mxu1 %vm13915_vm1, %v16393_v23 }
 0x760   :  { %13246 = vmatprep.subr.mxu1 %v16393_v23 }
 0x762   :  { %4254 = vadd.xlane.f32.xlu0 %v4253_v62  ;;  %13244 = vmatmul.mubr.msk.f32.vlgmr.msra.gmra.mrb[108].mxu1 %vm250_vm2, %v6999_v1 }
 0x763   :  { %13247 = vmatpush3.xpose.msk.msra.mxu1 %vm250_vm2, %v7079_v13  ;;  %13248 = vmatprep.mubr.msk.f32.mxu1 %vm13915_vm1, %v16393_v23 }
 0x764   :  { %13256 = vmatprep.subr.mxu1 %v16393_v23 }
 0x766   :  { %13249 = vmatmul.mubr.msk.f32.vlgmr.msra.gmra.mrb[110].mxu1 %vm250_vm2, %v7077_v2 }
 0x767   :  { %13258 = vmatprep.mubr.msk.f32.mxu1 %vm13915_vm1, %v16393_v23 }
 0x778   :  { %4297 = vrot.lane.b32.xlu0 %v14046_v25, %s13920_s17 }
 0x77c   :  { %4601 = vrot.lane.b32.xlu0 %v14060_v37, %s13920_s17 }
 0x780   :  { %4753 = vrot.lane.b32.xlu0 %v14068_v43, %s13920_s17 }
 0x784   :  { %4905 = vrot.lane.b32.xlu0 %v16394_v31, %s13920_s17 }
 0x786   :  { %v4165_v29 = vpop.xlane.xlu0 %4164 }
 0x787   :  { %v4183_v4 = vsub.f32 %v14775_v3, %v4165_v29 }
 0x788   :  { %5209 = vrot.lane.b32.xlu0 %v14096_v51, %s13920_s17 }
 0x789   :  { %v4213_v61 = vmul.f32 1.442695, %v4183_v4 }
 0x78a   :  { %v4219_v56 = vpop.xlane.xlu0 %4218 }
 0x78b   :  { %13720 = vpow2.f32 %v4213_v61 }
 0x78c   :  { %7330 = vrot.lane.b32.xlu0 %v14046_v25, %s13923_s20  ;;  %13722 = vrcp.f32 %v4219_v56 }
 0x78e   :  { %v4231_v36 = vpop.xlane.xlu0 %4230 }
 0x790   :  { %7482 = vrot.lane.b32.xlu0 %v16395_v53, %s13923_s20 }
 0x792   :  { %v4237_v60 = vpop.xlane.xlu0 %4236 }
 0x794   :  { %7786 = vrot.lane.b32.xlu0 %v14068_v43, %s13923_s20 }
 0x795   :  { %v15126_v50 = vpop.eup %13720 }
 0x796   :  { %v4259_v3 = vsel %vm1480_vm3, %v15126_v50, 0.0  ;;  %v4243_v57 = vpop.xlane.xlu0 %4242  ;;  %v13723_v34 = vpop.eup %13722 }
 0x797   :  { %4260 = vadd.xlane.f32.xlu1 %v4259_v3  ;;  %v4281_v55 = vmul.f32 %v13723_v34, %v14956_v8 }
 0x798   :  { %7938 = vrot.lane.b32.xlu0 %v16394_v31, %s13923_s20 }
 0x7a8   :  { %4449 = vrot.lane.b32.xlu1 %v16395_v53, %s13920_s17 }
 0x7ac   :  { %5057 = vrot.lane.b32.xlu1 %v16396_v44, %s13920_s17 }
 0x7b0   :  { %5361 = vrot.lane.b32.xlu1 %v14106_v52, %s13920_s17 }
 0x7b4   :  { %7406 = vrot.lane.b32.xlu1 %v16397_v7, %s13923_s20 }
 0x7b8   :  { %7558 = vrot.lane.b32.xlu1 %v16398_v33, %s13923_s20 }
 0x7bc   :  { %7634 = vrot.lane.b32.xlu1 %v14060_v37, %s13923_s20  ;;  %v15144_v38 = vpop.f32.mrb[64].mxu1 }
 0x7bd   :  { %v13048_v16 = vpop.f32.mrb[65].mxu1 }
 0x7c0   :  { %7710 = vrot.lane.b32.xlu1 %v16399_v12, %s13923_s20  ;;  %v15148_v46 = vpop.f32.mrb[66].mxu1 }
 0x7c1   :  { %v13058_v49 = vpop.f32.mrb[67].mxu1 }
 0x7c4   :  { %7862 = vrot.lane.b32.xlu1 %v16400_v6, %s13923_s20  ;;  %v15152_v47 = vpop.f32.mrb[68].mxu1 }
 0x7c5   :  { %v13068_v28 = vpop.f32.mrb[69].mxu1 }
 0x7c6   :  { %v4225_v28 = vpop.xlane.xlu1 %4224 }
 0x7c7   :  { %13724 = vrcp.f32 %v4225_v28 }
 0x7c8   :  { %8014 = vrot.lane.b32.xlu1 %v16401_v40, %s13923_s20  ;;  %v15156_v9 = vpop.f32.mrb[70].mxu1  ;;  %13726 = vrcp.f32 %v4231_v36 }
 0x7c9   :  { %v13078_v32 = vpop.f32.mrb[71].mxu1  ;;  %13728 = vrcp.f32 %v4237_v60 }
 0x7ca   :  { %13730 = vrcp.f32 %v4243_v57 }
 0x7cc   :  { %v15158_v59 = vpop.f32.mrb[72].mxu1 }
 0x7cd   :  { %v13088_v30 = vpop.f32.mrb[73].mxu1 }
 0x7d0   :  { %v15160_v26 = vpop.f32.mrb[74].mxu1 }
 0x7d1   :  { %v13098_v58 = vpop.f32.mrb[75].mxu1 }
 0x7d4   :  { %v15162_v17 = vpop.f32.mrb[76].mxu1 }
 0x7d5   :  { %v13108_v15 = vpop.f32.mrb[77].mxu1 }
 0x7eb   :  { %v15164_v41 = vpop.xlane.xlu0 %4248 }
 0x7ec   :  { %13732 = vrcp.f32 %v15164_v41 }
 0x7ef   :  { %v15166_v48 = vpop.xlane.xlu0 %4254 }
 0x7f0   :  { %13734 = vrcp.f32 %v15166_v48 }
 0x7f3   :  { %v4298_v54 = vpop.permute.xlu0 %4297 }
 0x7f4   :  { %13040 = vmatpush3.msra.mxu0 %v4298_v54 }
 0x7f5   :  { %13042 = vmatmul.mubr.msk.f32.vlgmr.msra.gmra.mrb[48].mxu0 %vm1480_vm3, %v4281_v55  ;;  %13049 = vmatprep.subr.mxu0 %v16393_v23 }
 0x7f6   :  { %13051 = vmatprep.mubr.msk.f32.mxu0 %vm13915_vm1, %v16393_v23 }
 0x7f9   :  { %v15173_v19 = vpop.f32.mrb[78].mxu1 }
 0x7fa   :  { %v13118_v14 = vpop.f32.mrb[79].mxu1 }
 0x7fd   :  { %v15175_v21 = vpop.f32.mrb[80].mxu1 }
 0x7fe   :  { %v13175_v42 = vpop.f32.mrb[81].mxu1  ;;  %v7154_v10 = vsel %vm1480_vm3, %v15175_v21, -inf }
 0x7ff   :  { %7155 = vmax.xlane.f32.xlu0 %v7154_v10  ;;  %v13725_v10 = vpop.eup %13724 }
 0x801   :  { %v15179_v22 = vpop.f32.mrb[82].mxu1 }
 0x802   :  { %v13180_v8 = vpop.f32.mrb[83].mxu1  ;;  %v7157_v63 = vsel %vm1480_vm3, %v15179_v22, -inf }
 0x803   :  { %7158 = vmax.xlane.f32.xlu1 %v7157_v63  ;;  %v4602_v63 = vpop.permute.xlu0 %4601 }
 0x805   :  { %v15183_v20 = vpop.f32.mrb[84].mxu1 }
 0x806   :  { %v13185_v35 = vpop.f32.mrb[85].mxu1  ;;  %v7160_v11 = vsel %vm1480_vm3, %v15183_v20, -inf }
 0x807   :  { %7161 = vmax.xlane.f32.xlu0 %v7160_v11  ;;  %v4754_v57 = vpop.permute.xlu0 %4753 }
 0x809   :  { %v15187_v1 = vpop.f32.mrb[86].mxu1 }
 0x80a   :  { %v13190_v0 = vpop.f32.mrb[87].mxu1  ;;  %v7163_v27 = vsel %vm1480_vm3, %v15187_v1, -inf }
 0x80b   :  { %7164 = vmax.xlane.f32.xlu0 %v7163_v27  ;;  %v16402_v0 = vld [vmem:[#allocation29_spill] sm:$0xff] }
 0x80c   :  { %v4283_v27 = vmul.f32 %v13725_v10, %v16402_v0 }
 0x80d   :  { %v15191_v13 = vpop.f32.mrb[88].mxu1 }
 0x80e   :  { %v13195_v62 = vpop.f32.mrb[89].mxu1  ;;  %v7166_v2 = vsel %vm1480_vm3, %v15191_v13, -inf }
 0x80f   :  { %7167 = vmax.xlane.f32.xlu0 %v7166_v2  ;;  %v13727_v62 = vpop.eup %13726 }
 0x811   :  { %v15195_v29 = vpop.f32.mrb[90].mxu1 }
 0x812   :  { %v13200_v4 = vpop.f32.mrb[91].mxu1  ;;  %v7169_v61 = vsel %vm1480_vm3, %v15195_v29, -inf }
 0x813   :  { %7170 = vmax.xlane.f32.xlu1 %v7169_v61 }
 0x815   :  { %v15199_v3 = vpop.f32.mrb[92].mxu1 }
 0x816   :  { %v13205_v16 = vpop.f32.mrb[93].mxu1  ;;  %v7172_v49 = vsel %vm1480_vm3, %v15199_v3, -inf }
 0x817   :  { %7173 = vmax.xlane.f32.xlu0 %v7172_v49  ;;  %v4285_v16 = vmul.f32 %v13727_v62, %v14966_v39  ;;  %v13729_v49 = vpop.eup %13728 }
 0x818   :  { %v4287_v39 = vmul.f32 %v13729_v49, %v14980_v45 }
 0x819   :  { %v15203_v32 = vpop.f32.mrb[94].mxu1 }
 0x81a   :  { %v13210_v30 = vpop.f32.mrb[95].mxu1  ;;  %v7175_v58 = vsel %vm1480_vm3, %v15203_v32, -inf }
 0x81b   :  { %7176 = vmax.xlane.f32.xlu1 %v7175_v58 }
 0x81d   :  { %v15207_v56 = vpop.f32.mrb[96].mxu1 }
 0x81e   :  { %v13215_v15 = vpop.f32.mrb[97].mxu1  ;;  %v7178_v34 = vsel %vm1480_vm3, %v15207_v56, -inf }
 0x81f   :  { %7179 = vmax.xlane.f32.xlu0 %v7178_v34  ;;  %v13731_v15 = vpop.eup %13730 }
 0x820   :  { %v4289_v45 = vmul.f32 %v13731_v15, %v14989_v5 }
 0x821   :  { %v15211_v54 = vpop.f32.mrb[98].mxu1 }
 0x822   :  { %v13220_v55 = vpop.f32.mrb[99].mxu1  ;;  %v7181_v14 = vsel %vm1480_vm3, %v15211_v54, -inf }
 0x823   :  { %7182 = vmax.xlane.f32.xlu1 %v7181_v14  ;;  %v4906_v55 = vpop.permute.xlu0 %4905 }
 0x824   :  { %v4261_v42 = vpop.xlane.xlu1 %4260 }
 0x825   :  { %v15215_v8 = vpop.f32.mrb[100].mxu1  ;;  %13736 = vrcp.f32 %v4261_v42 }
 0x826   :  { %v13225_v35 = vpop.f32.mrb[101].mxu1  ;;  %v7184_v11 = vsel %vm1480_vm3, %v15215_v8, -inf }
 0x827   :  { %7185 = vmax.xlane.f32.xlu0 %v7184_v11 }
 0x828   :  { %v4450_v36 = vpop.permute.xlu1 %4449 }
 0x829   :  { %13050 = vmatpush3.msra.mxu0 %v4450_v36  ;;  %v15220_v2 = vpop.f32.mrb[102].mxu1 }
 0x82a   :  { %13052 = vmatmul.mubr.msk.f32.vlgmr.msra.gmra.mrb[50].mxu0 %vm1480_vm3, %v4283_v27  ;;  %13059 = vmatprep.subr.mxu0 %v16393_v23  ;;  %v13230_v60 = vpop.f32.mrb[103].mxu1  ;;  %v7187_v4 = vsel %vm1480_vm3, %v15220_v2, -inf  ;;  %v5210_v27 = vpop.permute.xlu0 %5209 }
 0x82b   :  { %7188 = vmax.xlane.f32.xlu1 %v7187_v4  ;;  %13060 = vmatpush3.msra.mxu0 %v4602_v63  ;;  %v13733_v63 = vpop.eup %13732 }
 0x82c   :  { %v5058_v61 = vpop.permute.xlu1 %5057  ;;  %13061 = vmatprep.mubr.msk.f32.mxu0 %vm13915_vm1, %v16393_v23  ;;  %13069 = vmatprep.subr.mxu0 %v16393_v23  ;;  %v4291_v5 = vmul.f32 %v13733_v63, %v15087_v18  ;;  %v13735_v36 = vpop.eup %13734 }
 0x82d   :  { %v15231_v28 = vpop.f32.mrb[104].mxu1  ;;  %v4293_v60 = vmul.f32 %v13735_v36, %v15092_v24 }
 0x82e   :  { %13062 = vmatmul.mubr.msk.f32.vlgmr.msra.gmra.mrb[52].mxu0 %vm1480_vm3, %v4285_v16  ;;  %v13235_v30 = vpop.f32.mrb[105].mxu1  ;;  %v7190_v41 = vsel %vm1480_vm3, %v15231_v28, -inf  ;;  %v15292_v49 = vpop.permute.xlu0 %7330 }
 0x82f   :  { %13070 = vmatpush3.msra.mxu0 %v4754_v57  ;;  %7191 = vmax.xlane.f32.xlu0 %v7190_v41  ;;  %v13737_v4 = vpop.eup %13736  ;;  %v16403_v57 = vld [vmem:[#allocation8_spill] sm:$0xff]  ;;  %v16404_v30 = vld [vmem:[#allocation9_spill] sm:$0xff] }
 0x830   :  { %v5362_v58 = vpop.permute.xlu1 %5361  ;;  %13071 = vmatprep.mubr.msk.f32.mxu0 %vm13915_vm1, %v16393_v23  ;;  %13079 = vmatprep.subr.mxu0 %v16393_v23  ;;  %v4295_v18 = vmul.f32 %v13737_v4, %v15126_v50 }
 0x831   :  { %v15241_v34 = vpop.f32.mrb[106].mxu1 }
 0x832   :  { %13072 = vmatmul.mubr.msk.f32.vlgmr.msra.gmra.mrb[54].mxu0 %vm1480_vm3, %v4287_v39  ;;  %v13240_v14 = vpop.f32.mrb[107].mxu1  ;;  %v7193_v48 = vsel %vm1480_vm3, %v15241_v34, -inf }
 0x833   :  { %13080 = vmatpush3.msra.mxu0 %v4906_v55  ;;  %7194 = vmax.xlane.f32.xlu1 %v7193_v48 }
 0x834   :  { %v7407_v10 = vpop.permute.xlu1 %7406  ;;  %13081 = vmatprep.mubr.msk.f32.mxu0 %vm13915_vm1, %v16393_v23  ;;  %13089 = vmatprep.subr.mxu0 %v16393_v23 }
 0x835   :  { %v15250_v35 = vpop.f32.mrb[108].mxu1  ;;  %13257 = vmatpush3.msra.mxu1 %v7407_v10 }
 0x836   :  { %13082 = vmatmul.mubr.msk.f32.vlgmr.msra.gmra.mrb[56].mxu0 %vm1480_vm3, %v4289_v45  ;;  %v13245_v11 = vpop.f32.mrb[109].mxu1  ;;  %v7196_v42 = vsel %vm1480_vm3, %v15250_v35, -inf  ;;  %13266 = vmatprep.subr.mxu1 %v16393_v23 }
 0x837   :  { %13090 = vmatpush3.msra.mxu0 %v5058_v61  ;;  %7197 = vmax.xlane.f32.xlu0 %v7196_v42  ;;  %v15277_v61 = vld [vmem:[%s16335_s3] sm:$0xff] }
 0x838   :  { %13091 = vmatprep.mubr.msk.f32.mxu0 %vm13915_vm1, %v16393_v23  ;;  %13099 = vmatprep.subr.mxu0 %v16393_v23  ;;  %v5514_v24 = vrot.slane %v15277_v61, 4  ;;  %v15290_v16 = vpop.permute.xlu1 %7558 }
 0x839   :  { %v15260_v0 = vpop.f32.mrb[110].mxu1 }
 0x83a   :  { %13092 = vmatmul.mubr.msk.f32.vlgmr.msra.gmra.mrb[58].mxu0 %vm1480_vm3, %v4291_v5  ;;  %v13250_v62 = vpop.f32.mrb[111].mxu1  ;;  %v7199_v50 = vsel %vm1480_vm3, %v15260_v0, -inf }
 0x83b   :  { %13100 = vmatpush3.msra.mxu0 %v5210_v27  ;;  %13101 = vmatprep.mubr.msk.f32.mxu0 %vm13915_vm1, %v16393_v23 }
 0x83c   :  { %13109 = vmatprep.subr.mxu0 %v16393_v23  ;;  %v15296_v41 = vpop.permute.xlu1 %7634 }
 0x83e   :  { %13102 = vmatmul.mubr.msk.f32.vlgmr.msra.gmra.mrb[60].mxu0 %vm1480_vm3, %v4293_v60 }
 0x83f   :  { %13110 = vmatpush3.msra.mxu0 %v5362_v58  ;;  %13111 = vmatprep.mubr.msk.f32.mxu0 %vm13915_vm1, %v16393_v23  ;;  %v15298_v58 = vpop.permute.xlu0 %7482 }
 0x840   :  { %13119 = vmatprep.subr.msk.mxu0 %vm5563_vm4, %v5514_v24  ;;  %v15300_v39 = vpop.permute.xlu1 %7710 }
 0x842   :  { %13112 = vmatmul.mubr.msk.f32.vlgmr.msra.gmra.mrb[62].mxu0 %vm1480_vm3, %v4295_v18 }
 0x843   :  { %13120 = vmatpush3.msk.msra.mxu0 %vm5563_vm4, %v5514_v24  ;;  %v15302_v15 = vpop.permute.xlu0 %7786 }
 0x844   :  { %8166 = vrot.lane.b32.xlu1 %v16403_v57, %s13923_s20  ;;  %13145 = vmatprep.subr.msk.mxu0 %vm5563_vm4, %v15277_v61  ;;  %v15304_v55 = vpop.permute.xlu1 %7862 }
 0x847   :  { %v15306_v14 = vpop.permute.xlu0 %7938 }
 0x848   :  { %v15308_v48 = vpop.permute.xlu1 %8014 }
 0x84d   :  { %8090 = vrot.lane.b32.xlu0 %v16396_v44, %s13923_s20 }
 0x851   :  { %8242 = vrot.lane.b32.xlu0 %v14096_v51, %s13923_s20 }
 0x868   :  { %7200 = vmax.xlane.f32.xlu1 %v7199_v50 }
 0x879   :  { %8318 = vrot.lane.b32.xlu1 %v16404_v30, %s13923_s20 }
 0x88c   :  { %v7156_v10 = vpop.xlane.xlu0 %7155 }
 0x88d   :  { %v7202_v45 = vsub.f32 %v15175_v21, %v7156_v10 }
 0x88f   :  { %v7218_v63 = vmul.f32 1.442695, %v7202_v45 }
 0x890   :  { %v7159_v11 = vpop.xlane.xlu1 %7158 }
 0x891   :  { %13738 = vpow2.f32 %v7218_v63  ;;  %v7203_v42 = vsub.f32 %v15179_v22, %v7159_v11 }
 0x893   :  { %v7220_v5 = vmul.f32 1.442695, %v7203_v42 }
 0x894   :  { %v7162_v36 = vpop.xlane.xlu0 %7161 }
 0x895   :  { %13740 = vpow2.f32 %v7220_v5  ;;  %v7204_v27 = vsub.f32 %v15183_v20, %v7162_v36 }
 0x897   :  { %v7222_v62 = vmul.f32 1.442695, %v7204_v27 }
 0x898   :  { %v7165_v60 = vpop.xlane.xlu0 %7164 }
 0x899   :  { %13742 = vpow2.f32 %v7222_v62  ;;  %v7205_v4 = vsub.f32 %v15187_v1, %v7165_v60 }
 0x89b   :  { %v15314_v18 = vpop.eup %13738  ;;  %v7224_v24 = vmul.f32 1.442695, %v7205_v4 }
 0x89c   :  { %v7168_v50 = vpop.xlane.xlu0 %7167  ;;  %v7250_v21 = vsel %vm1480_vm3, %v15314_v18, 0.0 }
 0x89d   :  { %13744 = vpow2.f32 %v7224_v24  ;;  %v7206_v22 = vsub.f32 %v15191_v13, %v7168_v50  ;;  %7251 = vadd.xlane.f32.xlu0 %v7250_v21 }
 0x89f   :  { %v15319_v10 = vpop.eup %13740  ;;  %v7226_v45 = vmul.f32 1.442695, %v7206_v22 }
 0x8a0   :  { %v7171_v20 = vpop.xlane.xlu1 %7170  ;;  %v7253_v63 = vsel %vm1480_vm3, %v15319_v10, 0.0 }
 0x8a1   :  { %13746 = vpow2.f32 %v7226_v45  ;;  %v7207_v1 = vsub.f32 %v15195_v29, %v7171_v20  ;;  %7254 = vadd.xlane.f32.xlu1 %v7253_v63 }
 0x8a3   :  { %v15324_v11 = vpop.eup %13742  ;;  %v7228_v42 = vmul.f32 1.442695, %v7207_v1 }
 0x8a4   :  { %v7174_v5 = vpop.xlane.xlu0 %7173  ;;  %v7256_v36 = vsel %vm1480_vm3, %v15324_v11, 0.0 }
 0x8a5   :  { %13748 = vpow2.f32 %v7228_v42  ;;  %v7208_v13 = vsub.f32 %v15199_v3, %v7174_v5  ;;  %7257 = vadd.xlane.f32.xlu0 %v7256_v36 }
 0x8a7   :  { %v15329_v27 = vpop.eup %13744  ;;  %v7230_v62 = vmul.f32 1.442695, %v7208_v13 }
 0x8a8   :  { %v7177_v60 = vpop.xlane.xlu1 %7176  ;;  %v7259_v4 = vsel %vm1480_vm3, %v15329_v27, 0.0 }
 0x8a9   :  { %13750 = vpow2.f32 %v7230_v62  ;;  %v7209_v29 = vsub.f32 %v15203_v32, %v7177_v60  ;;  %7260 = vadd.xlane.f32.xlu1 %v7259_v4 }
 0x8ab   :  { %v15334_v24 = vpop.eup %13746  ;;  %v7232_v50 = vmul.f32 1.442695, %v7209_v29 }
 0x8ac   :  { %v7180_v21 = vpop.xlane.xlu0 %7179  ;;  %v7262_v22 = vsel %vm1480_vm3, %v15334_v24, 0.0 }
 0x8ad   :  { %13752 = vpow2.f32 %v7232_v50  ;;  %v7210_v3 = vsub.f32 %v15207_v56, %v7180_v21  ;;  %7263 = vadd.xlane.f32.xlu0 %v7262_v22 }
 0x8af   :  { %v15339_v45 = vpop.eup %13748  ;;  %v7234_v20 = vmul.f32 1.442695, %v7210_v3 }
 0x8b0   :  { %v7183_v63 = vpop.xlane.xlu1 %7182  ;;  %v7265_v1 = vsel %vm1480_vm3, %v15339_v45, 0.0 }
 0x8b1   :  { %13754 = vpow2.f32 %v7234_v20  ;;  %v7211_v32 = vsub.f32 %v15211_v54, %v7183_v63  ;;  %7266 = vadd.xlane.f32.xlu1 %v7265_v1 }
 0x8b3   :  { %v15344_v42 = vpop.eup %13750  ;;  %v7236_v5 = vmul.f32 1.442695, %v7211_v32 }
 0x8b4   :  { %v7186_v36 = vpop.xlane.xlu0 %7185  ;;  %v7268_v13 = vsel %vm1480_vm3, %v15344_v42, 0.0 }
 0x8b5   :  { %13756 = vpow2.f32 %v7236_v5  ;;  %v7212_v56 = vsub.f32 %v15215_v8, %v7186_v36  ;;  %7269 = vadd.xlane.f32.xlu0 %v7268_v13 }
 0x8b7   :  { %v15349_v62 = vpop.eup %13752  ;;  %v7238_v60 = vmul.f32 1.442695, %v7212_v56 }
 0x8b8   :  { %v7189_v4 = vpop.xlane.xlu1 %7188  ;;  %v7271_v29 = vsel %vm1480_vm3, %v15349_v62, 0.0 }
 0x8b9   :  { %13758 = vpow2.f32 %v7238_v60  ;;  %v7213_v54 = vsub.f32 %v15220_v2, %v7189_v4  ;;  %7272 = vadd.xlane.f32.xlu1 %v7271_v29 }
 0x8bb   :  { %v15354_v50 = vpop.eup %13754  ;;  %v7240_v21 = vmul.f32 1.442695, %v7213_v54 }
 0x8bc   :  { %v7192_v22 = vpop.xlane.xlu0 %7191  ;;  %v7274_v3 = vsel %vm1480_vm3, %v15354_v50, 0.0 }
 0x8bd   :  { %13760 = vpow2.f32 %v7240_v21  ;;  %v7214_v8 = vsub.f32 %v15231_v28, %v7192_v22  ;;  %7275 = vadd.xlane.f32.xlu0 %v7274_v3 }
 0x8bf   :  { %v15359_v20 = vpop.eup %13756  ;;  %v7242_v63 = vmul.f32 1.442695, %v7214_v8 }
 0x8c0   :  { %v7195_v1 = vpop.xlane.xlu1 %7194  ;;  %v7277_v32 = vsel %vm1480_vm3, %v15359_v20, 0.0 }
 0x8c1   :  { %13762 = vpow2.f32 %v7242_v63  ;;  %v7215_v2 = vsub.f32 %v15241_v34, %v7195_v1  ;;  %7278 = vadd.xlane.f32.xlu1 %v7277_v32 }
 0x8c3   :  { %v15364_v5 = vpop.eup %13758  ;;  %v7244_v36 = vmul.f32 1.442695, %v7215_v2 }
 0x8c4   :  { %v7198_v13 = vpop.xlane.xlu0 %7197  ;;  %v7280_v56 = vsel %vm1480_vm3, %v15364_v5, 0.0  ;;  %v15397_v63 = vpop.permute.xlu1 %8166 }
 0x8c5   :  { %13764 = vpow2.f32 %v7244_v36  ;;  %v7216_v28 = vsub.f32 %v15250_v35, %v7198_v13  ;;  %7281 = vadd.xlane.f32.xlu0 %v7280_v56 }
 0x8c7   :  { %v15369_v60 = vpop.eup %13760  ;;  %v7246_v4 = vmul.f32 1.442695, %v7216_v28 }
 0x8c8   :  { %v4369_v29 = vpop.f32.mrb[48].mxu0  ;;  %v7283_v54 = vsel %vm1480_vm3, %v15369_v60, 0.0 }
 0x8c9   :  { %13766 = vpow2.f32 %v7246_v4  ;;  %v13043_v34 = vpop.f32.mrb[49].mxu0  ;;  %13121 = vmatprep.mubr.msk.f32.mxu0 %vm250_vm2, %v4369_v29  ;;  %7284 = vadd.xlane.f32.xlu1 %v7283_v54 }
 0x8ca   :  { %13122 = vmatmul.mubr.msk.f32.vlgmr.msra.gmra.mrb[64].mxu0 %vm250_vm2, %v15144_v38 }
 0x8cb   :  { %v15376_v21 = vpop.eup %13762  ;;  %13146 = vmatpush3.msk.msra.mxu0 %vm5563_vm4, %v15277_v61  ;;  %v16405_v61 = vld [vmem:[#allocation11_spill] sm:$0xff] }
 0x8cc   :  { %v7286_v35 = vsel %vm1480_vm3, %v15376_v21, 0.0  ;;  %13251 = vmatprep.subr.mxu0 %v16393_v23 }
 0x8cd   :  { %7287 = vadd.xlane.f32.xlu0 %v7286_v35 }
 0x8cf   :  { %v15383_v22 = vpop.eup %13764 }
 0x8d0   :  { %v7289_v3 = vsel %vm1480_vm3, %v15383_v22, 0.0 }
 0x8d1   :  { %7290 = vadd.xlane.f32.xlu1 %v7289_v3 }
 0x8d3   :  { %v15387_v8 = vpop.eup %13766 }
 0x8d4   :  { %v7292_v38 = vsel %vm1480_vm3, %v15387_v8, 0.0 }
 0x8d5   :  { %7293 = vadd.xlane.f32.xlu1 %v7292_v38 }
 0x8e6   :  { %8470 = vrot.lane.b32.xlu1 %v16405_v61, %s13923_s20 }
 0x8ea   :  { %8758 = vrot.lane.b32.xlu1 %v14046_v25, %s13924_s23 }
 0x8ee   :  { %8836 = vrot.lane.b32.xlu1 %v16397_v7, %s13924_s23 }
 0x8f2   :  { %8914 = vrot.lane.b32.xlu1 %v16395_v53, %s13924_s23 }
 0x8f5   :  { %v7201_v1 = vpop.xlane.xlu1 %7200 }
 0x8f6   :  { %v7217_v32 = vsub.f32 %v15260_v0, %v7201_v1  ;;  %8992 = vrot.lane.b32.xlu1 %v16398_v33, %s13924_s23  ;;  %v16407_v1 = vld [vmem:[#allocation13_spill] sm:$0xff] }
 0x8f8   :  { %v7248_v2 = vmul.f32 1.442695, %v7217_v32  ;;  %v15461_v32 = vpop.permute.xlu0 %8090 }
 0x8fa   :  { %13768 = vpow2.f32 %v7248_v2  ;;  %9070 = vrot.lane.b32.xlu1 %v14060_v37, %s13924_s23  ;;  %v16410_v2 = vld [vmem:[#allocation23_spill] sm:$0xff] }
 0x8fd   :  { %v4521_v36 = vpop.f32.mrb[50].mxu0 }
 0x8fe   :  { %v13053_v13 = vpop.f32.mrb[51].mxu0  ;;  %13124 = vmatprep.mubr.msk.f32.mxu0 %vm250_vm2, %v4521_v36  ;;  %9148 = vrot.lane.b32.xlu1 %v16399_v12, %s13924_s23  ;;  %v16412_v36 = vld [vmem:[#allocation24_spill] sm:$0xff] }
 0x8ff   :  { %13125 = vmatmul.mubr.msk.f32.gmra.mrb[66].mxu0 %vm250_vm2, %v15148_v46  ;;  %v15475_v13 = vpop.permute.xlu0 %8242 }
 0x901   :  { %v4673_v56 = vpop.f32.mrb[52].mxu0 }
 0x902   :  { %v13063_v0 = vpop.f32.mrb[53].mxu0  ;;  %13127 = vmatprep.mubr.msk.f32.mxu0 %vm250_vm2, %v4673_v56  ;;  %9226 = vrot.lane.b32.xlu1 %v14068_v43, %s13924_s23  ;;  %v16413_v56 = vld [vmem:[#allocation16_spill] sm:$0xff] }
 0x903   :  { %13128 = vmatmul.mubr.msk.f32.gmra.mrb[68].mxu0 %vm250_vm2, %v15152_v47  ;;  %v16414_v0 = vld [vmem:[#allocation25_spill] sm:$0xff] }
 0x904   :  { %v15416_v28 = vpop.eup %13768 }
 0x905   :  { %v4825_v4 = vpop.f32.mrb[54].mxu0  ;;  %v7295_v29 = vsel %vm1480_vm3, %v15416_v28, 0.0 }
 0x906   :  { %v13073_v54 = vpop.f32.mrb[55].mxu0  ;;  %13130 = vmatprep.mubr.msk.f32.mxu0 %vm250_vm2, %v4825_v4  ;;  %7296 = vadd.xlane.f32.xlu0 %v7295_v29  ;;  %v15485_v4 = vpop.permute.xlu1 %8318 }
 0x907   :  { %9304 = vrot.lane.b32.xlu1 %v16400_v6, %s13924_s23  ;;  %13131 = vmatmul.mubr.msk.f32.gmra.mrb[70].mxu0 %vm250_vm2, %v15156_v9  ;;  %v16415_v54 = vld [vmem:[#allocation17_spill] sm:$0xff] }
 0x909   :  { %v4977_v46 = vpop.f32.mrb[56].mxu0 }
 0x90a   :  { %v13083_v34 = vpop.f32.mrb[57].mxu0  ;;  %13133 = vmatprep.mubr.msk.f32.mxu0 %vm250_vm2, %v4977_v46  ;;  %v16416_v46 = vld [vmem:[#allocation26_spill] sm:$0xff] }
 0x90b   :  { %9462 = vrot.lane.b32.xlu1 %v16401_v40, %s13925_s24  ;;  %13134 = vmatmul.mubr.msk.f32.gmra.mrb[72].mxu0 %vm250_vm2, %v15158_v59 }
 0x90d   :  { %v5129_v47 = vpop.f32.mrb[58].mxu0 }
 0x90e   :  { %v13093_v35 = vpop.f32.mrb[59].mxu0  ;;  %13136 = vmatprep.mubr.msk.f32.mxu0 %vm250_vm2, %v5129_v47  ;;  %v16417_v47 = vld [vmem:[#allocation18_spill] sm:$0xff] }
 0x90f   :  { %9460 = vrot.lane.b32.xlu1 %v16401_v40, %s13924_s23  ;;  %13137 = vmatmul.mubr.msk.f32.gmra.mrb[74].mxu0 %vm250_vm2, %v15160_v26  ;;  %v16406_v26 = vld [vmem:[#allocation21_spill] sm:$0xff]  ;;  %v16418_v35 = vld [vmem:[#allocation27_spill] sm:$0xff] }
 0x911   :  { %v5281_v9 = vpop.f32.mrb[60].mxu0 }
 0x912   :  { %v13103_v3 = vpop.f32.mrb[61].mxu0  ;;  %13139 = vmatprep.mubr.msk.f32.mxu0 %vm250_vm2, %v5281_v9 }
 0x913   :  { %9618 = vrot.lane.b32.xlu1 %v16403_v57, %s13925_s24  ;;  %13140 = vmatmul.mubr.msk.f32.gmra.mrb[76].mxu0 %vm250_vm2, %v15162_v17  ;;  %v16408_v17 = vld [vmem:[#allocation22_spill] sm:$0xff]  ;;  %v16419_v3 = vld [vmem:[#allocation19_spill] sm:$0xff] }
 0x915   :  { %v5433_v59 = vpop.f32.mrb[62].mxu0 }
 0x916   :  { %v13113_v38 = vpop.f32.mrb[63].mxu0  ;;  %13142 = vmatprep.mubr.msk.f32.mxu0 %vm250_vm2, %v5433_v59  ;;  %v16420_v59 = vld [vmem:[#allocation28_spill] sm:$0xff] }
 0x917   :  { %9616 = vrot.lane.b32.xlu1 %v16403_v57, %s13924_s23  ;;  %13143 = vmatmul.mubr.msk.f32.gmra.mrb[78].mxu0 %vm250_vm2, %v15173_v19  ;;  %v16409_v19 = vld [vmem:[#allocation14_spill] sm:$0xff] }
 0x918   :  { %13147 = vmatprep.mubr.msk.f32.mxu0 %vm250_vm2, %v16406_v26 }
 0x91b   :  { %9774 = vrot.lane.b32.xlu1 %v16404_v30, %s13925_s24  ;;  %13148 = vmatmul.mubr.msk.f32.vlgmr.msra.gmra.mrb[64].mxu0 %vm250_vm2, %v16407_v1  ;;  %v16421_v1 = vld [vmem:[#allocation20_spill] sm:$0xff] }
 0x91c   :  { %13252 = vmatpush3.msra.mxu0 %v15292_v49  ;;  %13150 = vmatprep.mubr.msk.f32.mxu0 %vm250_vm2, %v16408_v17  ;;  %v16411_v49 = vld [vmem:[#allocation15_spill] sm:$0xff] }
 0x91d   :  { %8394 = vrot.lane.b32.xlu0 %v14106_v52, %s13923_s20  ;;  %13261 = vmatprep.subr.mxu0 %v16393_v23 }
 0x91f   :  { %9772 = vrot.lane.b32.xlu1 %v16404_v30, %s13924_s23  ;;  %13151 = vmatmul.mubr.msk.f32.gmra.mrb[66].mxu0 %vm250_vm2, %v16409_v19 }
 0x920   :  { %13153 = vmatprep.mubr.msk.f32.mxu0 %vm250_vm2, %v16410_v2 }
 0x921   :  { %8760 = vrot.lane.b32.xlu0 %v14046_v25, %s13925_s24 }
 0x923   :  { %9930 = vrot.lane.b32.xlu1 %v16405_v61, %s13925_s24  ;;  %13154 = vmatmul.mubr.msk.f32.gmra.mrb[68].mxu0 %vm250_vm2, %v16411_v49 }
 0x924   :  { %13156 = vmatprep.mubr.msk.f32.mxu0 %vm250_vm2, %v16412_v36 }
 0x925   :  { %8838 = vrot.lane.b32.xlu0 %v16397_v7, %s13925_s24 }
 0x927   :  { %9928 = vrot.lane.b32.xlu1 %v16405_v61, %s13924_s23  ;;  %13157 = vmatmul.mubr.msk.f32.gmra.mrb[70].mxu0 %vm250_vm2, %v16413_v56 }
 0x928   :  { %13159 = vmatprep.mubr.msk.f32.mxu0 %vm250_vm2, %v16414_v0 }
 0x929   :  { %8916 = vrot.lane.b32.xlu0 %v16395_v53, %s13925_s24 }
 0x92a   :  { %v7252_v29 = vpop.xlane.xlu0 %7251 }
 0x92b   :  { %13160 = vmatmul.mubr.msk.f32.gmra.mrb[72].mxu0 %vm250_vm2, %v16415_v54  ;;  %13770 = vrcp.f32 %v7252_v29 }
 0x92c   :  { %13162 = vmatprep.mubr.msk.f32.mxu0 %vm250_vm2, %v16416_v46 }
 0x92d   :  { %8994 = vrot.lane.b32.xlu0 %v16398_v33, %s13925_s24 }
 0x92e   :  { %v7255_v34 = vpop.xlane.xlu1 %7254 }
 0x92f   :  { %13772 = vrcp.f32 %v7255_v34  ;;  %13163 = vmatmul.mubr.msk.f32.gmra.mrb[74].mxu0 %vm250_vm2, %v16417_v47 }
 0x930   :  { %13165 = vmatprep.mubr.msk.f32.mxu0 %vm250_vm2, %v16418_v35 }
 0x931   :  { %9072 = vrot.lane.b32.xlu0 %v14060_v37, %s13925_s24 }
 0x932   :  { %v7258_v9 = vpop.xlane.xlu0 %7257 }
 0x933   :  { %13774 = vrcp.f32 %v7258_v9  ;;  %13166 = vmatmul.mubr.msk.f32.gmra.mrb[76].mxu0 %vm250_vm2, %v16419_v3 }
 0x934   :  { %13168 = vmatprep.mubr.msk.f32.mxu0 %vm250_vm2, %v16420_v59 }
 0x935   :  { %9150 = vrot.lane.b32.xlu0 %v16399_v12, %s13925_s24  ;;  %v13771_v38 = vpop.eup %13770 }
 0x936   :  { %v7261_v26 = vpop.xlane.xlu1 %7260  ;;  %v7314_v19 = vmul.f32 %v13771_v38, %v15314_v18 }
 0x937   :  { %13776 = vrcp.f32 %v7261_v26  ;;  %13169 = vmatmul.mubr.msk.f32.gmra.mrb[78].mxu0 %vm250_vm2, %v16421_v1 }
 0x938   :  { %13253 = vmatprep.mubr.msk.f32.mxu0 %vm13915_vm1, %v16393_v23 }
 0x939   :  { %v13773_v17 = vpop.eup %13772  ;;  %9228 = vrot.lane.b32.xlu0 %v14068_v43, %s13925_s24 }
 0x93a   :  { %v7264_v2 = vpop.xlane.xlu0 %7263  ;;  %v7315_v49 = vmul.f32 %v13773_v17, %v15319_v10 }
 0x93b   :  { %13778 = vrcp.f32 %v7264_v2  ;;  %13254 = vmatmul.mubr.msk.f32.vlgmr.msra.gmra.mrb[80].mxu0 %vm1480_vm3, %v7314_v19 }
 0x93c   :  { %13262 = vmatpush3.msra.mxu0 %v15298_v58  ;;  %13259 = vmatmul.mubr.msk.f32.vlgmr.msra.gmra.mrb[112].mxu1 %vm1480_vm3, %v7315_v49 }
 0x93d   :  { %v13775_v36 = vpop.eup %13774  ;;  %13267 = vmatpush3.msra.mxu1 %v15290_v16  ;;  %9306 = vrot.lane.b32.xlu0 %v16400_v6, %s13925_s24 }
 0x93e   :  { %v7267_v18 = vpop.xlane.xlu1 %7266  ;;  %13263 = vmatprep.mubr.msk.f32.mxu0 %vm13915_vm1, %v16393_v23  ;;  %13271 = vmatprep.subr.mxu0 %v16393_v23  ;;  %v7316_v10 = vmul.f32 %v13775_v36, %v15324_v11 }
 0x93f   :  { %13780 = vrcp.f32 %v7267_v18  ;;  %13268 = vmatprep.mubr.msk.f32.mxu1 %vm13915_vm1, %v16393_v23  ;;  %13276 = vmatprep.subr.mxu1 %v16393_v23 }
 0x940   :  { %13264 = vmatmul.mubr.msk.f32.vlgmr.msra.gmra.mrb[82].mxu0 %vm1480_vm3, %v7316_v10 }
 0x941   :  { %v13777_v16 = vpop.eup %13776  ;;  %9384 = vrot.lane.b32.xlu0 %v16394_v31, %s13925_s24  ;;  %13272 = vmatpush3.msra.mxu0 %v15296_v41 }
 0x942   :  { %v7270_v58 = vpop.xlane.xlu0 %7269  ;;  %v7317_v56 = vmul.f32 %v13777_v16, %v15329_v27  ;;  %13273 = vmatprep.mubr.msk.f32.mxu0 %vm13915_vm1, %v16393_v23  ;;  %13281 = vmatprep.subr.mxu0 %v16393_v23 }
 0x943   :  { %13782 = vrcp.f32 %v7270_v58 }
 0x944   :  { %13269 = vmatmul.mubr.msk.f32.vlgmr.msra.gmra.mrb[114].mxu1 %vm1480_vm3, %v7317_v56 }
 0x945   :  { %v13779_v11 = vpop.eup %13778  ;;  %13277 = vmatpush3.msra.mxu1 %v15300_v39  ;;  %9382 = vrot.lane.b32.xlu0 %v16394_v31, %s13924_s23 }
 0x946   :  { %v7273_v0 = vpop.xlane.xlu1 %7272  ;;  %v7318_v41 = vmul.f32 %v13779_v11, %v15334_v24  ;;  %13278 = vmatprep.mubr.msk.f32.mxu1 %vm13915_vm1, %v16393_v23  ;;  %13286 = vmatprep.subr.mxu1 %v16393_v23 }
 0x947   :  { %13784 = vrcp.f32 %v7273_v0 }
 0x948   :  { %13274 = vmatmul.mubr.msk.f32.vlgmr.msra.gmra.mrb[84].mxu0 %vm1480_vm3, %v7318_v41 }
 0x949   :  { %v13781_v27 = vpop.eup %13780  ;;  %9540 = vrot.lane.b32.xlu0 %v16396_v44, %s13925_s24  ;;  %13282 = vmatpush3.msra.mxu0 %v15302_v15 }
 0x94a   :  { %v7276_v39 = vpop.xlane.xlu0 %7275  ;;  %v7319_v29 = vmul.f32 %v13781_v27, %v15339_v45  ;;  %13283 = vmatprep.mubr.msk.f32.mxu0 %vm13915_vm1, %v16393_v23  ;;  %13291 = vmatprep.subr.mxu0 %v16393_v23 }
 0x94b   :  { %13786 = vrcp.f32 %v7276_v39 }
 0x94c   :  { %13279 = vmatmul.mubr.msk.f32.vlgmr.msra.gmra.mrb[116].mxu1 %vm1480_vm3, %v7319_v29 }
 0x94d   :  { %v13783_v24 = vpop.eup %13782  ;;  %13287 = vmatpush3.msra.mxu1 %v15304_v55  ;;  %9538 = vrot.lane.b32.xlu0 %v16396_v44, %s13924_s23 }
 0x94e   :  { %v7279_v54 = vpop.xlane.xlu1 %7278  ;;  %v7320_v15 = vmul.f32 %v13783_v24, %v15344_v42  ;;  %13288 = vmatprep.mubr.msk.f32.mxu1 %vm13915_vm1, %v16393_v23  ;;  %13296 = vmatprep.subr.mxu1 %v16393_v23 }
 0x94f   :  { %13788 = vrcp.f32 %v7279_v54 }
 0x950   :  { %13284 = vmatmul.mubr.msk.f32.vlgmr.msra.gmra.mrb[86].mxu0 %vm1480_vm3, %v7320_v15 }
 0x951   :  { %v13785_v45 = vpop.eup %13784  ;;  %9696 = vrot.lane.b32.xlu0 %v14096_v51, %s13925_s24  ;;  %13292 = vmatpush3.msra.mxu0 %v15306_v14 }
 0x952   :  { %v7282_v55 = vpop.xlane.xlu0 %7281  ;;  %v7321_v46 = vmul.f32 %v13785_v45, %v15349_v62  ;;  %13293 = vmatprep.mubr.msk.f32.mxu0 %vm13915_vm1, %v16393_v23  ;;  %13301 = vmatprep.subr.mxu0 %v16393_v23 }
 0x953   :  { %13790 = vrcp.f32 %v7282_v55 }
 0x954   :  { %13289 = vmatmul.mubr.msk.f32.vlgmr.msra.gmra.mrb[118].mxu1 %vm1480_vm3, %v7321_v46 }
 0x955   :  { %v13787_v42 = vpop.eup %13786  ;;  %13297 = vmatpush3.msra.mxu1 %v15308_v48  ;;  %9694 = vrot.lane.b32.xlu0 %v14096_v51, %s13924_s23 }
 0x956   :  { %v7285_v34 = vpop.xlane.xlu1 %7284  ;;  %v7322_v14 = vmul.f32 %v13787_v42, %v15354_v50  ;;  %13298 = vmatprep.mubr.msk.f32.mxu1 %vm13915_vm1, %v16393_v23  ;;  %13306 = vmatprep.subr.mxu1 %v16393_v23 }
 0x957   :  { %13792 = vrcp.f32 %v7285_v34 }
 0x958   :  { %13294 = vmatmul.mubr.msk.f32.vlgmr.msra.gmra.mrb[88].mxu0 %vm1480_vm3, %v7322_v14 }
 0x959   :  { %v13789_v62 = vpop.eup %13788  ;;  %9852 = vrot.lane.b32.xlu0 %v14106_v52, %s13925_s24  ;;  %13302 = vmatpush3.msra.mxu0 %v15461_v32 }
 0x95a   :  { %v7288_v48 = vpop.xlane.xlu0 %7287  ;;  %v7323_v47 = vmul.f32 %v13789_v62, %v15359_v20  ;;  %13303 = vmatprep.mubr.msk.f32.mxu0 %vm13915_vm1, %v16393_v23  ;;  %13311 = vmatprep.subr.mxu0 %v16393_v23 }
 0x95b   :  { %13794 = vrcp.f32 %v7288_v48 }
 0x95c   :  { %13299 = vmatmul.mubr.msk.f32.vlgmr.msra.gmra.mrb[120].mxu1 %vm1480_vm3, %v7323_v47 }
 0x95d   :  { %v13791_v50 = vpop.eup %13790  ;;  %13307 = vmatpush3.msra.mxu1 %v15397_v63  ;;  %9850 = vrot.lane.b32.xlu0 %v14106_v52, %s13924_s23 }
 0x95e   :  { %v7291_v35 = vpop.xlane.xlu1 %7290  ;;  %v7324_v32 = vmul.f32 %v13791_v50, %v15364_v5  ;;  %13308 = vmatprep.mubr.msk.f32.mxu1 %vm13915_vm1, %v16393_v23  ;;  %13316 = vmatprep.subr.mxu1 %v16393_v23 }
 0x95f   :  { %13796 = vrcp.f32 %v7291_v35 }
 0x960   :  { %13304 = vmatmul.mubr.msk.f32.vlgmr.msra.gmra.mrb[90].mxu0 %vm1480_vm3, %v7324_v32 }
 0x961   :  { %v13793_v20 = vpop.eup %13792  ;;  %13312 = vmatpush3.msra.mxu0 %v15475_v13  ;;  %13313 = vmatprep.mubr.msk.f32.mxu0 %vm13915_vm1, %v16393_v23 }
 0x962   :  { %v7325_v63 = vmul.f32 %v13793_v20, %v15369_v60  ;;  %13321 = vmatprep.subr.mxu0 %v16393_v23  ;;  %v7294_v9 = vpop.xlane.xlu1 %7293 }
 0x963   :  { %13798 = vrcp.f32 %v7294_v9 }
 0x964   :  { %13309 = vmatmul.mubr.msk.f32.vlgmr.msra.gmra.mrb[122].mxu1 %vm1480_vm3, %v7325_v63 }
 0x965   :  { %v13795_v5 = vpop.eup %13794  ;;  %13317 = vmatpush3.msra.mxu1 %v15485_v4  ;;  %13318 = vmatprep.mubr.msk.f32.mxu1 %vm13915_vm1, %v16393_v23 }
 0x966   :  { %v7326_v3 = vmul.f32 %v13795_v5, %v15376_v21  ;;  %13326 = vmatprep.subr.mxu1 %v16393_v23  ;;  %v8471_v59 = vpop.permute.xlu1 %8470 }
 0x968   :  { %13314 = vmatmul.mubr.msk.f32.vlgmr.msra.gmra.mrb[92].mxu0 %vm1480_vm3, %v7326_v3 }
 0x969   :  { %v13797_v13 = vpop.eup %13796  ;;  %13323 = vmatprep.mubr.msk.f32.mxu0 %vm13915_vm1, %v16393_v23 }
 0x96a   :  { %v7327_v60 = vmul.f32 %v13797_v13, %v15383_v22  ;;  %v8759_v21 = vpop.permute.xlu1 %8758  ;;  %v15613_v22 = vld [vmem:[%s16335_s3 + $0x8] sm:$0xff]  ;;  %s13926_s3 = smov 84  }
 0x96c   :  { %13319 = vmatmul.mubr.msk.f32.vlgmr.msra.gmra.mrb[124].mxu1 %vm1480_vm3, %v7327_v60 }
 0x96d   :  { %13327 = vmatpush3.msra.mxu1 %v8471_v59  ;;  %13328 = vmatprep.mubr.msk.f32.mxu1 %vm13915_vm1, %v16393_v23  ;;  %v13799_v19 = vpop.eup %13798 }
 0x96e   :  { %13357 = vmatprep.subr.mxu1 %v16393_v23  ;;  %v8837_v4 = vpop.permute.xlu1 %8836  ;;  %v7328_v36 = vmul.f32 %v13799_v19, %v15387_v8 }
 0x972   :  { %v8915_v38 = vpop.permute.xlu1 %8914 }
 0x976   :  { %v8993_v26 = vpop.permute.xlu1 %8992 }
 0x97a   :  { %v9071_v1 = vpop.permute.xlu1 %9070 }
 0x97e   :  { %v9149_v2 = vpop.permute.xlu1 %9148 }
 0x982   :  { %v9227_v18 = vpop.permute.xlu1 %9226 }
 0x986   :  { %v9305_v11 = vpop.permute.xlu1 %9304 }
 0x98a   :  { %v9463_v0 = vpop.permute.xlu1 %9462 }
 0x98e   :  { %v9461_v27 = vpop.permute.xlu1 %9460 }
 0x992   :  { %v9619_v29 = vpop.permute.xlu1 %9618 }
 0x993   :  { %v7297_v17 = vpop.xlane.xlu0 %7296 }
 0x994   :  { %13800 = vrcp.f32 %v7297_v17 }
 0x996   :  { %v9617_v54 = vpop.permute.xlu1 %9616 }
 0x997   :  { %v8395_v49 = vpop.permute.xlu0 %8394 }
 0x998   :  { %13322 = vmatpush3.msra.mxu0 %v8395_v49 }
 0x999   :  { %13324 = vmatmul.mubr.msk.f32.vlgmr.msra.gmra.mrb[94].mxu0 %vm1480_vm3, %v7328_v36  ;;  %13331 = vmatprep.subr.msk.mxu0 %vm5563_vm4, %v15613_v22 }
 0x99a   :  { %13332 = vmatpush3.msk.msra.mxu0 %vm5563_vm4, %v15613_v22  ;;  %v9775_v45 = vpop.permute.xlu1 %9774 }
 0x99b   :  { %v8761_v10 = vpop.permute.xlu0 %8760  ;;  %13397 = vmatprep.subr.mxu0 %v16393_v23 }
 0x99e   :  { %v13801_v16 = vpop.eup %13800  ;;  %v9773_v55 = vpop.permute.xlu1 %9772 }
 0x99f   :  { %v8839_v58 = vpop.permute.xlu0 %8838  ;;  %v7329_v56 = vmul.f32 %v13801_v16, %v15416_v28 }
 0x9a1   :  { %13329 = vmatmul.mubr.msk.f32.vlgmr.msra.gmra.mrb[126].mxu1 %vm1480_vm3, %v7329_v56 }
 0x9a2   :  { %13358 = vmatpush3.xpose.msk.msra.mxu1 %vm250_vm2, %v8761_v10  ;;  %13359 = vmatprep.mubr.msk.f32.mxu1 %vm13915_vm1, %v16393_v23  ;;  %v9931_v46 = vpop.permute.xlu1 %9930 }
 0x9a3   :  { %v8917_v8 = vpop.permute.xlu0 %8916  ;;  %13362 = vmatprep.subr.mxu1 %v16393_v23 }
 0x9a5   :  { %13360 = vmatmul.mubr.msk.f32.vlgmr.msra.gmra.mrb[128].mxu1 %vm250_vm2, %v8759_v21 }
 0x9a6   :  { %13363 = vmatpush3.xpose.msk.msra.mxu1 %vm250_vm2, %v8839_v58  ;;  %13364 = vmatprep.mubr.msk.f32.mxu1 %vm13915_vm1, %v16393_v23  ;;  %v9929_v42 = vpop.permute.xlu1 %9928 }
 0x9a7   :  { %v8995_v28 = vpop.permute.xlu0 %8994  ;;  %13367 = vmatprep.subr.mxu1 %v16393_v23 }
 0x9a9   :  { %13365 = vmatmul.mubr.msk.f32.vlgmr.msra.gmra.mrb[130].mxu1 %vm250_vm2, %v8837_v4 }
 0x9aa   :  { %13368 = vmatpush3.xpose.msk.msra.mxu1 %vm250_vm2, %v8917_v8  ;;  %13369 = vmatprep.mubr.msk.f32.mxu1 %vm13915_vm1, %v16393_v23 }
 0x9ab   :  { %v9073_v41 = vpop.permute.xlu0 %9072  ;;  %13372 = vmatprep.subr.mxu1 %v16393_v23 }
 0x9ad   :  { %13370 = vmatmul.mubr.msk.f32.vlgmr.msra.gmra.mrb[132].mxu1 %vm250_vm2, %v8915_v38 }
 0x9ae   :  { %13373 = vmatpush3.xpose.msk.msra.mxu1 %vm250_vm2, %v8995_v28  ;;  %13374 = vmatprep.mubr.msk.f32.mxu1 %vm13915_vm1, %v16393_v23 }
 0x9af   :  { %13377 = vmatprep.subr.mxu1 %v16393_v23  ;;  %v9151_v39 = vpop.permute.xlu0 %9150 }
 0x9b1   :  { %13375 = vmatmul.mubr.msk.f32.vlgmr.msra.gmra.mrb[134].mxu1 %vm250_vm2, %v8993_v26 }
 0x9b2   :  { %13378 = vmatpush3.xpose.msk.msra.mxu1 %vm250_vm2, %v9073_v41  ;;  %13379 = vmatprep.mubr.msk.f32.mxu1 %vm13915_vm1, %v16393_v23 }
 0x9b3   :  { %13382 = vmatprep.subr.mxu1 %v16393_v23  ;;  %v9229_v24 = vpop.permute.xlu0 %9228 }
 0x9b5   :  { %13380 = vmatmul.mubr.msk.f32.vlgmr.msra.gmra.mrb[136].mxu1 %vm250_vm2, %v9071_v1 }
 0x9b6   :  { %13383 = vmatpush3.xpose.msk.msra.mxu1 %vm250_vm2, %v9151_v39  ;;  %13384 = vmatprep.mubr.msk.f32.mxu1 %vm13915_vm1, %v16393_v23 }
 0x9b7   :  { %13387 = vmatprep.subr.mxu1 %v16393_v23  ;;  %v9307_v15 = vpop.permute.xlu0 %9306 }
 0x9b9   :  { %13385 = vmatmul.mubr.msk.f32.vlgmr.msra.gmra.mrb[138].mxu1 %vm250_vm2, %v9149_v2 }
 0x9ba   :  { %13388 = vmatpush3.xpose.msk.msra.mxu1 %vm250_vm2, %v9229_v24  ;;  %13389 = vmatprep.mubr.msk.f32.mxu1 %vm13915_vm1, %v16393_v23 }
 0x9bb   :  { %13392 = vmatprep.subr.mxu1 %v16393_v23  ;;  %v9385_v48 = vpop.permute.xlu0 %9384 }
 0x9bd   :  { %13390 = vmatmul.mubr.msk.f32.vlgmr.msra.gmra.mrb[140].mxu1 %vm250_vm2, %v9227_v18 }
 0x9be   :  { %13393 = vmatpush3.xpose.msk.msra.mxu1 %vm250_vm2, %v9307_v15  ;;  %13394 = vmatprep.mubr.msk.f32.mxu1 %vm13915_vm1, %v16393_v23 }
 0x9bf   :  { %13402 = vmatprep.subr.mxu1 %v16393_v23  ;;  %v9383_v58 = vpop.permute.xlu0 %9382 }
 0x9c1   :  { %13395 = vmatmul.mubr.msk.f32.vlgmr.msra.gmra.mrb[142].mxu1 %vm250_vm2, %v9305_v11 }
 0x9c2   :  { %13403 = vmatpush3.xpose.msk.msra.mxu1 %vm250_vm2, %v9463_v0  ;;  %13404 = vmatprep.mubr.msk.f32.mxu1 %vm13915_vm1, %v16393_v23 }
 0x9c3   :  { %13412 = vmatprep.subr.mxu1 %v16393_v23  ;;  %v9541_v56 = vpop.permute.xlu0 %9540 }
 0x9c5   :  { %13405 = vmatmul.mubr.msk.f32.vlgmr.msra.gmra.mrb[144].mxu1 %vm250_vm2, %v9461_v27 }
 0x9c6   :  { %13413 = vmatpush3.xpose.msk.msra.mxu1 %vm250_vm2, %v9619_v29  ;;  %13414 = vmatprep.mubr.msk.f32.mxu1 %vm13915_vm1, %v16393_v23 }
 0x9c7   :  { %13422 = vmatprep.subr.mxu1 %v16393_v23  ;;  %v9539_v11 = vpop.permute.xlu0 %9538 }
 0x9c9   :  { %13415 = vmatmul.mubr.msk.f32.vlgmr.msra.gmra.mrb[146].mxu1 %vm250_vm2, %v9617_v54 }
 0x9ca   :  { %13423 = vmatpush3.xpose.msk.msra.mxu1 %vm250_vm2, %v9775_v45  ;;  %13424 = vmatprep.mubr.msk.f32.mxu1 %vm13915_vm1, %v16393_v23 }
 0x9cb   :  { %13432 = vmatprep.subr.mxu1 %v16393_v23  ;;  %v9697_v28 = vpop.permute.xlu0 %9696 }
 0x9cd   :  { %13425 = vmatmul.mubr.msk.f32.vlgmr.msra.gmra.mrb[148].mxu1 %vm250_vm2, %v9773_v55 }
 0x9ce   :  { %13433 = vmatpush3.xpose.msk.msra.mxu1 %vm250_vm2, %v9931_v46  ;;  %13434 = vmatprep.mubr.msk.f32.mxu1 %vm13915_vm1, %v16393_v23 }
 0x9cf   :  { %13442 = vmatprep.subr.mxu1 %v16393_v23  ;;  %v9695_v39 = vpop.permute.xlu0 %9694 }
 0x9d1   :  { %13435 = vmatmul.mubr.msk.f32.vlgmr.msra.gmra.mrb[150].mxu1 %vm250_vm2, %v9929_v42 }
 0x9d2   :  { %13444 = vmatprep.mubr.msk.f32.mxu1 %vm13915_vm1, %v16393_v23 }
 0x9d3   :  { %v9853_v46 = vpop.permute.xlu0 %9852 }
 0xa0e   :  { %v7402_v34 = vpop.f32.mrb[80].mxu0 }
 0xa0f   :  { %v13255_v14 = vpop.f32.mrb[81].mxu0  ;;  %v7478_v62 = vpop.f32.mrb[112].mxu1  ;;  %13333 = vmatprep.mubr.msk.f32.mxu0 %vm250_vm2, %v7402_v34 }
 0xa10   :  { %v13260_v47 = vpop.f32.mrb[113].mxu1  ;;  %13334 = vmatmul.mubr.msk.f32.vlgmr.msra.gmra.mrb[64].mxu0 %vm250_vm2, %v7478_v62  ;;  %v9851_v62 = vpop.permute.xlu0 %9850 }
 0xa11   :  { %13398 = vmatpush3.xpose.msk.msra.mxu0 %vm250_vm2, %v9385_v48 }
 0xa12   :  { %13407 = vmatprep.subr.mxu0 %v16393_v23 }
 0xa13   :  { %v7554_v50 = vpop.f32.mrb[82].mxu0 }
 0xa14   :  { %v13265_v35 = vpop.f32.mrb[83].mxu0  ;;  %13336 = vmatprep.mubr.msk.f32.mxu0 %vm250_vm2, %v7554_v50 }
 0xa17   :  { %v7630_v32 = vpop.f32.mrb[114].mxu1 }
 0xa18   :  { %v13270_v20 = vpop.f32.mrb[115].mxu1  ;;  %13337 = vmatmul.mubr.msk.f32.gmra.mrb[66].mxu0 %vm250_vm2, %v7630_v32 }
 0xa1b   :  { %v7706_v63 = vpop.f32.mrb[84].mxu0 }
 0xa1c   :  { %v13275_v5 = vpop.f32.mrb[85].mxu0  ;;  %13339 = vmatprep.mubr.msk.f32.mxu0 %vm250_vm2, %v7706_v63 }
 0xa1f   :  { %v7782_v9 = vpop.f32.mrb[116].mxu1 }
 0xa20   :  { %v13280_v3 = vpop.f32.mrb[117].mxu1  ;;  %13340 = vmatmul.mubr.msk.f32.gmra.mrb[68].mxu0 %vm250_vm2, %v7782_v9 }
 0xa23   :  { %v7858_v13 = vpop.f32.mrb[86].mxu0 }
 0xa24   :  { %v13285_v60 = vpop.f32.mrb[87].mxu0  ;;  %13342 = vmatprep.mubr.msk.f32.mxu0 %vm250_vm2, %v7858_v13 }
 0xa27   :  { %v7934_v59 = vpop.f32.mrb[118].mxu1 }
 0xa28   :  { %v13290_v21 = vpop.f32.mrb[119].mxu1  ;;  %13343 = vmatmul.mubr.msk.f32.gmra.mrb[70].mxu0 %vm250_vm2, %v7934_v59 }
 0xa2b   :  { %v8010_v4 = vpop.f32.mrb[88].mxu0 }
 0xa2c   :  { %v13295_v38 = vpop.f32.mrb[89].mxu0  ;;  %13345 = vmatprep.mubr.msk.f32.mxu0 %vm250_vm2, %v8010_v4 }
 0xa2f   :  { %v8086_v26 = vpop.f32.mrb[120].mxu1 }
 0xa30   :  { %v13300_v1 = vpop.f32.mrb[121].mxu1  ;;  %13346 = vmatmul.mubr.msk.f32.gmra.mrb[72].mxu0 %vm250_vm2, %v8086_v26 }
 0xa33   :  { %v8162_v17 = vpop.f32.mrb[90].mxu0 }
 0xa34   :  { %v13305_v19 = vpop.f32.mrb[91].mxu0  ;;  %13348 = vmatprep.mubr.msk.f32.mxu0 %vm250_vm2, %v8162_v17 }
 0xa37   :  { %v8238_v2 = vpop.f32.mrb[122].mxu1 }
 0xa38   :  { %v13310_v49 = vpop.f32.mrb[123].mxu1  ;;  %13349 = vmatmul.mubr.msk.f32.gmra.mrb[74].mxu0 %vm250_vm2, %v8238_v2 }
 0xa3b   :  { %v8314_v36 = vpop.f32.mrb[92].mxu0 }
 0xa3c   :  { %v13315_v18 = vpop.f32.mrb[93].mxu0  ;;  %13351 = vmatprep.mubr.msk.f32.mxu0 %vm250_vm2, %v8314_v36 }
 0xa3f   :  { %v8390_v10 = vpop.f32.mrb[124].mxu1 }
 0xa40   :  { %v13320_v16 = vpop.f32.mrb[125].mxu1  ;;  %13352 = vmatmul.mubr.msk.f32.gmra.mrb[76].mxu0 %vm250_vm2, %v8390_v10 }
 0xa6c   :  { %v8466_v8 = vpop.f32.mrb[94].mxu0 }
 0xa6d   :  { %v13325_v0 = vpop.f32.mrb[95].mxu0  ;;  %13354 = vmatprep.mubr.msk.f32.mxu0 %vm250_vm2, %v8466_v8 }
 0xa74   :  { %v8542_v41 = vpop.f32.mrb[126].mxu1 }
 0xa75   :  { %v13330_v27 = vpop.f32.mrb[127].mxu1  ;;  %13355 = vmatmul.mubr.msk.f32.gmra.mrb[78].mxu0 %vm250_vm2, %v8542_v41 }
 0xa76   :  { %13399 = vmatprep.mubr.msk.f32.mxu0 %vm13915_vm1, %v16393_v23 }
 0xa78   :  { %v15706_v29 = vpop.f32.mrb[128].mxu1 }
 0xa79   :  { %v13361_v24 = vpop.f32.mrb[129].mxu1  ;;  %13400 = vmatmul.mubr.msk.f32.vlgmr.msra.gmra.mrb[96].mxu0 %vm250_vm2, %v9383_v58  ;;  %v10006_v54 = vsel %vm1480_vm3, %v15706_v29, -inf }
 0xa7a   :  { %13408 = vmatpush3.xpose.msk.msra.mxu0 %vm250_vm2, %v9541_v56  ;;  %10007 = vmax.xlane.f32.xlu0 %v10006_v54 }
 0xa7b   :  { %13409 = vmatprep.mubr.msk.f32.mxu0 %vm13915_vm1, %v16393_v23  ;;  %13417 = vmatprep.subr.mxu0 %v16393_v23 }
 0xa7c   :  { %v8910_v15 = vpop.f32.mrb[130].mxu1 }
 0xa7d   :  { %v13366_v45 = vpop.f32.mrb[131].mxu1  ;;  %13410 = vmatmul.mubr.msk.f32.vlgmr.msra.gmra.mrb[98].mxu0 %vm250_vm2, %v9539_v11  ;;  %v10009_v55 = vsel %vm1480_vm3, %v8910_v15, -inf }
 0xa7e   :  { %13418 = vmatpush3.xpose.msk.msra.mxu0 %vm250_vm2, %v9697_v28  ;;  %10010 = vmax.xlane.f32.xlu1 %v10009_v55 }
 0xa7f   :  { %13419 = vmatprep.mubr.msk.f32.mxu0 %vm13915_vm1, %v16393_v23  ;;  %13427 = vmatprep.subr.mxu0 %v16393_v23 }
 0xa80   :  { %v8988_v42 = vpop.f32.mrb[132].mxu1 }
 0xa81   :  { %v13371_v34 = vpop.f32.mrb[133].mxu1  ;;  %13420 = vmatmul.mubr.msk.f32.vlgmr.msra.gmra.mrb[100].mxu0 %vm250_vm2, %v9695_v39  ;;  %v10012_v14 = vsel %vm1480_vm3, %v8988_v42, -inf }
 0xa82   :  { %13428 = vmatpush3.xpose.msk.msra.mxu0 %vm250_vm2, %v9853_v46  ;;  %10013 = vmax.xlane.f32.xlu0 %v10012_v14 }
 0xa83   :  { %13429 = vmatprep.mubr.msk.f32.mxu0 %vm13915_vm1, %v16393_v23  ;;  %13437 = vmatprep.subr.mxu0 %v16393_v23 }
 0xa84   :  { %v9066_v48 = vpop.f32.mrb[134].mxu1 }
 0xa85   :  { %v13376_v47 = vpop.f32.mrb[135].mxu1  ;;  %13430 = vmatmul.mubr.msk.f32.vlgmr.msra.gmra.mrb[102].mxu0 %vm250_vm2, %v9851_v62  ;;  %v10015_v50 = vsel %vm1480_vm3, %v9066_v48, -inf }
 0xa86   :  { %10016 = vmax.xlane.f32.xlu0 %v10015_v50  ;;  %13439 = vmatprep.mubr.msk.f32.mxu0 %vm13915_vm1, %v16393_v23 }
 0xa88   :  { %v9144_v35 = vpop.f32.mrb[136].mxu1 }
 0xa89   :  { %v13381_v32 = vpop.f32.mrb[137].mxu1  ;;  %v10018_v20 = vsel %vm1480_vm3, %v9144_v35, -inf }
 0xa8a   :  { %10019 = vmax.xlane.f32.xlu0 %v10018_v20 }
 0xa8c   :  { %v9222_v63 = vpop.f32.mrb[138].mxu1 }
 0xa8d   :  { %v13386_v5 = vpop.f32.mrb[139].mxu1  ;;  %v10021_v9 = vsel %vm1480_vm3, %v9222_v63, -inf }
 0xa8e   :  { %10022 = vmax.xlane.f32.xlu1 %v10021_v9 }
 0xa90   :  { %v9300_v3 = vpop.f32.mrb[140].mxu1 }
 0xa91   :  { %v13391_v13 = vpop.f32.mrb[141].mxu1  ;;  %v10024_v60 = vsel %vm1480_vm3, %v9300_v3, -inf }
 0xa92   :  { %10025 = vmax.xlane.f32.xlu0 %v10024_v60 }
 0xa94   :  { %v15734_v59 = vpop.f32.mrb[142].mxu1 }
 0xa95   :  { %v13396_v21 = vpop.f32.mrb[143].mxu1  ;;  %v10027_v4 = vsel %vm1480_vm3, %v15734_v59, -inf }
 0xa96   :  { %10028 = vmax.xlane.f32.xlu1 %v10027_v4 }
 0xa98   :  { %v15738_v38 = vpop.f32.mrb[144].mxu1 }
 0xa99   :  { %v13406_v26 = vpop.f32.mrb[145].mxu1  ;;  %v10033_v1 = vsel %vm1480_vm3, %v15738_v38, -inf }
 0xa9a   :  { %10034 = vmax.xlane.f32.xlu1 %v10033_v1 }
 0xa9c   :  { %v15742_v17 = vpop.f32.mrb[146].mxu1 }
 0xa9d   :  { %v13416_v19 = vpop.f32.mrb[147].mxu1  ;;  %v10039_v2 = vsel %vm1480_vm3, %v15742_v17, -inf }
 0xa9e   :  { %10040 = vmax.xlane.f32.xlu1 %v10039_v2 }
 0xaa0   :  { %v15746_v49 = vpop.f32.mrb[148].mxu1 }
 0xaa1   :  { %v13426_v36 = vpop.f32.mrb[149].mxu1  ;;  %v10045_v18 = vsel %vm1480_vm3, %v15746_v49, -inf }
 0xaa2   :  { %10046 = vmax.xlane.f32.xlu1 %v10045_v18 }
 0xaa4   :  { %v15750_v10 = vpop.f32.mrb[150].mxu1 }
 0xaa5   :  { %v13436_v16 = vpop.f32.mrb[151].mxu1  ;;  %v10051_v58 = vsel %vm1480_vm3, %v15750_v10, -inf }
 0xaa6   :  { %10052 = vmax.xlane.f32.xlu1 %v10051_v58 }
 0xb07   :  { %v10008_v56 = vpop.xlane.xlu0 %10007 }
 0xb08   :  { %v10054_v11 = vsub.f32 %v15706_v29, %v10008_v56 }
 0xb0a   :  { %v10070_v8 = vmul.f32 1.442695, %v10054_v11 }
 0xb0b   :  { %v10011_v0 = vpop.xlane.xlu1 %10010 }
 0xb0c   :  { %13802 = vpow2.f32 %v10070_v8  ;;  %v10055_v28 = vsub.f32 %v8910_v15, %v10011_v0 }
 0xb0e   :  { %v10072_v41 = vmul.f32 1.442695, %v10055_v28 }
 0xb0f   :  { %v10014_v27 = vpop.xlane.xlu0 %10013 }
 0xb10   :  { %13804 = vpow2.f32 %v10072_v41  ;;  %v10056_v39 = vsub.f32 %v8988_v42, %v10014_v27 }
 0xb12   :  { %v10074_v24 = vmul.f32 1.442695, %v10056_v39 }
 0xb13   :  { %v10017_v54 = vpop.xlane.xlu0 %10016 }
 0xb14   :  { %13806 = vpow2.f32 %v10074_v24  ;;  %v10057_v45 = vsub.f32 %v9066_v48, %v10017_v54 }
 0xb16   :  { %v15755_v55 = vpop.eup %13802  ;;  %v10076_v46 = vmul.f32 1.442695, %v10057_v45 }
 0xb17   :  { %v10020_v34 = vpop.xlane.xlu0 %10019  ;;  %v10102_v14 = vsel %vm1480_vm3, %v15755_v55, 0.0 }
 0xb18   :  { %13808 = vpow2.f32 %v10076_v46  ;;  %v10058_v29 = vsub.f32 %v9144_v35, %v10020_v34  ;;  %10103 = vadd.xlane.f32.xlu0 %v10102_v14 }
 0xb1a   :  { %v15759_v62 = vpop.eup %13804  ;;  %v10078_v15 = vmul.f32 1.442695, %v10058_v29 }
 0xb1b   :  { %v10023_v47 = vpop.xlane.xlu1 %10022  ;;  %v10105_v42 = vsel %vm1480_vm3, %v15759_v62, 0.0 }
 0xb1c   :  { %13810 = vpow2.f32 %v10078_v15  ;;  %v10059_v50 = vsub.f32 %v9222_v63, %v10023_v47  ;;  %10106 = vadd.xlane.f32.xlu1 %v10105_v42 }
 0xb1e   :  { %v15763_v48 = vpop.eup %13806  ;;  %v10080_v32 = vmul.f32 1.442695, %v10059_v50 }
 0xb1f   :  { %v10026_v20 = vpop.xlane.xlu0 %10025  ;;  %v10108_v5 = vsel %vm1480_vm3, %v15763_v48, 0.0 }
 0xb20   :  { %13812 = vpow2.f32 %v10080_v32  ;;  %v10060_v35 = vsub.f32 %v9300_v3, %v10026_v20  ;;  %10109 = vadd.xlane.f32.xlu0 %v10108_v5 }
 0xb22   :  { %v15767_v9 = vpop.eup %13808  ;;  %v10082_v13 = vmul.f32 1.442695, %v10060_v35 }
 0xb23   :  { %v10029_v60 = vpop.xlane.xlu1 %10028  ;;  %v10111_v21 = vsel %vm1480_vm3, %v15767_v9, 0.0 }
 0xb24   :  { %13814 = vpow2.f32 %v10082_v13  ;;  %v10061_v63 = vsub.f32 %v15734_v59, %v10029_v60  ;;  %10112 = vadd.xlane.f32.xlu1 %v10111_v21 }
 0xb26   :  { %v15772_v4 = vpop.eup %13810  ;;  %v10084_v26 = vmul.f32 1.442695, %v10061_v63 }
 0xb27   :  { %v10035_v1 = vpop.xlane.xlu1 %10034  ;;  %v10114_v19 = vsel %vm1480_vm3, %v15772_v4, 0.0 }
 0xb28   :  { %13816 = vpow2.f32 %v10084_v26  ;;  %v10063_v3 = vsub.f32 %v15738_v38, %v10035_v1  ;;  %10115 = vadd.xlane.f32.xlu0 %v10114_v19 }
 0xb2a   :  { %v15777_v2 = vpop.eup %13812  ;;  %v10088_v36 = vmul.f32 1.442695, %v10063_v3 }
 0xb2b   :  { %v10041_v18 = vpop.xlane.xlu1 %10040  ;;  %v10117_v16 = vsel %vm1480_vm3, %v15777_v2, 0.0 }
 0xb2c   :  { %13818 = vpow2.f32 %v10088_v36  ;;  %v10065_v59 = vsub.f32 %v15742_v17, %v10041_v18  ;;  %10118 = vadd.xlane.f32.xlu1 %v10117_v16 }
 0xb2e   :  { %v15782_v58 = vpop.eup %13814  ;;  %v10092_v56 = vmul.f32 1.442695, %v10065_v59 }
 0xb2f   :  { %v10047_v11 = vpop.xlane.xlu1 %10046  ;;  %v10120_v8 = vsel %vm1480_vm3, %v15782_v58, 0.0 }
 0xb30   :  { %13820 = vpow2.f32 %v10092_v56  ;;  %v10067_v38 = vsub.f32 %v15746_v49, %v10047_v11  ;;  %10121 = vadd.xlane.f32.xlu0 %v10120_v8 }
 0xb32   :  { %v15787_v0 = vpop.eup %13816  ;;  %v10096_v28 = vmul.f32 1.442695, %v10067_v38 }
 0xb33   :  { %v10123_v41 = vsel %vm1480_vm3, %v15787_v0, 0.0 }
 0xb34   :  { %13822 = vpow2.f32 %v10096_v28  ;;  %10124 = vadd.xlane.f32.xlu1 %v10123_v41 }
 0xb36   :  { %v15791_v17 = vpop.eup %13818 }
 0xb37   :  { %v10129_v27 = vsel %vm1480_vm3, %v15791_v17, 0.0 }
 0xb38   :  { %10130 = vadd.xlane.f32.xlu1 %v10129_v27 }
 0xb3a   :  { %v15795_v39 = vpop.eup %13820 }
 0xb3b   :  { %v10135_v49 = vsel %vm1480_vm3, %v15795_v39, 0.0 }
 0xb3c   :  { %10136 = vadd.xlane.f32.xlu1 %v10135_v49 }
 0xb3e   :  { %v15799_v24 = vpop.eup %13822 }
 0xb3f   :  { %v10141_v54 = vsel %vm1480_vm3, %v15799_v24, 0.0 }
 0xb40   :  { %10142 = vadd.xlane.f32.xlu1 %v10141_v54 }
 0xb4c   :  { %v15803_v45 = vpop.f32.mrb[96].mxu0 }
 0xb4d   :  { %v13401_v46 = vpop.f32.mrb[97].mxu0  ;;  %v10030_v34 = vsel %vm1480_vm3, %v15803_v45, -inf }
 0xb4e   :  { %10031 = vmax.xlane.f32.xlu0 %v10030_v34 }
 0xb50   :  { %v15807_v14 = vpop.f32.mrb[98].mxu0 }
 0xb51   :  { %v13411_v29 = vpop.f32.mrb[99].mxu0  ;;  %10258 = vrot.lane.b32.xlu1 %v16397_v7, %s13926_s3  ;;  %v10036_v15 = vsel %vm1480_vm3, %v15807_v14, -inf }
 0xb52   :  { %10037 = vmax.xlane.f32.xlu0 %v10036_v15 }
 0xb54   :  { %v15813_v47 = vpop.f32.mrb[100].mxu0 }
 0xb55   :  { %v13421_v42 = vpop.f32.mrb[101].mxu0  ;;  %10410 = vrot.lane.b32.xlu1 %v16398_v33, %s13926_s3  ;;  %v10042_v50 = vsel %vm1480_vm3, %v15813_v47, -inf }
 0xb56   :  { %10043 = vmax.xlane.f32.xlu0 %v10042_v50 }
 0xb58   :  { %v15819_v32 = vpop.f32.mrb[102].mxu0 }
 0xb59   :  { %v13431_v20 = vpop.f32.mrb[103].mxu0  ;;  %10486 = vrot.lane.b32.xlu1 %v14060_v37, %s13926_s3  ;;  %v10048_v7 = vsel %vm1480_vm3, %v15819_v32, -inf  ;;  %v10053_v37 = vpop.xlane.xlu1 %10052 }
 0xb5a   :  { %10049 = vmax.xlane.f32.xlu0 %v10048_v7  ;;  %v10069_v33 = vsub.f32 %v15750_v10, %v10053_v37 }
 0xb5c   :  { %v10100_v5 = vmul.f32 1.442695, %v10069_v33 }
 0xb5d   :  { %10562 = vrot.lane.b32.xlu1 %v16399_v12, %s13926_s3 }
 0xb5e   :  { %13824 = vpow2.f32 %v10100_v5 }
 0xb61   :  { %10714 = vrot.lane.b32.xlu1 %v16400_v6, %s13926_s3 }
 0xb65   :  { %10866 = vrot.lane.b32.xlu1 %v16401_v40, %s13926_s3 }
 0xb68   :  { %v15838_v12 = vpop.eup %13824 }
 0xb69   :  { %11018 = vrot.lane.b32.xlu1 %v16403_v57, %s13926_s3  ;;  %v10147_v6 = vsel %vm1480_vm3, %v15838_v12, 0.0 }
 0xb6d   :  { %11170 = vrot.lane.b32.xlu1 %v16404_v30, %s13926_s3 }
 0xb70   :  { %10182 = vrot.lane.b32.xlu0 %v14046_v25, %s13926_s3 }
 0xb8f   :  { %10148 = vadd.xlane.f32.xlu0 %v10147_v6 }
 0xba5   :  { %10334 = vrot.lane.b32.xlu0 %v16395_v53, %s13926_s3  ;;  %v10104_v35 = vpop.xlane.xlu0 %10103 }
 0xba9   :  { %10638 = vrot.lane.b32.xlu0 %v14068_v43, %s13926_s3  ;;  %v10107_v25 = vpop.xlane.xlu1 %10106 }
 0xbaa   :  { %13826 = vrcp.f32 %v10107_v25 }
 0xbad   :  { %10790 = vrot.lane.b32.xlu0 %v16394_v31, %s13926_s3  ;;  %v15852_v60 = vpop.xlane.xlu0 %10109 }
 0xbb1   :  { %10942 = vrot.lane.b32.xlu0 %v16396_v44, %s13926_s3  ;;  %v10113_v40 = vpop.xlane.xlu1 %10112 }
 0xbb2   :  { %13828 = vrcp.f32 %v10113_v40 }
 0xbb4   :  { %v13827_v43 = vpop.eup %13826 }
 0xbb5   :  { %11094 = vrot.lane.b32.xlu0 %v14096_v51, %s13926_s3  ;;  %v10167_v31 = vmul.f32 %v13827_v43, %v15759_v62  ;;  %v15855_v63 = vpop.xlane.xlu0 %10115 }
 0xbb9   :  { %v10119_v57 = vpop.xlane.xlu1 %10118 }
 0xbba   :  { %13830 = vrcp.f32 %v10119_v57 }
 0xbbc   :  { %v13829_v21 = vpop.eup %13828 }
 0xbbd   :  { %v10169_v51 = vmul.f32 %v13829_v21, %v15767_v9  ;;  %v15862_v1 = vpop.xlane.xlu0 %10121 }
 0xbc1   :  { %v10125_v30 = vpop.xlane.xlu1 %10124 }
 0xbc2   :  { %13832 = vrcp.f32 %v10125_v30 }
 0xbc4   :  { %v13831_v19 = vpop.eup %13830 }
 0xbc5   :  { %v10131_v10 = vpop.xlane.xlu1 %10130  ;;  %v10171_v9 = vmul.f32 %v13831_v19, %v15777_v2 }
 0xbc6   :  { %13834 = vrcp.f32 %v10131_v10 }
 0xbc9   :  { %v10137_v53 = vpop.xlane.xlu1 %10136 }
 0xbca   :  { %13836 = vrcp.f32 %v10137_v53 }
 0xbcb   :  { %13838 = vrcp.f32 %v10104_v35 }
 0xbcc   :  { %v13833_v16 = vpop.eup %13832 }
 0xbcd   :  { %v10143_v13 = vpop.xlane.xlu1 %10142  ;;  %v10173_v8 = vmul.f32 %v13833_v16, %v15787_v0 }
 0xbce   :  { %13840 = vrcp.f32 %v10143_v13 }
 0xbd0   :  { %v13835_v38 = vpop.eup %13834 }
 0xbd1   :  { %v10259_v44 = vpop.permute.xlu1 %10258  ;;  %v10175_v49 = vmul.f32 %v13835_v38, %v15791_v17 }
 0xbd2   :  { %13443 = vmatpush3.msra.mxu1 %v10259_v44 }
 0xbd3   :  { %13445 = vmatmul.mubr.msk.f32.vlgmr.msra.gmra.mrb[152].mxu1 %vm1480_vm3, %v10167_v31  ;;  %13452 = vmatprep.subr.mxu1 %v16393_v23 }
 0xbd4   :  { %13454 = vmatprep.mubr.msk.f32.mxu1 %vm13915_vm1, %v16393_v23 }
 0xbd5   :  { %v10411_v26 = vpop.permute.xlu1 %10410 }
 0xbd6   :  { %13453 = vmatpush3.msra.mxu1 %v10411_v26 }
 0xbd7   :  { %13455 = vmatmul.mubr.msk.f32.vlgmr.msra.gmra.mrb[154].mxu1 %vm1480_vm3, %v10169_v51  ;;  %13462 = vmatprep.subr.mxu1 %v16393_v23 }
 0xbd8   :  { %13464 = vmatprep.mubr.msk.f32.mxu1 %vm13915_vm1, %v16393_v23 }
 0xbd9   :  { %v15868_v62 = vpop.permute.xlu1 %10486 }
 0xbdb   :  { %v10032_v3 = vpop.xlane.xlu0 %10031 }
 0xbdc   :  { %v10062_v36 = vsub.f32 %v15803_v45, %v10032_v3  ;;  %v13837_v45 = vpop.eup %13836  ;;  %v11398_v3 = vrot.slane %v15613_v22, 4 }
 0xbdd   :  { %v10563_v18 = vpop.permute.xlu1 %10562  ;;  %v13839_v34 = vpop.eup %13838  ;;  %v10177_v15 = vmul.f32 %v13837_v45, %v15795_v39 }
 0xbde   :  { %v10086_v59 = vmul.f32 1.442695, %v10062_v36  ;;  %13463 = vmatpush3.msra.mxu1 %v10563_v18  ;;  %v13841_v29 = vpop.eup %13840  ;;  %v10166_v50 = vmul.f32 %v13839_v34, %v15755_v55 }
 0xbdf   :  { %13465 = vmatmul.mubr.msk.f32.vlgmr.msra.gmra.mrb[156].mxu1 %vm1480_vm3, %v10171_v9  ;;  %v10038_v56 = vpop.xlane.xlu0 %10037  ;;  %13472 = vmatprep.subr.mxu1 %v16393_v23  ;;  %v10179_v39 = vmul.f32 %v13841_v29, %v15799_v24 }
 0xbe0   :  { %13842 = vpow2.f32 %v10086_v59  ;;  %v10064_v11 = vsub.f32 %v15807_v14, %v10038_v56  ;;  %13474 = vmatprep.mubr.msk.f32.mxu1 %vm13915_vm1, %v16393_v23 }
 0xbe1   :  { %v10715_v2 = vpop.permute.xlu1 %10714 }
 0xbe2   :  { %v10090_v28 = vmul.f32 1.442695, %v10064_v11  ;;  %13473 = vmatpush3.msra.mxu1 %v10715_v2 }
 0xbe3   :  { %13475 = vmatmul.mubr.msk.f32.vlgmr.msra.gmra.mrb[158].mxu1 %vm1480_vm3, %v10173_v8  ;;  %v10044_v41 = vpop.xlane.xlu0 %10043  ;;  %13482 = vmatprep.subr.mxu1 %v16393_v23 }
 0xbe4   :  { %13844 = vpow2.f32 %v10090_v28  ;;  %v10066_v27 = vsub.f32 %v15813_v47, %v10044_v41  ;;  %13484 = vmatprep.mubr.msk.f32.mxu1 %vm13915_vm1, %v16393_v23 }
 0xbe5   :  { %v10867_v54 = vpop.permute.xlu1 %10866 }
 0xbe6   :  { %v10094_v0 = vmul.f32 1.442695, %v10066_v27  ;;  %13483 = vmatpush3.msra.mxu1 %v10867_v54 }
 0xbe7   :  { %13485 = vmatmul.mubr.msk.f32.vlgmr.msra.gmra.mrb[160].mxu1 %vm1480_vm3, %v10175_v49  ;;  %v10050_v46 = vpop.xlane.xlu0 %10049  ;;  %13492 = vmatprep.subr.mxu1 %v16393_v23 }
 0xbe8   :  { %13846 = vpow2.f32 %v10094_v0  ;;  %v10068_v14 = vsub.f32 %v15819_v32, %v10050_v46  ;;  %13494 = vmatprep.mubr.msk.f32.mxu1 %vm13915_vm1, %v16393_v23 }
 0xbe9   :  { %v11019_v17 = vpop.permute.xlu1 %11018 }
 0xbea   :  { %v15890_v47 = vpop.eup %13842  ;;  %v10098_v42 = vmul.f32 1.442695, %v10068_v14  ;;  %13493 = vmatpush3.msra.mxu1 %v11019_v17 }
 0xbeb   :  { %13495 = vmatmul.mubr.msk.f32.vlgmr.msra.gmra.mrb[162].mxu1 %vm1480_vm3, %v10177_v15  ;;  %v10183_v20 = vpop.permute.xlu0 %10182  ;;  %v10126_v7 = vsel %vm1480_vm3, %v15890_v47, 0.0  ;;  %13502 = vmatprep.subr.mxu1 %v16393_v23 }
 0xbec   :  { %13848 = vpow2.f32 %v10098_v42  ;;  %10127 = vadd.xlane.f32.xlu0 %v10126_v7  ;;  %13438 = vmatpush3.msra.mxu0 %v10183_v20 }
 0xbed   :  { %v11171_v32 = vpop.permute.xlu1 %11170  ;;  %13440 = vmatmul.mubr.msk.f32.vlgmr.msra.gmra.mrb[104].mxu0 %vm1480_vm3, %v10166_v50  ;;  %13504 = vmatprep.mubr.msk.f32.mxu1 %vm13915_vm1, %v16393_v23  ;;  %13850 = vrcp.f32 %v15852_v60 }
 0xbee   :  { %v15901_v55 = vpop.eup %13844  ;;  %13503 = vmatpush3.msra.mxu1 %v11171_v32  ;;  %13447 = vmatprep.subr.mxu0 %v16393_v23  ;;  %13852 = vrcp.f32 %v15855_v63 }
 0xbef   :  { %13505 = vmatmul.mubr.msk.f32.vlgmr.msra.gmra.mrb[164].mxu1 %vm1480_vm3, %v10179_v39  ;;  %v10132_v37 = vsel %vm1480_vm3, %v15901_v55, 0.0  ;;  %13449 = vmatprep.mubr.msk.f32.mxu0 %vm13915_vm1, %v16393_v23  ;;  %13854 = vrcp.f32 %v15862_v1 }
 0xbf0   :  { %10133 = vadd.xlane.f32.xlu0 %v10132_v37  ;;  %13512 = vmatprep.subr.mxu1 %v16393_v23 }
 0xbf1   :  { %13514 = vmatprep.mubr.msk.f32.mxu1 %vm13915_vm1, %v16393_v23 }
 0xbf2   :  { %v15912_v24 = vpop.eup %13846 }
 0xbf3   :  { %v10138_v33 = vsel %vm1480_vm3, %v15912_v24, 0.0 }
 0xbf4   :  { %10139 = vadd.xlane.f32.xlu0 %v10138_v33  ;;  %v15984_v33 = vld [vmem:[%s16336_s4] ss:$0 sm:$0xff] }
 0xbf6   :  { %v15916_v5 = vpop.eup %13848 }
 0xbf7   :  { %v10144_v6 = vsel %vm1480_vm3, %v15916_v5, 0.0  ;;  %v13851_v40 = vpop.eup %13850 }
 0xbf8   :  { %10145 = vadd.xlane.f32.xlu1 %v10144_v6  ;;  %v10168_v57 = vmul.f32 %v13851_v40, %v15763_v48  ;;  %v13853_v10 = vpop.eup %13852 }
 0xbf9   :  { %v13855_v53 = vpop.eup %13854 }
 0xbfa   :  { %v10172_v48 = vmul.f32 %v13855_v53, %v15782_v58 }
 0xc09   :  { %11322 = vrot.lane.b32.xlu1 %v16405_v61, %s13926_s3 }
 0xc0a   :  { %11246 = vrot.lane.b32.xlu0 %v14106_v52, %s13926_s3  ;;  %v10170_v52 = vmul.f32 %v13853_v10, %v15772_v4  ;;  %v13899_v10 = vld [vmem:[%s16333_s0] sm:$0xff] }
 0xc1c   :  { %v10149_v25 = vpop.xlane.xlu0 %10148 }
 0xc20   :  { %v10335_v30 = vpop.permute.xlu0 %10334 }
 0xc21   :  { %13448 = vmatpush3.msra.mxu0 %v10335_v30 }
 0xc22   :  { %13450 = vmatmul.mubr.msk.f32.vlgmr.msra.gmra.mrb[106].mxu0 %vm1480_vm3, %v10168_v57  ;;  %13457 = vmatprep.subr.mxu0 %v16393_v23  ;;  %v13898_v57 = vld [vmem:[%s16333_s0 + $0x8] sm:$0xff] }
 0xc23   :  { %13458 = vmatpush3.msra.mxu0 %v15868_v62  ;;  %13459 = vmatprep.mubr.msk.f32.mxu0 %vm13915_vm1, %v16393_v23 }
 0xc24   :  { %v10639_v61 = vpop.permute.xlu0 %10638  ;;  %13467 = vmatprep.subr.mxu0 %v16393_v23 }
 0xc26   :  { %13460 = vmatmul.mubr.msk.f32.vlgmr.msra.gmra.mrb[108].mxu0 %vm1480_vm3, %v10170_v52 }
 0xc27   :  { %13468 = vmatpush3.msra.mxu0 %v10639_v61  ;;  %13469 = vmatprep.mubr.msk.f32.mxu0 %vm13915_vm1, %v16393_v23 }
 0xc28   :  { %v10791_v35 = vpop.permute.xlu0 %10790  ;;  %13477 = vmatprep.subr.mxu0 %v16393_v23 }
 0xc2a   :  { %13470 = vmatmul.mubr.msk.f32.vlgmr.msra.gmra.mrb[110].mxu0 %vm1480_vm3, %v10172_v48 }
 0xc2b   :  { %13478 = vmatpush3.msra.mxu0 %v10791_v35  ;;  %13479 = vmatprep.mubr.msk.f32.mxu0 %vm13915_vm1, %v16393_v23 }
 0xc2c   :  { %13487 = vmatprep.subr.mxu0 %v16393_v23  ;;  %v10943_v4 = vpop.permute.xlu0 %10942 }
 0xc30   :  { %v11095_v13 = vpop.permute.xlu0 %11094 }
 0xc79   :  { %v10128_v43 = vpop.xlane.xlu0 %10127 }
 0xc7a   :  { %13856 = vrcp.f32 %v10128_v43  ;;  %v13900_v43 = vld [vmem:[%s16333_s0 + $0x18] sm:$0xff] }
 0xc7b   :  { %13858 = vrcp.f32 %v10149_v25 }
 0xc7d   :  { %v10134_v60 = vpop.xlane.xlu0 %10133 }
 0xc7e   :  { %13860 = vrcp.f32 %v10134_v60 }
 0xc81   :  { %v10140_v31 = vpop.xlane.xlu0 %10139 }
 0xc82   :  { %13862 = vrcp.f32 %v10140_v31 }
 0xc84   :  { %v13857_v58 = vpop.eup %13856 }
 0xc85   :  { %v10174_v44 = vmul.f32 %v13857_v58, %v15890_v47  ;;  %v10146_v21 = vpop.xlane.xlu1 %10145  ;;  %v13859_v63 = vpop.eup %13858  ;;  %v13901_v58 = vld [vmem:[%s16333_s0 + $0x10] sm:$0xff] }
 0xc86   :  { %13864 = vrcp.f32 %v10146_v21  ;;  %v10181_v26 = vmul.f32 %v13859_v63, %v15838_v12  ;;  %v11247_v12 = vpop.permute.xlu0 %11246 }
 0xc87   :  { %13480 = vmatmul.mubr.msk.f32.vlgmr.msra.gmra.mrb[112].mxu0 %vm1480_vm3, %v10174_v44 }
 0xc88   :  { %v13861_v51 = vpop.eup %13860  ;;  %13488 = vmatpush3.msra.mxu0 %v10943_v4  ;;  %13489 = vmatprep.mubr.msk.f32.mxu0 %vm13915_vm1, %v16393_v23 }
 0xc89   :  { %v10176_v1 = vmul.f32 %v13861_v51, %v15901_v55  ;;  %v11323_v62 = vpop.permute.xlu1 %11322  ;;  %13497 = vmatprep.subr.mxu0 %v16393_v23 }
 0xc8a   :  { %13513 = vmatpush3.msra.mxu1 %v11323_v62 }
 0xc8b   :  { %13490 = vmatmul.mubr.msk.f32.vlgmr.msra.gmra.mrb[114].mxu0 %vm1480_vm3, %v10176_v1  ;;  %13515 = vmatmul.mubr.msk.f32.vlgmr.msra.gmra.mrb[166].mxu1 %vm1480_vm3, %v10181_v26  ;;  %v13902_v1 = vld [vmem:[%s16333_s0 + $0x28] sm:$0xff] }
 0xc8c   :  { %v13863_v19 = vpop.eup %13862  ;;  %13498 = vmatpush3.msra.mxu0 %v11095_v13  ;;  %13499 = vmatprep.mubr.msk.f32.mxu0 %vm13915_vm1, %v16393_v23 }
 0xc8d   :  { %v10178_v36 = vmul.f32 %v13863_v19, %v15912_v24  ;;  %13507 = vmatprep.subr.mxu0 %v16393_v23 }
 0xc8f   :  { %13500 = vmatmul.mubr.msk.f32.vlgmr.msra.gmra.mrb[116].mxu0 %vm1480_vm3, %v10178_v36 }
 0xc90   :  { %v13865_v9 = vpop.eup %13864  ;;  %13508 = vmatpush3.msra.mxu0 %v11247_v12  ;;  %13509 = vmatprep.mubr.msk.f32.mxu0 %vm13915_vm1, %v16393_v23 }
 0xc91   :  { %v10180_v18 = vmul.f32 %v13865_v9, %v15916_v5  ;;  %13517 = vmatprep.subr.msk.mxu0 %vm5563_vm4, %v11398_v3 }
 0xc93   :  { %13510 = vmatmul.mubr.msk.f32.vlgmr.msra.gmra.mrb[118].mxu0 %vm1480_vm3, %v10180_v18 }
 0xc94   :  { %13518 = vmatpush3.msk.msra.mxu0 %vm5563_vm4, %v11398_v3  ;;  %v13903_v3 = vld [vmem:[%s16333_s0 + $0x20] sm:$0xff] }
 0xca6   :  { %v10330_v22 = vpop.f32.mrb[152].mxu1 }
 0xca7   :  { %v13446_v16 = vpop.f32.mrb[153].mxu1 }
 0xcaa   :  { %v10482_v59 = vpop.f32.mrb[154].mxu1 }
 0xcab   :  { %v13456_v56 = vpop.f32.mrb[155].mxu1 }
 0xcb2   :  { %v10634_v11 = vpop.f32.mrb[156].mxu1 }
 0xcb3   :  { %v13466_v8 = vpop.f32.mrb[157].mxu1 }
 0xcb6   :  { %v10786_v2 = vpop.f32.mrb[158].mxu1 }
 0xcb7   :  { %v13476_v38 = vpop.f32.mrb[159].mxu1 }
 0xcba   :  { %v10938_v28 = vpop.f32.mrb[160].mxu1 }
 0xcbb   :  { %v13486_v41 = vpop.f32.mrb[161].mxu1 }
 0xcbe   :  { %v11090_v27 = vpop.f32.mrb[162].mxu1 }
 0xcbf   :  { %v13496_v23 = vpop.f32.mrb[163].mxu1 }
 0xcc0   :  { %v10254_v49 = vpop.f32.mrb[104].mxu0 }
 0xcc1   :  { %v13441_v54 = vpop.f32.mrb[105].mxu0  ;;  %13519 = vmatprep.mubr.msk.f32.mxu0 %vm250_vm2, %v10254_v49 }
 0xcc2   :  { %v11242_v45 = vpop.f32.mrb[164].mxu1  ;;  %13520 = vmatmul.mubr.msk.f32.vlgmr.msra.gmra.mrb[64].mxu0 %vm250_vm2, %v10330_v22 }
 0xcc3   :  { %v13506_v0 = vpop.f32.mrb[165].mxu1 }
 0xcf5   :  { %v10406_v46 = vpop.f32.mrb[106].mxu0 }
 0xcf6   :  { %v13451_v34 = vpop.f32.mrb[107].mxu0  ;;  %13522 = vmatprep.mubr.msk.f32.mxu0 %vm250_vm2, %v10406_v46 }
 0xcf7   :  { %13523 = vmatmul.mubr.msk.f32.gmra.mrb[66].mxu0 %vm250_vm2, %v10482_v59  ;;  %v13904_v59 = vld [vmem:[%s16333_s0 + $0x38] sm:$0xff] }
 0xcf9   :  { %v10558_v14 = vpop.f32.mrb[108].mxu0 }
 0xcfa   :  { %v13461_v29 = vpop.f32.mrb[109].mxu0  ;;  %13525 = vmatprep.mubr.msk.f32.mxu0 %vm250_vm2, %v10558_v14 }
 0xcfb   :  { %13526 = vmatmul.mubr.msk.f32.gmra.mrb[68].mxu0 %vm250_vm2, %v10634_v11  ;;  %v13905_v11 = vld [vmem:[%s16333_s0 + $0x30] sm:$0xff] }
 0xcfd   :  { %v10710_v15 = vpop.f32.mrb[110].mxu0 }
 0xcfe   :  { %v13471_v17 = vpop.f32.mrb[111].mxu0  ;;  %13528 = vmatprep.mubr.msk.f32.mxu0 %vm250_vm2, %v10710_v15 }
 0xcff   :  { %13529 = vmatmul.mubr.msk.f32.gmra.mrb[70].mxu0 %vm250_vm2, %v10786_v2 }
 0xd5a   :  { %v10862_v47 = vpop.f32.mrb[112].mxu0 }
 0xd5b   :  { %v13481_v42 = vpop.f32.mrb[113].mxu0  ;;  %13531 = vmatprep.mubr.msk.f32.mxu0 %vm250_vm2, %v10862_v47 }
 0xd5c   :  { %13532 = vmatmul.mubr.msk.f32.gmra.mrb[72].mxu0 %vm250_vm2, %v10938_v28 }
 0xd5e   :  { %v11014_v50 = vpop.f32.mrb[114].mxu0  ;;  %v11394_v20 = vpop.f32.mrb[166].mxu1 }
 0xd5f   :  { %v13491_v7 = vpop.f32.mrb[115].mxu0  ;;  %v13516_v39 = vpop.f32.mrb[167].mxu1  ;;  %13534 = vmatprep.mubr.msk.f32.mxu0 %vm250_vm2, %v11014_v50 }
 0xd60   :  { %13535 = vmatmul.mubr.msk.f32.gmra.mrb[74].mxu0 %vm250_vm2, %v11090_v27 }
 0xd62   :  { %v11166_v32 = vpop.f32.mrb[116].mxu0 }
 0xd63   :  { %v13501_v55 = vpop.f32.mrb[117].mxu0  ;;  %13537 = vmatprep.mubr.msk.f32.mxu0 %vm250_vm2, %v11166_v32  ;;  %v13907_v32 = vld [vmem:[%s16333_s0 + $0x40] sm:$0xff] }
 0xd64   :  { %13538 = vmatmul.mubr.msk.f32.gmra.mrb[76].mxu0 %vm250_vm2, %v11242_v45 }
 0xd66   :  { %v11318_v37 = vpop.f32.mrb[118].mxu0 }
 0xd67   :  { %v13511_v24 = vpop.f32.mrb[119].mxu0  ;;  %13540 = vmatprep.mubr.msk.f32.mxu0 %vm250_vm2, %v11318_v37 }
 0xd68   :  { %13541 = vmatmul.mubr.msk.f32.gmra.mrb[78].mxu0 %vm250_vm2, %v11394_v20  ;;  %v13906_v20 = vld [vmem:[%s16333_s0 + $0x48] sm:$0xff] }
 0xd95   :  { %v13521_v5 = vpop.f32.mrb[64].mxu0 }
 0xd96   :  { %v11618_v6 = vadd.f32 %v13521_v5, %v15984_v33  ;;  %v11515_v25 = vpop.f32.mrb[65].mxu0 }
 0xd97   :  { %v11617_v40 = vadd.f32 %v15984_v33, %v11515_v25 }
 0xd98   :  { %v15991_v30 = vadd.f32 %v13898_v57, %v11618_v6 }
 0xd99   :  { %v15996_v52 = vadd.f32 %v13899_v10, %v11617_v40 }
 0xd9a   :  { %v11652_v61 = vsel %vm51_vm0, %v15991_v30, 0.0 }
 0xd9b   :  { %11653 = vadd.xlane.f32.xlu1 %v11652_v61  ;;  %v11649_v53 = vsel %vm51_vm0, %v15996_v52, 0.0 }
 0xd9c   :  { %11650 = vadd.xlane.f32.xlu0 %v11649_v53  ;;  %v13908_v53 = vld [vmem:[%s16333_s0 + $0x58] sm:$0xff] }
 0xdca   :  { %v13524_v48 = vpop.f32.mrb[66].mxu0 }
 0xdcb   :  { %v11620_v35 = vadd.f32 %v13524_v48, %v15984_v33  ;;  %v11525_v4 = vpop.f32.mrb[67].mxu0 }
 0xdcc   :  { %v11619_v13 = vadd.f32 %v15984_v33, %v11525_v4 }
 0xdcd   :  { %v16007_v60 = vadd.f32 %v13900_v43, %v11620_v35  ;;  %v13909_v35 = vld [vmem:[%s16333_s0 + $0x50] sm:$0xff] }
 0xdce   :  { %v13527_v31 = vpop.f32.mrb[68].mxu0  ;;  %v16012_v44 = vadd.f32 %v13901_v58, %v11619_v13 }
 0xdcf   :  { %v11622_v21 = vadd.f32 %v13527_v31, %v15984_v33  ;;  %v11535_v63 = vpop.f32.mrb[69].mxu0  ;;  %v11658_v51 = vsel %vm51_vm0, %v16007_v60, 0.0 }
 0xdd0   :  { %v11621_v26 = vadd.f32 %v15984_v33, %v11535_v63  ;;  %11659 = vadd.xlane.f32.xlu0 %v11658_v51  ;;  %v11655_v18 = vsel %vm51_vm0, %v16012_v44, 0.0 }
 0xdd1   :  { %v16021_v62 = vadd.f32 %v13902_v1, %v11622_v21  ;;  %v13910_v1 = vld [vmem:[%s16333_s0 + $0x68] sm:$0xff] }
 0xdd2   :  { %v13530_v19 = vpop.f32.mrb[70].mxu0  ;;  %v16026_v36 = vadd.f32 %v13903_v3, %v11621_v26  ;;  %v13911_v3 = vld [vmem:[%s16333_s0 + $0x60] sm:$0xff] }
 0xdd3   :  { %v11624_v12 = vadd.f32 %v13530_v19, %v15984_v33  ;;  %v11545_v9 = vpop.f32.mrb[71].mxu0  ;;  %v11664_v22 = vsel %vm51_vm0, %v16021_v62, 0.0 }
 0xdd4   :  { %v11623_v16 = vadd.f32 %v15984_v33, %v11545_v9  ;;  %11656 = vadd.xlane.f32.xlu0 %v11655_v18  ;;  %11665 = vadd.xlane.f32.xlu1 %v11664_v22  ;;  %v11661_v2 = vsel %vm51_vm0, %v16026_v36, 0.0 }
 0xdd5   :  { %v16037_v56 = vadd.f32 %v13904_v59, %v11624_v12 }
 0xdd6   :  { %v16042_v8 = vadd.f32 %v13905_v11, %v11623_v16 }
 0xdd7   :  { %v11670_v38 = vsel %vm51_vm0, %v16037_v56, 0.0 }
 0xdd8   :  { %11662 = vadd.xlane.f32.xlu0 %v11661_v2  ;;  %11671 = vadd.xlane.f32.xlu1 %v11670_v38  ;;  %v11667_v28 = vsel %vm51_vm0, %v16042_v8, 0.0 }
 0xddc   :  { %11668 = vadd.xlane.f32.xlu0 %v11667_v28  ;;  %v13912_v28 = vld [vmem:[%s16333_s0 + $0x78] sm:$0xff] }
 0xe28   :  { %v11654_v41 = vpop.xlane.xlu1 %11653 }
 0xe29   :  { %v11699_v27 = vmul.f32 0.0625, %v11654_v41  ;;  %v11651_v23 = vpop.xlane.xlu0 %11650 }
 0xe2a   :  { %v11698_v49 = vmul.f32 0.0625, %v11651_v23 }
 0xe2b   :  { %v11720_v54 = vrot.slane %v11699_v27, 4 }
 0xe2c   :  { %v11714_v45 = vrot.slane %v11698_v49, 4 }
 0xe2d   :  { %v11721_v0 = vadd.f32 %v11720_v54, %v11699_v27 }
 0xe2e   :  { %v11715_v46 = vadd.f32 %v11714_v45, %v11698_v49 }
 0xe2f   :  { %v11722_v34 = vrot.slane %v11721_v0, 2  ;;  %v13533_v14 = vpop.f32.mrb[72].mxu0 }
 0xe30   :  { %v11716_v29 = vrot.slane %v11715_v46, 2  ;;  %v11626_v15 = vadd.f32 %v13533_v14, %v15984_v33  ;;  %v11555_v17 = vpop.f32.mrb[73].mxu0 }
 0xe31   :  { %v11723_v47 = vadd.f32 %v11722_v34, %v11721_v0  ;;  %v11625_v42 = vadd.f32 %v15984_v33, %v11555_v17 }
 0xe32   :  { %v11717_v50 = vadd.f32 %v11716_v29, %v11715_v46  ;;  %v16055_v7 = vadd.f32 %v13906_v20, %v11626_v15 }
 0xe33   :  { %v11724_v39 = vrot.slane %v11723_v47, 1  ;;  %v16060_v55 = vadd.f32 %v13907_v32, %v11625_v42  ;;  %v13536_v37 = vpop.f32.mrb[74].mxu0 }
 0xe34   :  { %v11718_v24 = vrot.slane %v11717_v50, 1  ;;  %v11628_v5 = vadd.f32 %v13536_v37, %v15984_v33  ;;  %v11565_v6 = vpop.f32.mrb[75].mxu0  ;;  %v11676_v25 = vsel %vm51_vm0, %v16055_v7, 0.0 }
 0xe35   :  { %v11725_v40 = vadd.f32 %v11724_v39, %v11723_v47  ;;  %v11627_v57 = vadd.f32 %v15984_v33, %v11565_v6  ;;  %11677 = vadd.xlane.f32.xlu1 %v11676_v25  ;;  %v11673_v10 = vsel %vm51_vm0, %v16060_v55, 0.0 }
 0xe36   :  { %v11719_v61 = vadd.f32 %v11718_v24, %v11717_v50  ;;  %v16071_v48 = vadd.f32 %v13908_v53, %v11628_v5  ;;  %11674 = vadd.xlane.f32.xlu0 %v11673_v10 }
 0xe37   :  { %v16076_v4 = vadd.f32 %v13909_v35, %v11627_v57  ;;  %v13539_v13 = vpop.f32.mrb[76].mxu0  ;;  %v11812_v43 = vmul.f32 0.125, %v11725_v40 }
 0xe38   :  { %v11630_v31 = vadd.f32 %v13539_v13, %v15984_v33  ;;  %v11575_v58 = vpop.f32.mrb[77].mxu0  ;;  %v11682_v21 = vsel %vm51_vm0, %v16071_v48, 0.0  ;;  %v11811_v63 = vmul.f32 0.125, %v11719_v61 }
 0xe39   :  { %v11629_v51 = vadd.f32 %v15984_v33, %v11575_v58  ;;  %11683 = vadd.xlane.f32.xlu1 %v11682_v21  ;;  %v11679_v26 = vsel %vm51_vm0, %v16076_v4, 0.0  ;;  %v16098_v59 = vsub.f32 %v15991_v30, %v11812_v43  ;;  %v13913_v30 = vld [vmem:[%s16333_s0 + $0x70] sm:$0xff] }
 0xe3a   :  { %v16087_v19 = vadd.f32 %v13910_v1, %v11630_v31  ;;  %11680 = vadd.xlane.f32.xlu0 %v11679_v26  ;;  %v16104_v38 = vsub.f32 %v15996_v52, %v11811_v63 }
 0xe3b   :  { %v16092_v12 = vadd.f32 %v13911_v3, %v11629_v51  ;;  %v13542_v9 = vpop.f32.mrb[78].mxu0  ;;  %v11844_v52 = vmul.f32 %v16098_v59, %v16098_v59 }
 0xe3c   :  { %v11632_v18 = vadd.f32 %v13542_v9, %v15984_v33  ;;  %v11585_v22 = vpop.f32.mrb[79].mxu0  ;;  %v11688_v16 = vsel %vm51_vm0, %v16087_v19, 0.0  ;;  %v11843_v49 = vmul.f32 %v16104_v38, %v16104_v38 }
 0xe3d   :  { %v11631_v11 = vadd.f32 %v15984_v33, %v11585_v22  ;;  %11689 = vadd.xlane.f32.xlu1 %v11688_v16  ;;  %v11685_v2 = vsel %vm51_vm0, %v16092_v12, 0.0  ;;  %v11862_v54 = vsel %vm51_vm0, %v11844_v52, 0.0 }
 0xe3e   :  { %v16109_v41 = vadd.f32 %v13912_v28, %v11632_v18  ;;  %11686 = vadd.xlane.f32.xlu0 %v11685_v2  ;;  %v11859_v45 = vsel %vm51_vm0, %v11843_v49, 0.0 }
 0xe3f   :  { %v16114_v27 = vadd.f32 %v13913_v30, %v11631_v11 }
 0xe40   :  { %v11694_v33 = vsel %vm51_vm0, %v16109_v41, 0.0 }
 0xe41   :  { %11695 = vadd.xlane.f32.xlu1 %v11694_v33  ;;  %v11691_v23 = vsel %vm51_vm0, %v16114_v27, 0.0 }
 0xe42   :  { %11692 = vadd.xlane.f32.xlu0 %v11691_v23 }
 0xe45   :  { %11863 = vadd.xlane.f32.xlu1 %v11862_v54 }
 0xe46   :  { %11860 = vadd.xlane.f32.xlu0 %v11859_v45 }
 0xe5d   :  { %v11660_v0 = vpop.xlane.xlu0 %11659 }
 0xe5e   :  { %v11701_v46 = vmul.f32 0.0625, %v11660_v0 }
 0xe60   :  { %v11732_v34 = vrot.slane %v11701_v46, 4 }
 0xe61   :  { %v11657_v14 = vpop.xlane.xlu0 %11656  ;;  %v11666_v29 = vpop.xlane.xlu1 %11665 }
 0xe62   :  { %v11733_v15 = vadd.f32 %v11732_v34, %v11701_v46  ;;  %v11700_v17 = vmul.f32 0.0625, %v11657_v14  ;;  %v11703_v47 = vmul.f32 0.0625, %v11666_v29 }
 0xe64   :  { %v11734_v42 = vrot.slane %v11733_v15, 2  ;;  %v11726_v50 = vrot.slane %v11700_v17, 4  ;;  %v11744_v20 = vrot.slane %v11703_v47, 4 }
 0xe65   :  { %v11663_v39 = vpop.xlane.xlu0 %11662  ;;  %v11672_v32 = vpop.xlane.xlu1 %11671 }
 0xe66   :  { %v11735_v37 = vadd.f32 %v11734_v42, %v11733_v15  ;;  %v11727_v24 = vadd.f32 %v11726_v50, %v11700_v17  ;;  %v11745_v5 = vadd.f32 %v11744_v20, %v11703_v47  ;;  %v11702_v6 = vmul.f32 0.0625, %v11663_v39 }
 0xe67   :  { %v11705_v25 = vmul.f32 0.0625, %v11672_v32 }
 0xe68   :  { %v11736_v40 = vrot.slane %v11735_v37, 1  ;;  %v11728_v57 = vrot.slane %v11727_v24, 2  ;;  %v11746_v10 = vrot.slane %v11745_v5, 2  ;;  %v11738_v61 = vrot.slane %v11702_v6, 4 }
 0xe69   :  { %v11756_v53 = vrot.slane %v11705_v25, 4  ;;  %v11669_v35 = vpop.xlane.xlu0 %11668 }
 0xe6a   :  { %v11737_v13 = vadd.f32 %v11736_v40, %v11735_v37  ;;  %v11729_v43 = vadd.f32 %v11728_v57, %v11727_v24  ;;  %v11747_v31 = vadd.f32 %v11746_v10, %v11745_v5  ;;  %v11739_v58 = vadd.f32 %v11738_v61, %v11702_v6 }
 0xe6b   :  { %v11757_v21 = vadd.f32 %v11756_v53, %v11705_v25  ;;  %v11704_v63 = vmul.f32 0.0625, %v11669_v35 }
 0xe6c   :  { %v11814_v51 = vmul.f32 0.125, %v11737_v13  ;;  %v11730_v26 = vrot.slane %v11729_v43, 1  ;;  %v11748_v1 = vrot.slane %v11747_v31, 1  ;;  %v11740_v3 = vrot.slane %v11739_v58, 2 }
 0xe6d   :  { %v11758_v9 = vrot.slane %v11757_v21, 2  ;;  %v11750_v18 = vrot.slane %v11704_v63, 4 }
 0xe6e   :  { %v11731_v22 = vadd.f32 %v11730_v26, %v11729_v43  ;;  %v11749_v16 = vadd.f32 %v11748_v1, %v11747_v31  ;;  %v11741_v11 = vadd.f32 %v11740_v3, %v11739_v58  ;;  %v16127_v2 = vsub.f32 %v16007_v60, %v11814_v51 }
 0xe6f   :  { %v11759_v28 = vadd.f32 %v11758_v9, %v11757_v21  ;;  %v11751_v30 = vadd.f32 %v11750_v18, %v11704_v63 }
 0xe70   :  { %v11813_v33 = vmul.f32 0.125, %v11731_v22  ;;  %v11816_v52 = vmul.f32 0.125, %v11749_v16  ;;  %v11742_v23 = vrot.slane %v11741_v11, 1  ;;  %v11846_v49 = vmul.f32 %v16127_v2, %v16127_v2 }
 0xe71   :  { %v11760_v54 = vrot.slane %v11759_v28, 1  ;;  %v11752_v45 = vrot.slane %v11751_v30, 2 }
 0xe72   :  { %v11743_v0 = vadd.f32 %v11742_v23, %v11741_v11  ;;  %v11868_v46 = vsel %vm51_vm0, %v11846_v49, 0.0  ;;  %v16133_v34 = vsub.f32 %v16021_v62, %v11816_v52  ;;  %v16136_v14 = vsub.f32 %v16012_v44, %v11813_v33 }
 0xe73   :  { %v11761_v60 = vadd.f32 %v11760_v54, %v11759_v28  ;;  %v11753_v29 = vadd.f32 %v11752_v45, %v11751_v30  ;;  %11869 = vadd.xlane.f32.xlu1 %v11868_v46 }
 0xe74   :  { %v11815_v15 = vmul.f32 0.125, %v11743_v0  ;;  %v11848_v17 = vmul.f32 %v16133_v34, %v16133_v34  ;;  %v11845_v47 = vmul.f32 %v16136_v14, %v16136_v14 }
 0xe75   :  { %v11818_v42 = vmul.f32 0.125, %v11761_v60  ;;  %v11754_v50 = vrot.slane %v11753_v29, 1 }
 0xe76   :  { %v11874_v20 = vsel %vm51_vm0, %v11848_v17, 0.0  ;;  %v11865_v62 = vsel %vm51_vm0, %v11845_v47, 0.0  ;;  %v16145_v39 = vsub.f32 %v16026_v36, %v11815_v15 }
 0xe77   :  { %v11755_v44 = vadd.f32 %v11754_v50, %v11753_v29  ;;  %11875 = vadd.xlane.f32.xlu1 %v11874_v20  ;;  %11866 = vadd.xlane.f32.xlu0 %v11865_v62  ;;  %v16148_v32 = vsub.f32 %v16037_v56, %v11818_v42 }
 0xe78   :  { %v11847_v37 = vmul.f32 %v16145_v39, %v16145_v39 }
 0xe79   :  { %v11817_v24 = vmul.f32 0.125, %v11755_v44  ;;  %v11850_v5 = vmul.f32 %v16148_v32, %v16148_v32 }
 0xe7a   :  { %v11871_v6 = vsel %vm51_vm0, %v11847_v37, 0.0 }
 0xe7b   :  { %v11880_v25 = vsel %vm51_vm0, %v11850_v5, 0.0  ;;  %11872 = vadd.xlane.f32.xlu0 %v11871_v6  ;;  %v16157_v36 = vsub.f32 %v16042_v8, %v11817_v24 }
 0xe7c   :  { %11881 = vadd.xlane.f32.xlu1 %v11880_v25 }
 0xe7d   :  { %v11849_v56 = vmul.f32 %v16157_v36, %v16157_v36 }
 0xe7f   :  { %v11877_v40 = vsel %vm51_vm0, %v11849_v56, 0.0 }
 0xe80   :  { %11878 = vadd.xlane.f32.xlu0 %v11877_v40 }
 0xec2   :  { %v11678_v57 = vpop.xlane.xlu1 %11677 }
 0xec3   :  { %v11707_v10 = vmul.f32 0.0625, %v11678_v57  ;;  %v11675_v61 = vpop.xlane.xlu0 %11674 }
 0xec4   :  { %v11706_v53 = vmul.f32 0.0625, %v11675_v61 }
 0xec5   :  { %v11768_v35 = vrot.slane %v11707_v10, 4 }
 0xec6   :  { %v11762_v13 = vrot.slane %v11706_v53, 4  ;;  %v11684_v43 = vpop.xlane.xlu1 %11683 }
 0xec7   :  { %v11769_v31 = vadd.f32 %v11768_v35, %v11707_v10  ;;  %v11709_v58 = vmul.f32 0.0625, %v11684_v43  ;;  %v11681_v21 = vpop.xlane.xlu0 %11680 }
 0xec8   :  { %v11763_v63 = vadd.f32 %v11762_v13, %v11706_v53  ;;  %v11708_v8 = vmul.f32 0.0625, %v11681_v21 }
 0xec9   :  { %v11770_v51 = vrot.slane %v11769_v31, 2  ;;  %v11780_v26 = vrot.slane %v11709_v58, 4 }
 0xeca   :  { %v11764_v1 = vrot.slane %v11763_v63, 2  ;;  %v11774_v3 = vrot.slane %v11708_v8, 4  ;;  %v11690_v9 = vpop.xlane.xlu1 %11689 }
 0xecb   :  { %v11771_v18 = vadd.f32 %v11770_v51, %v11769_v31  ;;  %v11781_v22 = vadd.f32 %v11780_v26, %v11709_v58  ;;  %v11711_v16 = vmul.f32 0.0625, %v11690_v9  ;;  %v11687_v11 = vpop.xlane.xlu0 %11686 }
 0xecc   :  { %v11765_v28 = vadd.f32 %v11764_v1, %v11763_v63  ;;  %v11775_v30 = vadd.f32 %v11774_v3, %v11708_v8  ;;  %v11710_v33 = vmul.f32 0.0625, %v11687_v11 }
 0xecd   :  { %v11772_v52 = vrot.slane %v11771_v18, 1  ;;  %v11782_v23 = vrot.slane %v11781_v22, 2  ;;  %v11792_v49 = vrot.slane %v11711_v16, 4 }
 0xece   :  { %v11766_v54 = vrot.slane %v11765_v28, 1  ;;  %v11776_v45 = vrot.slane %v11775_v30, 2  ;;  %v11786_v0 = vrot.slane %v11710_v33, 4  ;;  %v11696_v46 = vpop.xlane.xlu1 %11695 }
 0xecf   :  { %v11773_v60 = vadd.f32 %v11772_v52, %v11771_v18  ;;  %v11783_v29 = vadd.f32 %v11782_v23, %v11781_v22  ;;  %v11793_v15 = vadd.f32 %v11792_v49, %v11711_v16  ;;  %v11713_v17 = vmul.f32 0.0625, %v11696_v46  ;;  %v11693_v47 = vpop.xlane.xlu0 %11692 }
 0xed0   :  { %v11767_v42 = vadd.f32 %v11766_v54, %v11765_v28  ;;  %v11777_v50 = vadd.f32 %v11776_v45, %v11775_v30  ;;  %v11787_v20 = vadd.f32 %v11786_v0, %v11710_v33  ;;  %v11712_v62 = vmul.f32 0.0625, %v11693_v47 }
 0xed1   :  { %v11820_v44 = vmul.f32 0.125, %v11773_v60  ;;  %v11784_v37 = vrot.slane %v11783_v29, 1  ;;  %v11794_v24 = vrot.slane %v11793_v15, 2  ;;  %v11804_v5 = vrot.slane %v11713_v17, 4 }
 0xed2   :  { %v11819_v6 = vmul.f32 0.125, %v11767_v42  ;;  %v11778_v25 = vrot.slane %v11777_v50, 1  ;;  %v11788_v56 = vrot.slane %v11787_v20, 2  ;;  %v11798_v40 = vrot.slane %v11712_v62, 4  ;;  %v11864_v57 = vpop.xlane.xlu1 %11863 }
 0xed3   :  { %v11785_v10 = vadd.f32 %v11784_v37, %v11783_v29  ;;  %v11795_v61 = vadd.f32 %v11794_v24, %v11793_v15  ;;  %v11805_v53 = vadd.f32 %v11804_v5, %v11713_v17  ;;  %v11908_v35 = vmul.f32 0.0625, %v11864_v57  ;;  %v11861_v13 = vpop.xlane.xlu0 %11860 }
 0xed4   :  { %v11779_v43 = vadd.f32 %v11778_v25, %v11777_v50  ;;  %v11789_v31 = vadd.f32 %v11788_v56, %v11787_v20  ;;  %v11799_v58 = vadd.f32 %v11798_v40, %v11712_v62  ;;  %v11907_v21 = vmul.f32 0.0625, %v11861_v13 }
 0xed5   :  { %v11822_v63 = vmul.f32 0.125, %v11785_v10  ;;  %v11796_v8 = vrot.slane %v11795_v61, 1  ;;  %v11806_v51 = vrot.slane %v11805_v53, 2  ;;  %v11929_v26 = vrot.slane %v11908_v35, 4 }
 0xed6   :  { %v11821_v1 = vmul.f32 0.125, %v11779_v43  ;;  %v11790_v3 = vrot.slane %v11789_v31, 1  ;;  %v11800_v9 = vrot.slane %v11799_v58, 2  ;;  %v11923_v18 = vrot.slane %v11907_v21, 4 }
 0xed7   :  { %v11797_v22 = vadd.f32 %v11796_v8, %v11795_v61  ;;  %v11807_v16 = vadd.f32 %v11806_v51, %v11805_v53  ;;  %v11930_v11 = vadd.f32 %v11929_v26, %v11908_v35  ;;  %v16163_v28 = vsub.f32 %v16055_v7, %v11820_v44  ;;  %v16213_v26 = vld [vmem:[%s16337_s5] ss:$0 sm:$0xff] }
 0xed8   :  { %v11791_v30 = vadd.f32 %v11790_v3, %v11789_v31  ;;  %v11801_v33 = vadd.f32 %v11800_v9, %v11799_v58  ;;  %v11924_v52 = vadd.f32 %v11923_v18, %v11907_v21  ;;  %v16166_v23 = vsub.f32 %v16060_v55, %v11819_v6  ;;  %v16219_v9 = vld [vmem:[%s16338_s6] ss:$0 sm:$0xff] }
 0xed9   :  { %v11824_v49 = vmul.f32 0.125, %v11797_v22  ;;  %v11808_v54 = vrot.slane %v11807_v16, 1  ;;  %v11931_v45 = vrot.slane %v11930_v11, 2  ;;  %v11852_v0 = vmul.f32 %v16163_v28, %v16163_v28 }
 0xeda   :  { %v11823_v46 = vmul.f32 0.125, %v11791_v30  ;;  %v11802_v60 = vrot.slane %v11801_v33, 1  ;;  %v11925_v29 = vrot.slane %v11924_v52, 2  ;;  %v11851_v15 = vmul.f32 %v16166_v23, %v16166_v23 }
 0xedb   :  { %v11809_v7 = vadd.f32 %v11808_v54, %v11807_v16  ;;  %v11932_v17 = vadd.f32 %v11931_v45, %v11930_v11  ;;  %v11886_v47 = vsel %vm51_vm0, %v11852_v0, 0.0  ;;  %v16174_v42 = vsub.f32 %v16071_v48, %v11822_v63 }
 0xedc   :  { %v11803_v55 = vadd.f32 %v11802_v60, %v11801_v33  ;;  %v11926_v50 = vadd.f32 %v11925_v29, %v11924_v52  ;;  %11887 = vadd.xlane.f32.xlu1 %v11886_v47  ;;  %v11883_v20 = vsel %vm51_vm0, %v11851_v15, 0.0  ;;  %v16178_v62 = vsub.f32 %v16076_v4, %v11821_v1 }
 0xedd   :  { %v11826_v44 = vmul.f32 0.125, %v11809_v7  ;;  %v11933_v37 = vrot.slane %v11932_v17, 1  ;;  %11884 = vadd.xlane.f32.xlu0 %v11883_v20  ;;  %v11854_v24 = vmul.f32 %v16174_v42, %v16174_v42  ;;  %v16183_v5 = vsub.f32 %v16087_v19, %v11824_v49 }
 0xede   :  { %v11825_v6 = vmul.f32 0.125, %v11803_v55  ;;  %v11927_v48 = vrot.slane %v11926_v50, 1  ;;  %v11853_v25 = vmul.f32 %v16178_v62, %v16178_v62  ;;  %v16188_v56 = vsub.f32 %v16092_v12, %v11823_v46 }
 0xedf   :  { %v11934_v40 = vadd.f32 %v11933_v37, %v11932_v17  ;;  %v11892_v4 = vsel %vm51_vm0, %v11854_v24, 0.0  ;;  %v11856_v57 = vmul.f32 %v16183_v5, %v16183_v5  ;;  %v16194_v10 = vsub.f32 %v16109_v41, %v11826_v44 }
 0xee0   :  { %v11928_v61 = vadd.f32 %v11927_v48, %v11926_v50  ;;  %11893 = vadd.xlane.f32.xlu1 %v11892_v4  ;;  %v11889_v19 = vsel %vm51_vm0, %v11853_v25, 0.0  ;;  %v11855_v53 = vmul.f32 %v16188_v56, %v16188_v56  ;;  %v16200_v35 = vsub.f32 %v16114_v27, %v11825_v6 }
 0xee1   :  { %v12020_v12 = vmul.f32 0.125, %v11934_v40  ;;  %11890 = vadd.xlane.f32.xlu0 %v11889_v19  ;;  %v11898_v13 = vsel %vm51_vm0, %v11856_v57, 0.0  ;;  %v11858_v43 = vmul.f32 %v16194_v10, %v16194_v10 }
 0xee2   :  { %v12019_v31 = vmul.f32 0.125, %v11928_v61  ;;  %v11895_v41 = vsel %vm51_vm0, %v11855_v53, 0.0  ;;  %v11857_v58 = vmul.f32 %v16200_v35, %v16200_v35 }
 0xee3   :  { %v12036_v21 = vadd.f32 1e-12, %v12020_v12  ;;  %v11904_v27 = vsel %vm51_vm0, %v11858_v43, 0.0 }
 0xee4   :  { %v12035_v63 = vadd.f32 1e-12, %v12019_v31  ;;  %11899 = vadd.xlane.f32.xlu1 %v11898_v13  ;;  %v11901_v8 = vsel %vm51_vm0, %v11857_v58, 0.0 }
 0xee5   :  { %13866 = vrsqrt.f32 %v12036_v21  ;;  %11896 = vadd.xlane.f32.xlu0 %v11895_v41 }
 0xee6   :  { %13868 = vrsqrt.f32 %v12035_v63 }
 0xee8   :  { %11905 = vadd.xlane.f32.xlu1 %v11904_v27 }
 0xee9   :  { %11902 = vadd.xlane.f32.xlu0 %v11901_v8 }
 0xeef   :  { %v13867_v51 = vpop.eup %13866 }
 0xef0   :  { %v13869_v1 = vpop.eup %13868  ;;  %v12068_v3 = vmul.f32 %v13867_v51, %v16098_v59 }
 0xef1   :  { %v12067_v18 = vmul.f32 %v13869_v1, %v16104_v38 }
 0xef2   :  { %v12091_v22 = vmul.f32 %v16213_v26, %v12068_v3 }
 0xef3   :  { %v12090_v16 = vmul.f32 %v16213_v26, %v12067_v18 }
 0xef4   :  { %v12114_v11 = vadd.f32 %v16219_v9, %v12091_v22 }
 0xef5   :  { %v12113_v30 = vadd.f32 %v16219_v9, %v12090_v16 }
 0xef6   :  { %12130 = vst.msk [vmem:[%s16339_s7 + $0x8] sm:$0xff] %vm51_vm0, %v12114_v11 }
 0xef7   :  { %12129 = vst.msk [vmem:[%s16339_s7] sm:$0xff] %vm51_vm0, %v12113_v30 }
 0xf00   :  { %v11870_v59 = vpop.xlane.xlu1 %11869 }
 0xf01   :  { %v11910_v38 = vmul.f32 0.0625, %v11870_v59 }
 0xf03   :  { %v11941_v33 = vrot.slane %v11910_v38, 4 }
 0xf04   :  { %v11876_v52 = vpop.xlane.xlu1 %11875  ;;  %v11867_v49 = vpop.xlane.xlu0 %11866 }
 0xf05   :  { %v11942_v54 = vadd.f32 %v11941_v33, %v11910_v38  ;;  %v11912_v45 = vmul.f32 0.0625, %v11876_v52  ;;  %v11909_v0 = vmul.f32 0.0625, %v11867_v49 }
 0xf07   :  { %v11943_v46 = vrot.slane %v11942_v54, 2  ;;  %v11953_v60 = vrot.slane %v11912_v45, 4  ;;  %v11935_v29 = vrot.slane %v11909_v0, 4 }
 0xf08   :  { %v11873_v15 = vpop.xlane.xlu0 %11872 }
 0xf09   :  { %v11944_v7 = vadd.f32 %v11943_v46, %v11942_v54  ;;  %v11954_v17 = vadd.f32 %v11953_v60, %v11912_v45  ;;  %v11936_v47 = vadd.f32 %v11935_v29, %v11909_v0  ;;  %v11882_v55 = vpop.xlane.xlu1 %11881  ;;  %v11911_v50 = vmul.f32 0.0625, %v11873_v15 }
 0xf0a   :  { %v11914_v20 = vmul.f32 0.0625, %v11882_v55 }
 0xf0b   :  { %v11945_v44 = vrot.slane %v11944_v7, 1  ;;  %v11955_v37 = vrot.slane %v11954_v17, 2  ;;  %v11937_v24 = vrot.slane %v11936_v47, 2  ;;  %v11947_v6 = vrot.slane %v11911_v50, 4 }
 0xf0c   :  { %v11965_v48 = vrot.slane %v11914_v20, 4 }
 0xf0d   :  { %v11946_v25 = vadd.f32 %v11945_v44, %v11944_v7  ;;  %v11956_v40 = vadd.f32 %v11955_v37, %v11954_v17  ;;  %v11938_v4 = vadd.f32 %v11937_v24, %v11936_v47  ;;  %v11948_v57 = vadd.f32 %v11947_v6, %v11911_v50  ;;  %v11879_v61 = vpop.xlane.xlu0 %11878 }
 0xf0e   :  { %v11966_v19 = vadd.f32 %v11965_v48, %v11914_v20  ;;  %v11913_v53 = vmul.f32 0.0625, %v11879_v61 }
 0xf0f   :  { %v12022_v12 = vmul.f32 0.125, %v11946_v25  ;;  %v11957_v13 = vrot.slane %v11956_v40, 1  ;;  %v11939_v43 = vrot.slane %v11938_v4, 1  ;;  %v11949_v31 = vrot.slane %v11948_v57, 2 }
 0xf10   :  { %v11967_v41 = vrot.slane %v11966_v19, 2  ;;  %v11959_v58 = vrot.slane %v11913_v53, 4 }
 0xf11   :  { %v12038_v21 = vadd.f32 1e-12, %v12022_v12  ;;  %v11958_v63 = vadd.f32 %v11957_v13, %v11956_v40  ;;  %v11940_v27 = vadd.f32 %v11939_v43, %v11938_v4  ;;  %v11950_v8 = vadd.f32 %v11949_v31, %v11948_v57 }
 0xf12   :  { %v11968_v51 = vadd.f32 %v11967_v41, %v11966_v19  ;;  %v11960_v1 = vadd.f32 %v11959_v58, %v11913_v53 }
 0xf13   :  { %13870 = vrsqrt.f32 %v12038_v21  ;;  %v12024_v3 = vmul.f32 0.125, %v11958_v63  ;;  %v12021_v18 = vmul.f32 0.125, %v11940_v27  ;;  %v11951_v22 = vrot.slane %v11950_v8, 1 }
 0xf14   :  { %v11969_v16 = vrot.slane %v11968_v51, 1  ;;  %v11961_v11 = vrot.slane %v11960_v1, 2 }
 0xf15   :  { %v12040_v30 = vadd.f32 1e-12, %v12024_v3  ;;  %v12037_v59 = vadd.f32 1e-12, %v12021_v18  ;;  %v11952_v38 = vadd.f32 %v11951_v22, %v11950_v8 }
 0xf16   :  { %v11970_v33 = vadd.f32 %v11969_v16, %v11968_v51  ;;  %v11962_v52 = vadd.f32 %v11961_v11, %v11960_v1 }
 0xf17   :  { %13872 = vrsqrt.f32 %v12040_v30  ;;  %v12023_v49 = vmul.f32 0.125, %v11952_v38 }
 0xf18   :  { %13874 = vrsqrt.f32 %v12037_v59  ;;  %v12026_v54 = vmul.f32 0.125, %v11970_v33  ;;  %v11963_v45 = vrot.slane %v11962_v52, 1 }
 0xf19   :  { %v12039_v0 = vadd.f32 1e-12, %v12023_v49 }
 0xf1a   :  { %v12042_v46 = vadd.f32 1e-12, %v12026_v54  ;;  %v11964_v60 = vadd.f32 %v11963_v45, %v11962_v52 }
 0xf1b   :  { %13876 = vrsqrt.f32 %v12039_v0 }
 0xf1c   :  { %13878 = vrsqrt.f32 %v12042_v46  ;;  %v12025_v29 = vmul.f32 0.125, %v11964_v60 }
 0xf1d   :  { %v13871_v15 = vpop.eup %13870 }
 0xf1e   :  { %v12070_v7 = vmul.f32 %v13871_v15, %v16127_v2  ;;  %v12041_v17 = vadd.f32 1e-12, %v12025_v29 }
 0xf20   :  { %v12093_v47 = vmul.f32 %v16213_v26, %v12070_v7  ;;  %13880 = vrsqrt.f32 %v12041_v17 }
 0xf21   :  { %v13873_v55 = vpop.eup %13872 }
 0xf22   :  { %v13875_v50 = vpop.eup %13874  ;;  %v12116_v20 = vadd.f32 %v16219_v9, %v12093_v47  ;;  %v12072_v44 = vmul.f32 %v13873_v55, %v16133_v34 }
 0xf23   :  { %v12069_v37 = vmul.f32 %v13875_v50, %v16136_v14 }
 0xf24   :  { %12132 = vst.msk [vmem:[%s16339_s7 + $0x18] sm:$0xff] %vm51_vm0, %v12116_v20  ;;  %v12095_v24 = vmul.f32 %v16213_v26, %v12072_v44 }
 0xf25   :  { %v13877_v2 = vpop.eup %13876  ;;  %v12092_v6 = vmul.f32 %v16213_v26, %v12069_v37 }
 0xf26   :  { %v13879_v48 = vpop.eup %13878  ;;  %v12118_v25 = vadd.f32 %v16219_v9, %v12095_v24  ;;  %v12071_v40 = vmul.f32 %v13877_v2, %v16145_v39 }
 0xf27   :  { %v12115_v4 = vadd.f32 %v16219_v9, %v12092_v6  ;;  %v12074_v34 = vmul.f32 %v13879_v48, %v16148_v32 }
 0xf28   :  { %12134 = vst.msk [vmem:[%s16339_s7 + $0x28] sm:$0xff] %vm51_vm0, %v12118_v25  ;;  %v12094_v14 = vmul.f32 %v16213_v26, %v12071_v40 }
 0xf29   :  { %12131 = vst.msk [vmem:[%s16339_s7 + $0x10] sm:$0xff] %vm51_vm0, %v12115_v4  ;;  %v12097_v57 = vmul.f32 %v16213_v26, %v12074_v34 }
 0xf2a   :  { %v13881_v61 = vpop.eup %13880  ;;  %v12117_v39 = vadd.f32 %v16219_v9, %v12094_v14 }
 0xf2b   :  { %v12120_v19 = vadd.f32 %v16219_v9, %v12097_v57  ;;  %v12073_v32 = vmul.f32 %v13881_v61, %v16157_v36 }
 0xf2c   :  { %12133 = vst.msk [vmem:[%s16339_s7 + $0x20] sm:$0xff] %vm51_vm0, %v12117_v39 }
 0xf2d   :  { %12136 = vst.msk [vmem:[%s16339_s7 + $0x38] sm:$0xff] %vm51_vm0, %v12120_v19  ;;  %v12096_v53 = vmul.f32 %v16213_v26, %v12073_v32 }
 0xf2f   :  { %v12119_v12 = vadd.f32 %v16219_v9, %v12096_v53 }
 0xf31   :  { %12135 = vst.msk [vmem:[%s16339_s7 + $0x30] sm:$0xff] %vm51_vm0, %v12119_v12 }
 0xf69   :  { %v11888_v36 = vpop.xlane.xlu1 %11887 }
 0xf6a   :  { %v11916_v13 = vmul.f32 0.0625, %v11888_v36  ;;  %v11885_v43 = vpop.xlane.xlu0 %11884 }
 0xf6b   :  { %v11915_v31 = vmul.f32 0.0625, %v11885_v43 }
 0xf6c   :  { %v11977_v41 = vrot.slane %v11916_v13, 4 }
 0xf6d   :  { %v11971_v58 = vrot.slane %v11915_v31, 4  ;;  %v11894_v21 = vpop.xlane.xlu1 %11893 }
 0xf6e   :  { %v11978_v63 = vadd.f32 %v11977_v41, %v11916_v13  ;;  %v11918_v27 = vmul.f32 0.0625, %v11894_v21  ;;  %v11891_v8 = vpop.xlane.xlu0 %11890 }
 0xf6f   :  { %v11972_v51 = vadd.f32 %v11971_v58, %v11915_v31  ;;  %v11917_v1 = vmul.f32 0.0625, %v11891_v8 }
 0xf70   :  { %v11979_v3 = vrot.slane %v11978_v63, 2  ;;  %v11989_v18 = vrot.slane %v11918_v27, 4 }
 0xf71   :  { %v11973_v22 = vrot.slane %v11972_v51, 2  ;;  %v11983_v16 = vrot.slane %v11917_v1, 4  ;;  %v11900_v11 = vpop.xlane.xlu1 %11899 }
 0xf72   :  { %v11980_v30 = vadd.f32 %v11979_v3, %v11978_v63  ;;  %v11990_v59 = vadd.f32 %v11989_v18, %v11918_v27  ;;  %v11920_v38 = vmul.f32 0.0625, %v11900_v11  ;;  %v11897_v33 = vpop.xlane.xlu0 %11896 }
 0xf73   :  { %v11974_v52 = vadd.f32 %v11973_v22, %v11972_v51  ;;  %v11984_v49 = vadd.f32 %v11983_v16, %v11917_v1  ;;  %v11919_v54 = vmul.f32 0.0625, %v11897_v33 }
 0xf74   :  { %v11981_v45 = vrot.slane %v11980_v30, 1  ;;  %v11991_v0 = vrot.slane %v11990_v59, 2  ;;  %v12001_v46 = vrot.slane %v11920_v38, 4 }
 0xf75   :  { %v11975_v60 = vrot.slane %v11974_v52, 1  ;;  %v11985_v29 = vrot.slane %v11984_v49, 2  ;;  %v11995_v15 = vrot.slane %v11919_v54, 4  ;;  %v11906_v7 = vpop.xlane.xlu1 %11905 }
 0xf76   :  { %v11982_v17 = vadd.f32 %v11981_v45, %v11980_v30  ;;  %v11992_v47 = vadd.f32 %v11991_v0, %v11990_v59  ;;  %v12002_v55 = vadd.f32 %v12001_v46, %v11920_v38  ;;  %v11922_v50 = vmul.f32 0.0625, %v11906_v7  ;;  %v11903_v20 = vpop.xlane.xlu0 %11902 }
 0xf77   :  { %v11976_v44 = vadd.f32 %v11975_v60, %v11974_v52  ;;  %v11986_v37 = vadd.f32 %v11985_v29, %v11984_v49  ;;  %v11996_v24 = vadd.f32 %v11995_v15, %v11919_v54  ;;  %v11921_v2 = vmul.f32 0.0625, %v11903_v20 }
 0xf78   :  { %v12028_v6 = vmul.f32 0.125, %v11982_v17  ;;  %v11993_v48 = vrot.slane %v11992_v47, 1  ;;  %v12003_v25 = vrot.slane %v12002_v55, 2  ;;  %v12013_v40 = vrot.slane %v11922_v50, 4 }
 0xf79   :  { %v12027_v4 = vmul.f32 0.125, %v11976_v44  ;;  %v11987_v34 = vrot.slane %v11986_v37, 1  ;;  %v11997_v14 = vrot.slane %v11996_v24, 2  ;;  %v12007_v57 = vrot.slane %v11921_v2, 4 }
 0xf7a   :  { %v12044_v61 = vadd.f32 1e-12, %v12028_v6  ;;  %v11994_v39 = vadd.f32 %v11993_v48, %v11992_v47  ;;  %v12004_v19 = vadd.f32 %v12003_v25, %v12002_v55  ;;  %v12014_v32 = vadd.f32 %v12013_v40, %v11922_v50 }
 0xf7b   :  { %v12043_v53 = vadd.f32 1e-12, %v12027_v4  ;;  %v11988_v12 = vadd.f32 %v11987_v34, %v11986_v37  ;;  %v11998_v36 = vadd.f32 %v11997_v14, %v11996_v24  ;;  %v12008_v13 = vadd.f32 %v12007_v57, %v11921_v2 }
 0xf7c   :  { %13882 = vrsqrt.f32 %v12044_v61  ;;  %v12030_v43 = vmul.f32 0.125, %v11994_v39  ;;  %v12005_v31 = vrot.slane %v12004_v19, 1  ;;  %v12015_v41 = vrot.slane %v12014_v32, 2 }
 0xf7d   :  { %13884 = vrsqrt.f32 %v12043_v53  ;;  %v12029_v58 = vmul.f32 0.125, %v11988_v12  ;;  %v11999_v21 = vrot.slane %v11998_v36, 1  ;;  %v12009_v63 = vrot.slane %v12008_v13, 2 }
 0xf7e   :  { %v12046_v27 = vadd.f32 1e-12, %v12030_v43  ;;  %v12006_v8 = vadd.f32 %v12005_v31, %v12004_v19  ;;  %v12016_v51 = vadd.f32 %v12015_v41, %v12014_v32 }
 0xf7f   :  { %v12045_v1 = vadd.f32 1e-12, %v12029_v58  ;;  %v12000_v3 = vadd.f32 %v11999_v21, %v11998_v36  ;;  %v12010_v18 = vadd.f32 %v12009_v63, %v12008_v13 }
 0xf80   :  { %13886 = vrsqrt.f32 %v12046_v27  ;;  %v12032_v22 = vmul.f32 0.125, %v12006_v8  ;;  %v12017_v16 = vrot.slane %v12016_v51, 1 }
 0xf81   :  { %13888 = vrsqrt.f32 %v12045_v1  ;;  %v12031_v11 = vmul.f32 0.125, %v12000_v3  ;;  %v12011_v30 = vrot.slane %v12010_v18, 1 }
 0xf82   :  { %v12048_v59 = vadd.f32 1e-12, %v12032_v22  ;;  %v12018_v38 = vadd.f32 %v12017_v16, %v12016_v51 }
 0xf83   :  { %v12047_v33 = vadd.f32 1e-12, %v12031_v11  ;;  %v12012_v52 = vadd.f32 %v12011_v30, %v12010_v18 }
 0xf84   :  { %13890 = vrsqrt.f32 %v12048_v59  ;;  %v12034_v49 = vmul.f32 0.125, %v12018_v38 }
 0xf85   :  { %13892 = vrsqrt.f32 %v12047_v33  ;;  %v12033_v54 = vmul.f32 0.125, %v12012_v52 }
 0xf86   :  { %v13883_v45 = vpop.eup %13882  ;;  %v12050_v0 = vadd.f32 1e-12, %v12034_v49 }
 0xf87   :  { %v13885_v46 = vpop.eup %13884  ;;  %v12076_v60 = vmul.f32 %v13883_v45, %v16163_v28  ;;  %v12049_v29 = vadd.f32 1e-12, %v12033_v54 }
 0xf88   :  { %v12075_v15 = vmul.f32 %v13885_v46, %v16166_v23  ;;  %13894 = vrsqrt.f32 %v12050_v0 }
 0xf89   :  { %v12099_v7 = vmul.f32 %v16213_v26, %v12076_v60  ;;  %13896 = vrsqrt.f32 %v12049_v29 }
 0xf8a   :  { %v13887_v17 = vpop.eup %13886  ;;  %v12098_v47 = vmul.f32 %v16213_v26, %v12075_v15 }
 0xf8b   :  { %v13889_v55 = vpop.eup %13888  ;;  %v12122_v50 = vadd.f32 %v16219_v9, %v12099_v7  ;;  %v12078_v20 = vmul.f32 %v13887_v17, %v16174_v42 }
 0xf8c   :  { %v12121_v44 = vadd.f32 %v16219_v9, %v12098_v47  ;;  %v12077_v37 = vmul.f32 %v13889_v55, %v16178_v62 }
 0xf8d   :  { %12138 = vst.msk [vmem:[%s16339_s7 + $0x48] sm:$0xff] %vm51_vm0, %v12122_v50  ;;  %v12101_v28 = vmul.f32 %v16213_v26, %v12078_v20 }
 0xf8e   :  { %v13891_v23 = vpop.eup %13890  ;;  %12137 = vst.msk [vmem:[%s16339_s7 + $0x40] sm:$0xff] %vm51_vm0, %v12121_v44  ;;  %v12100_v24 = vmul.f32 %v16213_v26, %v12077_v37 }
 0xf8f   :  { %v13893_v42 = vpop.eup %13892  ;;  %v12124_v2 = vadd.f32 %v16219_v9, %v12101_v28  ;;  %v12080_v62 = vmul.f32 %v13891_v23, %v16183_v5 }
 0xf90   :  { %v12123_v6 = vadd.f32 %v16219_v9, %v12100_v24  ;;  %v12079_v48 = vmul.f32 %v13893_v42, %v16188_v56 }
 0xf91   :  { %12140 = vst.msk [vmem:[%s16339_s7 + $0x58] sm:$0xff] %vm51_vm0, %v12124_v2  ;;  %v12103_v25 = vmul.f32 %v16213_v26, %v12080_v62 }
 0xf92   :  { %v13895_v40 = vpop.eup %13894  ;;  %12139 = vst.msk [vmem:[%s16339_s7 + $0x50] sm:$0xff] %vm51_vm0, %v12123_v6  ;;  %v12102_v4 = vmul.f32 %v16213_v26, %v12079_v48 }
 0xf93   :  { %v13897_v5 = vpop.eup %13896  ;;  %v12126_v34 = vadd.f32 %v16219_v9, %v12103_v25  ;;  %v12082_v56 = vmul.f32 %v13895_v40, %v16194_v10 }
 0xf94   :  { %v12125_v14 = vadd.f32 %v16219_v9, %v12102_v4  ;;  %v12081_v57 = vmul.f32 %v13897_v5, %v16200_v35 }
 0xf95   :  { %12142 = vst.msk [vmem:[%s16339_s7 + $0x68] sm:$0xff] %vm51_vm0, %v12126_v34  ;;  %v12105_v61 = vmul.f32 %v16213_v26, %v12082_v56 }
 0xf96   :  { %12141 = vst.msk [vmem:[%s16339_s7 + $0x60] sm:$0xff] %vm51_vm0, %v12125_v14  ;;  %v12104_v39 = vmul.f32 %v16213_v26, %v12081_v57 }
 0xf97   :  { %v12128_v10 = vadd.f32 %v16219_v9, %v12105_v61 }
 0xf98   :  { %v12127_v19 = vadd.f32 %v16219_v9, %v12104_v39 }
 0xf99   :  { %12144 = vst.msk [vmem:[%s16339_s7 + $0x78] sm:$0xff] %vm51_vm0, %v12128_v10 }
 0xf9a   :  { %12143 = vst.msk [vmem:[%s16339_s7 + $0x70] sm:$0xff] %vm51_vm0, %v12127_v19 }

</bundles_post_ra>
